<compile_context>
chip_gen: v7x
topology: tpu7x:2x2x1
jax: 0.10.0
libtpu: 0.0.40
codegen_flags: <defaults>
</compile_context>

<pallas_src>
import functools
import math

import jax
import jax.numpy as jnp
from jax.experimental import pallas as pl
from jax.experimental.pallas import tpu as pltpu

BF16 = jnp.bfloat16
F32 = jnp.float32
NEG_INF = -1e30


# -----------------------------------------------------------------------------
# Tiling / VMEM helpers
# -----------------------------------------------------------------------------
def _round_up(x, m):
    return (x + m - 1) // m * m


@functools.lru_cache(maxsize=None)
def _tpu_vmem_capacity():
    try:
        return int(pltpu.get_tpu_info().vmem_capacity_bytes)
    except Exception:  # pragma: no cover - conservative (v7x-sized) default
        return 64 * 1024 * 1024


def _row_tile(rows, cap=1024):
    # Multiple of 16 (bf16 sublane packing).  Large tiles amortize the ~0.35us
    # per-grid-step overhead (v6e guidance: cap raised 512 -> 1024), but keep
    # at least 2 grid steps when rows allow so dimension_semantics=("parallel",)
    # can shard the row axis across v7x's two TensorCores.
    rows16 = _round_up(rows, 16)
    tm = min(cap, rows16)
    if rows16 >= 32:
        tm = min(tm, _round_up((rows16 + 1) // 2, 16))
    return tm


def _pad_rows(x, target_rows):
    pad = target_rows - x.shape[0]
    if pad == 0:
        return x
    return jnp.pad(x, ((0, pad),) + ((0, 0),) * (x.ndim - 1))


def _nbytes(shape, dtype):
    return int(math.prod(shape)) * jnp.dtype(dtype).itemsize


def _full_spec(shape):
    nd = len(shape)
    return pl.BlockSpec(shape, lambda *_: (0,) * nd)


def _rowwise_call(kernel, row_inputs, aux_inputs, out_cols, out_dtypes):
    """Tile the leading (row) axis, keep small aux/weight arrays whole."""
    rows = row_inputs[0].shape[0]
    tm = _row_tile(rows)
    padded_rows = _round_up(rows, tm)
    padded = [_pad_rows(x, padded_rows) for x in row_inputs]

    row_specs = []
    for x in padded:
        rest = x.shape[1:]
        row_specs.append(
            pl.BlockSpec((tm,) + rest, lambda i, _n=len(rest): (i,) + (0,) * _n))
    aux_specs = [_full_spec(a.shape) for a in aux_inputs]

    out_shape = tuple(jax.ShapeDtypeStruct((padded_rows, c), d)
                      for c, d in zip(out_cols, out_dtypes))
    out_specs = tuple(pl.BlockSpec((tm, c), lambda i: (i, 0)) for c in out_cols)

    # Explicit scoped-VMEM budget: double-buffered blocks + whole aux arrays
    # + headroom for in-kernel temporaries.  >= 32 MiB (v5e's default is only
    # 16 MiB), <= 80% of the chip's physical VMEM (64 MiB on v7x).
    blk_bytes = sum(_nbytes((tm,) + x.shape[1:], x.dtype) for x in padded)
    aux_bytes = sum(_nbytes(a.shape, a.dtype) for a in aux_inputs)
    out_bytes = sum(_nbytes((tm, c), d) for c, d in zip(out_cols, out_dtypes))
    cap = _tpu_vmem_capacity()
    need = 2 * (blk_bytes + aux_bytes + out_bytes) + (16 << 20)
    vmem_limit = int(min(max(need, 32 << 20), int(cap * 0.8)))

    outs = pl.pallas_call(
        kernel,
        out_shape=out_shape,
        grid=(padded_rows // tm,),
        in_specs=row_specs + aux_specs,
        out_specs=out_specs,
        compiler_params=pltpu.CompilerParams(
            dimension_semantics=("parallel",),
            vmem_limit_bytes=vmem_limit),
    )(*padded, *aux_inputs)
    if not isinstance(outs, (tuple, list)):
        outs = (outs,)
    return [o[:rows] for o in outs]


# -----------------------------------------------------------------------------
# Pallas kernels
# -----------------------------------------------------------------------------
def _prep_qkv_kernel(feats_ref, coords_ref, posw_ref, posb_ref,
                     wq_ref, bq_ref, wkv_ref, bkv_ref, q_ref, kv_ref, *, c):
    # DADA3d prep: q = (feats + relu(coords@Wqp)) @ (Wq*scale)
    #              kv = (feats + relu(coords@Wkp)) @ [Wk|Wv]
    # Two separate lane-dense outputs (no 3C concatenate / wrapper slicing).
    feats = feats_ref[...].astype(F32)
    pos = jnp.dot(coords_ref[...], posw_ref[...],
                  preferred_element_type=jnp.float32) + posb_ref[...]
    pos = jnp.maximum(pos, 0.0)                     # [tm, 2C] = (q_pos | k_pos)
    qf = feats + pos[:, :c]
    kb = feats + pos[:, c:]
    q_ref[...] = (jnp.dot(qf.astype(BF16), wq_ref[...],
                          preferred_element_type=jnp.float32)
                  + bq_ref[...]).astype(q_ref.dtype)
    kv_ref[...] = (jnp.dot(kb.astype(BF16), wkv_ref[...],
                           preferred_element_type=jnp.float32)
                   + bkv_ref[...]).astype(kv_ref.dtype)


def _prep_q_kernel(coords_ref, qpw_ref, qpb_ref, wq_ref, bq_ref, q_ref):
    # SparseAttention3d query prep: q = relu(coords @ Wqp) @ (Wq*scale)
    pos = jnp.maximum(
        jnp.dot(coords_ref[...], qpw_ref[...],
                preferred_element_type=jnp.float32) + qpb_ref[...], 0.0)
    q_ref[...] = (jnp.dot(pos.astype(BF16), wq_ref[...],
                          preferred_element_type=jnp.float32)
                  + bq_ref[...]).astype(q_ref.dtype)


def _prep_kv_kernel(feats_ref, coords_ref, kpw_ref, kpb_ref,
                    wkv_ref, bkv_ref, kv_ref):
    # SparseAttention3d key/value prep on the N unique source voxels.
    pos = jnp.dot(coords_ref[...], kpw_ref[...],
                  preferred_element_type=jnp.float32) + kpb_ref[...]
    kb = feats_ref[...].astype(F32) + jnp.maximum(pos, 0.0)
    kv_ref[...] = (jnp.dot(kb.astype(BF16), wkv_ref[...],
                           preferred_element_type=jnp.float32)
                   + bkv_ref[...]).astype(kv_ref.dtype)


def _fused_attn_kernel(*refs, num_heads, gather_in_kernel, has_norm1,
                       add_input_residual, add_identity):
    # Fused: (in-kernel KV gather) -> MHA core -> out-proj -> (residual) ->
    #        (BN1) -> FFN -> residual -> output linear (BN2 + out-BN folded)
    #        -> ReLU -> (block identity add).
    it = iter(refs)
    q_ref = next(it)
    kidx_ref = kvg_ref = None
    if gather_in_kernel:
        kidx_ref = next(it)
    else:
        kvg_ref = next(it)
    mask_ref = next(it)
    res_ref = next(it) if add_input_residual else None
    ident_ref = next(it) if add_identity else None
    kvtab_ref = next(it) if gather_in_kernel else None
    hsum_ref = next(it)          # [C, H] 0/1 per-head lane-sum matrix
    hbc_ref = next(it)           # [H, C] 0/1 per-head lane-broadcast matrix
    wo_ref = next(it); bo_ref = next(it)
    if has_norm1:
        n1s_ref = next(it); n1h_ref = next(it)
    w1_ref = next(it); b1_ref = next(it)
    w2_ref = next(it); b2_ref = next(it)
    wout_ref = next(it); bout_ref = next(it)
    o_ref = next(it)

    tm, c = q_ref.shape
    kk = mask_ref.shape[1]
    H = num_heads

    # ---- multi-head attention core: single head-batched pass ----
    if gather_in_kernel:
        idx = jnp.clip(kidx_ref[...], 0, kvtab_ref.shape[0] - 1)
        kv = jnp.take(kvtab_ref[...], idx, axis=0)        # [tm, Kk, 2C] f32
    else:
        kv = kvg_ref[...].astype(F32)                     # [tm, Kk, 2C]
    q = q_ref[...].astype(F32)                            # scale folded into Wq

    prod = q[:, None, :] * kv[:, :, :c]                   # [tm, Kk, C] f32
    # Per-head segmented lane reduction via one tiny [C,H] matmul (MXU) instead
    # of H separate 8-lane slices.
    s = jnp.dot(prod.reshape(tm * kk, c), hsum_ref[...],
                preferred_element_type=jnp.float32).reshape(tm, kk, H)
    s = s + (mask_ref[...].astype(F32) * NEG_INF)[:, :, None]
    s = s - jnp.max(s, axis=1, keepdims=True)
    pexp = jnp.exp(s)                                     # one exp
    pexp = pexp * pl.reciprocal(jnp.sum(pexp, axis=1, keepdims=True),
                                approx=True)              # one EUP reciprocal
    # Broadcast per-head probabilities back to C lanes (one [H,C] matmul) and
    # reduce over the Kk keys (sublane reduction).
    pc = jnp.dot(pexp.reshape(tm * kk, H), hbc_ref[...],
                 preferred_element_type=jnp.float32).reshape(tm, kk, c)
    attn = jnp.sum(pc * kv[:, :, c:], axis=1)             # [tm, C]

    # ---- epilogue ----
    a = jnp.dot(attn.astype(BF16), wo_ref[...],
                preferred_element_type=jnp.float32) + bo_ref[...]
    if add_input_residual:
        x = res_ref[...].astype(F32) + a
    else:
        x = a
    if has_norm1:
        x = x * n1s_ref[...] + n1h_ref[...]
    h1 = jnp.maximum(
        jnp.dot(x.astype(BF16), w1_ref[...],
                preferred_element_type=jnp.float32) + b1_ref[...], 0.0)
    x = x + jnp.dot(h1.astype(BF16), w2_ref[...],
                    preferred_element_type=jnp.float32) + b2_ref[...]
    # BN2 and the output-layer BatchNorm are folded into wout/bout host-side.
    out = jnp.maximum(
        jnp.dot(x.astype(BF16), wout_ref[...],
                preferred_element_type=jnp.float32) + bout_ref[...], 0.0)
    if add_identity:
        out = out + ident_ref[...].astype(F32)
    # TODO(synk): Cout=32 (<128 lanes) stores stay masked vst; repacking to a
    # [rows/4, 128] slab needs an in-kernel relayout - measure before adopting.
    o_ref[...] = out.astype(o_ref.dtype)


# -----------------------------------------------------------------------------
# Kernel wrappers
# -----------------------------------------------------------------------------
def prep_qkv_dada(feats, coords, p, num_heads):
    """[N,C] feats + [N,3] coords -> (Q [N,C] bf16, KV [N,2C] f32)."""
    C = p["mha"]["wq"].shape[0]
    scale = 1.0 / math.sqrt(C // num_heads)
    mha = p["mha"]
    posw = jnp.concatenate([p["q_pos_w"], p["k_pos_w"]], axis=1).astype(F32)
    posb = jnp.concatenate([p["q_pos_b"], p["k_pos_b"]])[None, :].astype(F32)
    wq = (mha["wq"] * scale).astype(BF16)
    bq = (mha["bq"] * scale)[None, :].astype(F32)
    wkv = jnp.concatenate([mha["wk"], mha["wv"]], axis=1).astype(BF16)
    bkv = jnp.concatenate([mha["bk"], mha["bv"]])[None, :].astype(F32)
    q, kv = _rowwise_call(
        functools.partial(_prep_qkv_kernel, c=C),
        [feats, coords.astype(F32)],
        [posw, posb, wq, bq, wkv, bkv],
        [C, 2 * C], [BF16, F32])
    return q, kv


def prep_q_sp(query_coords, p, num_heads):
    """[M,3] downsampled query coords -> [M,C] bf16 projected (scaled) queries."""
    C = p["q_pos_w"].shape[1]
    scale = 1.0 / math.sqrt(C // num_heads)
    (q,) = _rowwise_call(
        _prep_q_kernel,
        [query_coords.astype(F32)],
        [p["q_pos_w"].astype(F32), p["q_pos_b"][None, :].astype(F32),
         (p["mha"]["wq"] * scale).astype(BF16),
         (p["mha"]["bq"] * scale)[None, :].astype(F32)],
        [C], [BF16])
    return q


def prep_kv_sp(feats, coords, p):
    """[N,C] feats + [N,3] coords -> [N,2C] f32 (K | V projections)."""
    _, C = feats.shape
    mha = p["mha"]
    wkv = jnp.concatenate([mha["wk"], mha["wv"]], axis=1).astype(BF16)
    bkv = jnp.concatenate([mha["bk"], mha["bv"]])[None, :].astype(F32)
    (kv,) = _rowwise_call(
        _prep_kv_kernel,
        [feats, coords.astype(F32)],
        [p["k_pos_w"].astype(F32), p["k_pos_b"][None, :].astype(F32), wkv, bkv],
        [2 * C], [F32])
    return kv


def fused_attention_block(q_proj, kv_table, key_indices, key_mask, p, num_heads,
                          *, norm1=None, norm2=None, feats_residual=None,
                          identity=None, out_dtype=F32, use_vmem_gather=True):
    """q_proj: [M,C] bf16; kv_table: [N,2C] f32 (projected K|V per source voxel);
    key_indices: [M,Kk] int; key_mask: [M,Kk] bool (True = masked)."""
    M, C = q_proj.shape
    N = kv_table.shape[0]
    Cout = p["out_w"].shape[1]
    H = num_heads
    assert C % H == 0
    D = C // H

    # Fold BN2 (and the output-layer BatchNorm) into the output projection.
    if norm2 is None:
        n2s, n2h = jnp.ones((C,), F32), jnp.zeros((C,), F32)
    else:
        n2s, n2h = norm2
    wout = (n2s[:, None] * p["out_w"].astype(F32)) * p["out_bn_scale"][None, :]
    bout = ((n2h @ p["out_w"].astype(F32)) + p["out_b"]) * p["out_bn_scale"] \
        + p["out_bn_shift"]

    idx = jnp.clip(key_indices, 0, N - 1).astype(jnp.int32)
    mask = key_mask.astype(jnp.int32)          # tiny; bias built in-kernel

    # Per-head segmented reduce / broadcast matrices (head h <-> lanes h*D..).
    head_of_lane = jnp.arange(C, dtype=jnp.int32) // D
    hsum = (head_of_lane[:, None]
            == jnp.arange(H, dtype=jnp.int32)[None, :]).astype(F32)   # [C,H]
    hbc = hsum.T                                                       # [H,C]

    # VMEM-resident KV table only if it (double-buffered) leaves headroom for
    # the per-tile blocks; otherwise fall back to the XLA gather path.
    cap = _tpu_vmem_capacity()
    npad = _round_up(N, 8)
    gather_in_kernel = bool(use_vmem_gather) and \
        (2 * npad * 2 * C * 4 <= int(0.4 * cap))

    row_inputs = [q_proj]
    if gather_in_kernel:
        row_inputs.append(idx)
    else:
        # Fallback: HBM-materialized gathered slab (original path).
        row_inputs.append(jnp.take(kv_table, idx, axis=0).astype(BF16))
    row_inputs.append(mask)
    add_res = feats_residual is not None
    add_ident = identity is not None
    if add_res:
        row_inputs.append(feats_residual)
    if add_ident:
        row_inputs.append(identity)

    aux_inputs = []
    if gather_in_kernel:
        aux_inputs.append(_pad_rows(kv_table.astype(F32), npad))
    aux_inputs += [hsum, hbc,
                   p["mha"]["wo"].astype(BF16),
                   p["mha"]["bo"][None, :].astype(F32)]
    has_norm1 = norm1 is not None
    if has_norm1:
        n1s, n1h = norm1
        aux_inputs += [n1s[None, :].astype(F32), n1h[None, :].astype(F32)]
    aux_inputs += [p["lin1_w"].astype(BF16), p["lin1_b"][None, :].astype(F32),
                   p["lin2_w"].astype(BF16), p["lin2_b"][None, :].astype(F32),
                   wout.astype(BF16), bout[None, :].astype(F32)]

    kernel = functools.partial(
        _fused_attn_kernel, num_heads=H, gather_in_kernel=gather_in_kernel,
        has_norm1=has_norm1, add_input_residual=add_res,
        add_identity=add_ident)
    (out,) = _rowwise_call(kernel, row_inputs, aux_inputs, [Cout], [out_dtype])
    return out


# -----------------------------------------------------------------------------
# Plain-JAX glue (sparse bookkeeping / parameter setup)
# -----------------------------------------------------------------------------
def with_coords(indices, point_cloud_range, voxel_size):
    # indices columns: (batch, z, y, x) - same convention as the PyTorch code.
    vs = jnp.asarray(voxel_size, F32)[None, :]
    mn = jnp.asarray(point_cloud_range[0:3], F32)[None, :]
    return (indices[:, jnp.array([3, 2, 1])].astype(F32) + 0.5) * vs + mn


def bn_fold(c, eps=1e-5):
    gamma = jnp.ones((c,), F32)
    beta = jnp.zeros((c,), F32)
    run_mean = jnp.zeros((c,), F32)
    run_var = jnp.ones((c,), F32)
    scale = gamma / jnp.sqrt(run_var + eps)
    shift = beta - run_mean * scale
    return scale, shift


def _w(key, shape):
    fan_in = shape[0]
    return jax.random.normal(key, shape, F32) * (1.0 / math.sqrt(fan_in))


def init_mha_params(key, c):
    ks = jax.random.split(key, 4)
    return dict(
        wq=_w(ks[0], (c, c)), wk=_w(ks[1], (c, c)),
        wv=_w(ks[2], (c, c)), wo=_w(ks[3], (c, c)),
        bq=jnp.zeros((c,)), bk=jnp.zeros((c,)),
        bv=jnp.zeros((c,)), bo=jnp.zeros((c,)),
    )


def init_sp_params(key, c, ff, cout):
    ks = jax.random.split(key, 8)
    nsc, nsh = bn_fold(c)
    osc, osh = bn_fold(cout)
    return dict(
        mha=init_mha_params(ks[0], c),
        lin1_w=_w(ks[1], (c, ff)), lin1_b=jnp.zeros((ff,)),
        lin2_w=_w(ks[2], (ff, c)), lin2_b=jnp.zeros((c,)),
        norm_scale=nsc, norm_shift=nsh,
        out_w=_w(ks[3], (c, cout)), out_b=jnp.zeros((cout,)),
        out_bn_scale=osc, out_bn_shift=osh,
        q_pos_w=_w(ks[4], (3, c)), q_pos_b=jnp.zeros((c,)),
        k_pos_w=_w(ks[5], (3, c)), k_pos_b=jnp.zeros((c,)),
    )


def init_subm_params(key, c, ff, cout):
    ks = jax.random.split(key, 8)
    n1sc, n1sh = bn_fold(c)
    n2sc, n2sh = bn_fold(c)
    osc, osh = bn_fold(cout)
    return dict(
        mha=init_mha_params(ks[0], c),
        lin1_w=_w(ks[1], (c, ff)), lin1_b=jnp.zeros((ff,)),
        lin2_w=_w(ks[2], (ff, c)), lin2_b=jnp.zeros((c,)),
        norm1_scale=n1sc, norm1_shift=n1sh,
        norm2_scale=n2sc, norm2_shift=n2sh,
        out_w=_w(ks[3], (c, cout)), out_b=jnp.zeros((cout,)),
        out_bn_scale=osc, out_bn_shift=osh,
        q_pos_w=_w(ks[4], (3, c)), q_pos_b=jnp.zeros((c,)),
        k_pos_w=_w(ks[5], (3, c)), k_pos_b=jnp.zeros((c,)),
    )


# -----------------------------------------------------------------------------
# Module forwards (SparseAttention3d, DADA3d, DADAResBlock)
# -----------------------------------------------------------------------------
def sparse_attention3d_forward(p, feats, indices, new_indices, key_indices,
                               key_mask, pc_range, voxel_size, new_voxel_size,
                               num_heads, out_dtype, use_vmem_gather):
    # use_pooled_feature=False, use_no_query_coords=False, use_relative_coords=False
    voxel_coords = with_coords(indices, pc_range, voxel_size)            # [N,3]
    query_coords = with_coords(new_indices, pc_range, new_voxel_size)    # [M,3]

    # Project K/V on the N unique source voxels (linearity: gather(W(x+pos))
    # == W(gather(x+pos))); the Kk-fold gather happens inside the fused kernel.
    kv_table = prep_kv_sp(feats, voxel_coords, p)          # [N, 2C] f32
    q_proj = prep_q_sp(query_coords, p, num_heads)         # [M, C]  bf16

    return fused_attention_block(
        q_proj, kv_table, key_indices, key_mask, p, num_heads,
        norm1=None, norm2=(p["norm_scale"], p["norm_shift"]),
        out_dtype=out_dtype, use_vmem_gather=use_vmem_gather)


def dada3d_forward(p, feats, indices, key_indices, key_mask, pc_range,
                   voxel_size, num_heads, identity, out_dtype,
                   use_vmem_gather):
    # use_pos_emb=True, use_relative_coords=False, use_no_query_coords=False
    # TODO(synk): the density-based reference/adjacent voxel index rewriting
    # (find_reference_and_adjacent_voxel_indices + torch.randperm) is
    # host-side, data-dependent python with no clean Pallas equivalent; skipped.
    coords = with_coords(indices, pc_range, voxel_size)
    q_proj, kv_table = prep_qkv_dada(feats, coords, p, num_heads)

    return fused_attention_block(
        q_proj, kv_table, key_indices, key_mask, p, num_heads,
        norm1=(p["norm1_scale"], p["norm1_shift"]),
        norm2=(p["norm2_scale"], p["norm2_shift"]),
        feats_residual=feats, identity=identity,
        out_dtype=out_dtype, use_vmem_gather=use_vmem_gather)


def dada_res_block_forward(params, feats, indices, new_indices, sp_key_indices,
                           sp_key_mask, subm_key_indices, subm_key_mask,
                           pc_range, voxel_size, new_voxel_size, num_heads,
                           use_vmem_gather=True):
    n_blocks = len(params["subm"])
    # Intermediate blocks chain activations in bf16; the final block emits f32.
    feats = sparse_attention3d_forward(
        params["sp"], feats, indices, new_indices, sp_key_indices, sp_key_mask,
        pc_range, voxel_size, new_voxel_size, num_heads,
        out_dtype=F32 if n_blocks == 0 else BF16,
        use_vmem_gather=use_vmem_gather)
    identity = feats
    for bi, blk in enumerate(params["subm"]):
        # gather_dict is built once and reused by every subm block, so the same
        # key_indices / key_mask are shared (matches the PyTorch control flow).
        # The final `sp_tensor.features += identity` residual is fused into the
        # LAST subm block's kernel epilogue.
        last = bi == n_blocks - 1
        feats = dada3d_forward(
            blk, feats, new_indices, subm_key_indices, subm_key_mask,
            pc_range, new_voxel_size, num_heads,
            identity=identity if last else None,
            out_dtype=F32 if last else BF16,
            use_vmem_gather=use_vmem_gather)
    if n_blocks == 0:
        feats = feats + identity
    return feats


# -----------------------------------------------------------------------------
# Driver
# -----------------------------------------------------------------------------
if __name__ == "__main__":
    # Model config (SP_CFGS / SUBM_CFGS equivalents), kept small.
    C_IN, C_FF, C_OUT = 32, 64, 32
    NUM_HEADS = 4
    NUM_BLOCKS = 2
    N_VOX = 64            # voxels before downsample
    M_VOX = 32            # voxels after stride-2 downsample
    N_KEYS = 16           # attended keys per query (concat of attention modes)
    BATCH = 2
    SPATIAL = (16, 16, 16)
    STRIDES = (2, 2, 2)
    VOXEL_SIZE = (0.2, 0.2, 0.2)
    PC_RANGE = (0.0, 0.0, 0.0, 3.2, 3.2, 3.2)
    NEW_VOXEL_SIZE = tuple(v * s for v, s in zip(VOXEL_SIZE, STRIDES))

    root = jax.random.PRNGKey(0)
    k_feat, k_idx, k_down, k_spki, k_spm, k_suki, k_sum, k_par = \
        jax.random.split(root, 8)

    # Synthetic sparse tensor.
    features = jax.random.normal(k_feat, (N_VOX, C_IN), F32)
    kz, ky, kx = jax.random.split(k_idx, 3)
    indices = jnp.stack(
        [jnp.arange(N_VOX, dtype=jnp.int32) // (N_VOX // BATCH),
         jax.random.randint(kz, (N_VOX,), 0, SPATIAL[2], jnp.int32),
         jax.random.randint(ky, (N_VOX,), 0, SPATIAL[1], jnp.int32),
         jax.random.randint(kx, (N_VOX,), 0, SPATIAL[0], jnp.int32)], axis=1)

    # TODO(synk): votr_utils.hash_table_down_sample and the hash-based
    # local/strided attention index builders are custom CUDA hash-table ops;
    # replaced with deterministic synthetic downsample indices and gather
    # indices/masks of identical shapes.
    new_indices = jnp.concatenate(
        [indices[::2, 0:1],
         indices[::2, 1:2] // STRIDES[2],
         indices[::2, 2:3] // STRIDES[1],
         indices[::2, 3:4] // STRIDES[0]], axis=1)          # [M_VOX, 4]

    sp_key_indices = jax.random.randint(k_spki, (M_VOX, N_KEYS), 0, N_VOX,
                                        jnp.int32)
    sp_key_mask = jax.random.uniform(k_spm, (M_VOX, N_KEYS)) < 0.3
    sp_key_mask = sp_key_mask.at[:, 0].set(False)           # at least 1 valid key

    subm_key_indices = jax.random.randint(k_suki, (M_VOX, N_KEYS), 0, M_VOX,
                                          jnp.int32)
    subm_key_mask = jax.random.uniform(k_sum, (M_VOX, N_KEYS)) < 0.3
    subm_key_mask = subm_key_mask.at[:, 0].set(False)

    # Parameters (deterministic init from PRNGKey(0) sub-keys).
    kp_sp, *kp_subm = jax.random.split(k_par, 1 + NUM_BLOCKS)
    params = dict(
        sp=init_sp_params(kp_sp, C_IN, C_FF, C_OUT),
        subm=[init_subm_params(kp_subm[i], C_OUT, C_FF, C_OUT)
              for i in range(NUM_BLOCKS)],
    )

    def run(use_vmem_gather):
        fwd = jax.jit(functools.partial(
            dada_res_block_forward,
            pc_range=PC_RANGE, voxel_size=VOXEL_SIZE,
            new_voxel_size=NEW_VOXEL_SIZE, num_heads=NUM_HEADS,
            use_vmem_gather=use_vmem_gather))
        return jax.block_until_ready(
            fwd(params, features, indices, new_indices, sp_key_indices,
                sp_key_mask, subm_key_indices, subm_key_mask))

    try:
        out = run(True)                 # in-kernel VMEM gather (no HBM KV slab)
    except Exception:
        # Fall back to the XLA-gather path if the in-kernel gather is not
        # supported by this backend's Mosaic lowering.
        out = run(False)

    assert out.shape == (M_VOX, C_OUT) and out.dtype == jnp.float32
    assert bool(jnp.all(jnp.isfinite(out)))
    print("KERNEL_OK")
</pallas_src>

<mosaic_0001>
module attributes {stable_mosaic.version = 11 : i64} {
  func.func @_prep_q_kernel(%arg0: i32, %arg1: memref<16x3xf32, #tpu.memory_space<vmem>>, %arg2: memref<3x32xf32, #tpu.memory_space<vmem>>, %arg3: memref<1x32xf32, #tpu.memory_space<vmem>>, %arg4: memref<32x32xbf16, #tpu.memory_space<vmem>>, %arg5: memref<1x32xf32, #tpu.memory_space<vmem>>, %arg6: memref<16x32xbf16, #tpu.memory_space<vmem>>) attributes {dimension_semantics = [#tpu.dimension_semantics<parallel>], iteration_bounds = array<i64: 2>, scalar_prefetch = 0 : i64, scratch_operands = 0 : i64, tpu.core_type = #tpu.core_type<tc>, window_params = [{transform_indices = @transform_0, window_bounds = array<i64: 16, 3>}, {pipeline_mode = #tpu.pipeline_mode<synchronous>, transform_indices = @transform_1, window_bounds = array<i64: 3, 32>}, {pipeline_mode = #tpu.pipeline_mode<synchronous>, transform_indices = @transform_2, window_bounds = array<i64: 1, 32>}, {pipeline_mode = #tpu.pipeline_mode<synchronous>, transform_indices = @transform_3, window_bounds = array<i64: 32, 32>}, {pipeline_mode = #tpu.pipeline_mode<synchronous>, transform_indices = @transform_4, window_bounds = array<i64: 1, 32>}, {transform_indices = @transform_5, window_bounds = array<i64: 16, 32>}]} {
    %c0 = arith.constant 0 : index
    %c0_0 = arith.constant 0 : index
    %0 = vector.load %arg1[%c0, %c0_0] : memref<16x3xf32, #tpu.memory_space<vmem>>, vector<16x3xf32>
    %c0_1 = arith.constant 0 : index
    %c0_2 = arith.constant 0 : index
    %1 = vector.load %arg2[%c0_1, %c0_2] : memref<3x32xf32, #tpu.memory_space<vmem>>, vector<3x32xf32>
    %cst = arith.constant dense<0.000000e+00> : vector<16x32xf32>
    %2 = tpu.matmul %0, %1, %cst {dimension_numbers = #tpu.dot_dimension_numbers<[1], [0], [0], [1], [0, 0, 1, 1], [], []>} : vector<16x3xf32>, vector<3x32xf32>, vector<16x32xf32> -> vector<16x32xf32>
    %c0_3 = arith.constant 0 : index
    %c0_4 = arith.constant 0 : index
    %3 = vector.load %arg3[%c0_3, %c0_4] : memref<1x32xf32, #tpu.memory_space<vmem>>, vector<1x32xf32>
    %4 = vector.broadcast %3 : vector<1x32xf32> to vector<16x32xf32>
    %5 = arith.addf %2, %4 : vector<16x32xf32>
    %cst_5 = arith.constant 0.000000e+00 : f32
    %6 = vector.broadcast %cst_5 : f32 to vector<16x32xf32>
    %7 = arith.maximumf %5, %6 : vector<16x32xf32>
    %8 = arith.truncf %7 : vector<16x32xf32> to vector<16x32xbf16>
    %c0_6 = arith.constant 0 : index
    %c0_7 = arith.constant 0 : index
    %9 = vector.load %arg4[%c0_6, %c0_7] : memref<32x32xbf16, #tpu.memory_space<vmem>>, vector<32x32xbf16>
    %cst_8 = arith.constant dense<0.000000e+00> : vector<16x32xf32>
    %10 = tpu.matmul %8, %9, %cst_8 {dimension_numbers = #tpu.dot_dimension_numbers<[1], [0], [0], [1], [0, 0, 1, 1], [], []>} : vector<16x32xbf16>, vector<32x32xbf16>, vector<16x32xf32> -> vector<16x32xf32>
    %c0_9 = arith.constant 0 : index
    %c0_10 = arith.constant 0 : index
    %11 = vector.load %arg5[%c0_9, %c0_10] : memref<1x32xf32, #tpu.memory_space<vmem>>, vector<1x32xf32>
    %12 = vector.broadcast %11 : vector<1x32xf32> to vector<16x32xf32>
    %13 = arith.addf %10, %12 : vector<16x32xf32>
    %14 = arith.truncf %13 : vector<16x32xf32> to vector<16x32xbf16>
    %c0_11 = arith.constant 0 : index
    %c0_12 = arith.constant 0 : index
    %15 = vector.load %arg6[%c0_11, %c0_12] : memref<16x32xbf16, #tpu.memory_space<vmem>>, vector<16x32xbf16>
    tpu.vector_store %arg6[%c0_11, %c0_12], %14 {strides = array<i32>} : memref<16x32xbf16, #tpu.memory_space<vmem>>, vector<16x32xbf16>,
    return
  }
  func.func @transform_0(%arg0: i32) -> (i32, i32) {
    %c0_i32 = arith.constant 0 : i32
    %c0_i32_0 = arith.constant 0 : i32
    return %arg0, %c0_i32 : i32, i32
  }
  func.func @transform_1(%arg0: i32) -> (i32, i32) {
    %c0_i32 = arith.constant 0 : i32
    %c0_i32_0 = arith.constant 0 : i32
    %c0_i32_1 = arith.constant 0 : i32
    return %c0_i32, %c0_i32_0 : i32, i32
  }
  func.func @transform_2(%arg0: i32) -> (i32, i32) {
    %c0_i32 = arith.constant 0 : i32
    %c0_i32_0 = arith.constant 0 : i32
    %c0_i32_1 = arith.constant 0 : i32
    return %c0_i32, %c0_i32_0 : i32, i32
  }
  func.func @transform_3(%arg0: i32) -> (i32, i32) {
    %c0_i32 = arith.constant 0 : i32
    %c0_i32_0 = arith.constant 0 : i32
    %c0_i32_1 = arith.constant 0 : i32
    return %c0_i32, %c0_i32_0 : i32, i32
  }
  func.func @transform_4(%arg0: i32) -> (i32, i32) {
    %c0_i32 = arith.constant 0 : i32
    %c0_i32_0 = arith.constant 0 : i32
    %c0_i32_1 = arith.constant 0 : i32
    return %c0_i32, %c0_i32_0 : i32, i32
  }
  func.func @transform_5(%arg0: i32) -> (i32, i32) {
    %c0_i32 = arith.constant 0 : i32
    %c0_i32_0 = arith.constant 0 : i32
    return %arg0, %c0_i32 : i32, i32
  }
}

module attributes {stable_mosaic.version = 11 : i64} {
  func.func @_prep_kv_kernel(%arg0: i32, %arg1: memref<32x32xf32, #tpu.memory_space<vmem>>, %arg2: memref<32x3xf32, #tpu.memory_space<vmem>>, %arg3: memref<3x32xf32, #tpu.memory_space<vmem>>, %arg4: memref<1x32xf32, #tpu.memory_space<vmem>>, %arg5: memref<32x64xbf16, #tpu.memory_space<vmem>>, %arg6: memref<1x64xf32, #tpu.memory_space<vmem>>, %arg7: memref<32x64xf32, #tpu.memory_space<vmem>>) attributes {dimension_semantics = [#tpu.dimension_semantics<parallel>], iteration_bounds = array<i64: 2>, scalar_prefetch = 0 : i64, scratch_operands = 0 : i64, tpu.core_type = #tpu.core_type<tc>, window_params = [{transform_indices = @transform_0, window_bounds = array<i64: 32, 32>}, {transform_indices = @transform_1, window_bounds = array<i64: 32, 3>}, {pipeline_mode = #tpu.pipeline_mode<synchronous>, transform_indices = @transform_2, window_bounds = array<i64: 3, 32>}, {pipeline_mode = #tpu.pipeline_mode<synchronous>, transform_indices = @transform_3, window_bounds = array<i64: 1, 32>}, {pipeline_mode = #tpu.pipeline_mode<synchronous>, transform_indices = @transform_4, window_bounds = array<i64: 32, 64>}, {pipeline_mode = #tpu.pipeline_mode<synchronous>, transform_indices = @transform_5, window_bounds = array<i64: 1, 64>}, {transform_indices = @transform_6, window_bounds = array<i64: 32, 64>}]} {
    %c0 = arith.constant 0 : index
    %c0_0 = arith.constant 0 : index
    %0 = vector.load %arg2[%c0, %c0_0] : memref<32x3xf32, #tpu.memory_space<vmem>>, vector<32x3xf32>
    %c0_1 = arith.constant 0 : index
    %c0_2 = arith.constant 0 : index
    %1 = vector.load %arg3[%c0_1, %c0_2] : memref<3x32xf32, #tpu.memory_space<vmem>>, vector<3x32xf32>
    %cst = arith.constant dense<0.000000e+00> : vector<32x32xf32>
    %2 = tpu.matmul %0, %1, %cst {dimension_numbers = #tpu.dot_dimension_numbers<[1], [0], [0], [1], [0, 0, 1, 1], [], []>} : vector<32x3xf32>, vector<3x32xf32>, vector<32x32xf32> -> vector<32x32xf32>
    %c0_3 = arith.constant 0 : index
    %c0_4 = arith.constant 0 : index
    %3 = vector.load %arg4[%c0_3, %c0_4] : memref<1x32xf32, #tpu.memory_space<vmem>>, vector<1x32xf32>
    %4 = vector.broadcast %3 : vector<1x32xf32> to vector<32x32xf32>
    %5 = arith.addf %2, %4 : vector<32x32xf32>
    %c0_5 = arith.constant 0 : index
    %c0_6 = arith.constant 0 : index
    %6 = vector.load %arg1[%c0_5, %c0_6] : memref<32x32xf32, #tpu.memory_space<vmem>>, vector<32x32xf32>
    %cst_7 = arith.constant 0.000000e+00 : f32
    %7 = vector.broadcast %cst_7 : f32 to vector<32x32xf32>
    %8 = arith.maximumf %5, %7 : vector<32x32xf32>
    %9 = arith.addf %6, %8 : vector<32x32xf32>
    %10 = arith.truncf %9 : vector<32x32xf32> to vector<32x32xbf16>
    %c0_8 = arith.constant 0 : index
    %c0_9 = arith.constant 0 : index
    %11 = vector.load %arg5[%c0_8, %c0_9] : memref<32x64xbf16, #tpu.memory_space<vmem>>, vector<32x64xbf16>
    %cst_10 = arith.constant dense<0.000000e+00> : vector<32x64xf32>
    %12 = tpu.matmul %10, %11, %cst_10 {dimension_numbers = #tpu.dot_dimension_numbers<[1], [0], [0], [1], [0, 0, 1, 1], [], []>} : vector<32x32xbf16>, vector<32x64xbf16>, vector<32x64xf32> -> vector<32x64xf32>
    %c0_11 = arith.constant 0 : index
    %c0_12 = arith.constant 0 : index
    %13 = vector.load %arg6[%c0_11, %c0_12] : memref<1x64xf32, #tpu.memory_space<vmem>>, vector<1x64xf32>
    %14 = vector.broadcast %13 : vector<1x64xf32> to vector<32x64xf32>
    %15 = arith.addf %12, %14 : vector<32x64xf32>
    %c0_13 = arith.constant 0 : index
    %c0_14 = arith.constant 0 : index
    %16 = vector.load %arg7[%c0_13, %c0_14] : memref<32x64xf32, #tpu.memory_space<vmem>>, vector<32x64xf32>
    tpu.vector_store %arg7[%c0_13, %c0_14], %15 {strides = array<i32>} : memref<32x64xf32, #tpu.memory_space<vmem>>, vector<32x64xf32>,
    return
  }
  func.func @transform_0(%arg0: i32) -> (i32, i32) {
    %c0_i32 = arith.constant 0 : i32
    %c0_i32_0 = arith.constant 0 : i32
    return %arg0, %c0_i32 : i32, i32
  }
  func.func @transform_1(%arg0: i32) -> (i32, i32) {
    %c0_i32 = arith.constant 0 : i32
    %c0_i32_0 = arith.constant 0 : i32
    return %arg0, %c0_i32 : i32, i32
  }
  func.func @transform_2(%arg0: i32) -> (i32, i32) {
    %c0_i32 = arith.constant 0 : i32
    %c0_i32_0 = arith.constant 0 : i32
    %c0_i32_1 = arith.constant 0 : i32
    return %c0_i32, %c0_i32_0 : i32, i32
  }
  func.func @transform_3(%arg0: i32) -> (i32, i32) {
    %c0_i32 = arith.constant 0 : i32
    %c0_i32_0 = arith.constant 0 : i32
    %c0_i32_1 = arith.constant 0 : i32
    return %c0_i32, %c0_i32_0 : i32, i32
  }
  func.func @transform_4(%arg0: i32) -> (i32, i32) {
    %c0_i32 = arith.constant 0 : i32
    %c0_i32_0 = arith.constant 0 : i32
    %c0_i32_1 = arith.constant 0 : i32
    return %c0_i32, %c0_i32_0 : i32, i32
  }
  func.func @transform_5(%arg0: i32) -> (i32, i32) {
    %c0_i32 = arith.constant 0 : i32
    %c0_i32_0 = arith.constant 0 : i32
    %c0_i32_1 = arith.constant 0 : i32
    return %c0_i32, %c0_i32_0 : i32, i32
  }
  func.func @transform_6(%arg0: i32) -> (i32, i32) {
    %c0_i32 = arith.constant 0 : i32
    %c0_i32_0 = arith.constant 0 : i32
    return %arg0, %c0_i32 : i32, i32
  }
}

module attributes {stable_mosaic.version = 11 : i64} {
  func.func @_prep_qkv_kernel(%arg0: i32, %arg1: memref<16x32xbf16, #tpu.memory_space<vmem>>, %arg2: memref<16x3xf32, #tpu.memory_space<vmem>>, %arg3: memref<3x64xf32, #tpu.memory_space<vmem>>, %arg4: memref<1x64xf32, #tpu.memory_space<vmem>>, %arg5: memref<32x32xbf16, #tpu.memory_space<vmem>>, %arg6: memref<1x32xf32, #tpu.memory_space<vmem>>, %arg7: memref<32x64xbf16, #tpu.memory_space<vmem>>, %arg8: memref<1x64xf32, #tpu.memory_space<vmem>>, %arg9: memref<16x32xbf16, #tpu.memory_space<vmem>>, %arg10: memref<16x64xf32, #tpu.memory_space<vmem>>) attributes {dimension_semantics = [#tpu.dimension_semantics<parallel>], iteration_bounds = array<i64: 2>, scalar_prefetch = 0 : i64, scratch_operands = 0 : i64, tpu.core_type = #tpu.core_type<tc>, window_params = [{transform_indices = @transform_0, window_bounds = array<i64: 16, 32>}, {transform_indices = @transform_1, window_bounds = array<i64: 16, 3>}, {pipeline_mode = #tpu.pipeline_mode<synchronous>, transform_indices = @transform_2, window_bounds = array<i64: 3, 64>}, {pipeline_mode = #tpu.pipeline_mode<synchronous>, transform_indices = @transform_3, window_bounds = array<i64: 1, 64>}, {pipeline_mode = #tpu.pipeline_mode<synchronous>, transform_indices = @transform_4, window_bounds = array<i64: 32, 32>}, {pipeline_mode = #tpu.pipeline_mode<synchronous>, transform_indices = @transform_5, window_bounds = array<i64: 1, 32>}, {pipeline_mode = #tpu.pipeline_mode<synchronous>, transform_indices = @transform_6, window_bounds = array<i64: 32, 64>}, {pipeline_mode = #tpu.pipeline_mode<synchronous>, transform_indices = @transform_7, window_bounds = array<i64: 1, 64>}, {transform_indices = @transform_8, window_bounds = array<i64: 16, 32>}, {transform_indices = @transform_9, window_bounds = array<i64: 16, 64>}]} {
    %c0 = arith.constant 0 : index
    %c0_0 = arith.constant 0 : index
    %0 = vector.load %arg1[%c0, %c0_0] : memref<16x32xbf16, #tpu.memory_space<vmem>>, vector<16x32xbf16>
    %1 = arith.extf %0 : vector<16x32xbf16> to vector<16x32xf32>
    %c0_1 = arith.constant 0 : index
    %c0_2 = arith.constant 0 : index
    %2 = vector.load %arg2[%c0_1, %c0_2] : memref<16x3xf32, #tpu.memory_space<vmem>>, vector<16x3xf32>
    %c0_3 = arith.constant 0 : index
    %c0_4 = arith.constant 0 : index
    %3 = vector.load %arg3[%c0_3, %c0_4] : memref<3x64xf32, #tpu.memory_space<vmem>>, vector<3x64xf32>
    %cst = arith.constant dense<0.000000e+00> : vector<16x64xf32>
    %4 = tpu.matmul %2, %3, %cst {dimension_numbers = #tpu.dot_dimension_numbers<[1], [0], [0], [1], [0, 0, 1, 1], [], []>} : vector<16x3xf32>, vector<3x64xf32>, vector<16x64xf32> -> vector<16x64xf32>
    %c0_5 = arith.constant 0 : index
    %c0_6 = arith.constant 0 : index
    %5 = vector.load %arg4[%c0_5, %c0_6] : memref<1x64xf32, #tpu.memory_space<vmem>>, vector<1x64xf32>
    %6 = vector.broadcast %5 : vector<1x64xf32> to vector<16x64xf32>
    %7 = arith.addf %4, %6 : vector<16x64xf32>
    %cst_7 = arith.constant 0.000000e+00 : f32
    %8 = vector.broadcast %cst_7 : f32 to vector<16x64xf32>
    %9 = arith.maximumf %7, %8 : vector<16x64xf32>
    %10 = vector.extract_strided_slice %9 {offsets = [0, 0], sizes = [16, 32], strides = [1, 1]} : vector<16x64xf32> to vector<16x32xf32>
    %11 = arith.addf %1, %10 : vector<16x32xf32>
    %12 = vector.extract_strided_slice %9 {offsets = [0, 32], sizes = [16, 32], strides = [1, 1]} : vector<16x64xf32> to vector<16x32xf32>
    %13 = arith.addf %1, %12 : vector<16x32xf32>
    %14 = arith.truncf %11 : vector<16x32xf32> to vector<16x32xbf16>
    %c0_8 = arith.constant 0 : index
    %c0_9 = arith.constant 0 : index
    %15 = vector.load %arg5[%c0_8, %c0_9] : memref<32x32xbf16, #tpu.memory_space<vmem>>, vector<32x32xbf16>
    %cst_10 = arith.constant dense<0.000000e+00> : vector<16x32xf32>
    %16 = tpu.matmul %14, %15, %cst_10 {dimension_numbers = #tpu.dot_dimension_numbers<[1], [0], [0], [1], [0, 0, 1, 1], [], []>} : vector<16x32xbf16>, vector<32x32xbf16>, vector<16x32xf32> -> vector<16x32xf32>
    %c0_11 = arith.constant 0 : index
    %c0_12 = arith.constant 0 : index
    %17 = vector.load %arg6[%c0_11, %c0_12] : memref<1x32xf32, #tpu.memory_space<vmem>>, vector<1x32xf32>
    %18 = vector.broadcast %17 : vector<1x32xf32> to vector<16x32xf32>
    %19 = arith.addf %16, %18 : vector<16x32xf32>
    %20 = arith.truncf %19 : vector<16x32xf32> to vector<16x32xbf16>
    %c0_13 = arith.constant 0 : index
    %c0_14 = arith.constant 0 : index
    %21 = vector.load %arg9[%c0_13, %c0_14] : memref<16x32xbf16, #tpu.memory_space<vmem>>, vector<16x32xbf16>
    tpu.vector_store %arg9[%c0_13, %c0_14], %20 {strides = array<i32>} : memref<16x32xbf16, #tpu.memory_space<vmem>>, vector<16x32xbf16>,
    %22 = arith.truncf %13 : vector<16x32xf32> to vector<16x32xbf16>
    %c0_15 = arith.constant 0 : index
    %c0_16 = arith.constant 0 : index
    %23 = vector.load %arg7[%c0_15, %c0_16] : memref<32x64xbf16, #tpu.memory_space<vmem>>, vector<32x64xbf16>
    %cst_17 = arith.constant dense<0.000000e+00> : vector<16x64xf32>
    %24 = tpu.matmul %22, %23, %cst_17 {dimension_numbers = #tpu.dot_dimension_numbers<[1], [0], [0], [1], [0, 0, 1, 1], [], []>} : vector<16x32xbf16>, vector<32x64xbf16>, vector<16x64xf32> -> vector<16x64xf32>
    %c0_18 = arith.constant 0 : index
    %c0_19 = arith.constant 0 : index
    %25 = vector.load %arg8[%c0_18, %c0_19] : memref<1x64xf32, #tpu.memory_space<vmem>>, vector<1x64xf32>
    %26 = vector.broadcast %25 : vector<1x64xf32> to vector<16x64xf32>
    %27 = arith.addf %24, %26 : vector<16x64xf32>
    %c0_20 = arith.constant 0 : index
    %c0_21 = arith.constant 0 : index
    %28 = vector.load %arg10[%c0_20, %c0_21] : memref<16x64xf32, #tpu.memory_space<vmem>>, vector<16x64xf32>
    tpu.vector_store %arg10[%c0_20, %c0_21], %27 {strides = array<i32>} : memref<16x64xf32, #tpu.memory_space<vmem>>, vector<16x64xf32>,
    return
  }
  func.func @transform_0(%arg0: i32) -> (i32, i32) {
    %c0_i32 = arith.constant 0 : i32
    %c0_i32_0 = arith.constant 0 : i32
    return %arg0, %c0_i32 : i32, i32
  }
  func.func @transform_1(%arg0: i32) -> (i32, i32) {
    %c0_i32 = arith.constant 0 : i32
    %c0_i32_0 = arith.constant 0 : i32
    return %arg0, %c0_i32 : i32, i32
  }
  func.func @transform_2(%arg0: i32) -> (i32, i32) {
    %c0_i32 = arith.constant 0 : i32
    %c0_i32_0 = arith.constant 0 : i32
    %c0_i32_1 = arith.constant 0 : i32
    return %c0_i32, %c0_i32_0 : i32, i32
  }
  func.func @transform_3(%arg0: i32) -> (i32, i32) {
    %c0_i32 = arith.constant 0 : i32
    %c0_i32_0 = arith.constant 0 : i32
    %c0_i32_1 = arith.constant 0 : i32
    return %c0_i32, %c0_i32_0 : i32, i32
  }
  func.func @transform_4(%arg0: i32) -> (i32, i32) {
    %c0_i32 = arith.constant 0 : i32
    %c0_i32_0 = arith.constant 0 : i32
    %c0_i32_1 = arith.constant 0 : i32
    return %c0_i32, %c0_i32_0 : i32, i32
  }
  func.func @transform_5(%arg0: i32) -> (i32, i32) {
    %c0_i32 = arith.constant 0 : i32
    %c0_i32_0 = arith.constant 0 : i32
    %c0_i32_1 = arith.constant 0 : i32
    return %c0_i32, %c0_i32_0 : i32, i32
  }
  func.func @transform_6(%arg0: i32) -> (i32, i32) {
    %c0_i32 = arith.constant 0 : i32
    %c0_i32_0 = arith.constant 0 : i32
    %c0_i32_1 = arith.constant 0 : i32
    return %c0_i32, %c0_i32_0 : i32, i32
  }
  func.func @transform_7(%arg0: i32) -> (i32, i32) {
    %c0_i32 = arith.constant 0 : i32
    %c0_i32_0 = arith.constant 0 : i32
    %c0_i32_1 = arith.constant 0 : i32
    return %c0_i32, %c0_i32_0 : i32, i32
  }
  func.func @transform_8(%arg0: i32) -> (i32, i32) {
    %c0_i32 = arith.constant 0 : i32
    %c0_i32_0 = arith.constant 0 : i32
    return %arg0, %c0_i32 : i32, i32
  }
  func.func @transform_9(%arg0: i32) -> (i32, i32) {
    %c0_i32 = arith.constant 0 : i32
    %c0_i32_0 = arith.constant 0 : i32
    return %arg0, %c0_i32 : i32, i32
  }
}

module attributes {stable_mosaic.version = 11 : i64} {
  func.func @_fused_attn_kernel(%arg0: i32, %arg1: memref<16x32xbf16, #tpu.memory_space<vmem>>, %arg2: memref<16x16x64xbf16, #tpu.memory_space<vmem>>, %arg3: memref<16x16xi32, #tpu.memory_space<vmem>>, %arg4: memref<32x4xf32, #tpu.memory_space<vmem>>, %arg5: memref<4x32xf32, #tpu.memory_space<vmem>>, %arg6: memref<32x32xbf16, #tpu.memory_space<vmem>>, %arg7: memref<1x32xf32, #tpu.memory_space<vmem>>, %arg8: memref<32x64xbf16, #tpu.memory_space<vmem>>, %arg9: memref<1x64xf32, #tpu.memory_space<vmem>>, %arg10: memref<64x32xbf16, #tpu.memory_space<vmem>>, %arg11: memref<1x32xf32, #tpu.memory_space<vmem>>, %arg12: memref<32x32xbf16, #tpu.memory_space<vmem>>, %arg13: memref<1x32xf32, #tpu.memory_space<vmem>>, %arg14: memref<16x32xbf16, #tpu.memory_space<vmem>>) attributes {dimension_semantics = [#tpu.dimension_semantics<parallel>], iteration_bounds = array<i64: 2>, scalar_prefetch = 0 : i64, scratch_operands = 0 : i64, tpu.core_type = #tpu.core_type<tc>, window_params = [{transform_indices = @transform_0, window_bounds = array<i64: 16, 32>}, {transform_indices = @transform_1, window_bounds = array<i64: 16, 16, 64>}, {transform_indices = @transform_2, window_bounds = array<i64: 16, 16>}, {pipeline_mode = #tpu.pipeline_mode<synchronous>, transform_indices = @transform_3, window_bounds = array<i64: 32, 4>}, {pipeline_mode = #tpu.pipeline_mode<synchronous>, transform_indices = @transform_4, window_bounds = array<i64: 4, 32>}, {pipeline_mode = #tpu.pipeline_mode<synchronous>, transform_indices = @transform_5, window_bounds = array<i64: 32, 32>}, {pipeline_mode = #tpu.pipeline_mode<synchronous>, transform_indices = @transform_6, window_bounds = array<i64: 1, 32>}, {pipeline_mode = #tpu.pipeline_mode<synchronous>, transform_indices = @transform_7, window_bounds = array<i64: 32, 64>}, {pipeline_mode = #tpu.pipeline_mode<synchronous>, transform_indices = @transform_8, window_bounds = array<i64: 1, 64>}, {pipeline_mode = #tpu.pipeline_mode<synchronous>, transform_indices = @transform_9, window_bounds = array<i64: 64, 32>}, {pipeline_mode = #tpu.pipeline_mode<synchronous>, transform_indices = @transform_10, window_bounds = array<i64: 1, 32>}, {pipeline_mode = #tpu.pipeline_mode<synchronous>, transform_indices = @transform_11, window_bounds = array<i64: 32, 32>}, {pipeline_mode = #tpu.pipeline_mode<synchronous>, transform_indices = @transform_12, window_bounds = array<i64: 1, 32>}, {transform_indices = @transform_13, window_bounds = array<i64: 16, 32>}]} {
    %c0 = arith.constant 0 : index
    %c0_0 = arith.constant 0 : index
    %c0_1 = arith.constant 0 : index
    %0 = vector.load %arg2[%c0, %c0_0, %c0_1] : memref<16x16x64xbf16, #tpu.memory_space<vmem>>, vector<16x16x64xbf16>
    %1 = arith.extf %0 : vector<16x16x64xbf16> to vector<16x16x64xf32>
    %c0_2 = arith.constant 0 : index
    %c0_3 = arith.constant 0 : index
    %2 = vector.load %arg1[%c0_2, %c0_3] : memref<16x32xbf16, #tpu.memory_space<vmem>>, vector<16x32xbf16>
    %3 = arith.extf %2 : vector<16x32xbf16> to vector<16x32xf32>
    %4 = vector.shape_cast %3 : vector<16x32xf32> to vector<16x1x32xf32>
    %5 = vector.extract_strided_slice %1 {offsets = [0, 0, 0], sizes = [16, 16, 32], strides = [1, 1, 1]} : vector<16x16x64xf32> to vector<16x16x32xf32>
    %6 = vector.broadcast %4 : vector<16x1x32xf32> to vector<16x16x32xf32>
    %7 = arith.mulf %6, %5 : vector<16x16x32xf32>
    %8 = vector.shape_cast %7 : vector<16x16x32xf32> to vector<256x32xf32>
    %c0_4 = arith.constant 0 : index
    %c0_5 = arith.constant 0 : index
    %9 = vector.load %arg4[%c0_4, %c0_5] : memref<32x4xf32, #tpu.memory_space<vmem>>, vector<32x4xf32>
    %cst = arith.constant dense<0.000000e+00> : vector<256x4xf32>
    %10 = tpu.matmul %8, %9, %cst {dimension_numbers = #tpu.dot_dimension_numbers<[1], [0], [0], [1], [0, 0, 1, 1], [], []>} : vector<256x32xf32>, vector<32x4xf32>, vector<256x4xf32> -> vector<256x4xf32>
    %11 = vector.shape_cast %10 : vector<256x4xf32> to vector<16x16x4xf32>
    %c0_6 = arith.constant 0 : index
    %c0_7 = arith.constant 0 : index
    %12 = vector.load %arg3[%c0_6, %c0_7] : memref<16x16xi32, #tpu.memory_space<vmem>>, vector<16x16xi32>
    %13 = arith.sitofp %12 : vector<16x16xi32> to vector<16x16xf32>
    %cst_8 = arith.constant -1.000000e+30 : f32
    %14 = vector.broadcast %cst_8 : f32 to vector<16x16xf32>
    %15 = arith.mulf %13, %14 : vector<16x16xf32>
    %16 = vector.shape_cast %15 : vector<16x16xf32> to vector<16x16x1xf32>
    %17 = vector.broadcast %16 : vector<16x16x1xf32> to vector<16x16x4xf32>
    %18 = arith.addf %11, %17 : vector<16x16x4xf32>
    %cst_9 = arith.constant dense<0xFF800000> : vector<16x4xf32>
    %19 = vector.multi_reduction <maximumf>, %18, %cst_9 [1] : vector<16x16x4xf32> to vector<16x4xf32>
    %20 = vector.shape_cast %19 : vector<16x4xf32> to vector<16x1x4xf32>
    %21 = vector.broadcast %20 : vector<16x1x4xf32> to vector<16x16x4xf32>
    %22 = arith.subf %18, %21 : vector<16x16x4xf32>
    %23 = math.exp %22 : vector<16x16x4xf32>
    %cst_10 = arith.constant dense<0.000000e+00> : vector<16x4xf32>
    %24 = vector.multi_reduction <add>, %23, %cst_10 [1] : vector<16x16x4xf32> to vector<16x4xf32>
    %25 = vector.shape_cast %24 : vector<16x4xf32> to vector<16x1x4xf32>
    %26 = tpu.reciprocal %25 {approx = true} : vector<16x1x4xf32> -> vector<16x1x4xf32>
    %27 = vector.broadcast %26 : vector<16x1x4xf32> to vector<16x16x4xf32>
    %28 = arith.mulf %23, %27 : vector<16x16x4xf32>
    %29 = vector.shape_cast %28 : vector<16x16x4xf32> to vector<256x4xf32>
    %c0_11 = arith.constant 0 : index
    %c0_12 = arith.constant 0 : index
    %30 = vector.load %arg5[%c0_11, %c0_12] : memref<4x32xf32, #tpu.memory_space<vmem>>, vector<4x32xf32>
    %cst_13 = arith.constant dense<0.000000e+00> : vector<256x32xf32>
    %31 = tpu.matmul %29, %30, %cst_13 {dimension_numbers = #tpu.dot_dimension_numbers<[1], [0], [0], [1], [0, 0, 1, 1], [], []>} : vector<256x4xf32>, vector<4x32xf32>, vector<256x32xf32> -> vector<256x32xf32>
    %32 = vector.shape_cast %31 : vector<256x32xf32> to vector<16x16x32xf32>
    %33 = vector.extract_strided_slice %1 {offsets = [0, 0, 32], sizes = [16, 16, 32], strides = [1, 1, 1]} : vector<16x16x64xf32> to vector<16x16x32xf32>
    %34 = arith.mulf %32, %33 : vector<16x16x32xf32>
    %cst_14 = arith.constant dense<0.000000e+00> : vector<16x32xf32>
    %35 = vector.multi_reduction <add>, %34, %cst_14 [1] : vector<16x16x32xf32> to vector<16x32xf32>
    %36 = arith.truncf %35 : vector<16x32xf32> to vector<16x32xbf16>
    %c0_15 = arith.constant 0 : index
    %c0_16 = arith.constant 0 : index
    %37 = vector.load %arg6[%c0_15, %c0_16] : memref<32x32xbf16, #tpu.memory_space<vmem>>, vector<32x32xbf16>
    %cst_17 = arith.constant dense<0.000000e+00> : vector<16x32xf32>
    %38 = tpu.matmul %36, %37, %cst_17 {dimension_numbers = #tpu.dot_dimension_numbers<[1], [0], [0], [1], [0, 0, 1, 1], [], []>} : vector<16x32xbf16>, vector<32x32xbf16>, vector<16x32xf32> -> vector<16x32xf32>
    %c0_18 = arith.constant 0 : index
    %c0_19 = arith.constant 0 : index
    %39 = vector.load %arg7[%c0_18, %c0_19] : memref<1x32xf32, #tpu.memory_space<vmem>>, vector<1x32xf32>
    %40 = vector.broadcast %39 : vector<1x32xf32> to vector<16x32xf32>
    %41 = arith.addf %38, %40 : vector<16x32xf32>
    %42 = arith.truncf %41 : vector<16x32xf32> to vector<16x32xbf16>
    %c0_20 = arith.constant 0 : index
    %c0_21 = arith.constant 0 : index
    %43 = vector.load %arg8[%c0_20, %c0_21] : memref<32x64xbf16, #tpu.memory_space<vmem>>, vector<32x64xbf16>
    %cst_22 = arith.constant dense<0.000000e+00> : vector<16x64xf32>
    %44 = tpu.matmul %42, %43, %cst_22 {dimension_numbers = #tpu.dot_dimension_numbers<[1], [0], [0], [1], [0, 0, 1, 1], [], []>} : vector<16x32xbf16>, vector<32x64xbf16>, vector<16x64xf32> -> vector<16x64xf32>
    %c0_23 = arith.constant 0 : index
    %c0_24 = arith.constant 0 : index
    %45 = vector.load %arg9[%c0_23, %c0_24] : memref<1x64xf32, #tpu.memory_space<vmem>>, vector<1x64xf32>
    %46 = vector.broadcast %45 : vector<1x64xf32> to vector<16x64xf32>
    %47 = arith.addf %44, %46 : vector<16x64xf32>
    %cst_25 = arith.constant 0.000000e+00 : f32
    %48 = vector.broadcast %cst_25 : f32 to vector<16x64xf32>
    %49 = arith.maximumf %47, %48 : vector<16x64xf32>
    %50 = arith.truncf %49 : vector<16x64xf32> to vector<16x64xbf16>
    %c0_26 = arith.constant 0 : index
    %c0_27 = arith.constant 0 : index
    %51 = vector.load %arg10[%c0_26, %c0_27] : memref<64x32xbf16, #tpu.memory_space<vmem>>, vector<64x32xbf16>
    %cst_28 = arith.constant dense<0.000000e+00> : vector<16x32xf32>
    %52 = tpu.matmul %50, %51, %cst_28 {dimension_numbers = #tpu.dot_dimension_numbers<[1], [0], [0], [1], [0, 0, 1, 1], [], []>} : vector<16x64xbf16>, vector<64x32xbf16>, vector<16x32xf32> -> vector<16x32xf32>
    %53 = arith.addf %41, %52 : vector<16x32xf32>
    %c0_29 = arith.constant 0 : index
    %c0_30 = arith.constant 0 : index
    %54 = vector.load %arg11[%c0_29, %c0_30] : memref<1x32xf32, #tpu.memory_space<vmem>>, vector<1x32xf32>
    %55 = vector.broadcast %54 : vector<1x32xf32> to vector<16x32xf32>
    %56 = arith.addf %53, %55 : vector<16x32xf32>
    %57 = arith.truncf %56 : vector<16x32xf32> to vector<16x32xbf16>
    %c0_31 = arith.constant 0 : index
    %c0_32 = arith.constant 0 : index
    %58 = vector.load %arg12[%c0_31, %c0_32] : memref<32x32xbf16, #tpu.memory_space<vmem>>, vector<32x32xbf16>
    %cst_33 = arith.constant dense<0.000000e+00> : vector<16x32xf32>
    %59 = tpu.matmul %57, %58, %cst_33 {dimension_numbers = #tpu.dot_dimension_numbers<[1], [0], [0], [1], [0, 0, 1, 1], [], []>} : vector<16x32xbf16>, vector<32x32xbf16>, vector<16x32xf32> -> vector<16x32xf32>
    %c0_34 = arith.constant 0 : index
    %c0_35 = arith.constant 0 : index
    %60 = vector.load %arg13[%c0_34, %c0_35] : memref<1x32xf32, #tpu.memory_space<vmem>>, vector<1x32xf32>
    %61 = vector.broadcast %60 : vector<1x32xf32> to vector<16x32xf32>
    %62 = arith.addf %59, %61 : vector<16x32xf32>
    %cst_36 = arith.constant 0.000000e+00 : f32
    %63 = vector.broadcast %cst_36 : f32 to vector<16x32xf32>
    %64 = arith.maximumf %62, %63 : vector<16x32xf32>
    %65 = arith.truncf %64 : vector<16x32xf32> to vector<16x32xbf16>
    %c0_37 = arith.constant 0 : index
    %c0_38 = arith.constant 0 : index
    %66 = vector.load %arg14[%c0_37, %c0_38] : memref<16x32xbf16, #tpu.memory_space<vmem>>, vector<16x32xbf16>
    tpu.vector_store %arg14[%c0_37, %c0_38], %65 {strides = array<i32>} : memref<16x32xbf16, #tpu.memory_space<vmem>>, vector<16x32xbf16>,
    return
  }
  func.func @transform_0(%arg0: i32) -> (i32, i32) {
    %c0_i32 = arith.constant 0 : i32
    %c0_i32_0 = arith.constant 0 : i32
    return %arg0, %c0_i32 : i32, i32
  }
  func.func @transform_1(%arg0: i32) -> (i32, i32, i32) {
    %c0_i32 = arith.constant 0 : i32
    %c0_i32_0 = arith.constant 0 : i32
    %c0_i32_1 = arith.constant 0 : i32
    return %arg0, %c0_i32, %c0_i32_0 : i32, i32, i32
  }
  func.func @transform_2(%arg0: i32) -> (i32, i32) {
    %c0_i32 = arith.constant 0 : i32
    %c0_i32_0 = arith.constant 0 : i32
    return %arg0, %c0_i32 : i32, i32
  }
  func.func @transform_3(%arg0: i32) -> (i32, i32) {
    %c0_i32 = arith.constant 0 : i32
    %c0_i32_0 = arith.constant 0 : i32
    %c0_i32_1 = arith.constant 0 : i32
    return %c0_i32, %c0_i32_0 : i32, i32
  }
  func.func @transform_4(%arg0: i32) -> (i32, i32) {
    %c0_i32 = arith.constant 0 : i32
    %c0_i32_0 = arith.constant 0 : i32
    %c0_i32_1 = arith.constant 0 : i32
    return %c0_i32, %c0_i32_0 : i32, i32
  }
  func.func @transform_5(%arg0: i32) -> (i32, i32) {
    %c0_i32 = arith.constant 0 : i32
    %c0_i32_0 = arith.constant 0 : i32
    %c0_i32_1 = arith.constant 0 : i32
    return %c0_i32, %c0_i32_0 : i32, i32
  }
  func.func @transform_6(%arg0: i32) -> (i32, i32) {
    %c0_i32 = arith.constant 0 : i32
    %c0_i32_0 = arith.constant 0 : i32
    %c0_i32_1 = arith.constant 0 : i32
    return %c0_i32, %c0_i32_0 : i32, i32
  }
  func.func @transform_7(%arg0: i32) -> (i32, i32) {
    %c0_i32 = arith.constant 0 : i32
    %c0_i32_0 = arith.constant 0 : i32
    %c0_i32_1 = arith.constant 0 : i32
    return %c0_i32, %c0_i32_0 : i32, i32
  }
  func.func @transform_8(%arg0: i32) -> (i32, i32) {
    %c0_i32 = arith.constant 0 : i32
    %c0_i32_0 = arith.constant 0 : i32
    %c0_i32_1 = arith.constant 0 : i32
    return %c0_i32, %c0_i32_0 : i32, i32
  }
  func.func @transform_9(%arg0: i32) -> (i32, i32) {
    %c0_i32 = arith.constant 0 : i32
    %c0_i32_0 = arith.constant 0 : i32
    %c0_i32_1 = arith.constant 0 : i32
    return %c0_i32, %c0_i32_0 : i32, i32
  }
  func.func @transform_10(%arg0: i32) -> (i32, i32) {
    %c0_i32 = arith.constant 0 : i32
    %c0_i32_0 = arith.constant 0 : i32
    %c0_i32_1 = arith.constant 0 : i32
    return %c0_i32, %c0_i32_0 : i32, i32
  }
  func.func @transform_11(%arg0: i32) -> (i32, i32) {
    %c0_i32 = arith.constant 0 : i32
    %c0_i32_0 = arith.constant 0 : i32
    %c0_i32_1 = arith.constant 0 : i32
    return %c0_i32, %c0_i32_0 : i32, i32
  }
  func.func @transform_12(%arg0: i32) -> (i32, i32) {
    %c0_i32 = arith.constant 0 : i32
    %c0_i32_0 = arith.constant 0 : i32
    %c0_i32_1 = arith.constant 0 : i32
    return %c0_i32, %c0_i32_0 : i32, i32
  }
  func.func @transform_13(%arg0: i32) -> (i32, i32) {
    %c0_i32 = arith.constant 0 : i32
    %c0_i32_0 = arith.constant 0 : i32
    return %arg0, %c0_i32 : i32, i32
  }
}

module attributes {stable_mosaic.version = 11 : i64} {
  func.func @_fused_attn_kernel(%arg0: i32, %arg1: memref<16x32xbf16, #tpu.memory_space<vmem>>, %arg2: memref<16x16x64xbf16, #tpu.memory_space<vmem>>, %arg3: memref<16x16xi32, #tpu.memory_space<vmem>>, %arg4: memref<16x32xbf16, #tpu.memory_space<vmem>>, %arg5: memref<32x4xf32, #tpu.memory_space<vmem>>, %arg6: memref<4x32xf32, #tpu.memory_space<vmem>>, %arg7: memref<32x32xbf16, #tpu.memory_space<vmem>>, %arg8: memref<1x32xf32, #tpu.memory_space<vmem>>, %arg9: memref<1x32xf32, #tpu.memory_space<vmem>>, %arg10: memref<1x32xf32, #tpu.memory_space<vmem>>, %arg11: memref<32x64xbf16, #tpu.memory_space<vmem>>, %arg12: memref<1x64xf32, #tpu.memory_space<vmem>>, %arg13: memref<64x32xbf16, #tpu.memory_space<vmem>>, %arg14: memref<1x32xf32, #tpu.memory_space<vmem>>, %arg15: memref<32x32xbf16, #tpu.memory_space<vmem>>, %arg16: memref<1x32xf32, #tpu.memory_space<vmem>>, %arg17: memref<16x32xbf16, #tpu.memory_space<vmem>>) attributes {dimension_semantics = [#tpu.dimension_semantics<parallel>], iteration_bounds = array<i64: 2>, scalar_prefetch = 0 : i64, scratch_operands = 0 : i64, tpu.core_type = #tpu.core_type<tc>, window_params = [{transform_indices = @transform_0, window_bounds = array<i64: 16, 32>}, {transform_indices = @transform_1, window_bounds = array<i64: 16, 16, 64>}, {transform_indices = @transform_2, window_bounds = array<i64: 16, 16>}, {transform_indices = @transform_3, window_bounds = array<i64: 16, 32>}, {pipeline_mode = #tpu.pipeline_mode<synchronous>, transform_indices = @transform_4, window_bounds = array<i64: 32, 4>}, {pipeline_mode = #tpu.pipeline_mode<synchronous>, transform_indices = @transform_5, window_bounds = array<i64: 4, 32>}, {pipeline_mode = #tpu.pipeline_mode<synchronous>, transform_indices = @transform_6, window_bounds = array<i64: 32, 32>}, {pipeline_mode = #tpu.pipeline_mode<synchronous>, transform_indices = @transform_7, window_bounds = array<i64: 1, 32>}, {pipeline_mode = #tpu.pipeline_mode<synchronous>, transform_indices = @transform_8, window_bounds = array<i64: 1, 32>}, {pipeline_mode = #tpu.pipeline_mode<synchronous>, transform_indices = @transform_9, window_bounds = array<i64: 1, 32>}, {pipeline_mode = #tpu.pipeline_mode<synchronous>, transform_indices = @transform_10, window_bounds = array<i64: 32, 64>}, {pipeline_mode = #tpu.pipeline_mode<synchronous>, transform_indices = @transform_11, window_bounds = array<i64: 1, 64>}, {pipeline_mode = #tpu.pipeline_mode<synchronous>, transform_indices = @transform_12, window_bounds = array<i64: 64, 32>}, {pipeline_mode = #tpu.pipeline_mode<synchronous>, transform_indices = @transform_13, window_bounds = array<i64: 1, 32>}, {pipeline_mode = #tpu.pipeline_mode<synchronous>, transform_indices = @transform_14, window_bounds = array<i64: 32, 32>}, {pipeline_mode = #tpu.pipeline_mode<synchronous>, transform_indices = @transform_15, window_bounds = array<i64: 1, 32>}, {transform_indices = @transform_16, window_bounds = array<i64: 16, 32>}]} {
    %c0 = arith.constant 0 : index
    %c0_0 = arith.constant 0 : index
    %c0_1 = arith.constant 0 : index
    %0 = vector.load %arg2[%c0, %c0_0, %c0_1] : memref<16x16x64xbf16, #tpu.memory_space<vmem>>, vector<16x16x64xbf16>
    %1 = arith.extf %0 : vector<16x16x64xbf16> to vector<16x16x64xf32>
    %c0_2 = arith.constant 0 : index
    %c0_3 = arith.constant 0 : index
    %2 = vector.load %arg1[%c0_2, %c0_3] : memref<16x32xbf16, #tpu.memory_space<vmem>>, vector<16x32xbf16>
    %3 = arith.extf %2 : vector<16x32xbf16> to vector<16x32xf32>
    %4 = vector.shape_cast %3 : vector<16x32xf32> to vector<16x1x32xf32>
    %5 = vector.extract_strided_slice %1 {offsets = [0, 0, 0], sizes = [16, 16, 32], strides = [1, 1, 1]} : vector<16x16x64xf32> to vector<16x16x32xf32>
    %6 = vector.broadcast %4 : vector<16x1x32xf32> to vector<16x16x32xf32>
    %7 = arith.mulf %6, %5 : vector<16x16x32xf32>
    %8 = vector.shape_cast %7 : vector<16x16x32xf32> to vector<256x32xf32>
    %c0_4 = arith.constant 0 : index
    %c0_5 = arith.constant 0 : index
    %9 = vector.load %arg5[%c0_4, %c0_5] : memref<32x4xf32, #tpu.memory_space<vmem>>, vector<32x4xf32>
    %cst = arith.constant dense<0.000000e+00> : vector<256x4xf32>
    %10 = tpu.matmul %8, %9, %cst {dimension_numbers = #tpu.dot_dimension_numbers<[1], [0], [0], [1], [0, 0, 1, 1], [], []>} : vector<256x32xf32>, vector<32x4xf32>, vector<256x4xf32> -> vector<256x4xf32>
    %11 = vector.shape_cast %10 : vector<256x4xf32> to vector<16x16x4xf32>
    %c0_6 = arith.constant 0 : index
    %c0_7 = arith.constant 0 : index
    %12 = vector.load %arg3[%c0_6, %c0_7] : memref<16x16xi32, #tpu.memory_space<vmem>>, vector<16x16xi32>
    %13 = arith.sitofp %12 : vector<16x16xi32> to vector<16x16xf32>
    %cst_8 = arith.constant -1.000000e+30 : f32
    %14 = vector.broadcast %cst_8 : f32 to vector<16x16xf32>
    %15 = arith.mulf %13, %14 : vector<16x16xf32>
    %16 = vector.shape_cast %15 : vector<16x16xf32> to vector<16x16x1xf32>
    %17 = vector.broadcast %16 : vector<16x16x1xf32> to vector<16x16x4xf32>
    %18 = arith.addf %11, %17 : vector<16x16x4xf32>
    %cst_9 = arith.constant dense<0xFF800000> : vector<16x4xf32>
    %19 = vector.multi_reduction <maximumf>, %18, %cst_9 [1] : vector<16x16x4xf32> to vector<16x4xf32>
    %20 = vector.shape_cast %19 : vector<16x4xf32> to vector<16x1x4xf32>
    %21 = vector.broadcast %20 : vector<16x1x4xf32> to vector<16x16x4xf32>
    %22 = arith.subf %18, %21 : vector<16x16x4xf32>
    %23 = math.exp %22 : vector<16x16x4xf32>
    %cst_10 = arith.constant dense<0.000000e+00> : vector<16x4xf32>
    %24 = vector.multi_reduction <add>, %23, %cst_10 [1] : vector<16x16x4xf32> to vector<16x4xf32>
    %25 = vector.shape_cast %24 : vector<16x4xf32> to vector<16x1x4xf32>
    %26 = tpu.reciprocal %25 {approx = true} : vector<16x1x4xf32> -> vector<16x1x4xf32>
    %27 = vector.broadcast %26 : vector<16x1x4xf32> to vector<16x16x4xf32>
    %28 = arith.mulf %23, %27 : vector<16x16x4xf32>
    %29 = vector.shape_cast %28 : vector<16x16x4xf32> to vector<256x4xf32>
    %c0_11 = arith.constant 0 : index
    %c0_12 = arith.constant 0 : index
    %30 = vector.load %arg6[%c0_11, %c0_12] : memref<4x32xf32, #tpu.memory_space<vmem>>, vector<4x32xf32>
    %cst_13 = arith.constant dense<0.000000e+00> : vector<256x32xf32>
    %31 = tpu.matmul %29, %30, %cst_13 {dimension_numbers = #tpu.dot_dimension_numbers<[1], [0], [0], [1], [0, 0, 1, 1], [], []>} : vector<256x4xf32>, vector<4x32xf32>, vector<256x32xf32> -> vector<256x32xf32>
    %32 = vector.shape_cast %31 : vector<256x32xf32> to vector<16x16x32xf32>
    %33 = vector.extract_strided_slice %1 {offsets = [0, 0, 32], sizes = [16, 16, 32], strides = [1, 1, 1]} : vector<16x16x64xf32> to vector<16x16x32xf32>
    %34 = arith.mulf %32, %33 : vector<16x16x32xf32>
    %cst_14 = arith.constant dense<0.000000e+00> : vector<16x32xf32>
    %35 = vector.multi_reduction <add>, %34, %cst_14 [1] : vector<16x16x32xf32> to vector<16x32xf32>
    %36 = arith.truncf %35 : vector<16x32xf32> to vector<16x32xbf16>
    %c0_15 = arith.constant 0 : index
    %c0_16 = arith.constant 0 : index
    %37 = vector.load %arg7[%c0_15, %c0_16] : memref<32x32xbf16, #tpu.memory_space<vmem>>, vector<32x32xbf16>
    %cst_17 = arith.constant dense<0.000000e+00> : vector<16x32xf32>
    %38 = tpu.matmul %36, %37, %cst_17 {dimension_numbers = #tpu.dot_dimension_numbers<[1], [0], [0], [1], [0, 0, 1, 1], [], []>} : vector<16x32xbf16>, vector<32x32xbf16>, vector<16x32xf32> -> vector<16x32xf32>
    %c0_18 = arith.constant 0 : index
    %c0_19 = arith.constant 0 : index
    %39 = vector.load %arg8[%c0_18, %c0_19] : memref<1x32xf32, #tpu.memory_space<vmem>>, vector<1x32xf32>
    %40 = vector.broadcast %39 : vector<1x32xf32> to vector<16x32xf32>
    %41 = arith.addf %38, %40 : vector<16x32xf32>
    %c0_20 = arith.constant 0 : index
    %c0_21 = arith.constant 0 : index
    %42 = vector.load %arg4[%c0_20, %c0_21] : memref<16x32xbf16, #tpu.memory_space<vmem>>, vector<16x32xbf16>
    %43 = arith.extf %42 : vector<16x32xbf16> to vector<16x32xf32>
    %44 = arith.addf %43, %41 : vector<16x32xf32>
    %c0_22 = arith.constant 0 : index
    %c0_23 = arith.constant 0 : index
    %45 = vector.load %arg9[%c0_22, %c0_23] : memref<1x32xf32, #tpu.memory_space<vmem>>, vector<1x32xf32>
    %46 = vector.broadcast %45 : vector<1x32xf32> to vector<16x32xf32>
    %47 = arith.mulf %44, %46 : vector<16x32xf32>
    %c0_24 = arith.constant 0 : index
    %c0_25 = arith.constant 0 : index
    %48 = vector.load %arg10[%c0_24, %c0_25] : memref<1x32xf32, #tpu.memory_space<vmem>>, vector<1x32xf32>
    %49 = vector.broadcast %48 : vector<1x32xf32> to vector<16x32xf32>
    %50 = arith.addf %47, %49 : vector<16x32xf32>
    %51 = arith.truncf %50 : vector<16x32xf32> to vector<16x32xbf16>
    %c0_26 = arith.constant 0 : index
    %c0_27 = arith.constant 0 : index
    %52 = vector.load %arg11[%c0_26, %c0_27] : memref<32x64xbf16, #tpu.memory_space<vmem>>, vector<32x64xbf16>
    %cst_28 = arith.constant dense<0.000000e+00> : vector<16x64xf32>
    %53 = tpu.matmul %51, %52, %cst_28 {dimension_numbers = #tpu.dot_dimension_numbers<[1], [0], [0], [1], [0, 0, 1, 1], [], []>} : vector<16x32xbf16>, vector<32x64xbf16>, vector<16x64xf32> -> vector<16x64xf32>
    %c0_29 = arith.constant 0 : index
    %c0_30 = arith.constant 0 : index
    %54 = vector.load %arg12[%c0_29, %c0_30] : memref<1x64xf32, #tpu.memory_space<vmem>>, vector<1x64xf32>
    %55 = vector.broadcast %54 : vector<1x64xf32> to vector<16x64xf32>
    %56 = arith.addf %53, %55 : vector<16x64xf32>
    %cst_31 = arith.constant 0.000000e+00 : f32
    %57 = vector.broadcast %cst_31 : f32 to vector<16x64xf32>
    %58 = arith.maximumf %56, %57 : vector<16x64xf32>
    %59 = arith.truncf %58 : vector<16x64xf32> to vector<16x64xbf16>
    %c0_32 = arith.constant 0 : index
    %c0_33 = arith.constant 0 : index
    %60 = vector.load %arg13[%c0_32, %c0_33] : memref<64x32xbf16, #tpu.memory_space<vmem>>, vector<64x32xbf16>
    %cst_34 = arith.constant dense<0.000000e+00> : vector<16x32xf32>
    %61 = tpu.matmul %59, %60, %cst_34 {dimension_numbers = #tpu.dot_dimension_numbers<[1], [0], [0], [1], [0, 0, 1, 1], [], []>} : vector<16x64xbf16>, vector<64x32xbf16>, vector<16x32xf32> -> vector<16x32xf32>
    %62 = arith.addf %50, %61 : vector<16x32xf32>
    %c0_35 = arith.constant 0 : index
    %c0_36 = arith.constant 0 : index
    %63 = vector.load %arg14[%c0_35, %c0_36] : memref<1x32xf32, #tpu.memory_space<vmem>>, vector<1x32xf32>
    %64 = vector.broadcast %63 : vector<1x32xf32> to vector<16x32xf32>
    %65 = arith.addf %62, %64 : vector<16x32xf32>
    %66 = arith.truncf %65 : vector<16x32xf32> to vector<16x32xbf16>
    %c0_37 = arith.constant 0 : index
    %c0_38 = arith.constant 0 : index
    %67 = vector.load %arg15[%c0_37, %c0_38] : memref<32x32xbf16, #tpu.memory_space<vmem>>, vector<32x32xbf16>
    %cst_39 = arith.constant dense<0.000000e+00> : vector<16x32xf32>
    %68 = tpu.matmul %66, %67, %cst_39 {dimension_numbers = #tpu.dot_dimension_numbers<[1], [0], [0], [1], [0, 0, 1, 1], [], []>} : vector<16x32xbf16>, vector<32x32xbf16>, vector<16x32xf32> -> vector<16x32xf32>
    %c0_40 = arith.constant 0 : index
    %c0_41 = arith.constant 0 : index
    %69 = vector.load %arg16[%c0_40, %c0_41] : memref<1x32xf32, #tpu.memory_space<vmem>>, vector<1x32xf32>
    %70 = vector.broadcast %69 : vector<1x32xf32> to vector<16x32xf32>
    %71 = arith.addf %68, %70 : vector<16x32xf32>
    %cst_42 = arith.constant 0.000000e+00 : f32
    %72 = vector.broadcast %cst_42 : f32 to vector<16x32xf32>
    %73 = arith.maximumf %71, %72 : vector<16x32xf32>
    %74 = arith.truncf %73 : vector<16x32xf32> to vector<16x32xbf16>
    %c0_43 = arith.constant 0 : index
    %c0_44 = arith.constant 0 : index
    %75 = vector.load %arg17[%c0_43, %c0_44] : memref<16x32xbf16, #tpu.memory_space<vmem>>, vector<16x32xbf16>
    tpu.vector_store %arg17[%c0_43, %c0_44], %74 {strides = array<i32>} : memref<16x32xbf16, #tpu.memory_space<vmem>>, vector<16x32xbf16>,
    return
  }
  func.func @transform_0(%arg0: i32) -> (i32, i32) {
    %c0_i32 = arith.constant 0 : i32
    %c0_i32_0 = arith.constant 0 : i32
    return %arg0, %c0_i32 : i32, i32
  }
  func.func @transform_1(%arg0: i32) -> (i32, i32, i32) {
    %c0_i32 = arith.constant 0 : i32
    %c0_i32_0 = arith.constant 0 : i32
    %c0_i32_1 = arith.constant 0 : i32
    return %arg0, %c0_i32, %c0_i32_0 : i32, i32, i32
  }
  func.func @transform_2(%arg0: i32) -> (i32, i32) {
    %c0_i32 = arith.constant 0 : i32
    %c0_i32_0 = arith.constant 0 : i32
    return %arg0, %c0_i32 : i32, i32
  }
  func.func @transform_3(%arg0: i32) -> (i32, i32) {
    %c0_i32 = arith.constant 0 : i32
    %c0_i32_0 = arith.constant 0 : i32
    return %arg0, %c0_i32 : i32, i32
  }
  func.func @transform_4(%arg0: i32) -> (i32, i32) {
    %c0_i32 = arith.constant 0 : i32
    %c0_i32_0 = arith.constant 0 : i32
    %c0_i32_1 = arith.constant 0 : i32
    return %c0_i32, %c0_i32_0 : i32, i32
  }
  func.func @transform_5(%arg0: i32) -> (i32, i32) {
    %c0_i32 = arith.constant 0 : i32
    %c0_i32_0 = arith.constant 0 : i32
    %c0_i32_1 = arith.constant 0 : i32
    return %c0_i32, %c0_i32_0 : i32, i32
  }
  func.func @transform_6(%arg0: i32) -> (i32, i32) {
    %c0_i32 = arith.constant 0 : i32
    %c0_i32_0 = arith.constant 0 : i32
    %c0_i32_1 = arith.constant 0 : i32
    return %c0_i32, %c0_i32_0 : i32, i32
  }
  func.func @transform_7(%arg0: i32) -> (i32, i32) {
    %c0_i32 = arith.constant 0 : i32
    %c0_i32_0 = arith.constant 0 : i32
    %c0_i32_1 = arith.constant 0 : i32
    return %c0_i32, %c0_i32_0 : i32, i32
  }
  func.func @transform_8(%arg0: i32) -> (i32, i32) {
    %c0_i32 = arith.constant 0 : i32
    %c0_i32_0 = arith.constant 0 : i32
    %c0_i32_1 = arith.constant 0 : i32
    return %c0_i32, %c0_i32_0 : i32, i32
  }
  func.func @transform_9(%arg0: i32) -> (i32, i32) {
    %c0_i32 = arith.constant 0 : i32
    %c0_i32_0 = arith.constant 0 : i32
    %c0_i32_1 = arith.constant 0 : i32
    return %c0_i32, %c0_i32_0 : i32, i32
  }
  func.func @transform_10(%arg0: i32) -> (i32, i32) {
    %c0_i32 = arith.constant 0 : i32
    %c0_i32_0 = arith.constant 0 : i32
    %c0_i32_1 = arith.constant 0 : i32
    return %c0_i32, %c0_i32_0 : i32, i32
  }
  func.func @transform_11(%arg0: i32) -> (i32, i32) {
    %c0_i32 = arith.constant 0 : i32
    %c0_i32_0 = arith.constant 0 : i32
    %c0_i32_1 = arith.constant 0 : i32
    return %c0_i32, %c0_i32_0 : i32, i32
  }
  func.func @transform_12(%arg0: i32) -> (i32, i32) {
    %c0_i32 = arith.constant 0 : i32
    %c0_i32_0 = arith.constant 0 : i32
    %c0_i32_1 = arith.constant 0 : i32
    return %c0_i32, %c0_i32_0 : i32, i32
  }
  func.func @transform_13(%arg0: i32) -> (i32, i32) {
    %c0_i32 = arith.constant 0 : i32
    %c0_i32_0 = arith.constant 0 : i32
    %c0_i32_1 = arith.constant 0 : i32
    return %c0_i32, %c0_i32_0 : i32, i32
  }
  func.func @transform_14(%arg0: i32) -> (i32, i32) {
    %c0_i32 = arith.constant 0 : i32
    %c0_i32_0 = arith.constant 0 : i32
    %c0_i32_1 = arith.constant 0 : i32
    return %c0_i32, %c0_i32_0 : i32, i32
  }
  func.func @transform_15(%arg0: i32) -> (i32, i32) {
    %c0_i32 = arith.constant 0 : i32
    %c0_i32_0 = arith.constant 0 : i32
    %c0_i32_1 = arith.constant 0 : i32
    return %c0_i32, %c0_i32_0 : i32, i32
  }
  func.func @transform_16(%arg0: i32) -> (i32, i32) {
    %c0_i32 = arith.constant 0 : i32
    %c0_i32_0 = arith.constant 0 : i32
    return %arg0, %c0_i32 : i32, i32
  }
}

module attributes {stable_mosaic.version = 11 : i64} {
  func.func @_fused_attn_kernel(%arg0: i32, %arg1: memref<16x32xbf16, #tpu.memory_space<vmem>>, %arg2: memref<16x16x64xbf16, #tpu.memory_space<vmem>>, %arg3: memref<16x16xi32, #tpu.memory_space<vmem>>, %arg4: memref<16x32xbf16, #tpu.memory_space<vmem>>, %arg5: memref<16x32xbf16, #tpu.memory_space<vmem>>, %arg6: memref<32x4xf32, #tpu.memory_space<vmem>>, %arg7: memref<4x32xf32, #tpu.memory_space<vmem>>, %arg8: memref<32x32xbf16, #tpu.memory_space<vmem>>, %arg9: memref<1x32xf32, #tpu.memory_space<vmem>>, %arg10: memref<1x32xf32, #tpu.memory_space<vmem>>, %arg11: memref<1x32xf32, #tpu.memory_space<vmem>>, %arg12: memref<32x64xbf16, #tpu.memory_space<vmem>>, %arg13: memref<1x64xf32, #tpu.memory_space<vmem>>, %arg14: memref<64x32xbf16, #tpu.memory_space<vmem>>, %arg15: memref<1x32xf32, #tpu.memory_space<vmem>>, %arg16: memref<32x32xbf16, #tpu.memory_space<vmem>>, %arg17: memref<1x32xf32, #tpu.memory_space<vmem>>, %arg18: memref<16x32xf32, #tpu.memory_space<vmem>>) attributes {dimension_semantics = [#tpu.dimension_semantics<parallel>], iteration_bounds = array<i64: 2>, scalar_prefetch = 0 : i64, scratch_operands = 0 : i64, tpu.core_type = #tpu.core_type<tc>, window_params = [{transform_indices = @transform_0, window_bounds = array<i64: 16, 32>}, {transform_indices = @transform_1, window_bounds = array<i64: 16, 16, 64>}, {transform_indices = @transform_2, window_bounds = array<i64: 16, 16>}, {transform_indices = @transform_3, window_bounds = array<i64: 16, 32>}, {transform_indices = @transform_4, window_bounds = array<i64: 16, 32>}, {pipeline_mode = #tpu.pipeline_mode<synchronous>, transform_indices = @transform_5, window_bounds = array<i64: 32, 4>}, {pipeline_mode = #tpu.pipeline_mode<synchronous>, transform_indices = @transform_6, window_bounds = array<i64: 4, 32>}, {pipeline_mode = #tpu.pipeline_mode<synchronous>, transform_indices = @transform_7, window_bounds = array<i64: 32, 32>}, {pipeline_mode = #tpu.pipeline_mode<synchronous>, transform_indices = @transform_8, window_bounds = array<i64: 1, 32>}, {pipeline_mode = #tpu.pipeline_mode<synchronous>, transform_indices = @transform_9, window_bounds = array<i64: 1, 32>}, {pipeline_mode = #tpu.pipeline_mode<synchronous>, transform_indices = @transform_10, window_bounds = array<i64: 1, 32>}, {pipeline_mode = #tpu.pipeline_mode<synchronous>, transform_indices = @transform_11, window_bounds = array<i64: 32, 64>}, {pipeline_mode = #tpu.pipeline_mode<synchronous>, transform_indices = @transform_12, window_bounds = array<i64: 1, 64>}, {pipeline_mode = #tpu.pipeline_mode<synchronous>, transform_indices = @transform_13, window_bounds = array<i64: 64, 32>}, {pipeline_mode = #tpu.pipeline_mode<synchronous>, transform_indices = @transform_14, window_bounds = array<i64: 1, 32>}, {pipeline_mode = #tpu.pipeline_mode<synchronous>, transform_indices = @transform_15, window_bounds = array<i64: 32, 32>}, {pipeline_mode = #tpu.pipeline_mode<synchronous>, transform_indices = @transform_16, window_bounds = array<i64: 1, 32>}, {transform_indices = @transform_17, window_bounds = array<i64: 16, 32>}]} {
    %c0 = arith.constant 0 : index
    %c0_0 = arith.constant 0 : index
    %c0_1 = arith.constant 0 : index
    %0 = vector.load %arg2[%c0, %c0_0, %c0_1] : memref<16x16x64xbf16, #tpu.memory_space<vmem>>, vector<16x16x64xbf16>
    %1 = arith.extf %0 : vector<16x16x64xbf16> to vector<16x16x64xf32>
    %c0_2 = arith.constant 0 : index
    %c0_3 = arith.constant 0 : index
    %2 = vector.load %arg1[%c0_2, %c0_3] : memref<16x32xbf16, #tpu.memory_space<vmem>>, vector<16x32xbf16>
    %3 = arith.extf %2 : vector<16x32xbf16> to vector<16x32xf32>
    %4 = vector.shape_cast %3 : vector<16x32xf32> to vector<16x1x32xf32>
    %5 = vector.extract_strided_slice %1 {offsets = [0, 0, 0], sizes = [16, 16, 32], strides = [1, 1, 1]} : vector<16x16x64xf32> to vector<16x16x32xf32>
    %6 = vector.broadcast %4 : vector<16x1x32xf32> to vector<16x16x32xf32>
    %7 = arith.mulf %6, %5 : vector<16x16x32xf32>
    %8 = vector.shape_cast %7 : vector<16x16x32xf32> to vector<256x32xf32>
    %c0_4 = arith.constant 0 : index
    %c0_5 = arith.constant 0 : index
    %9 = vector.load %arg6[%c0_4, %c0_5] : memref<32x4xf32, #tpu.memory_space<vmem>>, vector<32x4xf32>
    %cst = arith.constant dense<0.000000e+00> : vector<256x4xf32>
    %10 = tpu.matmul %8, %9, %cst {dimension_numbers = #tpu.dot_dimension_numbers<[1], [0], [0], [1], [0, 0, 1, 1], [], []>} : vector<256x32xf32>, vector<32x4xf32>, vector<256x4xf32> -> vector<256x4xf32>
    %11 = vector.shape_cast %10 : vector<256x4xf32> to vector<16x16x4xf32>
    %c0_6 = arith.constant 0 : index
    %c0_7 = arith.constant 0 : index
    %12 = vector.load %arg3[%c0_6, %c0_7] : memref<16x16xi32, #tpu.memory_space<vmem>>, vector<16x16xi32>
    %13 = arith.sitofp %12 : vector<16x16xi32> to vector<16x16xf32>
    %cst_8 = arith.constant -1.000000e+30 : f32
    %14 = vector.broadcast %cst_8 : f32 to vector<16x16xf32>
    %15 = arith.mulf %13, %14 : vector<16x16xf32>
    %16 = vector.shape_cast %15 : vector<16x16xf32> to vector<16x16x1xf32>
    %17 = vector.broadcast %16 : vector<16x16x1xf32> to vector<16x16x4xf32>
    %18 = arith.addf %11, %17 : vector<16x16x4xf32>
    %cst_9 = arith.constant dense<0xFF800000> : vector<16x4xf32>
    %19 = vector.multi_reduction <maximumf>, %18, %cst_9 [1] : vector<16x16x4xf32> to vector<16x4xf32>
    %20 = vector.shape_cast %19 : vector<16x4xf32> to vector<16x1x4xf32>
    %21 = vector.broadcast %20 : vector<16x1x4xf32> to vector<16x16x4xf32>
    %22 = arith.subf %18, %21 : vector<16x16x4xf32>
    %23 = math.exp %22 : vector<16x16x4xf32>
    %cst_10 = arith.constant dense<0.000000e+00> : vector<16x4xf32>
    %24 = vector.multi_reduction <add>, %23, %cst_10 [1] : vector<16x16x4xf32> to vector<16x4xf32>
    %25 = vector.shape_cast %24 : vector<16x4xf32> to vector<16x1x4xf32>
    %26 = tpu.reciprocal %25 {approx = true} : vector<16x1x4xf32> -> vector<16x1x4xf32>
    %27 = vector.broadcast %26 : vector<16x1x4xf32> to vector<16x16x4xf32>
    %28 = arith.mulf %23, %27 : vector<16x16x4xf32>
    %29 = vector.shape_cast %28 : vector<16x16x4xf32> to vector<256x4xf32>
    %c0_11 = arith.constant 0 : index
    %c0_12 = arith.constant 0 : index
    %30 = vector.load %arg7[%c0_11, %c0_12] : memref<4x32xf32, #tpu.memory_space<vmem>>, vector<4x32xf32>
    %cst_13 = arith.constant dense<0.000000e+00> : vector<256x32xf32>
    %31 = tpu.matmul %29, %30, %cst_13 {dimension_numbers = #tpu.dot_dimension_numbers<[1], [0], [0], [1], [0, 0, 1, 1], [], []>} : vector<256x4xf32>, vector<4x32xf32>, vector<256x32xf32> -> vector<256x32xf32>
    %32 = vector.shape_cast %31 : vector<256x32xf32> to vector<16x16x32xf32>
    %33 = vector.extract_strided_slice %1 {offsets = [0, 0, 32], sizes = [16, 16, 32], strides = [1, 1, 1]} : vector<16x16x64xf32> to vector<16x16x32xf32>
    %34 = arith.mulf %32, %33 : vector<16x16x32xf32>
    %cst_14 = arith.constant dense<0.000000e+00> : vector<16x32xf32>
    %35 = vector.multi_reduction <add>, %34, %cst_14 [1] : vector<16x16x32xf32> to vector<16x32xf32>
    %36 = arith.truncf %35 : vector<16x32xf32> to vector<16x32xbf16>
    %c0_15 = arith.constant 0 : index
    %c0_16 = arith.constant 0 : index
    %37 = vector.load %arg8[%c0_15, %c0_16] : memref<32x32xbf16, #tpu.memory_space<vmem>>, vector<32x32xbf16>
    %cst_17 = arith.constant dense<0.000000e+00> : vector<16x32xf32>
    %38 = tpu.matmul %36, %37, %cst_17 {dimension_numbers = #tpu.dot_dimension_numbers<[1], [0], [0], [1], [0, 0, 1, 1], [], []>} : vector<16x32xbf16>, vector<32x32xbf16>, vector<16x32xf32> -> vector<16x32xf32>
    %c0_18 = arith.constant 0 : index
    %c0_19 = arith.constant 0 : index
    %39 = vector.load %arg9[%c0_18, %c0_19] : memref<1x32xf32, #tpu.memory_space<vmem>>, vector<1x32xf32>
    %40 = vector.broadcast %39 : vector<1x32xf32> to vector<16x32xf32>
    %41 = arith.addf %38, %40 : vector<16x32xf32>
    %c0_20 = arith.constant 0 : index
    %c0_21 = arith.constant 0 : index
    %42 = vector.load %arg4[%c0_20, %c0_21] : memref<16x32xbf16, #tpu.memory_space<vmem>>, vector<16x32xbf16>
    %43 = arith.extf %42 : vector<16x32xbf16> to vector<16x32xf32>
    %44 = arith.addf %43, %41 : vector<16x32xf32>
    %c0_22 = arith.constant 0 : index
    %c0_23 = arith.constant 0 : index
    %45 = vector.load %arg10[%c0_22, %c0_23] : memref<1x32xf32, #tpu.memory_space<vmem>>, vector<1x32xf32>
    %46 = vector.broadcast %45 : vector<1x32xf32> to vector<16x32xf32>
    %47 = arith.mulf %44, %46 : vector<16x32xf32>
    %c0_24 = arith.constant 0 : index
    %c0_25 = arith.constant 0 : index
    %48 = vector.load %arg11[%c0_24, %c0_25] : memref<1x32xf32, #tpu.memory_space<vmem>>, vector<1x32xf32>
    %49 = vector.broadcast %48 : vector<1x32xf32> to vector<16x32xf32>
    %50 = arith.addf %47, %49 : vector<16x32xf32>
    %51 = arith.truncf %50 : vector<16x32xf32> to vector<16x32xbf16>
    %c0_26 = arith.constant 0 : index
    %c0_27 = arith.constant 0 : index
    %52 = vector.load %arg12[%c0_26, %c0_27] : memref<32x64xbf16, #tpu.memory_space<vmem>>, vector<32x64xbf16>
    %cst_28 = arith.constant dense<0.000000e+00> : vector<16x64xf32>
    %53 = tpu.matmul %51, %52, %cst_28 {dimension_numbers = #tpu.dot_dimension_numbers<[1], [0], [0], [1], [0, 0, 1, 1], [], []>} : vector<16x32xbf16>, vector<32x64xbf16>, vector<16x64xf32> -> vector<16x64xf32>
    %c0_29 = arith.constant 0 : index
    %c0_30 = arith.constant 0 : index
    %54 = vector.load %arg13[%c0_29, %c0_30] : memref<1x64xf32, #tpu.memory_space<vmem>>, vector<1x64xf32>
    %55 = vector.broadcast %54 : vector<1x64xf32> to vector<16x64xf32>
    %56 = arith.addf %53, %55 : vector<16x64xf32>
    %cst_31 = arith.constant 0.000000e+00 : f32
    %57 = vector.broadcast %cst_31 : f32 to vector<16x64xf32>
    %58 = arith.maximumf %56, %57 : vector<16x64xf32>
    %59 = arith.truncf %58 : vector<16x64xf32> to vector<16x64xbf16>
    %c0_32 = arith.constant 0 : index
    %c0_33 = arith.constant 0 : index
    %60 = vector.load %arg14[%c0_32, %c0_33] : memref<64x32xbf16, #tpu.memory_space<vmem>>, vector<64x32xbf16>
    %cst_34 = arith.constant dense<0.000000e+00> : vector<16x32xf32>
    %61 = tpu.matmul %59, %60, %cst_34 {dimension_numbers = #tpu.dot_dimension_numbers<[1], [0], [0], [1], [0, 0, 1, 1], [], []>} : vector<16x64xbf16>, vector<64x32xbf16>, vector<16x32xf32> -> vector<16x32xf32>
    %62 = arith.addf %50, %61 : vector<16x32xf32>
    %c0_35 = arith.constant 0 : index
    %c0_36 = arith.constant 0 : index
    %63 = vector.load %arg15[%c0_35, %c0_36] : memref<1x32xf32, #tpu.memory_space<vmem>>, vector<1x32xf32>
    %64 = vector.broadcast %63 : vector<1x32xf32> to vector<16x32xf32>
    %65 = arith.addf %62, %64 : vector<16x32xf32>
    %66 = arith.truncf %65 : vector<16x32xf32> to vector<16x32xbf16>
    %c0_37 = arith.constant 0 : index
    %c0_38 = arith.constant 0 : index
    %67 = vector.load %arg16[%c0_37, %c0_38] : memref<32x32xbf16, #tpu.memory_space<vmem>>, vector<32x32xbf16>
    %cst_39 = arith.constant dense<0.000000e+00> : vector<16x32xf32>
    %68 = tpu.matmul %66, %67, %cst_39 {dimension_numbers = #tpu.dot_dimension_numbers<[1], [0], [0], [1], [0, 0, 1, 1], [], []>} : vector<16x32xbf16>, vector<32x32xbf16>, vector<16x32xf32> -> vector<16x32xf32>
    %c0_40 = arith.constant 0 : index
    %c0_41 = arith.constant 0 : index
    %69 = vector.load %arg17[%c0_40, %c0_41] : memref<1x32xf32, #tpu.memory_space<vmem>>, vector<1x32xf32>
    %70 = vector.broadcast %69 : vector<1x32xf32> to vector<16x32xf32>
    %71 = arith.addf %68, %70 : vector<16x32xf32>
    %cst_42 = arith.constant 0.000000e+00 : f32
    %72 = vector.broadcast %cst_42 : f32 to vector<16x32xf32>
    %73 = arith.maximumf %71, %72 : vector<16x32xf32>
    %c0_43 = arith.constant 0 : index
    %c0_44 = arith.constant 0 : index
    %74 = vector.load %arg5[%c0_43, %c0_44] : memref<16x32xbf16, #tpu.memory_space<vmem>>, vector<16x32xbf16>
    %75 = arith.extf %74 : vector<16x32xbf16> to vector<16x32xf32>
    %76 = arith.addf %73, %75 : vector<16x32xf32>
    %c0_45 = arith.constant 0 : index
    %c0_46 = arith.constant 0 : index
    %77 = vector.load %arg18[%c0_45, %c0_46] : memref<16x32xf32, #tpu.memory_space<vmem>>, vector<16x32xf32>
    tpu.vector_store %arg18[%c0_45, %c0_46], %76 {strides = array<i32>} : memref<16x32xf32, #tpu.memory_space<vmem>>, vector<16x32xf32>,
    return
  }
  func.func @transform_0(%arg0: i32) -> (i32, i32) {
    %c0_i32 = arith.constant 0 : i32
    %c0_i32_0 = arith.constant 0 : i32
    return %arg0, %c0_i32 : i32, i32
  }
  func.func @transform_1(%arg0: i32) -> (i32, i32, i32) {
    %c0_i32 = arith.constant 0 : i32
    %c0_i32_0 = arith.constant 0 : i32
    %c0_i32_1 = arith.constant 0 : i32
    return %arg0, %c0_i32, %c0_i32_0 : i32, i32, i32
  }
  func.func @transform_2(%arg0: i32) -> (i32, i32) {
    %c0_i32 = arith.constant 0 : i32
    %c0_i32_0 = arith.constant 0 : i32
    return %arg0, %c0_i32 : i32, i32
  }
  func.func @transform_3(%arg0: i32) -> (i32, i32) {
    %c0_i32 = arith.constant 0 : i32
    %c0_i32_0 = arith.constant 0 : i32
    return %arg0, %c0_i32 : i32, i32
  }
  func.func @transform_4(%arg0: i32) -> (i32, i32) {
    %c0_i32 = arith.constant 0 : i32
    %c0_i32_0 = arith.constant 0 : i32
    return %arg0, %c0_i32 : i32, i32
  }
  func.func @transform_5(%arg0: i32) -> (i32, i32) {
    %c0_i32 = arith.constant 0 : i32
    %c0_i32_0 = arith.constant 0 : i32
    %c0_i32_1 = arith.constant 0 : i32
    return %c0_i32, %c0_i32_0 : i32, i32
  }
  func.func @transform_6(%arg0: i32) -> (i32, i32) {
    %c0_i32 = arith.constant 0 : i32
    %c0_i32_0 = arith.constant 0 : i32
    %c0_i32_1 = arith.constant 0 : i32
    return %c0_i32, %c0_i32_0 : i32, i32
  }
  func.func @transform_7(%arg0: i32) -> (i32, i32) {
    %c0_i32 = arith.constant 0 : i32
    %c0_i32_0 = arith.constant 0 : i32
    %c0_i32_1 = arith.constant 0 : i32
    return %c0_i32, %c0_i32_0 : i32, i32
  }
  func.func @transform_8(%arg0: i32) -> (i32, i32) {
    %c0_i32 = arith.constant 0 : i32
    %c0_i32_0 = arith.constant 0 : i32
    %c0_i32_1 = arith.constant 0 : i32
    return %c0_i32, %c0_i32_0 : i32, i32
  }
  func.func @transform_9(%arg0: i32) -> (i32, i32) {
    %c0_i32 = arith.constant 0 : i32
    %c0_i32_0 = arith.constant 0 : i32
    %c0_i32_1 = arith.constant 0 : i32
    return %c0_i32, %c0_i32_0 : i32, i32
  }
  func.func @transform_10(%arg0: i32) -> (i32, i32) {
    %c0_i32 = arith.constant 0 : i32
    %c0_i32_0 = arith.constant 0 : i32
    %c0_i32_1 = arith.constant 0 : i32
    return %c0_i32, %c0_i32_0 : i32, i32
  }
  func.func @transform_11(%arg0: i32) -> (i32, i32) {
    %c0_i32 = arith.constant 0 : i32
    %c0_i32_0 = arith.constant 0 : i32
    %c0_i32_1 = arith.constant 0 : i32
    return %c0_i32, %c0_i32_0 : i32, i32
  }
  func.func @transform_12(%arg0: i32) -> (i32, i32) {
    %c0_i32 = arith.constant 0 : i32
    %c0_i32_0 = arith.constant 0 : i32
    %c0_i32_1 = arith.constant 0 : i32
    return %c0_i32, %c0_i32_0 : i32, i32
  }
  func.func @transform_13(%arg0: i32) -> (i32, i32) {
    %c0_i32 = arith.constant 0 : i32
    %c0_i32_0 = arith.constant 0 : i32
    %c0_i32_1 = arith.constant 0 : i32
    return %c0_i32, %c0_i32_0 : i32, i32
  }
  func.func @transform_14(%arg0: i32) -> (i32, i32) {
    %c0_i32 = arith.constant 0 : i32
    %c0_i32_0 = arith.constant 0 : i32
    %c0_i32_1 = arith.constant 0 : i32
    return %c0_i32, %c0_i32_0 : i32, i32
  }
  func.func @transform_15(%arg0: i32) -> (i32, i32) {
    %c0_i32 = arith.constant 0 : i32
    %c0_i32_0 = arith.constant 0 : i32
    %c0_i32_1 = arith.constant 0 : i32
    return %c0_i32, %c0_i32_0 : i32, i32
  }
  func.func @transform_16(%arg0: i32) -> (i32, i32) {
    %c0_i32 = arith.constant 0 : i32
    %c0_i32_0 = arith.constant 0 : i32
    %c0_i32_1 = arith.constant 0 : i32
    return %c0_i32, %c0_i32_0 : i32, i32
  }
  func.func @transform_17(%arg0: i32) -> (i32, i32) {
    %c0_i32 = arith.constant 0 : i32
    %c0_i32_0 = arith.constant 0 : i32
    return %arg0, %c0_i32 : i32, i32
  }
}

</mosaic_0001>

<bundles_post_ra>
// kernel: dada_res_block_forward.7
= control target key start
LH: loop header
LB: loop body
LE: loop exit
PB: predicated region body
PF: predicated region fallthrough
CT: control target
= control target key end

     0   :  { %s660_s21 = smov 0   ;;  %s700_s0 = inlined_call_operand.vmem [shape: f32[64,32], index: 0, kind: input, shape index: {}]   ;;  %s701_s1 = inlined_call_operand.vmem [shape: f32[64,3], index: 1, kind: input, shape index: {}]   ;;  %s702_s2 = inlined_call_operand.vmem [shape: f32[3,32], index: 2, kind: input, shape index: {}]   ;;  %s703_s3 = inlined_call_operand.vmem [shape: f32[1,32], index: 3, kind: input, shape index: {}]   ;;  %s704_s4 = inlined_call_operand.vmem [shape: bf16[32,64], index: 4, kind: input, shape index: {}]   ;;  %s705_s5 = inlined_call_operand.vmem [shape: f32[1,64], index: 5, kind: input, shape index: {}]   ;;  %s706_s6 = inlined_call_operand.vmem [shape: f32[64,64], index: 6, kind: output, shape index: {}]  }
   0x1 LB: > { %s558_s22 = sadd.s32 4294967295, %s623_s21   ;;  %p562_p0 = scmp.ge.s32.totalorder %s623_s21, 1  ;;  %s623_s21 = sphi %s660_s21, %s16_s21  }
   0x2   : > { %p224_p1 = scmp.lt.s32.totalorder %s623_s21, 3 }
   0x4   : > { %p225_p2 = pnand %p562_p0, %p224_p1 }
   0x5   : > { %v282_v0 = vld [vmem:[%s702_s2] sm:$0x7] (!%p225_p2)  ;;  %vm303_vm0 = vcmask (!%p225_p2), 1042432   ;;  %s563_s25 = sshll.u32 (!%p225_p2), %s558_s22, 2  ;;  %vm290_vm1 = vcmask (!%p225_p2), 23552   ;;  %v616_v6 = vld [vmem:[%s704_s4 + $0x8] sm:$0xff] (!%p225_p2)  }
   0x6   : > { %228 = sbr.rel (%p225_p2) target bundleno = 461 (0x1cd), region = 44  ;;  %591 = vmatprep.subr.msk.mxu0 (!%p225_p2), %vm303_vm0, %v282_v0  ;;  %p260_p3 = scmp.lt.s32.totalorder (!%p225_p2), %s563_s25, 7  ;;  %v615_v5 = vld [vmem:[%s704_s4] sm:$0xff] (!%p225_p2)   ;;  %vm429_vm2 = vcmask (!%p225_p2), 261120   ;;  %vm485_vm3 = vcmask (!%p225_p2), 523264  }
   0x7   : > { %592 = vmatpush3.msk.msra.mxu0 (!%p225_p2), %vm303_vm0, %v282_v0  ;;  %599 = vmatprep.subr.bf16.mxu1 (!%p225_p2), %v615_v5  ;;  %v569_v7 = vld [vmem:[%s703_s3] ss:$0 sm:$0xff] (!%p225_p2) }
   0x8   : > { %600 = vmatpush3.bf16.msra.mxu1 (!%p225_p2), %v615_v5  ;;  %v575_v30 = vld [vmem:[%s705_s5] ss:$0 sm:$0xff] (!%p225_p2) }
   0x9   : > { %601 = vmatprep.subr.bf16.mxu1 (!%p225_p2), %v616_v6 }
   0xc   : > { %602 = vmatpush3.bf16.msra.mxu1 (!%p225_p2), %v616_v6 }
   0xd   : > { %s708_s25 = smov (!%p260_p3, %s563_s25), 7 }
   0xe   : > { %s671_s26 = sshll.u32 %s708_s25, 3 }
   0xf   : > { %s269_s29 = scalar_lea.vmem %s701_s1, %s671_s26  ;;  %s263_s14 = scalar_lea.vmem %s700_s0, %s671_s26 }
  0x10   : > { %v278_v1 = vld [vmem:[%s269_s29] sm:$0xff]  ;;  %v279_v2 = vld [vmem:[%s269_s29 + $0x8] sm:$0xff]  ;;  %v280_v3 = vld [vmem:[%s269_s29 + $0x10] sm:$0xff]  ;;  %s275_s19 = scalar_lea.vmem %s706_s6, %s671_s26 }
  0x11   : > { %593 = vmatprep.mubr.msk.f32.mxu0 %vm290_vm1, %v278_v1  ;;  %v281_v4 = vld [vmem:[%s269_s29 + $0x18] sm:$0xff]  ;;  %v393_v11 = vld [vmem:[%s263_s14 + $0x8] sm:$0xff]  ;;  %v392_v14 = vld [vmem:[%s263_s14] sm:$0xff] }
  0x12   : > { %594 = vmatmul.mubr.msk.f32.vlgmr.msra.gmra.mrb[0].mxu0 %vm290_vm1, %v279_v2  ;;  %v395_v21 = vld [vmem:[%s263_s14 + $0x18] sm:$0xff]  ;;  %v394_v24 = vld [vmem:[%s263_s14 + $0x10] sm:$0xff] }
  0x13   : > { %596 = vmatprep.mubr.msk.f32.mxu0 %vm290_vm1, %v280_v3 }
  0x16   : > { %597 = vmatmul.mubr.msk.f32.gmra.mrb[2].mxu0 %vm290_vm1, %v281_v4 }
  0xe5   : > { %v595_v8 = vpop.f32.mrb[0].mxu0 }
  0xe6   : > { %v379_v9 = vadd.f32 %v595_v8, %v569_v7  ;;  %v373_v10 = vpop.f32.mrb[1].mxu0 }
  0xe7   : > { %v374_v12 = vadd.f32 %v569_v7, %v373_v10 }
  0xe8   : > { %v397_v13 = vmax.f32 %v379_v9, 0.0 }
  0xe9   : > { %v396_v15 = vmax.f32 %v374_v12, 0.0  ;;  %v598_v16 = vpop.f32.mrb[2].mxu0 }
  0xea   : > { %v401_v17 = vadd.f32 %v397_v13, %v393_v11  ;;  %v389_v18 = vadd.f32 %v598_v16, %v569_v7  ;;  %v383_v19 = vpop.f32.mrb[3].mxu0 }
  0xeb   : > { %v400_v20 = vadd.f32 %v396_v15, %v392_v14  ;;  %v384_v22 = vadd.f32 %v569_v7, %v383_v19 }
  0xec   : > { %v399_v23 = vmax.f32 %v389_v18, 0.0 }
  0xed   : > { %v398_v25 = vmax.f32 %v384_v22, 0.0  ;;  %v404_v26 = vpack.c.bf16 %v401_v17, %v400_v20 }
  0xee   : > { %v403_v27 = vadd.f32 %v399_v23, %v395_v21 }
  0xef   : > { %v402_v28 = vadd.f32 %v398_v25, %v394_v24  ;;  %603 = vmatprep.mubr.msk.bf16.mxu1 %vm429_vm2, %v404_v26 }
  0xf1   : > { %v405_v29 = vpack.c.bf16 %v403_v27, %v402_v28 }
  0xf3   : > { %604 = vmatmul.mubr.msk.bf16.vlgmr.msra.gmra.mrb[0].mxu1 %vm429_vm2, %v405_v29 }
 0x1c6   : > { %v605_v31 = vpop.f32.mrb[0].mxu1 }
 0x1c7   : > { %v470_v32 = vpop.f32.mrb[1].mxu1  ;;  %v479_v37 = vadd.f32 %v605_v31, %v575_v30 }
 0x1c8   : > { %v471_v33 = vadd.f32 %v575_v30, %v470_v32  ;;  %v606_v34 = vpop.f32.mrb[2].mxu1 }
 0x1c9   : > { %v473_v35 = vpop.f32.mrb[3].mxu1  ;;  %v482_v38 = vadd.f32 %v606_v34, %v575_v30  ;;  %488 = vst.msk [vmem:[%s275_s19 + $0x10] sm:$0xff] %vm485_vm3, %v479_v37 }
 0x1ca   : > { %486 = vst.msk [vmem:[%s275_s19] sm:$0xff] %vm485_vm3, %v471_v33  ;;  %v474_v36 = vadd.f32 %v575_v30, %v473_v35 }
 0x1cb   : > { %489 = vst.msk [vmem:[%s275_s19 + $0x18] sm:$0xff] %vm485_vm3, %v482_v38 }
 0x1cc   : > { %487 = vst.msk [vmem:[%s275_s19 + $0x8] sm:$0xff] %vm485_vm3, %v474_v36 }
 0x1cd PF: > { %s16_s21 = sadd.s32 1, %s623_s21  }
 0x1ce   : > { %p13_p4 = scmp.ge.s32.totalorder %s16_s21, 4  }
 0x1d0   :  { %15 = sbr.rel (!%p13_p4) target bundleno = 1 (0x1), region = 77 }

// kernel: dada_res_block_forward.8
= control target key start
LH: loop header
LB: loop body
LE: loop exit
PB: predicated region body
PF: predicated region fallthrough
CT: control target
= control target key end

     0   :  { %s557_s18 = smov 0   ;;  %s593_s0 = inlined_call_operand.vmem [shape: f32[32,3], index: 0, kind: input, shape index: {}]   ;;  %s594_s1 = inlined_call_operand.vmem [shape: f32[3,32], index: 1, kind: input, shape index: {}]   ;;  %s595_s2 = inlined_call_operand.vmem [shape: f32[1,32], index: 2, kind: input, shape index: {}]   ;;  %s596_s3 = inlined_call_operand.vmem [shape: bf16[32,32], index: 3, kind: input, shape index: {}]   ;;  %s597_s4 = inlined_call_operand.vmem [shape: f32[1,32], index: 4, kind: input, shape index: {}]   ;;  %s598_s5 = inlined_call_operand.vmem [shape: bf16[32,32], index: 5, kind: output, shape index: {}]  }
   0x1 LB: > { %s463_s19 = sadd.s32 4294967295, %s523_s18   ;;  %p467_p0 = scmp.ge.s32.totalorder %s523_s18, 1  ;;  %s523_s18 = sphi %s557_s18, %s15_s18  }
   0x2   : > { %p188_p1 = scmp.lt.s32.totalorder %s523_s18, 3 }
   0x4   : > { %p189_p2 = pnand %p467_p0, %p188_p1 }
   0x5   : > { %v231_v0 = vld [vmem:[%s594_s1] sm:$0x7] (!%p189_p2)  ;;  %vm246_vm0 = vcmask (!%p189_p2), 1042432   ;;  %s468_s22 = sshll.u32 (!%p189_p2), %s463_s19, 1  ;;  %vm239_vm1 = vcmask (!%p189_p2), 23552   ;;  %v525_v4 = vmov (!%p189_p2), 0.0  }
   0x6   : > { %192 = sbr.rel (%p189_p2) target bundleno = 456 (0x1c8), region = 40  ;;  %492 = vmatprep.subr.msk.mxu0 (!%p189_p2), %vm246_vm0, %v231_v0  ;;  %p217_p3 = scmp.lt.s32.totalorder (!%p189_p2), %s468_s22, 3  ;;  %v515_v3 = vld [vmem:[%s596_s3] sm:$0xff] (!%p189_p2)   ;;  %497 = vmatprep.subr.bf16.mxu1 (!%p189_p2), %v525_v4  ;;  %v516_v5 = vld [vmem:[%s596_s3 + $0x8] sm:$0xff] (!%p189_p2)   ;;  %vm526_vm2 = vmmov (!%p189_p2), 0   ;;  %vm351_vm3 = vcmask (!%p189_p2), 261120  }
   0x7   : > { %493 = vmatpush3.msk.msra.mxu0 (!%p189_p2), %vm246_vm0, %v231_v0  ;;  %498 = vmatpush3.bf16.msra.mxu1 (!%p189_p2), %v515_v3  ;;  %v472_v6 = vld [vmem:[%s595_s2] ss:$0 sm:$0xff] (!%p189_p2)  ;;  %vm404_vm4 = vcmask (!%p189_p2), 257024  }
   0x8   : > { %499 = vmatprep.subr.bf16.mxu1 (!%p189_p2), %v525_v4  ;;  %501 = vmatprep.mubr.msk.bf16.mxu1 (!%p189_p2), %vm526_vm2, %v525_v4  ;;  %v476_v14 = vld [vmem:[%s597_s4] ss:$0 sm:$0xff] (!%p189_p2) }
   0xb   : > { %500 = vmatpush3.bf16.msra.mxu1 (!%p189_p2), %v516_v5 }
   0xd   : > { %s600_s22 = smov (!%p217_p3, %s468_s22), 3 }
   0xe   : > { %s469_s23 = sshll.u32 %s600_s22, 3  ;;  %s471_s10 = sshll.u32 %s600_s22, 2 }
   0xf   : > { %s220_s26 = scalar_lea.vmem %s593_s0, %s469_s23  ;;  %s226_s13 = scalar_lea.vmem %s598_s5, %s471_s10 }
  0x10   : > { %v229_v1 = vld [vmem:[%s220_s26] sm:$0xff]  ;;  %v230_v2 = vld [vmem:[%s220_s26 + $0x8] sm:$0xff] }
  0x11   : > { %494 = vmatprep.mubr.msk.f32.mxu0 %vm239_vm1, %v229_v1 }
  0x12   : > { %495 = vmatmul.mubr.msk.f32.vlgmr.msra.gmra.mrb[0].mxu0 %vm239_vm1, %v230_v2 }
  0xe5   : > { %v496_v7 = vpop.f32.mrb[0].mxu0 }
  0xe6   : > { %v322_v8 = vadd.f32 %v496_v7, %v472_v6  ;;  %v316_v9 = vpop.f32.mrb[1].mxu0 }
  0xe7   : > { %v317_v10 = vadd.f32 %v472_v6, %v316_v9 }
  0xe8   : > { %v326_v11 = vmax.f32 %v322_v8, 0.0 }
  0xe9   : > { %v325_v12 = vmax.f32 %v317_v10, 0.0 }
  0xeb   : > { %v327_v13 = vpack.c.bf16 %v326_v11, %v325_v12 }
  0xed   : > { %502 = vmatmul.mubr.msk.bf16.vlgmr.msra.gmra.mrb[0].mxu1 %vm351_vm3, %v327_v13 }
 0x1c0   : > { %v389_v15 = vpop.f32.mrb[0].mxu1 }
 0x1c1   : > { %v390_v16 = vadd.f32 %v476_v14, %v389_v15  ;;  %v503_v17 = vpop.f32.mrb[1].mxu1 }
 0x1c2   : > { %v392_v18 = vpop.f32.mrb[2].mxu1 }
 0x1c3   : > { %v484_v19 = vpack.c.bf16 %v390_v16, %v390_v16  ;;  %v393_v20 = vadd.f32 %v476_v14, %v392_v18  ;;  %v504_v21 = vpop.f32.mrb[3].mxu1 }
 0x1c5   : > { %405 = vst.msk [vmem:[%s226_s13] sm:$0xf] %vm404_vm4, %v484_v19  ;;  %v485_v22 = vpack.c.bf16 %v393_v20, %v393_v20 }
 0x1c7   : > { %406 = vst.msk [vmem:[%s226_s13 + $0x4] sm:$0xf] %vm404_vm4, %v485_v22 }
 0x1c8 PF: > { %s15_s18 = sadd.s32 1, %s523_s18  }
 0x1c9   : > { %p12_p4 = scmp.ge.s32.totalorder %s15_s18, 4  }
 0x1cb   :  { %14 = sbr.rel (!%p12_p4) target bundleno = 1 (0x1), region = 70 }

// kernel: dada_res_block_forward.10
= control target key start
LH: loop header
LB: loop body
LE: loop exit
PB: predicated region body
PF: predicated region fallthrough
CT: control target
= control target key end

     0   :  { %s881_s30 = smov 0   ;;  %s940_s0 = inlined_call_operand.vmem [shape: bf16[32,32], index: 0, kind: input, shape index: {}]   ;;  %s941_s1 = inlined_call_operand.vmem [shape: f32[32,3], index: 1, kind: input, shape index: {}]   ;;  %s942_s2 = inlined_call_operand.vmem [shape: f32[3,64], index: 2, kind: input, shape index: {}]   ;;  %s943_s3 = inlined_call_operand.vmem [shape: f32[1,64], index: 3, kind: input, shape index: {}]   ;;  %s944_s4 = inlined_call_operand.vmem [shape: bf16[32,32], index: 4, kind: input, shape index: {}]   ;;  %s945_s5 = inlined_call_operand.vmem [shape: f32[1,32], index: 5, kind: input, shape index: {}]   ;;  %s946_s6 = inlined_call_operand.vmem [shape: bf16[32,64], index: 6, kind: input, shape index: {}]   ;;  %s947_s7 = inlined_call_operand.vmem [shape: f32[1,64], index: 7, kind: input, shape index: {}]   ;;  %s948_s8 = inlined_call_operand.vmem [shape: bf16[32,32], index: 8, kind: output, shape index: {0}]   ;;  %s949_s9 = inlined_call_operand.vmem [shape: f32[32,64], index: 9, kind: output, shape index: {1}]  }
   0x1 LB: > { %s740_s10 = sadd.s32 4294967295, %s826_s30   ;;  %p744_p0 = scmp.ge.s32.totalorder %s826_s30, 1  ;;  %s826_s30 = sphi %s881_s30, %s20_s30  }
   0x2   : > { %p302_p1 = scmp.lt.s32.totalorder %s826_s30, 3 }
   0x4   : > { %p303_p2 = pnand %p744_p0, %p302_p1 }
   0x5   : > { %v379_v0 = vld [vmem:[%s942_s2] sm:$0x7] (!%p303_p2)  ;;  %vm394_vm0 = vcmask (!%p303_p2), 1042432   ;;  %s745_s13 = sshll.u32 (!%p303_p2), %s740_s10, 1  ;;  %vm387_vm1 = vcmask (!%p303_p2), 23552   ;;  %v828_v4 = vmov (!%p303_p2), 0.0  }
   0x6   : > { %306 = sbr.rel (%p303_p2) target bundleno = 575 (0x23f), region = 52  ;;  %784 = vmatprep.subr.msk.mxu0 (!%p303_p2), %vm394_vm0, %v379_v0  ;;  %p349_p3 = scmp.lt.s32.totalorder (!%p303_p2), %s745_s13, 3  ;;  %v816_v3 = vld [vmem:[%s944_s4] sm:$0xff] (!%p303_p2)   ;;  %789 = vmatprep.subr.bf16.mxu1 (!%p303_p2), %v828_v4  ;;  %v817_v5 = vld [vmem:[%s944_s4 + $0x8] sm:$0xff] (!%p303_p2)   ;;  %vm829_vm2 = vmmov (!%p303_p2), 0   ;;  %vm511_vm3 = vcmask (!%p303_p2), 261120  }
   0x7   : > { %785 = vmatpush3.msk.msra.mxu0 (!%p303_p2), %vm394_vm0, %v379_v0  ;;  %790 = vmatpush3.bf16.msra.mxu1 (!%p303_p2), %v816_v3  ;;  %v818_v6 = vld [vmem:[%s946_s6] sm:$0xff] (!%p303_p2)   ;;  %v819_v7 = vld [vmem:[%s946_s6 + $0x8] sm:$0xff] (!%p303_p2)   ;;  %s830_s12 = smov (!%p303_p2), 96   ;;  %vm564_vm4 = vcmask (!%p303_p2), 257024   ;;  %vm635_vm5 = vcmask (!%p303_p2), 523264  }
   0x8   : > { %797 = vmatprep.subr.bf16.mxu0 (!%p303_p2), %v828_v4  ;;  %791 = vmatprep.subr.bf16.mxu1 (!%p303_p2), %v828_v4  ;;  %v753_v9 = vld [vmem:[%s943_s3] ss:$0 sm:$0xff] (!%p303_p2) }
   0x9   : > { %793 = vmatprep.mubr.msk.bf16.mxu1 (!%p303_p2), %vm829_vm2, %v828_v4  ;;  %v757_v26 = vld [vmem:[%s945_s5] ss:$0 sm:$0xff] (!%p303_p2) }
   0xa   : > { %v763_v35 = vld [vmem:[%s947_s7] ss:$0 sm:$0xff] (!%p303_p2) }
   0xb   : > { %792 = vmatpush3.bf16.msra.mxu1 (!%p303_p2), %v817_v5 }
   0xd   : > { %s951_s13 = smov (!%p349_p3, %s745_s13), 3 }
   0xe   : > { %s748_s14 = sshll.u32 %s951_s13, 3  ;;  %s746_s22 = sshll.u32 %s951_s13, 2 }
   0xf   : > { %s358_s17 = scalar_lea.vmem %s941_s1, %s748_s14  ;;  %s352_s27 = scalar_lea.vmem %s940_s0, %s746_s22 }
  0x10   : > { %v377_v1 = vld [vmem:[%s358_s17] sm:$0xff]  ;;  %v378_v2 = vld [vmem:[%s358_s17 + $0x8] sm:$0xff]  ;;  %s364_s19 = scalar_lea.vmem %s948_s8, %s746_s22  ;;  %s370_s25 = scalar_lea.vmem %s949_s9, %s748_s14 }
  0x11   : > { %786 = vmatprep.mubr.msk.f32.mxu0 %vm387_vm1, %v377_v1  ;;  %v772_v8 = vld [vmem:[%s352_s27] sm:$0xff]  }
  0x12   : > { %787 = vmatmul.mubr.msk.f32.vlgmr.msra.gmra.mrb[0].mxu0 %vm387_vm1, %v378_v2  ;;  %v774_v11 = vunpack.c.h.bf16 %v772_v8  ;;  %v773_v14 = vunpack.c.l.bf16 %v772_v8 }
  0x13   : > { %801 = vmatprep.mubr.msk.bf16.mxu0 %vm829_vm2, %v828_v4  ;;  %798 = vmatpush3.bf16.msra.mxu0 %v818_v6 }
  0x14   : > { %799 = vmatprep.subr.bf16.mxu0 %v828_v4 }
  0x17   : > { %800 = vmatpush3.bf16.msra.mxu0 %v819_v7 }
  0xe5   : > { %v788_v10 = vpop.f32.mrb[0].mxu0 }
  0xe6   : > { %v470_v12 = vadd.f32 %v788_v10, %v753_v9  ;;  %v464_v13 = vpop.f32.mrb[1].mxu0 }
  0xe7   : > { %v465_v15 = vadd.f32 %v753_v9, %v464_v13 }
  0xe8   : > { %v474_v16 = vmax.f32 %v470_v12, 0.0 }
  0xe9   : > { %v473_v17 = vmax.f32 %v465_v15, 0.0 }
  0xea   : > { %v476_v18 = vadd.f32 %v774_v11, %v474_v16 }
  0xeb   : > { %v475_v19 = vadd.f32 %v773_v14, %v473_v17  ;;  %479 = vrot.lane.b32.xlu0 %v473_v17, %s830_s12 }
  0xed   : > { %v487_v20 = vpack.c.bf16 %v476_v18, %v475_v19 }
  0xef   : > { %481 = vrot.lane.b32.xlu0 %v474_v16, %s830_s12  ;;  %794 = vmatmul.mubr.msk.bf16.vlgmr.msra.gmra.mrb[0].mxu1 %vm511_vm3, %v487_v20 }
 0x15d   : > { %v480_v21 = vpop.permute.xlu0 %479 }
 0x15e   : > { %v485_v23 = vadd.f32 %v773_v14, %v480_v21 }
 0x161   : > { %v482_v22 = vpop.permute.xlu0 %481 }
 0x162   : > { %v486_v24 = vadd.f32 %v774_v11, %v482_v22 }
 0x164   : > { %v567_v25 = vpack.c.bf16 %v486_v24, %v485_v23 }
 0x166   : > { %802 = vmatmul.mubr.msk.bf16.vlgmr.msra.gmra.mrb[4].mxu0 %vm511_vm3, %v567_v25 }
 0x1c2   : > { %v549_v27 = vpop.f32.mrb[0].mxu1 }
 0x1c3   : > { %v550_v28 = vadd.f32 %v757_v26, %v549_v27  ;;  %v795_v29 = vpop.f32.mrb[1].mxu1 }
 0x1c4   : > { %v552_v30 = vpop.f32.mrb[2].mxu1 }
 0x1c5   : > { %v769_v31 = vpack.c.bf16 %v550_v28, %v550_v28  ;;  %v553_v32 = vadd.f32 %v757_v26, %v552_v30  ;;  %v796_v33 = vpop.f32.mrb[3].mxu1 }
 0x1c7   : > { %565 = vst.msk [vmem:[%s364_s19] sm:$0xf] %vm564_vm4, %v769_v31  ;;  %v770_v34 = vpack.c.bf16 %v553_v32, %v553_v32 }
 0x1c9   : > { %566 = vst.msk [vmem:[%s364_s19 + $0x4] sm:$0xf] %vm564_vm4, %v770_v34 }
 0x239   : > { %v628_v36 = vpop.f32.mrb[4].mxu0 }
 0x23a   : > { %v629_v37 = vadd.f32 %v763_v35, %v628_v36  ;;  %v803_v38 = vpop.f32.mrb[5].mxu0 }
 0x23b   : > { %v631_v39 = vpop.f32.mrb[6].mxu0 }
 0x23c   : > { %636 = vst.msk [vmem:[%s370_s25] sm:$0xff] %vm635_vm5, %v629_v37  ;;  %v632_v40 = vadd.f32 %v763_v35, %v631_v39  ;;  %v804_v41 = vpop.f32.mrb[7].mxu0 }
 0x23e   : > { %637 = vst.msk [vmem:[%s370_s25 + $0x8] sm:$0xff] %vm635_vm5, %v632_v40 }
 0x23f PF: > { %s20_s30 = sadd.s32 1, %s826_s30  }
 0x240   : > { %p17_p4 = scmp.ge.s32.totalorder %s20_s30, 4  }
 0x242   :  { %19 = sbr.rel (!%p17_p4) target bundleno = 1 (0x1), region = 97 }

// kernel: dada_res_block_forward.9
= control target key start
LH: loop header
LB: loop body
LE: loop exit
PB: predicated region body
PF: predicated region fallthrough
CT: control target
= control target key end

     0   :  { %s3532_s25 = smov 0   ;;  %s4488_s0 = inlined_call_operand.vmem [shape: bf16[32,32], index: 0, kind: input, shape index: {}]   ;;  %s4489_s1 = inlined_call_operand.vmem [shape: bf16[32,16,64], index: 1, kind: input, shape index: {}]   ;;  %s4490_s2 = inlined_call_operand.vmem [shape: s32[32,16], index: 2, kind: input, shape index: {}]   ;;  %s4491_s3 = inlined_call_operand.vmem [shape: f32[32,4], index: 3, kind: input, shape index: {}]   ;;  %s4492_s4 = inlined_call_operand.vmem [shape: f32[4,32], index: 4, kind: input, shape index: {}]   ;;  %s4493_s5 = inlined_call_operand.vmem [shape: bf16[32,32], index: 5, kind: input, shape index: {}]   ;;  %s4494_s6 = inlined_call_operand.vmem [shape: f32[1,32], index: 6, kind: input, shape index: {}]   ;;  %s4495_s7 = inlined_call_operand.vmem [shape: bf16[32,64], index: 7, kind: input, shape index: {}]   ;;  %s4496_s8 = inlined_call_operand.vmem [shape: f32[1,64], index: 8, kind: input, shape index: {}]   ;;  %s4497_s9 = inlined_call_operand.vmem [shape: bf16[64,32], index: 9, kind: input, shape index: {}]   ;;  %s4498_s10 = inlined_call_operand.vmem [shape: f32[1,32], index: 10, kind: input, shape index: {}]   ;;  %s4499_s11 = inlined_call_operand.vmem [shape: bf16[32,32], index: 11, kind: input, shape index: {}]   ;;  %s4500_s12 = inlined_call_operand.vmem [shape: f32[1,32], index: 12, kind: input, shape index: {}]   ;;  %s4501_s13 = inlined_call_operand.vmem [shape: bf16[32,32], index: 13, kind: output, shape index: {}]  }
   0x1 LB: > { %s2832_s26 = sadd.s32 4294967295, %s3456_s25   ;;  %p2836_p0 = scmp.ge.s32.totalorder %s3456_s25, 1  ;;  %s3456_s25 = sphi %s3532_s25, %s23_s25  }
   0x2   : > { %p411_p1 = scmp.lt.s32.totalorder %s3456_s25, 3 }
   0x4   : > { %p412_p2 = pnand %p2836_p0, %p411_p1 }
   0x6   : > { %415 = sbr.rel (%p412_p2) target bundleno = 1532 (0x5fc), region = 72 }
   0xd   : > { %v772_v0 = vld [vmem:[%s4491_s3] sm:$0xff]  ;;  %v773_v1 = vld [vmem:[%s4491_s3 + $0x8] sm:$0xff]  ;;  %v774_v2 = vld [vmem:[%s4491_s3 + $0x10] sm:$0xff]  ;;  %s2837_s16 = sshll.u32 %s2832_s26, 1  ;;  %s2839_s17 = sshll.u32 %s2832_s26, 4  ;;  %v566_v3 = vlaneseq  ;;  %vm776_vm0 = vcmask 261120  }
   0xe   : > { %v3244_v4 = vpack.c.bf16 %v773_v1, %v772_v0  ;;  %v775_v5 = vld [vmem:[%s4491_s3 + $0x18] sm:$0xff]  ;;  %p467_p3 = scmp.lt.s32.totalorder %s2837_s16, 3  ;;  %p473_p4 = scmp.lt.s32.totalorder %s2839_s17, 31  ;;  %v3458_v7 = vmov 1966171168   ;;  %vm1842_vm1 = vcmask 1043456  }
   0xf   : > { %v3248_v6 = vpack.c.bf16 %v775_v5, %v774_v2  ;;  %v564_v8 = vunpack.c.l.s4 %v3458_v7  ;;  %v3552_v9 = vshrl.u32 %v566_v3, 7  ;;  %vm1312_vm2 = vcmask 31744   ;;  %s3459_s19 = smov 96  }
  0x10   : > { %3245 = vmatprep.subr.bf16.mxu0 %v3244_v4  ;;  %s4619_s16 = smov (!%p467_p3, %s2837_s16), 3  ;;  %s4621_s17 = smov (!%p473_p4, %s2839_s17), 31  ;;  %vm3461_vm3 = vmmov 0   ;;  %vm2434_vm4 = vcmask 1041409   ;;  %vm2436_vm5 = vcmask 1042434   ;;  %vm2438_vm6 = vcmask 1043459  }
  0x11   : > { %3247 = vmatpush3.bf16.msra.mxu0 %v3244_v4  ;;  %v565_v10 = vunpack.c.0.s8 %v564_v8  ;;  %s2838_s20 = sshll.u32 %s4619_s16, 2  ;;  %s2933_s24 = sshll.u32 %s4621_s17, 3  ;;  %v3575_v16 = vsub.s32 0, %v3552_v9  ;;  %v1117_v8 = vsub.s32 1, %v3552_v9  ;;  %vm2440_vm7 = vcmask 1044484  }
  0x12   : > { %3249 = vmatprep.subr.bf16.mxu0 %v3248_v6  ;;  %s470_s23 = scalar_lea.vmem %s4488_s0, %s2838_s20  ;;  %s3568_s28 = scalar_lea.vmem %s4489_s1, %s2933_s24  ;;  %vm2442_vm8 = vcmask 1045509   ;;  %vm2444_vm9 = vcmask 1046534   ;;  %vm2446_vm10 = vcmask 1047559   ;;  %vm2615_vm11 = vcmask 523264  }
  0x13   : > { %v3563_v11 = vsub.s32 %v565_v10, %v3552_v9  ;;  %v3001_v12 = vld [vmem:[%s470_s23] sm:$0xff]   ;;  %v3578_v18 = vld [vmem:[%s3568_s28 + $0x8] sm:$0xff]   ;;  %v3584_v23 = vld [vmem:[%s3568_s28 + $0x10] sm:$0xff]   ;;  %s2843_s29 = sshll.u32 %s4619_s16, 3  ;;  %s489_s23 = scalar_lea.vmem %s4501_s13, %s2838_s20  ;;  %vm2749_vm12 = vcmask 257024  }
  0x14   : > { %v3002_v13 = vunpack.c.l.bf16 %v3001_v12  ;;  %v3571_v14 = vld [vmem:[%s3568_s28] sm:$0xff]   ;;  %v4531_v26 = vunpack.c.l.bf16 %v3578_v18  ;;  %v3590_v28 = vld [vmem:[%s3568_s28 + $0x18] sm:$0xff]   ;;  %v4530_v29 = vunpack.c.h.bf16 %v3578_v18  ;;  %v4527_v30 = vunpack.c.l.bf16 %v3584_v23  ;;  %s3621_s15 = scalar_lea.vmem %s4490_s2, %s2843_s29  ;;  %v3635_v53 = vld [vmem:[%s3568_s28 + $0x28] sm:$0xff]  }
  0x15   : > { %3251 = vmatpush3.bf16.msra.mxu0 %v3248_v6  ;;  %v4533_v19 = vunpack.c.l.bf16 %v3571_v14  ;;  %v4532_v20 = vunpack.c.h.bf16 %v3571_v14  ;;  %4559 = vst [vmem:[#allocation2_spill] sm:$0xff] %v3590_v28  ;;  %v4526_v39 = vunpack.c.h.bf16 %v3584_v23  ;;  %v4525_v40 = vunpack.c.l.bf16 %v3590_v28  ;;  %v3616_v45 = vld [vmem:[%s3568_s28 + $0x20] sm:$0xff]   ;;  %4561 = vst [vmem:[#allocation4_spill] sm:$0xff] %v3635_v53  ;;  %v3649_v62 = vld [vmem:[%s3568_s28 + $0x30] sm:$0xff]  }
  0x16   : > { %v569_v15 = vrot.slane %v3002_v13, %v3563_v11  ;;  %v562_v17 = vcombine.high %v3002_v13, %v3002_v13  ;;  %4560 = vst [vmem:[#allocation3_spill] sm:$0xff] %v3616_v45  ;;  %v4524_v47 = vunpack.c.h.bf16 %v3590_v28  ;;  %v4519_v49 = vunpack.c.l.bf16 %v3616_v45  ;;  %v1098_v52 = vld [vmem:[%s3621_s15] sm:$0xff]  ;;  %4562 = vst [vmem:[#allocation5_spill] sm:$0xff] %v3649_v62  ;;  %v3663_v6 = vld [vmem:[%s3568_s28 + $0x38] sm:$0xff]  }
  0x17   : > { %v3637_v54 = vunpack.c.h.bf16 %v3001_v12  ;;  %v4518_v56 = vunpack.c.h.bf16 %v3616_v45  ;;  %v1100_v58 = vcvt.s32.f32 %v1098_v52  ;;  %v4515_v60 = vunpack.c.l.bf16 %v3635_v53  ;;  %4563 = vst [vmem:[#allocation6_spill] sm:$0xff] %v3663_v6  ;;  %v3716_v52 = vld [vmem:[%s3568_s28 + $0x50] sm:$0xff]  }
  0x18   : > { %v577_v21 = vcombine.high %v569_v15, %v569_v15  ;;  %v585_v22 = vrot.slane %v569_v15, %v3563_v11  ;;  %v576_v31 = vrot.slane %v562_v17, %v3563_v11  ;;  %v4514_v63 = vunpack.c.h.bf16 %v3635_v53  ;;  %4565 = vst [vmem:[#allocation8_spill] sm:$0xff] %v3716_v52 }
  0x19   : > { %v4511_v1 = vunpack.c.l.bf16 %v3649_v62  ;;  %v3657_v4 = vmul.f32 -1e+30, %v1100_v58  ;;  %v618_v7 = vrot.slane %v3637_v54, %v3563_v11  ;;  %v4504_v10 = vunpack.c.h.bf16 %v3649_v62 }
  0x1a   : > { %v607_v24 = vcombine.high %v585_v22, %v585_v22  ;;  %v663_v25 = vrot.slane %v585_v22, %v3575_v16  ;;  %v599_v27 = vrot.slane %v577_v21, %v3563_v11  ;;  %v592_v43 = vrot.slane %v576_v31, %v3563_v11 }
  0x1b   : > { %v578_v44 = vcombine.high %v576_v31, %v576_v31  ;;  %v4503_v15 = vunpack.c.l.bf16 %v3663_v6  ;;  %v634_v21 = vrot.slane %v618_v7, %v3563_v11  ;;  %v626_v22 = vcombine.high %v618_v7, %v618_v7 }
  0x1c   : > { %v740_v32 = vmul.f32 %v4533_v19, %v663_v25  ;;  %v741_v33 = vmul.f32 %v4532_v20, %v663_v25  ;;  %v667_v34 = vrot.slane %v599_v27, %v3575_v16  ;;  %v671_v35 = vrot.slane %v607_v24, %v3575_v16 }
  0x1d   : > { %v609_v36 = vcombine.high %v599_v27, %v599_v27  ;;  %v679_v50 = vrot.slane %v592_v43, %v3575_v16  ;;  %v606_v51 = vrot.slane %v578_v44, %v3563_v11  ;;  %v608_v57 = vcombine.high %v592_v43, %v592_v43  ;;  %v3684_v27 = vld [vmem:[%s3568_s28 + $0x40] sm:$0xff]  }
  0x1e   : > { %3110 = vmatprep.mubr.msk.f32.mxu0 %vm776_vm0, %v740_v32  ;;  %v742_v37 = vmul.f32 %v4531_v26, %v667_v34  ;;  %v743_v38 = vmul.f32 %v4530_v29, %v667_v34  ;;  %v744_v41 = vmul.f32 %v4527_v30, %v671_v35  ;;  %v745_v46 = vmul.f32 %v4526_v39, %v671_v35 }
  0x1f   : > { %3111 = vmatmul.mubr.msk.f32.vlgmr.msra.gmra.mrb[0].mxu0 %vm776_vm0, %v741_v33  ;;  %v675_v42 = vrot.slane %v609_v36, %v3575_v16  ;;  %v748_v59 = vmul.f32 %v4519_v49, %v679_v50  ;;  %v683_v61 = vrot.slane %v606_v51, %v3575_v16  ;;  %v749_v0 = vmul.f32 %v4518_v56, %v679_v50 }
  0x20   : > { %3113 = vmatprep.mubr.msk.f32.mxu0 %vm776_vm0, %v742_v37  ;;  %v687_v2 = vrot.slane %v608_v57, %v3575_v16  ;;  %v610_v3 = vcombine.high %v606_v51, %v606_v51  ;;  %v1107_v24 = vrot.slane %v3657_v4, %v3575_v16  ;;  %v1118_v25 = vrot.slane %v3657_v4, %v1117_v8 }
  0x21   : > { %v746_v48 = vmul.f32 %v4525_v40, %v675_v42  ;;  %v747_v55 = vmul.f32 %v4524_v47, %v675_v42  ;;  %v750_v5 = vmul.f32 %v4515_v60, %v683_v61  ;;  %v751_v12 = vmul.f32 %v4514_v63, %v683_v61 }
  0x22   : > { %v752_v13 = vmul.f32 %v4511_v1, %v687_v2  ;;  %v691_v17 = vrot.slane %v610_v3, %v3575_v16  ;;  %1109 = vbcast.lane.b32.xlu0 %v1107_v24, 256  ;;  %1120 = vbcast.lane.b32.xlu1 %v1118_v25, 256  ;;  %v1128_v31 = vsub.s32 2, %v3552_v9  ;;  %v753_v32 = vmul.f32 %v4504_v10, %v687_v2  ;;  %v3732_v3 = vld [vmem:[%s3568_s28 + $0x58] sm:$0xff]  }
  0x23   : > { %3114 = vmatmul.mubr.msk.f32.gmra.mrb[2].mxu0 %vm776_vm0, %v743_v38  ;;  %v4502_v33 = vunpack.c.h.bf16 %v3663_v6  ;;  %v4529_v35 = vunpack.c.l.bf16 %v3684_v27  ;;  %v695_v36 = vrot.slane %v634_v21, %v3575_v16  ;;  %v648_v37 = vrot.slane %v626_v22, %v3563_v11  ;;  %v3698_v38 = vld [vmem:[%s3568_s28 + $0x48] sm:$0xff]   ;;  %4566 = vst [vmem:[#allocation9_spill] sm:$0xff] %v3732_v3 }
  0x24   : > { %3116 = vmatprep.mubr.msk.f32.mxu0 %vm776_vm0, %v744_v41  ;;  %v754_v34 = vmul.f32 %v4503_v15, %v691_v17  ;;  %4564 = vst [vmem:[#allocation7_spill] sm:$0xff] %v3698_v38  ;;  %v1129_v41 = vrot.slane %v3657_v4, %v1128_v31  ;;  %v1139_v42 = vsub.s32 3, %v3552_v9  ;;  %v611_v43 = vcombine.high %v3637_v54, %v3637_v54 }
  0x25   : > { %v755_v44 = vmul.f32 %v4502_v33, %v691_v17  ;;  %v4523_v50 = vunpack.c.l.bf16 %v3698_v38  ;;  %v699_v51 = vrot.slane %v648_v37, %v3575_v16  ;;  %v656_v54 = vcombine.high %v634_v21, %v634_v21 }
  0x26   : > { %1113 = vbcast.lane.b32.xlu0 %v1107_v24, 264  ;;  %1124 = vbcast.lane.b32.xlu1 %v1118_v25, 264  ;;  %v1150_v57 = vsub.s32 4, %v3552_v9  ;;  %v4521_v61 = vunpack.c.l.bf16 %v3716_v52  ;;  %v625_v7 = vrot.slane %v611_v43, %v3563_v11  ;;  %v4520_v21 = vunpack.c.h.bf16 %v3716_v52  ;;  %v1099_v43 = vld [vmem:[%s3621_s15 + $0x8] sm:$0xff] }
  0x27   : > { %3117 = vmatmul.mubr.msk.f32.gmra.mrb[4].mxu0 %vm776_vm0, %v745_v46  ;;  %v4528_v46 = vunpack.c.h.bf16 %v3684_v27  ;;  %v703_v2 = vrot.slane %v656_v54, %v3575_v16  ;;  %v4517_v22 = vunpack.c.l.bf16 %v3732_v3 }
  0x28   : > { %3119 = vmatprep.mubr.msk.f32.mxu0 %vm776_vm0, %v746_v48  ;;  %v756_v48 = vmul.f32 %v4529_v35, %v695_v36 }
  0x29   : > { %v757_v58 = vmul.f32 %v4528_v46, %v695_v36  ;;  %v760_v24 = vmul.f32 %v4521_v61, %v703_v2  ;;  %v3750_v36 = vld [vmem:[%s3568_s28 + $0x60] sm:$0xff]  }
  0x2a   : > { %1135 = vbcast.lane.b32.xlu1 %v1129_v41, 264  ;;  %1131 = vbcast.lane.b32.xlu0 %v1129_v41, 256  ;;  %4567 = vst [vmem:[#allocation10_spill] sm:$0xff] %v3750_v36  ;;  %v1172_v41 = vsub.s32 6, %v3552_v9  ;;  %v4513_v54 = vunpack.c.l.bf16 %v3750_v36 }
  0x2b   : > { %3120 = vmatmul.mubr.msk.f32.gmra.mrb[6].mxu0 %vm776_vm0, %v747_v55  ;;  %v1140_v55 = vrot.slane %v3657_v4, %v1139_v42 }
  0x2c   : > { %3122 = vmatprep.mubr.msk.f32.mxu0 %vm776_vm0, %v748_v59  ;;  %v4522_v59 = vunpack.c.h.bf16 %v3698_v38 }
  0x2e   : > { %1146 = vbcast.lane.b32.xlu1 %v1140_v55, 264  ;;  %1142 = vbcast.lane.b32.xlu0 %v1140_v55, 256  ;;  %v759_v17 = vmul.f32 %v4522_v59, %v699_v51 }
  0x2f   : > { %3123 = vmatmul.mubr.msk.f32.gmra.mrb[8].mxu0 %vm776_vm0, %v749_v0  ;;  %v758_v0 = vmul.f32 %v4523_v50, %v699_v51 }
  0x30   : > { %3125 = vmatprep.mubr.msk.f32.mxu0 %vm776_vm0, %v750_v5  ;;  %v658_v5 = vcombine.high %v648_v37, %v648_v37 }
  0x32   : > { %v707_v25 = vrot.slane %v658_v5, %v3575_v16  ;;  %v1101_v5 = vcvt.s32.f32 %v1099_v43  ;;  %v3784_v43 = vld [vmem:[%s3568_s28 + $0x70] sm:$0xff]  }
  0x33   : > { %3126 = vmatmul.mubr.msk.f32.gmra.mrb[10].mxu0 %vm776_vm0, %v751_v12  ;;  %v1151_v12 = vrot.slane %v3657_v4, %v1150_v57  ;;  %4569 = vst [vmem:[#allocation12_spill] sm:$0xff] %v3784_v43 }
  0x34   : > { %3128 = vmatprep.mubr.msk.f32.mxu0 %vm776_vm0, %v752_v13  ;;  %v1161_v13 = vsub.s32 5, %v3552_v9  ;;  %v762_v51 = vmul.f32 %v4517_v22, %v707_v25  ;;  %v1103_v33 = vmul.f32 -1e+30, %v1101_v5 }
  0x35   : > { %1157 = vbcast.lane.b32.xlu1 %v1151_v12, 264  ;;  %1153 = vbcast.lane.b32.xlu0 %v1151_v12, 256 }
  0x36   : > { %v1162_v37 = vrot.slane %v3657_v4, %v1161_v13 }
  0x37   : > { %3129 = vmatmul.mubr.msk.f32.gmra.mrb[12].mxu0 %vm776_vm0, %v753_v32  ;;  %v641_v32 = vrot.slane %v625_v7, %v3563_v11 }
  0x38   : > { %3131 = vmatprep.mubr.msk.f32.mxu0 %vm776_vm0, %v754_v34  ;;  %v627_v34 = vcombine.high %v625_v7, %v625_v7  ;;  %v1183_v7 = vsub.s32 7, %v3552_v9 }
  0x39   : > { %v711_v55 = vrot.slane %v641_v32, %v3575_v16  ;;  %1168 = vbcast.lane.b32.xlu1 %v1162_v37, 264  ;;  %1164 = vbcast.lane.b32.xlu0 %v1162_v37, 256  ;;  %v657_v37 = vcombine.high %v641_v32, %v641_v32  ;;  %v4508_v32 = vunpack.c.l.bf16 %v3784_v43 }
  0x3b   : > { %3132 = vmatmul.mubr.msk.f32.gmra.mrb[14].mxu0 %vm776_vm0, %v755_v44  ;;  %v761_v44 = vmul.f32 %v4520_v21, %v703_v2  ;;  %v1173_v2 = vrot.slane %v3657_v4, %v1172_v41  ;;  %v719_v5 = vrot.slane %v657_v37, %v3575_v16 }
  0x3c   : > { %3134 = vmatprep.mubr.msk.f32.mxu0 %vm776_vm0, %v756_v48  ;;  %v4516_v48 = vunpack.c.h.bf16 %v3732_v3 }
  0x3d   : > { %1179 = vbcast.lane.b32.xlu1 %v1173_v2, 264  ;;  %1175 = vbcast.lane.b32.xlu0 %v1173_v2, 256  ;;  %v3797_v2 = vld [vmem:[%s3568_s28 + $0x78] sm:$0xff]  }
  0x3e   : > { %v763_v12 = vmul.f32 %v4516_v48, %v707_v25  ;;  %v1184_v25 = vrot.slane %v3657_v4, %v1183_v7  ;;  %4570 = vst [vmem:[#allocation13_spill] sm:$0xff] %v3797_v2  ;;  %v1195_v4 = vrot.slane %v1103_v33, %v3575_v16 }
  0x3f   : > { %3135 = vmatmul.mubr.msk.f32.gmra.mrb[16].mxu0 %vm776_vm0, %v757_v58  ;;  %v655_v58 = vrot.slane %v627_v34, %v3563_v11  ;;  %v764_v11 = vmul.f32 %v4513_v54, %v711_v55 }
  0x40   : > { %3137 = vmatprep.mubr.msk.f32.mxu0 %vm776_vm0, %v758_v0  ;;  %v3768_v0 = vld [vmem:[%s3568_s28 + $0x68] sm:$0xff]  }
  0x41   : > { %4568 = vst [vmem:[#allocation11_spill] sm:$0xff] %v3768_v0  ;;  %v715_v34 = vrot.slane %v655_v58, %v3575_v16  ;;  %v659_v10 = vcombine.high %v655_v58, %v655_v58  ;;  %1190 = vbcast.lane.b32.xlu1 %v1184_v25, 264  ;;  %1186 = vbcast.lane.b32.xlu0 %v1184_v25, 256  ;;  %v4506_v58 = vunpack.c.l.bf16 %v3797_v2 }
  0x42   : > { %v1206_v25 = vrot.slane %v1103_v33, %v1117_v8 }
  0x43   : > { %3138 = vmatmul.mubr.msk.f32.gmra.mrb[18].mxu0 %vm776_vm0, %v759_v17  ;;  %v4512_v17 = vunpack.c.h.bf16 %v3750_v36  ;;  %v723_v37 = vrot.slane %v659_v10, %v3575_v16  ;;  %v1217_v16 = vrot.slane %v1103_v33, %v1128_v31  ;;  %v1228_v10 = vrot.slane %v1103_v33, %v1139_v42 }
  0x44   : > { %3140 = vmatprep.mubr.msk.f32.mxu0 %vm776_vm0, %v760_v24  ;;  %v4510_v24 = vunpack.c.l.bf16 %v3768_v0  ;;  %v1250_v31 = vrot.slane %v1103_v33, %v1161_v13  ;;  %v1272_v42 = vrot.slane %v1103_v33, %v1183_v7 }
  0x45   : > { %1201 = vbcast.lane.b32.xlu1 %v1195_v4, 264  ;;  %1197 = vbcast.lane.b32.xlu0 %v1195_v4, 256  ;;  %v1261_v4 = vrot.slane %v1103_v33, %v1172_v41 }
  0x46   : > { %v766_v15 = vmul.f32 %v4510_v24, %v715_v34 }
  0x47   : > { %3141 = vmatmul.mubr.msk.f32.gmra.mrb[20].mxu0 %vm776_vm0, %v761_v44  ;;  %v765_v44 = vmul.f32 %v4512_v17, %v711_v55 }
  0x48   : > { %3143 = vmatprep.mubr.msk.f32.mxu0 %vm776_vm0, %v762_v51  ;;  %v4509_v51 = vunpack.c.h.bf16 %v3768_v0 }
  0x49   : > { %1212 = vbcast.lane.b32.xlu1 %v1206_v25, 264  ;;  %1208 = vbcast.lane.b32.xlu0 %v1206_v25, 256 }
  0x4a   : > { %v767_v55 = vmul.f32 %v4509_v51, %v715_v34 }
  0x4b   : > { %3144 = vmatmul.mubr.msk.f32.gmra.mrb[22].mxu0 %vm776_vm0, %v763_v12  ;;  %v4507_v12 = vunpack.c.h.bf16 %v3784_v43 }
  0x4c   : > { %3146 = vmatprep.mubr.msk.f32.mxu0 %vm776_vm0, %v764_v11  ;;  %v768_v11 = vmul.f32 %v4508_v32, %v719_v5 }
  0x4d   : > { %v769_v34 = vmul.f32 %v4507_v12, %v719_v5  ;;  %1223 = vbcast.lane.b32.xlu1 %v1217_v16, 264  ;;  %1219 = vbcast.lane.b32.xlu0 %v1217_v16, 256  ;;  %v1239_v5 = vrot.slane %v1103_v33, %v1150_v57 }
  0x4f   : > { %3147 = vmatmul.mubr.msk.f32.gmra.mrb[24].mxu0 %vm776_vm0, %v765_v44  ;;  %v4505_v44 = vunpack.c.h.bf16 %v3797_v2 }
  0x50   : > { %3149 = vmatprep.mubr.msk.f32.mxu0 %vm776_vm0, %v766_v15  ;;  %v770_v15 = vmul.f32 %v4506_v58, %v723_v37 }
  0x51   : > { %v771_v8 = vmul.f32 %v4505_v44, %v723_v37  ;;  %1234 = vbcast.lane.b32.xlu1 %v1228_v10, 264  ;;  %1230 = vbcast.lane.b32.xlu0 %v1228_v10, 256 }
  0x53   : > { %3150 = vmatmul.mubr.msk.f32.gmra.mrb[26].mxu0 %vm776_vm0, %v767_v55  ;;  %v1745_v55 = vld [vmem:[%s4492_s4] sm:$0xf] }
  0x54   : > { %3152 = vmatprep.mubr.msk.f32.mxu0 %vm776_vm0, %v768_v11  ;;  %3158 = vmatprep.subr.msk.mxu1 %vm1842_vm1, %v1745_v55 }
  0x55   : > { %1245 = vbcast.lane.b32.xlu1 %v1239_v5, 264  ;;  %1241 = vbcast.lane.b32.xlu0 %v1239_v5, 256 }
  0x56   : > { %3159 = vmatpush3.msk.msra.mxu1 %vm1842_vm1, %v1745_v55 }
  0x57   : > { %3153 = vmatmul.mubr.msk.f32.gmra.mrb[28].mxu0 %vm776_vm0, %v769_v34 }
  0x58   : > { %3155 = vmatprep.mubr.msk.f32.mxu0 %vm776_vm0, %v770_v15 }
  0x59   : > { %1256 = vbcast.lane.b32.xlu1 %v1250_v31, 264  ;;  %1252 = vbcast.lane.b32.xlu0 %v1250_v31, 256 }
  0x5b   : > { %3156 = vmatmul.mubr.msk.f32.gmra.mrb[30].mxu0 %vm776_vm0, %v771_v8 }
  0x5d   : > { %1267 = vbcast.lane.b32.xlu1 %v1261_v4, 264  ;;  %1263 = vbcast.lane.b32.xlu0 %v1261_v4, 256 }
  0x61   : > { %1278 = vbcast.lane.b32.xlu1 %v1272_v42, 264  ;;  %1274 = vbcast.lane.b32.xlu0 %v1272_v42, 256 }
  0x94   : > { %v1121_v57 = vpop.permute.xlu1 %1120  ;;  %v1110_v11 = vpop.permute.xlu0 %1109 }
  0x98   : > { %v1125_v13 = vpop.permute.xlu1 %1124  ;;  %v1114_v37 = vpop.permute.xlu0 %1113 }
  0x9c   : > { %v1136_v25 = vpop.permute.xlu1 %1135  ;;  %v1132_v34 = vpop.permute.xlu0 %1131 }
  0xa0   : > { %v1147_v16 = vpop.permute.xlu1 %1146  ;;  %v1143_v5 = vpop.permute.xlu0 %1142 }
  0xa7   : > { %v1158_v51 = vpop.permute.xlu1 %1157 }
  0xab   : > { %v1169_v54 = vpop.permute.xlu1 %1168 }
  0xf2   : > { %v3112_v9 = vpop.f32.mrb[0].mxu0 }
  0xf3   : > { %v1281_v41 = vadd.f32 %v3112_v9, %v1114_v37  ;;  %v939_v15 = vpop.f32.mrb[1].mxu0 }
  0xf4   : > { %v1280_v33 = vadd.f32 %v1110_v11, %v939_v15 }
  0xf5   : > { %v1314_v7 = vsel %vm1312_vm2, %v1281_v41, -inf }
  0xf6   : > { %v1313_v8 = vsel %vm1312_vm2, %v1280_v33, -inf  ;;  %v3115_v10 = vpop.f32.mrb[2].mxu0 }
  0xf7   : > { %v1315_v31 = vmax.f32 %v1313_v8, %v1314_v7  ;;  %v3838_v4 = vadd.f32 %v3115_v10, %v1125_v13  ;;  %v949_v42 = vpop.f32.mrb[3].mxu0  ;;  %v1154_v13 = vpop.permute.xlu0 %1153 }
  0xf8   : > { %v3840_v55 = vadd.f32 %v1121_v57, %v949_v42 }
  0xf9   : > { %v1316_v44 = vrot.slane %v1315_v31, 4  ;;  %v1323_v58 = vsel %vm1312_vm2, %v3838_v4, -inf }
  0xfa   : > { %v1322_v11 = vsel %vm1312_vm2, %v3840_v55, -inf  ;;  %v3118_v37 = vpop.f32.mrb[4].mxu0 }
  0xfb   : > { %v1317_v9 = vmax.f32 %v1315_v31, %v1316_v44  ;;  %v1324_v15 = vmax.f32 %v1322_v11, %v1323_v58  ;;  %v3846_v12 = vadd.f32 %v3118_v37, %v1136_v25  ;;  %v959_v32 = vpop.f32.mrb[5].mxu0  ;;  %v1165_v48 = vpop.permute.xlu0 %1164 }
  0xfc   : > { %v3848_v7 = vadd.f32 %v1132_v34, %v959_v32 }
  0xfd   : > { %v1318_v8 = vrot.slane %v1317_v9, 2  ;;  %v1325_v57 = vrot.slane %v1324_v15, 4  ;;  %v1332_v10 = vsel %vm1312_vm2, %v3846_v12, -inf }
  0xfe   : > { %v1331_v42 = vsel %vm1312_vm2, %v3848_v7, -inf  ;;  %v3121_v24 = vpop.f32.mrb[6].mxu0 }
  0xff   : > { %v1319_v1 = vmax.f32 %v1317_v9, %v1318_v8  ;;  %v1326_v17 = vmax.f32 %v1324_v15, %v1325_v57  ;;  %v1333_v44 = vmax.f32 %v1331_v42, %v1332_v10  ;;  %v3854_v58 = vadd.f32 %v3121_v24, %v1147_v16  ;;  %v969_v25 = vpop.f32.mrb[7].mxu0 }
 0x100   : > { %v3856_v31 = vadd.f32 %v1143_v5, %v969_v25 }
 0x101   : > { %v1320_v32 = vrot.slane %v1319_v1, 1  ;;  %v1327_v34 = vrot.slane %v1326_v17, 2  ;;  %v1334_v11 = vrot.slane %v1333_v44, 4  ;;  %v1341_v37 = vsel %vm1312_vm2, %v3854_v58, -inf }
 0x102   : > { %v1340_v63 = vsel %vm1312_vm2, %v3856_v31, -inf  ;;  %v3124_v60 = vpop.f32.mrb[8].mxu0 }
 0x103   : > { %v1321_v9 = vmax.f32 %v1319_v1, %v1320_v32  ;;  %v1328_v15 = vmax.f32 %v1326_v17, %v1327_v34  ;;  %v1335_v8 = vmax.f32 %v1333_v44, %v1334_v11  ;;  %v1342_v24 = vmax.f32 %v1340_v63, %v1341_v37  ;;  %v979_v16 = vpop.f32.mrb[9].mxu0  ;;  %v1176_v11 = vpop.permute.xlu0 %1175 }
 0x104   : > { %v3862_v57 = vadd.f32 %v3124_v60, %v1158_v51  ;;  %v3864_v5 = vadd.f32 %v1154_v13, %v979_v16  ;;  %v1180_v51 = vpop.permute.xlu1 %1179 }
 0x105   : > { %v1457_v10 = vsub.f32 %v1280_v33, %v1321_v9  ;;  %v1458_v42 = vsub.f32 %v1281_v41, %v1321_v9  ;;  %v1329_v25 = vrot.slane %v1328_v15, 1  ;;  %v1336_v22 = vrot.slane %v1335_v8, 2 }
 0x106   : > { %v1343_v56 = vrot.slane %v1342_v24, 4  ;;  %v1350_v49 = vsel %vm1312_vm2, %v3862_v57, -inf  ;;  %v1349_v21 = vsel %vm1312_vm2, %v3864_v5, -inf  ;;  %v3127_v1 = vpop.f32.mrb[10].mxu0 }
 0x107   : > { %v1489_v17 = vmul.f32 1.442695, %v1457_v10  ;;  %v1491_v44 = vmul.f32 1.442695, %v1458_v42  ;;  %v1330_v63 = vmax.f32 %v1328_v15, %v1329_v25  ;;  %v1337_v32 = vmax.f32 %v1335_v8, %v1336_v22  ;;  %v989_v60 = vpop.f32.mrb[11].mxu0 }
 0x108   : > { %v1344_v13 = vmax.f32 %v1342_v24, %v1343_v56  ;;  %v1351_v34 = vmax.f32 %v1349_v21, %v1350_v49  ;;  %v3870_v33 = vadd.f32 %v3127_v1, %v1169_v54  ;;  %v3872_v41 = vadd.f32 %v1165_v48, %v989_v60 }
 0x109   : > { %3354 = vpow2.f32 %v1489_v17  ;;  %v1459_v37 = vsub.f32 %v3840_v55, %v1330_v63  ;;  %v1460_v9 = vsub.f32 %v3838_v4, %v1330_v63  ;;  %v1338_v16 = vrot.slane %v1337_v32, 1 }
 0x10a   : > { %3356 = vpow2.f32 %v1491_v44  ;;  %v1345_v10 = vrot.slane %v1344_v13, 2  ;;  %v1352_v42 = vrot.slane %v1351_v34, 4  ;;  %v1359_v22 = vsel %vm1312_vm2, %v3870_v33, -inf  ;;  %v3130_v15 = vpop.f32.mrb[12].mxu0  ;;  %v1191_v44 = vpop.permute.xlu1 %1190 }
 0x10b   : > { %v1493_v56 = vmul.f32 1.442695, %v1459_v37  ;;  %v1495_v49 = vmul.f32 1.442695, %v1460_v9  ;;  %v1339_v21 = vmax.f32 %v1337_v32, %v1338_v16  ;;  %v1358_v48 = vsel %vm1312_vm2, %v3872_v41, -inf  ;;  %v999_v54 = vpop.f32.mrb[13].mxu0  ;;  %v1187_v9 = vpop.permute.xlu0 %1186 }
 0x10c   : > { %v1346_v8 = vmax.f32 %v1344_v13, %v1345_v10  ;;  %v1353_v24 = vmax.f32 %v1351_v34, %v1352_v42  ;;  %v1360_v55 = vmax.f32 %v1358_v48, %v1359_v22  ;;  %v3880_v25 = vadd.f32 %v3130_v15, %v1180_v51 }
 0x10d   : > { %3358 = vpow2.f32 %v1493_v56  ;;  %v1461_v4 = vsub.f32 %v3848_v7, %v1339_v21  ;;  %v1462_v1 = vsub.f32 %v3846_v12, %v1339_v21  ;;  %v3884_v17 = vadd.f32 %v1176_v11, %v999_v54 }
 0x10e   : > { %3360 = vpow2.f32 %v1495_v49  ;;  %v1347_v63 = vrot.slane %v1346_v8, 1  ;;  %v1354_v32 = vrot.slane %v1353_v24, 2  ;;  %v1361_v60 = vrot.slane %v1360_v55, 4  ;;  %v3133_v37 = vpop.f32.mrb[14].mxu0 }
 0x10f   : > { %v1497_v16 = vmul.f32 1.442695, %v1461_v4  ;;  %v1499_v13 = vmul.f32 1.442695, %v1462_v1  ;;  %v1368_v51 = vsel %vm1312_vm2, %v3880_v25, -inf  ;;  %v1367_v34 = vsel %vm1312_vm2, %v3884_v17, -inf  ;;  %v1202_v1 = vpop.permute.xlu1 %1201 }
 0x110   : > { %v1348_v7 = vmax.f32 %v1346_v8, %v1347_v63  ;;  %v1355_v10 = vmax.f32 %v1353_v24, %v1354_v32  ;;  %v1362_v12 = vmax.f32 %v1360_v55, %v1361_v60  ;;  %v1369_v11 = vmax.f32 %v1367_v34, %v1368_v51  ;;  %v1009_v42 = vpop.f32.mrb[15].mxu0 }
 0x111   : > { %3362 = vpow2.f32 %v1497_v16  ;;  %v3890_v22 = vadd.f32 %v3133_v37, %v1191_v44  ;;  %v3892_v15 = vadd.f32 %v1187_v9, %v1009_v42  ;;  %v1198_v42 = vpop.permute.xlu0 %1197 }
 0x112   : > { %3364 = vpow2.f32 %v1499_v13  ;;  %v1463_v56 = vsub.f32 %v3856_v31, %v1348_v7  ;;  %v1464_v49 = vsub.f32 %v3854_v58, %v1348_v7  ;;  %v1356_v21 = vrot.slane %v1355_v10, 1  ;;  %v3136_v48 = vpop.f32.mrb[16].mxu0 }
 0x113   : > { %v3896_v54 = vpop.eup %3354  ;;  %v1363_v4 = vrot.slane %v1362_v12, 2  ;;  %v1370_v8 = vrot.slane %v1369_v11, 4  ;;  %v1377_v24 = vsel %vm1312_vm2, %v3890_v22, -inf  ;;  %v1376_v55 = vsel %vm1312_vm2, %v3892_v15, -inf  ;;  %v1019_v44 = vpop.f32.mrb[17].mxu0 }
 0x114   : > { %v3902_v63 = vpop.eup %3356  ;;  %v1553_v31 = vsel %vm1312_vm2, %v3896_v54, 0.0  ;;  %v1501_v58 = vmul.f32 1.442695, %v1463_v56  ;;  %v1503_v32 = vmul.f32 1.442695, %v1464_v49  ;;  %v1357_v60 = vmax.f32 %v1355_v10, %v1356_v21 }
 0x115   : > { %v1554_v37 = vsel %vm1312_vm2, %v3902_v63, 0.0  ;;  %v1364_v9 = vmax.f32 %v1362_v12, %v1363_v4  ;;  %v1371_v16 = vmax.f32 %v1369_v11, %v1370_v8  ;;  %v1378_v13 = vmax.f32 %v1376_v55, %v1377_v24 }
 0x116   : > { %v3908_v51 = vadd.f32 %v1554_v37, %v1553_v31  ;;  %3366 = vpow2.f32 %v1501_v58  ;;  %v1465_v34 = vsub.f32 %v3864_v5, %v1357_v60  ;;  %v1466_v7 = vsub.f32 %v3862_v57, %v1357_v60  ;;  %v3912_v61 = vpop.f32.mrb[18].mxu0  ;;  %v1213_v58 = vpop.permute.xlu1 %1212 }
 0x117   : > { %v3914_v59 = vpop.eup %3358  ;;  %3368 = vpow2.f32 %v1503_v32  ;;  %v1365_v10 = vrot.slane %v1364_v9, 1  ;;  %v1372_v56 = vrot.slane %v1371_v16, 2  ;;  %v1379_v49 = vrot.slane %v1378_v13, 4  ;;  %v3916_v21 = vpop.f32.mrb[19].mxu0 }
 0x118   : > { %v3918_v12 = vpop.eup %3360  ;;  %v1562_v5 = vsel %vm1312_vm2, %v3914_v59, 0.0  ;;  %v1505_v4 = vmul.f32 1.442695, %v1465_v34  ;;  %v1507_v57 = vmul.f32 1.442695, %v1466_v7  ;;  %v3925_v60 = vadd.f32 %v3136_v48, %v1202_v1 }
 0x119   : > { %v1563_v8 = vsel %vm1312_vm2, %v3918_v12, 0.0  ;;  %v1366_v24 = vmax.f32 %v1364_v9, %v1365_v10  ;;  %v1373_v55 = vmax.f32 %v1371_v16, %v1372_v56  ;;  %v1380_v31 = vmax.f32 %v1378_v13, %v1379_v49 }
 0x11a   : > { %v1564_v32 = vadd.f32 %v1563_v8, %v1562_v5  ;;  %3370 = vpow2.f32 %v1505_v4  ;;  %v3927_v37 = vadd.f32 %v1198_v42, %v1019_v44  ;;  %v3929_v50 = vpop.f32.mrb[20].mxu0  ;;  %v1386_v44 = vsel %vm1312_vm2, %v3925_v60, -inf  ;;  %v1209_v42 = vpop.permute.xlu0 %1208 }
 0x11b   : > { %v3931_v47 = vpop.eup %3362  ;;  %3372 = vpow2.f32 %v1507_v57  ;;  %v1467_v34 = vsub.f32 %v3872_v41, %v1366_v24  ;;  %v1468_v7 = vsub.f32 %v3870_v33, %v1366_v24  ;;  %v1374_v40 = vrot.slane %v1373_v55, 1  ;;  %v3935_v9 = vpop.f32.mrb[21].mxu0 }
 0x11c   : > { %v3937_v16 = vpop.eup %3364  ;;  %v1565_v13 = vrot.slane %v1564_v32, 4  ;;  %v1571_v48 = vsel %vm1312_vm2, %v3931_v47, 0.0  ;;  %v1381_v1 = vrot.slane %v1380_v31, 2  ;;  %v1385_v57 = vsel %vm1312_vm2, %v3927_v37, -inf  ;;  %v1224_v46 = vpop.permute.xlu1 %1223 }
 0x11d   : > { %v1572_v10 = vsel %vm1312_vm2, %v3937_v16, 0.0  ;;  %v1509_v41 = vmul.f32 1.442695, %v1467_v34  ;;  %v1511_v56 = vmul.f32 1.442695, %v1468_v7  ;;  %v1375_v33 = vmax.f32 %v1373_v55, %v1374_v40 }
 0x11e   : > { %v1566_v49 = vadd.f32 %v1565_v13, %v1564_v32  ;;  %v1573_v5 = vadd.f32 %v1572_v10, %v1571_v48  ;;  %v1382_v4 = vmax.f32 %v1380_v31, %v1381_v1  ;;  %v3145_v8 = vpop.f32.mrb[22].mxu0  ;;  %v1387_v30 = vmax.f32 %v1385_v57, %v1386_v44  ;;  %v1220_v10 = vpop.permute.xlu0 %1219 }
 0x11f   : > { %3374 = vpow2.f32 %v1509_v41  ;;  %v1469_v24 = vsub.f32 %v3884_v17, %v1375_v33  ;;  %v1470_v39 = vsub.f32 %v3880_v25, %v1375_v33  ;;  %v3949_v35 = vpop.f32.mrb[23].mxu0  ;;  %v3964_v57 = vadd.f32 %v3912_v61, %v1213_v58 }
 0x120   : > { %v3951_v29 = vpop.eup %3366  ;;  %v1567_v34 = vrot.slane %v1566_v49, 2  ;;  %v1574_v40 = vrot.slane %v1573_v5, 4  ;;  %3376 = vpow2.f32 %v1511_v56  ;;  %v1383_v55 = vrot.slane %v1382_v4, 1  ;;  %v1235_v58 = vpop.permute.xlu1 %1234 }
 0x121   : > { %v3953_v31 = vpop.eup %3368  ;;  %v1580_v32 = vsel %vm1312_vm2, %v3951_v29, 0.0  ;;  %v1513_v7 = vmul.f32 1.442695, %v1469_v24  ;;  %v1515_v13 = vmul.f32 1.442695, %v1470_v39  ;;  %v1388_v17 = vrot.slane %v1387_v30, 4 }
 0x122   : > { %v3957_v48 = vadd.f32 %v1567_v34, %v1566_v49  ;;  %v1575_v25 = vadd.f32 %v1574_v40, %v1573_v5  ;;  %v1581_v1 = vsel %vm1312_vm2, %v3953_v31, 0.0  ;;  %v1384_v44 = vmax.f32 %v1382_v4, %v1383_v55  ;;  %v3961_v41 = vpop.f32.mrb[24].mxu0 }
 0x123   : > { %v1582_v56 = vadd.f32 %v1581_v1, %v1580_v32  ;;  %3378 = vpow2.f32 %v1513_v7  ;;  %v1389_v33 = vmax.f32 %v1387_v30, %v1388_v17  ;;  %v3966_v26 = vpop.f32.mrb[25].mxu0  ;;  %v1395_v61 = vsel %vm1312_vm2, %v3964_v57, -inf }
 0x124   : > { %v3968_v39 = vpop.eup %3370  ;;  %v1576_v49 = vrot.slane %v1575_v25, 2  ;;  %3380 = vpow2.f32 %v1515_v13  ;;  %v1471_v5 = vsub.f32 %v3892_v15, %v1384_v44  ;;  %v1472_v24 = vsub.f32 %v3890_v22, %v1384_v44 }
 0x125   : > { %v3972_v4 = vpop.eup %3372  ;;  %v1583_v34 = vrot.slane %v1582_v56, 4  ;;  %v1589_v40 = vsel %vm1312_vm2, %v3968_v39, 0.0  ;;  %v1390_v30 = vrot.slane %v1389_v33, 2  ;;  %v3985_v44 = vadd.f32 %v1209_v42, %v3916_v21 }
 0x126   : > { %v3978_v55 = vadd.f32 %v1576_v49, %v1575_v25  ;;  %v1590_v32 = vsel %vm1312_vm2, %v3972_v4, 0.0  ;;  %v1517_v7 = vmul.f32 1.442695, %v1471_v5  ;;  %v1519_v15 = vmul.f32 1.442695, %v1472_v24  ;;  %v3982_v13 = vpop.f32.mrb[26].mxu0  ;;  %v1231_v5 = vpop.permute.xlu0 %1230 }
 0x127   : > { %v1584_v22 = vadd.f32 %v1583_v34, %v1582_v56  ;;  %v1591_v17 = vadd.f32 %v1590_v32, %v1589_v40  ;;  %v1391_v1 = vmax.f32 %v1389_v33, %v1390_v30  ;;  %v3987_v20 = vpop.f32.mrb[27].mxu0  ;;  %v3990_v19 = vadd.f32 %v3929_v50, %v1224_v46 }
 0x128   : > { %3382 = vpow2.f32 %v1517_v7  ;;  %v3993_v25 = vadd.f32 %v1220_v10, %v3935_v9  ;;  %v3995_v49 = vadd.f32 %v3145_v8, %v1235_v58  ;;  %v1394_v46 = vsel %vm1312_vm2, %v3985_v44, -inf }
 0x129   : > { %v3997_v24 = vpop.eup %3374  ;;  %v1585_v56 = vrot.slane %v1584_v22, 2  ;;  %v1592_v34 = vrot.slane %v1591_v17, 4  ;;  %3384 = vpow2.f32 %v1519_v15  ;;  %v1392_v33 = vrot.slane %v1391_v1, 1 }
 0x12a   : > { %v3999_v21 = vpop.eup %3376  ;;  %v1598_v42 = vsel %vm1312_vm2, %v3997_v24, 0.0  ;;  %v1404_v50 = vsel %vm1312_vm2, %v3990_v19, -inf  ;;  %v1403_v9 = vsel %vm1312_vm2, %v3993_v25, -inf  ;;  %v4009_v8 = vpop.f32.mrb[28].mxu0  ;;  %v1396_v15 = vmax.f32 %v1394_v46, %v1395_v61 }
 0x12b   : > { %v4011_v10 = vadd.f32 %v1585_v56, %v1584_v22  ;;  %v1593_v40 = vadd.f32 %v1592_v34, %v1591_v17  ;;  %v1599_v30 = vsel %vm1312_vm2, %v3999_v21, 0.0  ;;  %v1393_v58 = vmax.f32 %v1391_v1, %v1392_v33  ;;  %v4015_v32 = vpop.f32.mrb[29].mxu0  ;;  %v1246_v56 = vpop.permute.xlu1 %1245 }
 0x12c   : > { %v1600_v7 = vadd.f32 %v1599_v30, %v1598_v42  ;;  %v1405_v11 = vmax.f32 %v1403_v9, %v1404_v50  ;;  %v1413_v2 = vsel %vm1312_vm2, %v3995_v49, -inf  ;;  %v4024_v17 = vadd.f32 %v1231_v5, %v3949_v35  ;;  %v1242_v46 = vpop.permute.xlu0 %1241 }
 0x12d   : > { %v4019_v43 = vpop.eup %3378  ;;  %v1594_v6 = vrot.slane %v1593_v40, 2  ;;  %v1473_v0 = vsub.f32 %v3927_v37, %v1393_v58  ;;  %v1474_v22 = vsub.f32 %v3925_v60, %v1393_v58  ;;  %v1397_v33 = vrot.slane %v1396_v15, 4 }
 0x12e   : > { %v4026_v1 = vpop.eup %3380  ;;  %v1601_v34 = vrot.slane %v1600_v7, 4  ;;  %v1607_v61 = vsel %vm1312_vm2, %v4019_v43, 0.0  ;;  %v1406_v42 = vrot.slane %v1405_v11, 4  ;;  %v4030_v50 = vpop.f32.mrb[30].mxu0  ;;  %v1412_v53 = vsel %vm1312_vm2, %v4024_v17, -inf }
 0x12f   : > { %v4032_v9 = vadd.f32 %v1594_v6, %v1593_v40  ;;  %v1608_v60 = vsel %vm1312_vm2, %v4026_v1, 0.0  ;;  %v1521_v37 = vmul.f32 1.442695, %v1473_v0  ;;  %v1523_v35 = vmul.f32 1.442695, %v1474_v22  ;;  %v4036_v5 = vpop.f32.mrb[31].mxu0 }
 0x130   : > { %v1602_v30 = vadd.f32 %v1601_v34, %v1600_v7  ;;  %v1609_v58 = vadd.f32 %v1608_v60, %v1607_v61  ;;  %v1398_v62 = vmax.f32 %v1396_v15, %v1397_v33  ;;  %v1407_v36 = vmax.f32 %v1405_v11, %v1406_v42 }
 0x131   : > { %3386 = vpow2.f32 %v1521_v37  ;;  %v4041_v3 = vadd.f32 %v3961_v41, %v1246_v56  ;;  %v4044_v6 = vadd.f32 %v1242_v46, %v3966_v26  ;;  %v1414_v34 = vmax.f32 %v1412_v53, %v1413_v2  ;;  %v1257_v56 = vpop.permute.xlu1 %1256  ;;  %v1253_v46 = vpop.permute.xlu0 %1252 }
 0x132   : > { %v4046_v40 = vpop.eup %3382  ;;  %v1603_v0 = vrot.slane %v1602_v30, 2  ;;  %v1610_v22 = vrot.slane %v1609_v58, 4  ;;  %3388 = vpow2.f32 %v1523_v35  ;;  %v1399_v45 = vrot.slane %v1398_v62, 2 }
 0x133   : > { %v4048_v7 = vpop.eup %3384  ;;  %v1616_v11 = vsel %vm1312_vm2, %v4046_v40, 0.0  ;;  %v1408_v15 = vrot.slane %v1407_v36, 2  ;;  %v1422_v41 = vsel %vm1312_vm2, %v4041_v3, -inf  ;;  %v1415_v35 = vrot.slane %v1414_v34, 4 }
 0x134   : > { %4571 = vst [vmem:[#allocation14_spill] sm:$0xff] %v4048_v7  ;;  %v4054_v61 = vadd.f32 %v1603_v0, %v1602_v30  ;;  %v1611_v26 = vadd.f32 %v1610_v22, %v1609_v58  ;;  %v1617_v33 = vsel %vm1312_vm2, %v4048_v7, 0.0  ;;  %v1400_v42 = vmax.f32 %v1398_v62, %v1399_v45 }
 0x135   : > { %v1618_v60 = vadd.f32 %v1617_v33, %v1616_v11  ;;  %v1409_v37 = vmax.f32 %v1407_v36, %v1408_v15  ;;  %v1421_v52 = vsel %vm1312_vm2, %v4044_v6, -inf  ;;  %v4061_v28 = vadd.f32 %v3982_v13, %v1257_v56  ;;  %v1268_v56 = vpop.permute.xlu1 %1267 }
 0x136   : > { %v1612_v38 = vrot.slane %v1611_v26, 2  ;;  %v1401_v53 = vrot.slane %v1400_v42, 1  ;;  %v1423_v2 = vmax.f32 %v1421_v52, %v1422_v41  ;;  %v1416_v58 = vmax.f32 %v1414_v34, %v1415_v35 }
 0x137   : > { %v1619_v30 = vrot.slane %v1618_v60, 4  ;;  %v1410_v0 = vrot.slane %v1409_v37, 1  ;;  %v4064_v22 = vadd.f32 %v1253_v46, %v3987_v20  ;;  %v1431_v11 = vsel %vm1312_vm2, %v4061_v28, -inf }
 0x138   : > { %v4066_v45 = vadd.f32 %v1612_v38, %v1611_v26  ;;  %v1402_v62 = vmax.f32 %v1400_v42, %v1401_v53  ;;  %v1424_v36 = vrot.slane %v1423_v2, 4  ;;  %v1417_v7 = vrot.slane %v1416_v58, 2  ;;  %v1264_v38 = vpop.permute.xlu0 %1263 }
 0x139   : > { %v1620_v15 = vadd.f32 %v1619_v30, %v1618_v60  ;;  %v1411_v33 = vmax.f32 %v1409_v37, %v1410_v0  ;;  %v1430_v52 = vsel %vm1312_vm2, %v4064_v22, -inf }
 0x13a   : > { %v1475_v13 = vsub.f32 %v3985_v44, %v1402_v62  ;;  %v1476_v34 = vsub.f32 %v3964_v57, %v1402_v62  ;;  %v1425_v41 = vmax.f32 %v1423_v2, %v1424_v36  ;;  %v1432_v20 = vmax.f32 %v1430_v52, %v1431_v11 }
 0x13b   : > { %v4074_v26 = vpop.eup %3386  ;;  %v1621_v42 = vrot.slane %v1620_v15, 2  ;;  %v1477_v46 = vsub.f32 %v3993_v25, %v1411_v33  ;;  %v1478_v60 = vsub.f32 %v3990_v19, %v1411_v33  ;;  %v1418_v37 = vmax.f32 %v1416_v58, %v1417_v7 }
 0x13c   : > { %v4078_v35 = vpop.eup %3388  ;;  %v1625_v53 = vsel %vm1312_vm2, %v4074_v26, 0.0  ;;  %v1525_v44 = vmul.f32 1.442695, %v1475_v13  ;;  %v1527_v30 = vmul.f32 1.442695, %v1476_v34  ;;  %v1426_v57 = vrot.slane %v1425_v41, 2  ;;  %v1279_v34 = vpop.permute.xlu1 %1278 }
 0x13d   : > { %v4082_v2 = vadd.f32 %v1621_v42, %v1620_v15  ;;  %v1626_v0 = vsel %vm1312_vm2, %v4078_v35, 0.0  ;;  %v1529_v62 = vmul.f32 1.442695, %v1477_v46  ;;  %v1531_v36 = vmul.f32 1.442695, %v1478_v60  ;;  %v1275_v42 = vpop.permute.xlu0 %1274 }
 0x13e   : > { %v1627_v11 = vadd.f32 %v1626_v0, %v1625_v53  ;;  %3390 = vpow2.f32 %v1525_v44  ;;  %v1419_v25 = vrot.slane %v1418_v37, 1  ;;  %v1427_v19 = vmax.f32 %v1425_v41, %v1426_v57 }
 0x13f   : > { %3392 = vpow2.f32 %v1527_v30  ;;  %v1433_v7 = vrot.slane %v1432_v20, 4  ;;  %v4087_v58 = vadd.f32 %v4009_v8, %v1268_v56  ;;  %v4090_v33 = vadd.f32 %v1264_v38, %v4015_v32 }
 0x140   : > { %v1628_v52 = vrot.slane %v1627_v11, 4  ;;  %3394 = vpow2.f32 %v1529_v62  ;;  %v1420_v15 = vmax.f32 %v1418_v37, %v1419_v25  ;;  %v1428_v13 = vrot.slane %v1427_v19, 1 }
 0x141   : > { %3396 = vpow2.f32 %v1531_v36  ;;  %v1434_v46 = vmax.f32 %v1432_v20, %v1433_v7  ;;  %v1440_v60 = vsel %vm1312_vm2, %v4087_v58, -inf  ;;  %v1439_v41 = vsel %vm1312_vm2, %v4090_v33, -inf }
 0x142   : > { %v1629_v53 = vadd.f32 %v1628_v52, %v1627_v11  ;;  %v1479_v8 = vsub.f32 %v4024_v17, %v1420_v15  ;;  %v1480_v32 = vsub.f32 %v3995_v49, %v1420_v15  ;;  %v1429_v56 = vmax.f32 %v1427_v19, %v1428_v13 }
 0x143   : > { %v1435_v38 = vrot.slane %v1434_v46, 2  ;;  %v1441_v44 = vmax.f32 %v1439_v41, %v1440_v60  ;;  %v4099_v37 = vadd.f32 %v4030_v50, %v1279_v34  ;;  %v4102_v30 = vadd.f32 %v1275_v42, %v4036_v5 }
 0x144   : > { %v1630_v20 = vrot.slane %v1629_v53, 2  ;;  %v1533_v57 = vmul.f32 1.442695, %v1479_v8  ;;  %v1535_v0 = vmul.f32 1.442695, %v1480_v32  ;;  %v1481_v62 = vsub.f32 %v4044_v6, %v1429_v56 }
 0x145   : > { %v1482_v36 = vsub.f32 %v4041_v3, %v1429_v56  ;;  %v1436_v11 = vmax.f32 %v1434_v46, %v1435_v38  ;;  %v1442_v17 = vrot.slane %v1441_v44, 4  ;;  %v1449_v49 = vsel %vm1312_vm2, %v4099_v37, -inf }
 0x146   : > { %v4108_v25 = vadd.f32 %v1630_v20, %v1629_v53  ;;  %3398 = vpow2.f32 %v1533_v57  ;;  %v1537_v50 = vmul.f32 1.442695, %v1481_v62  ;;  %v1448_v5 = vsel %vm1312_vm2, %v4102_v30, -inf }
 0x147   : > { %3400 = vpow2.f32 %v1535_v0  ;;  %v1539_v19 = vmul.f32 1.442695, %v1482_v36  ;;  %v1437_v7 = vrot.slane %v1436_v11, 1  ;;  %v1443_v52 = vmax.f32 %v1441_v44, %v1442_v17 }
 0x148   : > { %v4112_v15 = vpop.eup %3390  ;;  %3402 = vpow2.f32 %v1537_v50  ;;  %v1450_v3 = vmax.f32 %v1448_v5, %v1449_v49  ;;  %v4572_v6 = vrot.slane %v3908_v51, 4  ;;  %v1569_v34 = vrot.slane %v3957_v48, 1 }
 0x149   : > { %v4118_v42 = vpop.eup %3392  ;;  %v1634_v46 = vsel %vm1312_vm2, %v4112_v15, 0.0  ;;  %3404 = vpow2.f32 %v1539_v19  ;;  %v1438_v60 = vmax.f32 %v1436_v11, %v1437_v7  ;;  %v1444_v41 = vrot.slane %v1443_v52, 2 }
 0x14a   : > { %v1557_v13 = vadd.f32 %v4572_v6, %v3908_v51  ;;  %v4122_v53 = vpop.eup %3394  ;;  %v1635_v8 = vsel %vm1312_vm2, %v4118_v42, 0.0  ;;  %v1451_v32 = vrot.slane %v1450_v3, 4  ;;  %v1570_v38 = vadd.f32 %v1569_v34, %v3957_v48 }
 0x14b   : > { %v4127_v51 = vpop.eup %3396  ;;  %v1636_v44 = vadd.f32 %v1635_v8, %v1634_v46  ;;  %v1643_v20 = vsel %vm1312_vm2, %v4122_v53, 0.0  ;;  %v1483_v57 = vsub.f32 %v4064_v22, %v1438_v60  ;;  %v1484_v0 = vsub.f32 %v4061_v28, %v1438_v60 }
 0x14c   : > { %v1558_v56 = vrot.slane %v1557_v13, 2  ;;  %v1644_v62 = vsel %vm1312_vm2, %v4127_v51, 0.0  ;;  %v1445_v36 = vmax.f32 %v1443_v52, %v1444_v41  ;;  %v1452_v11 = vmax.f32 %v1450_v3, %v1451_v32 }
 0x14d   : > { %v1637_v49 = vrot.slane %v1636_v44, 4  ;;  %v1645_v50 = vadd.f32 %v1644_v62, %v1643_v20  ;;  %v1541_v5 = vmul.f32 1.442695, %v1483_v57  ;;  %v1543_v48 = vmul.f32 1.442695, %v1484_v0 }
 0x14e   : > { %v1559_v17 = vadd.f32 %v1558_v56, %v1557_v13  ;;  %v1446_v19 = vrot.slane %v1445_v36, 1  ;;  %v1453_v7 = vrot.slane %v1452_v11, 2  ;;  %3406 = vrcp.f32 %v1570_v38 }
 0x14f   : > { %v1638_v34 = vadd.f32 %v1637_v49, %v1636_v44  ;;  %v1646_v46 = vrot.slane %v1645_v50, 4  ;;  %3408 = vpow2.f32 %v1541_v5  ;;  %v1578_v22 = vrot.slane %v3978_v55, 1 }
 0x150   : > { %v1560_v6 = vrot.slane %v1559_v17, 1  ;;  %v4136_v28 = vpop.eup %3398  ;;  %3410 = vpow2.f32 %v1543_v48  ;;  %v1447_v60 = vmax.f32 %v1445_v36, %v1446_v19  ;;  %v1454_v52 = vmax.f32 %v1452_v11, %v1453_v7 }
 0x151   : > { %v4138_v13 = vpop.eup %3400  ;;  %v1639_v41 = vrot.slane %v1638_v34, 2  ;;  %v1647_v8 = vadd.f32 %v1646_v46, %v1645_v50  ;;  %v1652_v32 = vsel %vm1312_vm2, %v4136_v28, 0.0  ;;  %v1579_v56 = vadd.f32 %v1578_v22, %v3978_v55 }
 0x152   : > { %v1561_v3 = vadd.f32 %v1560_v6, %v1559_v17  ;;  %v4143_v38 = vpop.eup %3402  ;;  %v1653_v44 = vsel %vm1312_vm2, %v4138_v13, 0.0  ;;  %v1485_v20 = vsub.f32 %v4090_v33, %v1447_v60  ;;  %v1486_v57 = vsub.f32 %v4087_v58, %v1447_v60 }
 0x153   : > { %v1455_v0 = vrot.slane %v1454_v52, 1  ;;  %v4149_v62 = vpop.eup %3404  ;;  %v4151_v36 = vadd.f32 %v1639_v41, %v1638_v34  ;;  %v1648_v11 = vrot.slane %v1647_v8, 2  ;;  %v1654_v17 = vadd.f32 %v1653_v44, %v1652_v32 }
 0x154   : > { %v1661_v49 = vsel %vm1312_vm2, %v4143_v38, 0.0  ;;  %v1662_v55 = vsel %vm1312_vm2, %v4149_v62, 0.0  ;;  %v1545_v50 = vmul.f32 1.442695, %v1485_v20  ;;  %v1547_v5 = vmul.f32 1.442695, %v1486_v57 }
 0x155   : > { %v1456_v48 = vmax.f32 %v1454_v52, %v1455_v0  ;;  %v1649_v19 = vadd.f32 %v1648_v11, %v1647_v8  ;;  %v1655_v33 = vrot.slane %v1654_v17, 4  ;;  %v1663_v7 = vadd.f32 %v1662_v55, %v1661_v49 }
 0x156   : > { %3412 = vrcp.f32 %v1561_v3  ;;  %v1587_v34 = vrot.slane %v4011_v10, 1  ;;  %v1596_v60 = vrot.slane %v4032_v9, 1  ;;  %v1614_v55 = vrot.slane %v4066_v45, 1 }
 0x157   : > { %3414 = vpow2.f32 %v1545_v50  ;;  %v1487_v58 = vsub.f32 %v4102_v30, %v1456_v48  ;;  %v1488_v6 = vsub.f32 %v4099_v37, %v1456_v48  ;;  %v1656_v46 = vadd.f32 %v1655_v33, %v1654_v17 }
 0x158   : > { %v1664_v22 = vrot.slane %v1663_v7, 4  ;;  %3416 = vpow2.f32 %v1547_v5  ;;  %v3407_v41 = vpop.eup %3406  ;;  %v1588_v52 = vadd.f32 %v1587_v34, %v4011_v10  ;;  %v1597_v11 = vadd.f32 %v1596_v60, %v4032_v9 }
 0x159   : > { %v1549_v32 = vmul.f32 1.442695, %v1487_v58  ;;  %v1551_v44 = vmul.f32 1.442695, %v1488_v6  ;;  %3418 = vrcp.f32 %v1579_v56  ;;  %v4162_v8 = vpop.eup %3408  ;;  %v1657_v3 = vrot.slane %v1656_v46, 2 }
 0x15a   : > { %v1665_v20 = vadd.f32 %v1664_v22, %v1663_v7  ;;  %v1715_v30 = vmul.f32 %v3407_v41, %v3914_v59  ;;  %v4166_v37 = vmul.f32 %v3407_v41, %v3918_v12  ;;  %v4168_v57 = vpop.eup %3410  ;;  %v1670_v0 = vsel %vm1312_vm2, %v4162_v8, 0.0 }
 0x15b   : > { %3420 = vpow2.f32 %v1549_v32  ;;  %v1605_v56 = vrot.slane %v4054_v61, 1  ;;  %v1658_v10 = vadd.f32 %v1657_v3, %v1656_v46  ;;  %v1671_v49 = vsel %vm1312_vm2, %v4168_v57, 0.0 }
 0x15c   : > { %v1666_v17 = vrot.slane %v1665_v20, 2  ;;  %3422 = vpow2.f32 %v1551_v44  ;;  %v1672_v59 = vadd.f32 %v1671_v49, %v1670_v0  ;;  %v1623_v5 = vrot.slane %v4082_v2, 1 }
 0x15d   : > { %3424 = vrcp.f32 %v1588_v52  ;;  %v1606_v12 = vadd.f32 %v1605_v56, %v4054_v61  ;;  %v1632_v9 = vrot.slane %v4108_v25, 1  ;;  %v1615_v33 = vadd.f32 %v1614_v55, %v4066_v45 }
 0x15e   : > { %v1667_v50 = vadd.f32 %v1666_v17, %v1665_v20  ;;  %3426 = vrcp.f32 %v1597_v11  ;;  %v1673_v48 = vrot.slane %v1672_v59, 4  ;;  %v1641_v7 = vrot.slane %v4151_v36, 1 }
 0x15f   : > { %3428 = vrcp.f32 %v1606_v12  ;;  %v1624_v6 = vadd.f32 %v1623_v5, %v4082_v2  ;;  %v1633_v34 = vadd.f32 %v1632_v9, %v4108_v25  ;;  %v1650_v61 = vrot.slane %v1649_v19, 1 }
 0x160   : > { %v3413_v58 = vpop.eup %3412  ;;  %v1659_v46 = vrot.slane %v1658_v10, 1  ;;  %v1674_v60 = vadd.f32 %v1673_v48, %v1672_v59  ;;  %3430 = vrcp.f32 %v1615_v33  ;;  %v1642_v2 = vadd.f32 %v1641_v7, %v4151_v36 }
 0x161   : > { %v4184_v22 = vpop.eup %3414  ;;  %v1713_v41 = vmul.f32 %v3413_v58, %v3896_v54  ;;  %v1714_v32 = vmul.f32 %v3413_v58, %v3902_v63  ;;  %3432 = vrcp.f32 %v1624_v6  ;;  %v1651_v52 = vadd.f32 %v1650_v61, %v1649_v19 }
 0x162   : > { %v4188_v44 = vpop.eup %3416  ;;  %v1679_v45 = vsel %vm1312_vm2, %v4184_v22, 0.0  ;;  %v1675_v3 = vrot.slane %v1674_v60, 2  ;;  %3434 = vrcp.f32 %v1633_v34  ;;  %v1660_v54 = vadd.f32 %v1659_v46, %v1658_v10 }
 0x163   : > { %v3419_v25 = vpop.eup %3418  ;;  %v1680_v20 = vsel %vm1312_vm2, %v4188_v44, 0.0  ;;  %3160 = vmatprep.mubr.msk.f32.mxu1 %vm1312_vm2, %v1713_v41  ;;  %3436 = vrcp.f32 %v1642_v2  ;;  %v1668_v19 = vrot.slane %v1667_v50, 1  ;;  %v4573_v17 = vunpack.c.l.bf16 %v3571_v14 }
 0x164   : > { %v1681_v63 = vadd.f32 %v1680_v20, %v1679_v45  ;;  %3161 = vmatmul.mubr.msk.f32.vlgmr.msra.gmra.mrb[0].mxu1 %vm1312_vm2, %v1714_v32  ;;  %v1717_v0 = vmul.f32 %v3419_v25, %v3931_v47  ;;  %v1718_v11 = vmul.f32 %v3419_v25, %v3937_v16  ;;  %v1676_v36 = vadd.f32 %v1675_v3, %v1674_v60 }
 0x165   : > { %v4199_v56 = vpop.eup %3420  ;;  %3163 = vmatprep.mubr.msk.f32.mxu1 %vm1312_vm2, %v1715_v30  ;;  %3438 = vrcp.f32 %v1651_v52  ;;  %v4574_v49 = vunpack.c.h.bf16 %v3571_v14  ;;  %v4575_v16 = vunpack.c.l.bf16 %v3578_v18  ;;  %v4576_v55 = vunpack.c.h.bf16 %v3578_v18 }
 0x166   : > { %v4206_v59 = vpop.eup %3422  ;;  %v1682_v12 = vrot.slane %v1681_v63, 4  ;;  %v1688_v47 = vsel %vm1312_vm2, %v4199_v56, 0.0  ;;  %3440 = vrcp.f32 %v1660_v54  ;;  %v1669_v48 = vadd.f32 %v1668_v19, %v1667_v50 }
 0x167   : > { %v3264_v10 = vpack.i.bf16 %v4574_v49, %v4573_v17  ;;  %v3269_v5 = vpack.i.bf16 %v4576_v55, %v4575_v16  ;;  %v3425_v30 = vpop.eup %3424  ;;  %v1689_v9 = vsel %vm1312_vm2, %v4206_v59, 0.0  ;;  %v1677_v33 = vrot.slane %v1676_v36, 1  ;;  %v4585_v16 = vld [vmem:[#allocation7_spill] sm:$0xff] }
 0x168   : > { %v4577_v14 = vunpack.c.l.bf16 %v3684_v27  ;;  %v4578_v7 = vunpack.c.h.bf16 %v3684_v27  ;;  %v3427_v6 = vpop.eup %3426  ;;  %v1683_v34 = vadd.f32 %v1682_v12, %v1681_v63  ;;  %v1690_v61 = vadd.f32 %v1689_v9, %v1688_v47  ;;  %3164 = vmatmul.mubr.msk.f32.gmra.mrb[2].mxu1 %vm1312_vm2, %v4166_v37  ;;  %v4581_v63 = vld [vmem:[#allocation14_spill] sm:$0xff] }
 0x169   : > { %3265 = vrot.lane.b32.xlu0 %v3264_v10, %s3459_s19  ;;  %v1719_v18 = vmul.f32 %v3425_v30, %v3951_v29  ;;  %v1720_v46 = vmul.f32 %v3425_v30, %v3953_v31  ;;  %v3429_v50 = vpop.eup %3428  ;;  %3166 = vmatprep.mubr.msk.f32.mxu1 %vm1312_vm2, %v1717_v0  ;;  %v1721_v60 = vmul.f32 %v3427_v6, %v3968_v39  ;;  %3442 = vrcp.f32 %v1669_v48 }
 0x16a   : > { %v3274_v58 = vpack.i.bf16 %v4578_v7, %v4577_v14  ;;  %v1722_v41 = vmul.f32 %v3427_v6, %v3972_v4  ;;  %v1678_v27 = vadd.f32 %v1677_v33, %v1676_v36  ;;  %3270 = vrot.lane.b32.xlu1 %v3269_v5, %s3459_s19  ;;  %v1684_v32 = vrot.slane %v1683_v34, 2  ;;  %v3431_v29 = vpop.eup %3430  ;;  %v4588_v14 = vld [vmem:[#allocation8_spill] sm:$0xff] }
 0x16b   : > { %v1691_v45 = vrot.slane %v1690_v61, 4  ;;  %v1723_v2 = vmul.f32 %v3429_v50, %v3997_v24  ;;  %v1724_v37 = vmul.f32 %v3429_v50, %v3999_v21  ;;  %v4579_v31 = vunpack.c.l.bf16 %v3584_v23  ;;  %v3433_v4 = vpop.eup %3432 }
 0x16c   : > { %3444 = vrcp.f32 %v1678_v27  ;;  %v4580_v39 = vunpack.c.h.bf16 %v3584_v23  ;;  %v1685_v25 = vadd.f32 %v1684_v32, %v1683_v34  ;;  %3167 = vmatmul.mubr.msk.f32.gmra.mrb[4].mxu1 %vm1312_vm2, %v1718_v11  ;;  %v1725_v20 = vmul.f32 %v3431_v29, %v4019_v43  ;;  %v3435_v54 = vpop.eup %3434  ;;  %v4594_v27 = vld [vmem:[#allocation9_spill] sm:$0xff] }
 0x16d   : > { %3275 = vrot.lane.b32.xlu0 %v3274_v58, %s3459_s19  ;;  %v1692_v3 = vadd.f32 %v1691_v45, %v1690_v61  ;;  %v1726_v24 = vmul.f32 %v3431_v29, %v4026_v1  ;;  %3169 = vmatprep.mubr.msk.f32.mxu1 %vm1312_vm2, %v1719_v18  ;;  %v1727_v21 = vmul.f32 %v3433_v4, %v4046_v40  ;;  %v3437_v36 = vpop.eup %3436  ;;  %v4582_v1 = vld [vmem:[#allocation2_spill] sm:$0xff]  ;;  %v4586_v55 = vunpack.c.l.bf16 %v4585_v16 }
 0x16e   : > { %v3284_v52 = vpack.i.bf16 %v4580_v39, %v4579_v31  ;;  %v1728_v0 = vmul.f32 %v3433_v4, %v4581_v63  ;;  %v1729_v23 = vmul.f32 %v3435_v54, %v4074_v26  ;;  %v1730_v17 = vmul.f32 %v3435_v54, %v4078_v35 }
 0x16f   : > { %v1693_v19 = vrot.slane %v1692_v3, 2  ;;  %v1686_v49 = vrot.slane %v1685_v25, 1  ;;  %v3439_v10 = vpop.eup %3438  ;;  %v1731_v11 = vmul.f32 %v3437_v36, %v4112_v15  ;;  %v1732_v43 = vmul.f32 %v3437_v36, %v4118_v42 }
 0x170   : > { %v4583_v12 = vunpack.c.l.bf16 %v4582_v1  ;;  %v4584_v40 = vunpack.c.h.bf16 %v4582_v1  ;;  %v4587_v5 = vunpack.c.h.bf16 %v4585_v16  ;;  %v3441_v30 = vpop.eup %3440  ;;  %3170 = vmatmul.mubr.msk.f32.gmra.mrb[6].mxu1 %vm1312_vm2, %v1720_v46  ;;  %v1733_v15 = vmul.f32 %v3439_v10, %v4122_v53  ;;  %v4591_v53 = vld [vmem:[#allocation3_spill] sm:$0xff] }
 0x171   : > { %3285 = vrot.lane.b32.xlu0 %v3284_v52, %s3459_s19  ;;  %v1694_v35 = vadd.f32 %v1693_v19, %v1692_v3  ;;  %v1734_v42 = vmul.f32 %v3439_v10, %v4127_v51  ;;  %v1687_v9 = vadd.f32 %v1686_v49, %v1685_v25  ;;  %3172 = vmatprep.mubr.msk.f32.mxu1 %vm1312_vm2, %v1721_v60  ;;  %v4589_v7 = vunpack.c.l.bf16 %v4588_v14  ;;  %v4606_v19 = vld [vmem:[#allocation11_spill] sm:$0xff] }
 0x172   : > { %v3294_v47 = vpack.i.bf16 %v4584_v40, %v4583_v12  ;;  %v3279_v26 = vpack.i.bf16 %v4587_v5, %v4586_v55  ;;  %v1735_v48 = vmul.f32 %v3441_v30, %v4136_v28  ;;  %v1736_v33 = vmul.f32 %v3441_v30, %v4138_v13  ;;  %v4609_v12 = vld [vmem:[#allocation6_spill] sm:$0xff] }
 0x173   : > { %v4590_v58 = vunpack.c.h.bf16 %v4588_v14  ;;  %3446 = vrcp.f32 %v1687_v9  ;;  %v1695_v34 = vrot.slane %v1694_v35, 1  ;;  %v3443_v61 = vpop.eup %3442  ;;  %v4592_v51 = vunpack.c.l.bf16 %v4591_v53  ;;  %v3346_v30 = vld [vmem:[%s4495_s7] sm:$0xff]  }
 0x174   : > { %3280 = vrot.lane.b32.xlu1 %v3279_v26, %s3459_s19  ;;  %v4593_v18 = vunpack.c.h.bf16 %v4591_v53  ;;  %3173 = vmatmul.mubr.msk.f32.gmra.mrb[8].mxu1 %vm1312_vm2, %v1722_v41  ;;  %v1737_v28 = vmul.f32 %v3443_v61, %v4143_v38  ;;  %v1738_v13 = vmul.f32 %v3443_v61, %v4149_v62  ;;  %v4595_v32 = vunpack.c.l.bf16 %v4594_v27  ;;  %v4597_v38 = vld [vmem:[#allocation4_spill] sm:$0xff] }
 0x175   : > { %v3289_v6 = vpack.i.bf16 %v4590_v58, %v4589_v7  ;;  %3295 = vrot.lane.b32.xlu0 %v3294_v47, %s3459_s19  ;;  %v1696_v50 = vadd.f32 %v1695_v34, %v1694_v35  ;;  %3175 = vmatprep.mubr.msk.f32.mxu1 %vm1312_vm2, %v1723_v2  ;;  %v4596_v45 = vunpack.c.h.bf16 %v4594_v27  ;;  %v4598_v62 = vunpack.c.l.bf16 %v4597_v38  ;;  %v4600_v2 = vld [vmem:[#allocation10_spill] sm:$0xff]  ;;  %v3347_v35 = vld [vmem:[%s4495_s7 + $0x8] sm:$0xff]  }
 0x176   : > { %v3304_v46 = vpack.i.bf16 %v4593_v18, %v4592_v51  ;;  %v3445_v60 = vpop.eup %3444  ;;  %v4599_v41 = vunpack.c.h.bf16 %v4597_v38  ;;  %v4601_v4 = vunpack.c.l.bf16 %v4600_v2  ;;  %v4607_v49 = vunpack.c.l.bf16 %v4606_v19 }
 0x177   : > { %v3299_v29 = vpack.i.bf16 %v4596_v45, %v4595_v32  ;;  %v1739_v31 = vmul.f32 %v3445_v60, %v4162_v8  ;;  %v1740_v39 = vmul.f32 %v3445_v60, %v4168_v57  ;;  %3448 = vrcp.f32 %v1696_v50  ;;  %v4603_v57 = vld [vmem:[#allocation5_spill] sm:$0xff] }
 0x178   : > { %3290 = vrot.lane.b32.xlu1 %v3289_v6, %s3459_s19  ;;  %v3314_v52 = vpack.i.bf16 %v4599_v41, %v4598_v62  ;;  %3176 = vmatmul.mubr.msk.f32.gmra.mrb[10].mxu1 %vm1312_vm2, %v1724_v37  ;;  %v4602_v8 = vunpack.c.h.bf16 %v4600_v2  ;;  %v4604_v3 = vunpack.c.l.bf16 %v4603_v57  ;;  %v4605_v54 = vunpack.c.h.bf16 %v4603_v57 }
 0x179   : > { %3305 = vrot.lane.b32.xlu0 %v3304_v46, %s3459_s19  ;;  %3178 = vmatprep.mubr.msk.f32.mxu1 %vm1312_vm2, %v1725_v20  ;;  %v4608_v10 = vunpack.c.h.bf16 %v4606_v19  ;;  %v4610_v40 = vunpack.c.l.bf16 %v4609_v12  ;;  %v4611_v47 = vunpack.c.h.bf16 %v4609_v12 }
 0x17a   : > { %v3309_v25 = vpack.i.bf16 %v4602_v8, %v4601_v4  ;;  %v3324_v63 = vpack.i.bf16 %v4605_v54, %v4604_v3 }
 0x17b   : > { %v3319_v1 = vpack.i.bf16 %v4608_v10, %v4607_v49 }
 0x17c   : > { %3300 = vrot.lane.b32.xlu1 %v3299_v29, %s3459_s19  ;;  %3179 = vmatmul.mubr.msk.f32.gmra.mrb[12].mxu1 %vm1312_vm2, %v1726_v24  ;;  %v3334_v24 = vpack.i.bf16 %v4611_v47, %v4610_v40 }
 0x17d   : > { %3315 = vrot.lane.b32.xlu0 %v3314_v52, %s3459_s19  ;;  %v3447_v36 = vpop.eup %3446  ;;  %3181 = vmatprep.mubr.msk.f32.mxu1 %vm1312_vm2, %v1727_v21  ;;  %v4612_v21 = vld [vmem:[#allocation12_spill] sm:$0xff] }
 0x17e   : > { %v1741_v37 = vmul.f32 %v3447_v36, %v4184_v22  ;;  %v1742_v20 = vmul.f32 %v3447_v36, %v4188_v44  ;;  %v4613_v55 = vunpack.c.l.bf16 %v4612_v21  ;;  %v4614_v5 = vunpack.c.h.bf16 %v4612_v21 }
 0x180   : > { %3310 = vrot.lane.b32.xlu1 %v3309_v25, %s3459_s19  ;;  %3182 = vmatmul.mubr.msk.f32.gmra.mrb[14].mxu1 %vm1312_vm2, %v1728_v0  ;;  %v3329_v26 = vpack.i.bf16 %v4614_v5, %v4613_v55  ;;  %v4615_v0 = vld [vmem:[#allocation13_spill] sm:$0xff] }
 0x181   : > { %3325 = vrot.lane.b32.xlu0 %v3324_v63, %s3459_s19  ;;  %v3449_v16 = vpop.eup %3448  ;;  %3184 = vmatprep.mubr.msk.f32.mxu1 %vm1312_vm2, %v1729_v23  ;;  %v4616_v23 = vunpack.c.l.bf16 %v4615_v0 }
 0x182   : > { %v1743_v22 = vmul.f32 %v3449_v16, %v4199_v56  ;;  %v1744_v44 = vmul.f32 %v3449_v16, %v4206_v59  ;;  %v4617_v56 = vunpack.c.h.bf16 %v4615_v0 }
 0x184   : > { %3320 = vrot.lane.b32.xlu1 %v3319_v1, %s3459_s19  ;;  %3185 = vmatmul.mubr.msk.f32.gmra.mrb[16].mxu1 %vm1312_vm2, %v1730_v17  ;;  %v3339_v59 = vpack.i.bf16 %v4617_v56, %v4616_v23  ;;  %v3344_v17 = vld [vmem:[%s4493_s5] sm:$0xff]  }
 0x185   : > { %3335 = vrot.lane.b32.xlu0 %v3334_v24, %s3459_s19  ;;  %3187 = vmatprep.mubr.msk.f32.mxu1 %vm1312_vm2, %v1731_v11  ;;  %v3460_v11 = vmov 0.0  }
 0x186   : > { %3208 = vmatprep.subr.bf16.mxu1 %v3460_v11  ;;  %3216 = vmatprep.subr.bf16.mxu0 %v3460_v11 }
 0x187   : > { %3209 = vmatpush3.bf16.msra.mxu1 %v3344_v17  ;;  %3220 = vmatprep.mubr.msk.bf16.mxu0 %vm3461_vm3, %v3460_v11 }
 0x188   : > { %3330 = vrot.lane.b32.xlu1 %v3329_v26, %s3459_s19  ;;  %3188 = vmatmul.mubr.msk.f32.gmra.mrb[18].mxu1 %vm1312_vm2, %v1732_v43  ;;  %v3345_v43 = vld [vmem:[%s4493_s5 + $0x8] sm:$0xff]  }
 0x189   : > { %3190 = vmatprep.mubr.msk.f32.mxu1 %vm1312_vm2, %v1733_v15  ;;  %3210 = vmatprep.subr.bf16.mxu1 %v3460_v11 }
 0x18a   : > { %3217 = vmatpush3.bf16.msra.mxu0 %v3346_v30 }
 0x18b   : > { %3211 = vmatpush3.bf16.msra.mxu1 %v3345_v43  ;;  %3218 = vmatprep.subr.bf16.mxu0 %v3460_v11 }
 0x18c   : > { %3340 = vrot.lane.b32.xlu1 %v3339_v59, %s3459_s19  ;;  %3191 = vmatmul.mubr.msk.f32.gmra.mrb[20].mxu1 %vm1312_vm2, %v1734_v42 }
 0x18d   : > { %3193 = vmatprep.mubr.msk.f32.mxu1 %vm1312_vm2, %v1735_v48  ;;  %3224 = vmatprep.subr.bf16.mxu1 %v3460_v11 }
 0x18e   : > { %3219 = vmatpush3.bf16.msra.mxu0 %v3347_v35 }
 0x18f   : > { %3236 = vmatprep.subr.bf16.mxu0 %v3460_v11 }
 0x190   : > { %3194 = vmatmul.mubr.msk.f32.gmra.mrb[22].mxu1 %vm1312_vm2, %v1736_v33 }
 0x191   : > { %3196 = vmatprep.mubr.msk.f32.mxu1 %vm1312_vm2, %v1737_v28 }
 0x194   : > { %3197 = vmatmul.mubr.msk.f32.gmra.mrb[24].mxu1 %vm1312_vm2, %v1738_v13 }
 0x195   : > { %3199 = vmatprep.mubr.msk.f32.mxu1 %vm1312_vm2, %v1739_v31 }
 0x198   : > { %3200 = vmatmul.mubr.msk.f32.gmra.mrb[26].mxu1 %vm1312_vm2, %v1740_v39 }
 0x199   : > { %3202 = vmatprep.mubr.msk.f32.mxu1 %vm1312_vm2, %v1741_v37 }
 0x19c   : > { %3203 = vmatmul.mubr.msk.f32.gmra.mrb[28].mxu1 %vm1312_vm2, %v1742_v20 }
 0x19d   : > { %3205 = vmatprep.mubr.msk.f32.mxu1 %vm1312_vm2, %v1743_v22 }
 0x1a0   : > { %3206 = vmatmul.mubr.msk.f32.gmra.mrb[30].mxu1 %vm1312_vm2, %v1744_v44 }
 0x1a1   : > { %3212 = vmatprep.mubr.msk.bf16.mxu1 %vm3461_vm3, %v3460_v11 }
 0x1db   : > { %v3266_v15 = vpop.permute.xlu0 %3265 }
 0x1dc   : > { %v3268_v33 = vunpack.i.h.bf16 %v3266_v15  ;;  %v3267_v14 = vunpack.i.l.bf16 %v3266_v15  ;;  %v3271_v7 = vpop.permute.xlu1 %3270 }
 0x1dd   : > { %v3273_v61 = vunpack.i.h.bf16 %v3271_v7  ;;  %v3272_v51 = vunpack.i.l.bf16 %v3271_v7 }
 0x1df   : > { %v4366_v42 = vpop.permute.xlu0 %3275 }
 0x1e3   : > { %v3286_v9 = vpop.permute.xlu0 %3285 }
 0x1e4   : > { %v3288_v32 = vunpack.i.h.bf16 %v3286_v9  ;;  %v3287_v29 = vunpack.i.l.bf16 %v3286_v9 }
 0x1e6   : > { %v4376_v0 = vpop.permute.xlu1 %3280 }
 0x1e7   : > { %v3296_v48 = vpop.permute.xlu0 %3295 }
 0x1e8   : > { %v3298_v25 = vunpack.i.h.bf16 %v3296_v48  ;;  %v3297_v3 = vunpack.i.l.bf16 %v3296_v48 }
 0x1eb   : > { %v3306_v18 = vpop.permute.xlu0 %3305 }
 0x1ec   : > { %v3308_v47 = vunpack.i.h.bf16 %v3306_v18  ;;  %v3307_v24 = vunpack.i.l.bf16 %v3306_v18 }
 0x1ef   : > { %v3316_v41 = vpop.permute.xlu0 %3315 }
 0x1f0   : > { %v3318_v15 = vunpack.i.h.bf16 %v3316_v41  ;;  %v3317_v9 = vunpack.i.l.bf16 %v3316_v41 }
 0x1f3   : > { %v3326_v16 = vpop.permute.xlu0 %3325 }
 0x237   : > { %v3162_v58 = vpop.f32.mrb[0].mxu1 }
 0x238   : > { %v2200_v6 = vmul.f32 %v3268_v33, %v3162_v58  ;;  %v1912_v34 = vpop.f32.mrb[1].mxu1 }
 0x239   : > { %v2199_v53 = vmul.f32 %v3267_v14, %v1912_v34 }
 0x23a   : > { %v2232_v46 = vsel %vm776_vm0, %v2200_v6, 0.0 }
 0x23b   : > { %v2231_v28 = vsel %vm776_vm0, %v2199_v53, 0.0  ;;  %v3165_v13 = vpop.f32.mrb[2].mxu1 }
 0x23c   : > { %v2233_v50 = vadd.f32 %v2232_v46, %v2231_v28  ;;  %v2202_v60 = vmul.f32 %v3273_v61, %v3165_v13  ;;  %v1922_v27 = vpop.f32.mrb[3].mxu1  ;;  %v3336_v61 = vpop.permute.xlu0 %3335  ;;  %v3328_v28 = vunpack.i.h.bf16 %v3326_v16 }
 0x23d   : > { %v2201_v45 = vmul.f32 %v3272_v51, %v1922_v27  ;;  %v3327_v27 = vunpack.i.l.bf16 %v3326_v16 }
 0x23e   : > { %v2234_v31 = vrot.slane %v2233_v50, 4  ;;  %v2241_v39 = vsel %vm776_vm0, %v2202_v60, 0.0 }
 0x23f   : > { %v2240_v38 = vsel %vm776_vm0, %v2201_v45, 0.0  ;;  %v3168_v62 = vpop.f32.mrb[4].mxu1 }
 0x240   : > { %v2235_v52 = vadd.f32 %v2234_v31, %v2233_v50  ;;  %v2242_v2 = vadd.f32 %v2241_v39, %v2240_v38  ;;  %v2204_v4 = vmul.f32 %v3288_v32, %v3168_v62  ;;  %v1932_v8 = vpop.f32.mrb[5].mxu1  ;;  %v4380_v32 = vpop.permute.xlu1 %3290  ;;  %v3338_v39 = vunpack.i.h.bf16 %v3336_v61 }
 0x241   : > { %v2203_v57 = vmul.f32 %v3287_v29, %v1932_v8 }
 0x242   : > { %v2236_v54 = vrot.slane %v2235_v52, 2  ;;  %v2243_v63 = vrot.slane %v2242_v2, 4  ;;  %v2250_v36 = vsel %vm776_vm0, %v2204_v4, 0.0 }
 0x243   : > { %v2249_v37 = vsel %vm776_vm0, %v2203_v57, 0.0  ;;  %v3171_v20 = vpop.f32.mrb[6].mxu1 }
 0x244   : > { %v2237_v19 = vadd.f32 %v2236_v54, %v2235_v52  ;;  %v2244_v49 = vadd.f32 %v2243_v63, %v2242_v2  ;;  %v2251_v10 = vadd.f32 %v2250_v36, %v2249_v37  ;;  %v2206_v1 = vmul.f32 %v3298_v25, %v3171_v20  ;;  %v1942_v12 = vpop.f32.mrb[7].mxu1  ;;  %v4388_v16 = vpop.permute.xlu1 %3300 }
 0x245   : > { %v2205_v40 = vmul.f32 %v3297_v3, %v1942_v12  ;;  %v3337_v37 = vunpack.i.l.bf16 %v3336_v61 }
 0x246   : > { %v2238_v22 = vrot.slane %v2237_v19, 1  ;;  %v2245_v44 = vrot.slane %v2244_v49, 2  ;;  %v2252_v21 = vrot.slane %v2251_v10, 4  ;;  %v2259_v55 = vsel %vm776_vm0, %v2206_v1, 0.0 }
 0x247   : > { %v2258_v5 = vsel %vm776_vm0, %v2205_v40, 0.0  ;;  %v3174_v26 = vpop.f32.mrb[8].mxu1  ;;  %v3278_v1 = vunpack.i.h.bf16 %v4366_v42 }
 0x248   : > { %v2239_v23 = vadd.f32 %v2238_v22, %v2237_v19  ;;  %v2246_v56 = vadd.f32 %v2245_v44, %v2244_v49  ;;  %v2253_v59 = vadd.f32 %v2252_v21, %v2251_v10  ;;  %v2260_v17 = vadd.f32 %v2259_v55, %v2258_v5  ;;  %v1952_v43 = vpop.f32.mrb[9].mxu1 }
 0x249   : > { %v2208_v30 = vmul.f32 %v3308_v47, %v3174_v26  ;;  %v2207_v35 = vmul.f32 %v3307_v24, %v1952_v43  ;;  %v3277_v26 = vunpack.i.l.bf16 %v4366_v42 }
 0x24a   : > { %v2247_v48 = vrot.slane %v2246_v56, 1  ;;  %v2254_v33 = vrot.slane %v2253_v59, 2  ;;  %v2261_v14 = vrot.slane %v2260_v17, 4  ;;  %v2375_v7 = vpack.c.bf16 %v2239_v23, %v2239_v23 }
 0x24b   : > { %v2268_v58 = vsel %vm776_vm0, %v2208_v30, 0.0  ;;  %v2267_v6 = vsel %vm776_vm0, %v2207_v35, 0.0  ;;  %v3177_v34 = vpop.f32.mrb[10].mxu1 }
 0x24c   : > { %v2248_v53 = vadd.f32 %v2247_v48, %v2246_v56  ;;  %v2255_v51 = vadd.f32 %v2254_v33, %v2253_v59  ;;  %v2262_v18 = vadd.f32 %v2261_v14, %v2260_v17  ;;  %v1962_v46 = vpop.f32.mrb[11].mxu1  ;;  %v2269_v13 = vadd.f32 %v2268_v58, %v2267_v6 }
 0x24d   : > { %v2210_v50 = vmul.f32 %v3318_v15, %v3177_v34  ;;  %v2209_v60 = vmul.f32 %v3317_v9, %v1962_v46  ;;  %v2418_v38 = vunpack.c.l.b16 %v2375_v7  ;;  %v3283_v14 = vunpack.i.h.bf16 %v4376_v0  ;;  %v4396_v46 = vpop.permute.xlu1 %3310 }
 0x24e   : > { %v2376_v45 = vpack.c.bf16 %v2248_v53, %v2248_v53  ;;  %v2256_v29 = vrot.slane %v2255_v51, 1  ;;  %v2263_v31 = vrot.slane %v2262_v18, 2  ;;  %v2270_v62 = vrot.slane %v2269_v13, 4 }
 0x24f   : > { %v2277_v41 = vsel %vm776_vm0, %v2210_v50, 0.0  ;;  %v2276_v52 = vsel %vm776_vm0, %v2209_v60, 0.0  ;;  %v3180_v2 = vpop.f32.mrb[12].mxu1 }
 0x250   : > { %v2419_v4 = vunpack.c.l.b16 %v2376_v45  ;;  %v2257_v8 = vadd.f32 %v2256_v29, %v2255_v51  ;;  %v2264_v25 = vadd.f32 %v2263_v31, %v2262_v18  ;;  %v2278_v57 = vadd.f32 %v2277_v41, %v2276_v52  ;;  %v1972_v3 = vpop.f32.mrb[13].mxu1 }
 0x251   : > { %v2271_v54 = vadd.f32 %v2270_v62, %v2269_v13  ;;  %v2212_v63 = vmul.f32 %v3328_v28, %v3180_v2  ;;  %v2211_v36 = vmul.f32 %v3327_v27, %v1972_v3  ;;  %v3282_v18 = vunpack.i.l.bf16 %v4376_v0 }
 0x252   : > { %v2435_v20 = vsel %vm2434_vm4, %v2419_v4, %v2418_v38  ;;  %v2377_v19 = vpack.c.bf16 %v2257_v8, %v2257_v8  ;;  %v2265_v49 = vrot.slane %v2264_v25, 1  ;;  %v2279_v10 = vrot.slane %v2278_v57, 4 }
 0x253   : > { %v2272_v12 = vrot.slane %v2271_v54, 2  ;;  %v2286_v40 = vsel %vm776_vm0, %v2212_v63, 0.0  ;;  %v2285_v47 = vsel %vm776_vm0, %v2211_v36, 0.0  ;;  %v3183_v24 = vpop.f32.mrb[14].mxu1 }
 0x254   : > { %v2420_v22 = vunpack.c.l.b16 %v2377_v19  ;;  %v2266_v44 = vadd.f32 %v2265_v49, %v2264_v25  ;;  %v2280_v21 = vadd.f32 %v2279_v10, %v2278_v57  ;;  %v2287_v55 = vadd.f32 %v2286_v40, %v2285_v47  ;;  %v1982_v5 = vpop.f32.mrb[15].mxu1  ;;  %v4407_v10 = vpop.permute.xlu1 %3320 }
 0x255   : > { %v2273_v23 = vadd.f32 %v2272_v12, %v2271_v54  ;;  %v2214_v56 = vmul.f32 %v3338_v39, %v3183_v24  ;;  %v2213_v59 = vmul.f32 %v3337_v37, %v1982_v5  ;;  %v3293_v39 = vunpack.i.h.bf16 %v4380_v32 }
 0x256   : > { %v2437_v17 = vsel %vm2436_vm5, %v2420_v22, %v2435_v20  ;;  %v2378_v43 = vpack.c.bf16 %v2266_v44, %v2266_v44  ;;  %v2281_v30 = vrot.slane %v2280_v21, 2  ;;  %v2288_v35 = vrot.slane %v2287_v55, 4 }
 0x257   : > { %v2274_v15 = vrot.slane %v2273_v23, 1  ;;  %v2295_v9 = vsel %vm776_vm0, %v2214_v56, 0.0  ;;  %v2294_v48 = vsel %vm776_vm0, %v2213_v59, 0.0  ;;  %v3186_v33 = vpop.f32.mrb[16].mxu1  ;;  %v3292_v25 = vunpack.i.l.bf16 %v4380_v32 }
 0x258   : > { %v2421_v7 = vunpack.c.l.b16 %v2378_v43  ;;  %v2282_v58 = vadd.f32 %v2281_v30, %v2280_v21  ;;  %v2289_v42 = vadd.f32 %v2288_v35, %v2287_v55  ;;  %v2296_v6 = vadd.f32 %v2295_v9, %v2294_v48  ;;  %v1992_v34 = vpop.f32.mrb[17].mxu1 }
 0x259   : > { %v2275_v61 = vadd.f32 %v2274_v15, %v2273_v23  ;;  %v2216_v53 = vmul.f32 %v3278_v1, %v3186_v33  ;;  %v2215_v51 = vmul.f32 %v3277_v26, %v1992_v34  ;;  %v3303_v49 = vunpack.i.h.bf16 %v4388_v16 }
 0x25a   : > { %v2439_v28 = vsel %vm2438_vm6, %v2421_v7, %v2437_v17  ;;  %v2283_v13 = vrot.slane %v2282_v58, 1  ;;  %v2290_v50 = vrot.slane %v2289_v42, 2  ;;  %v2297_v60 = vrot.slane %v2296_v6, 4 }
 0x25b   : > { %v2379_v27 = vpack.c.bf16 %v2275_v61, %v2275_v61  ;;  %v2304_v45 = vsel %vm776_vm0, %v2216_v53, 0.0  ;;  %v2303_v29 = vsel %vm776_vm0, %v2215_v51, 0.0  ;;  %v3189_v31 = vpop.f32.mrb[18].mxu1  ;;  %v3302_v21 = vunpack.i.l.bf16 %v4388_v16 }
 0x25c   : > { %v2284_v38 = vadd.f32 %v2283_v13, %v2282_v58  ;;  %v2291_v62 = vadd.f32 %v2290_v50, %v2289_v42  ;;  %v2298_v41 = vadd.f32 %v2297_v60, %v2296_v6  ;;  %v2305_v0 = vadd.f32 %v2304_v45, %v2303_v29  ;;  %v2002_v52 = vpop.f32.mrb[19].mxu1  ;;  %v3331_v42 = vpop.permute.xlu1 %3330 }
 0x25d   : > { %v2422_v2 = vunpack.c.l.b16 %v2379_v27  ;;  %v2218_v4 = vmul.f32 %v3283_v14, %v3189_v31  ;;  %v2217_v8 = vmul.f32 %v3282_v18, %v2002_v52  ;;  %v3313_v30 = vunpack.i.h.bf16 %v4396_v46 }
 0x25e   : > { %v2380_v57 = vpack.c.bf16 %v2284_v38, %v2284_v38  ;;  %v2292_v3 = vrot.slane %v2291_v62, 1  ;;  %v2299_v54 = vrot.slane %v2298_v41, 2  ;;  %v2306_v63 = vrot.slane %v2305_v0, 4 }
 0x25f   : > { %v2441_v36 = vsel %vm2440_vm7, %v2422_v2, %v2439_v28  ;;  %v2313_v37 = vsel %vm776_vm0, %v2218_v4, 0.0  ;;  %v2312_v20 = vsel %vm776_vm0, %v2217_v8, 0.0  ;;  %v3192_v19 = vpop.f32.mrb[20].mxu1  ;;  %v3312_v58 = vunpack.i.l.bf16 %v4396_v46 }
 0x260   : > { %v2423_v1 = vunpack.c.l.b16 %v2380_v57  ;;  %v2293_v12 = vadd.f32 %v2292_v3, %v2291_v62  ;;  %v2300_v40 = vadd.f32 %v2299_v54, %v2298_v41  ;;  %v2307_v32 = vadd.f32 %v2306_v63, %v2305_v0  ;;  %v2012_v47 = vpop.f32.mrb[21].mxu1  ;;  %v3341_v3 = vpop.permute.xlu1 %3340 }
 0x261   : > { %v2314_v24 = vadd.f32 %v2313_v37, %v2312_v20  ;;  %v2220_v22 = vmul.f32 %v3293_v39, %v3192_v19  ;;  %v2219_v44 = vmul.f32 %v3292_v25, %v2012_v47  ;;  %v3323_v50 = vunpack.i.h.bf16 %v4407_v10 }
 0x262   : > { %v2443_v55 = vsel %vm2442_vm8, %v2423_v1, %v2441_v36  ;;  %v2381_v5 = vpack.c.bf16 %v2293_v12, %v2293_v12  ;;  %v2301_v26 = vrot.slane %v2300_v40, 1  ;;  %v2308_v23 = vrot.slane %v2307_v32, 2 }
 0x263   : > { %v2315_v56 = vrot.slane %v2314_v24, 4  ;;  %v2322_v59 = vsel %vm776_vm0, %v2220_v22, 0.0  ;;  %v2321_v17 = vsel %vm776_vm0, %v2219_v44, 0.0  ;;  %v3195_v43 = vpop.f32.mrb[22].mxu1  ;;  %v3322_v46 = vunpack.i.l.bf16 %v4407_v10 }
 0x264   : > { %v2424_v35 = vunpack.c.l.b16 %v2381_v5  ;;  %v2302_v15 = vadd.f32 %v2301_v26, %v2300_v40  ;;  %v2309_v9 = vadd.f32 %v2308_v23, %v2307_v32  ;;  %v2323_v48 = vadd.f32 %v2322_v59, %v2321_v17  ;;  %v2022_v33 = vpop.f32.mrb[23].mxu1 }
 0x265   : > { %v2316_v14 = vadd.f32 %v2315_v56, %v2314_v24  ;;  %v2222_v16 = vmul.f32 %v3303_v49, %v3195_v43  ;;  %v2221_v7 = vmul.f32 %v3302_v21, %v2022_v33  ;;  %v3333_v57 = vunpack.i.h.bf16 %v3331_v42 }
 0x266   : > { %v2445_v6 = vsel %vm2444_vm9, %v2424_v35, %v2443_v55  ;;  %v2382_v34 = vpack.c.bf16 %v2302_v15, %v2302_v15  ;;  %v2310_v61 = vrot.slane %v2309_v9, 1  ;;  %v2324_v53 = vrot.slane %v2323_v48, 4 }
 0x267   : > { %v2317_v51 = vrot.slane %v2316_v14, 2  ;;  %v2331_v18 = vsel %vm776_vm0, %v2222_v16, 0.0  ;;  %v2330_v28 = vsel %vm776_vm0, %v2221_v7, 0.0  ;;  %v3198_v13 = vpop.f32.mrb[24].mxu1  ;;  %v3332_v20 = vunpack.i.l.bf16 %v3331_v42 }
 0x268   : > { %v2425_v60 = vunpack.c.l.b16 %v2382_v34  ;;  %v2325_v27 = vadd.f32 %v2324_v53, %v2323_v48  ;;  %v2332_v45 = vadd.f32 %v2331_v18, %v2330_v28  ;;  %v2032_v29 = vpop.f32.mrb[25].mxu1  ;;  %v2311_v31 = vadd.f32 %v2310_v61, %v2309_v9 }
 0x269   : > { %v2318_v39 = vadd.f32 %v2317_v51, %v2316_v14  ;;  %v2224_v38 = vmul.f32 %v3313_v30, %v3198_v13  ;;  %v2223_v62 = vmul.f32 %v3312_v58, %v2032_v29  ;;  %v3343_v47 = vunpack.i.h.bf16 %v3341_v3 }
 0x26a   : > { %v4421_v41 = vsel %vm2446_vm10, %v2425_v60, %v2445_v6  ;;  %v2326_v0 = vrot.slane %v2325_v27, 2  ;;  %v2333_v52 = vrot.slane %v2332_v45, 4  ;;  %v2383_v19 = vpack.c.bf16 %v2311_v31, %v2311_v31 }
 0x26b   : > { %v2319_v2 = vrot.slane %v2318_v39, 1  ;;  %v2340_v4 = vsel %vm776_vm0, %v2224_v38, 0.0  ;;  %v2339_v8 = vsel %vm776_vm0, %v2223_v62, 0.0  ;;  %v3201_v25 = vpop.f32.mrb[26].mxu1  ;;  %v3342_v55 = vunpack.i.l.bf16 %v3341_v3 }
 0x26c   : > { %v2327_v54 = vadd.f32 %v2326_v0, %v2325_v27  ;;  %v2334_v63 = vadd.f32 %v2333_v52, %v2332_v45  ;;  %v2341_v36 = vadd.f32 %v2340_v4, %v2339_v8  ;;  %v2042_v37 = vpop.f32.mrb[27].mxu1  ;;  %v2226_v10 = vmul.f32 %v3323_v50, %v3201_v25 }
 0x26d   : > { %v2320_v49 = vadd.f32 %v2319_v2, %v2318_v39  ;;  %v2225_v1 = vmul.f32 %v3322_v46, %v2042_v37  ;;  %v2426_v17 = vunpack.c.l.b16 %v2383_v19 }
 0x26e   : > { %v2328_v12 = vrot.slane %v2327_v54, 1  ;;  %v2335_v40 = vrot.slane %v2334_v63, 2  ;;  %v2342_v32 = vrot.slane %v2341_v36, 4  ;;  %v2349_v22 = vsel %vm776_vm0, %v2226_v10, 0.0 }
 0x26f   : > { %v2384_v24 = vpack.c.bf16 %v2320_v49, %v2320_v49  ;;  %v2348_v44 = vsel %vm776_vm0, %v2225_v1, 0.0  ;;  %v3204_v21 = vpop.f32.mrb[28].mxu1 }
 0x270   : > { %v2329_v5 = vadd.f32 %v2328_v12, %v2327_v54  ;;  %v2336_v26 = vadd.f32 %v2335_v40, %v2334_v63  ;;  %v2343_v23 = vadd.f32 %v2342_v32, %v2341_v36  ;;  %v2350_v56 = vadd.f32 %v2349_v22, %v2348_v44  ;;  %v2052_v59 = vpop.f32.mrb[29].mxu1 }
 0x271   : > { %v2427_v43 = vunpack.c.l.b16 %v2384_v24  ;;  %v2228_v30 = vmul.f32 %v3333_v57, %v3204_v21  ;;  %v2227_v35 = vmul.f32 %v3332_v20, %v2052_v59 }
 0x272   : > { %v2385_v15 = vpack.c.bf16 %v2329_v5, %v2329_v5  ;;  %v2337_v9 = vrot.slane %v2336_v26, 1  ;;  %v2344_v48 = vrot.slane %v2343_v23, 2  ;;  %v2351_v33 = vrot.slane %v2350_v56, 4 }
 0x273   : > { %v2448_v14 = vsel %vm2434_vm4, %v2427_v43, %v2426_v17  ;;  %v2358_v16 = vsel %vm776_vm0, %v2228_v30, 0.0  ;;  %v2357_v7 = vsel %vm776_vm0, %v2227_v35, 0.0  ;;  %v3207_v58 = vpop.f32.mrb[30].mxu1 }
 0x274   : > { %v2428_v42 = vunpack.c.l.b16 %v2385_v15  ;;  %v2338_v6 = vadd.f32 %v2337_v9, %v2336_v26  ;;  %v2345_v34 = vadd.f32 %v2344_v48, %v2343_v23  ;;  %v2352_v61 = vadd.f32 %v2351_v33, %v2350_v56  ;;  %v2062_v53 = vpop.f32.mrb[31].mxu1  ;;  %v3348_v26 = vld [vmem:[%s4497_s9] sm:$0xff]   ;;  %v3349_v23 = vld [vmem:[%s4497_s9 + $0x8] sm:$0xff]   ;;  %v3350_v9 = vld [vmem:[%s4497_s9 + $0x10] sm:$0xff]  }
 0x275   : > { %v2359_v51 = vadd.f32 %v2358_v16, %v2357_v7  ;;  %v2230_v18 = vmul.f32 %v3343_v47, %v3207_v58  ;;  %v2229_v28 = vmul.f32 %v3342_v55, %v2062_v53  ;;  %v3351_v48 = vld [vmem:[%s4497_s9 + $0x18] sm:$0xff]   ;;  %v2915_v33 = vld [vmem:[%s4496_s8] ss:$0 sm:$0xff] }
 0x276   : > { %v2449_v13 = vsel %vm2436_vm5, %v2428_v42, %v2448_v14  ;;  %v2386_v50 = vpack.c.bf16 %v2338_v6, %v2338_v6  ;;  %v2346_v60 = vrot.slane %v2345_v34, 1  ;;  %v2353_v27 = vrot.slane %v2352_v61, 2 }
 0x277   : > { %v2360_v45 = vrot.slane %v2359_v51, 4  ;;  %v2367_v29 = vsel %vm776_vm0, %v2230_v18, 0.0  ;;  %v2366_v46 = vsel %vm776_vm0, %v2229_v28, 0.0  ;;  %v3353_v18 = vld [vmem:[%s4499_s11 + $0x8] sm:$0xff]  }
 0x278   : > { %v2429_v31 = vunpack.c.l.b16 %v2386_v50  ;;  %v2347_v39 = vadd.f32 %v2346_v60, %v2345_v34  ;;  %v2354_v38 = vadd.f32 %v2353_v27, %v2352_v61  ;;  %v2368_v62 = vadd.f32 %v2367_v29, %v2366_v46  ;;  %v2924_v60 = vld [vmem:[%s4498_s10] ss:$0 sm:$0xff] }
 0x279   : > { %v2361_v0 = vadd.f32 %v2360_v45, %v2359_v51  ;;  %v3352_v51 = vld [vmem:[%s4499_s11] sm:$0xff]  }
 0x27a   : > { %v2450_v52 = vsel %vm2438_vm6, %v2429_v31, %v2449_v13  ;;  %v2387_v2 = vpack.c.bf16 %v2347_v39, %v2347_v39  ;;  %v2355_v4 = vrot.slane %v2354_v38, 1  ;;  %v2369_v8 = vrot.slane %v2368_v62, 4 }
 0x27b   : > { %v2362_v25 = vrot.slane %v2361_v0, 2 }
 0x27c   : > { %v2430_v57 = vunpack.c.l.b16 %v2387_v2  ;;  %v2356_v3 = vadd.f32 %v2355_v4, %v2354_v38  ;;  %v2370_v54 = vadd.f32 %v2369_v8, %v2368_v62 }
 0x27d   : > { %v2363_v63 = vadd.f32 %v2362_v25, %v2361_v0 }
 0x27e   : > { %v2451_v36 = vsel %vm2440_vm7, %v2430_v57, %v2450_v52  ;;  %v2388_v37 = vpack.c.bf16 %v2356_v3, %v2356_v3  ;;  %v2371_v20 = vrot.slane %v2370_v54, 2 }
 0x27f   : > { %v2364_v19 = vrot.slane %v2363_v63, 1 }
 0x280   : > { %v2431_v49 = vunpack.c.l.b16 %v2388_v37  ;;  %v2372_v10 = vadd.f32 %v2371_v20, %v2370_v54 }
 0x281   : > { %v2365_v1 = vadd.f32 %v2364_v19, %v2363_v63 }
 0x282   : > { %v2452_v12 = vsel %vm2442_vm8, %v2431_v49, %v2451_v36  ;;  %v2373_v40 = vrot.slane %v2372_v10, 1 }
 0x283   : > { %v2389_v32 = vpack.c.bf16 %v2365_v1, %v2365_v1 }
 0x284   : > { %v2374_v47 = vadd.f32 %v2373_v40, %v2372_v10 }
 0x285   : > { %v2432_v24 = vunpack.c.l.b16 %v2389_v32 }
 0x286   : > { %v2390_v22 = vpack.c.bf16 %v2374_v47, %v2374_v47 }
 0x287   : > { %v2453_v44 = vsel %vm2444_vm9, %v2432_v24, %v2452_v12 }
 0x288   : > { %v2433_v21 = vunpack.c.l.b16 %v2390_v22 }
 0x28a   : > { %v2454_v55 = vsel %vm2446_vm10, %v2433_v21, %v2453_v44 }
 0x28b   : > { %v2455_v5 = vpack.c.b16 %v2454_v55, %v4421_v41  ;;  %v2911_v41 = vld [vmem:[%s4494_s6] ss:$0 sm:$0xff] }
 0x28d   : > { %3213 = vmatmul.mubr.msk.bf16.vlgmr.msra.gmra.mrb[32].mxu1 %vm776_vm0, %v2455_v5 }
 0x28e   : > { %3232 = vmatprep.mubr.msk.bf16.mxu1 %vm3461_vm3, %v3460_v11  ;;  %3225 = vmatpush3.bf16.msra.mxu1 %v3348_v26 }
 0x28f   : > { %3226 = vmatprep.subr.bf16.mxu1 %v3460_v11 }
 0x292   : > { %3227 = vmatpush3.bf16.msra.mxu1 %v3349_v23 }
 0x293   : > { %3228 = vmatprep.subr.bf16.mxu1 %v3460_v11 }
 0x296   : > { %3229 = vmatpush3.bf16.msra.mxu1 %v3350_v9 }
 0x297   : > { %3230 = vmatprep.subr.bf16.mxu1 %v3460_v11 }
 0x29a   : > { %3231 = vmatpush3.bf16.msra.mxu1 %v3351_v48 }
 0x360   : > { %v2505_v56 = vpop.f32.mrb[32].mxu1 }
 0x361   : > { %v3214_v59 = vpop.f32.mrb[33].mxu1  ;;  %v2506_v43 = vadd.f32 %v2911_v41, %v2505_v56 }
 0x362   : > { %v2508_v17 = vpop.f32.mrb[34].mxu1 }
 0x363   : > { %v2509_v30 = vadd.f32 %v2911_v41, %v2508_v17  ;;  %v3215_v35 = vpop.f32.mrb[35].mxu1 }
 0x365   : > { %v2512_v15 = vpack.c.bf16 %v2509_v30, %v2506_v43 }
 0x367   : > { %3221 = vmatmul.mubr.msk.bf16.vlgmr.msra.gmra.mrb[32].mxu0 %vm776_vm0, %v2512_v15 }
 0x368   : > { %3240 = vmatprep.mubr.msk.bf16.mxu0 %vm3461_vm3, %v3460_v11  ;;  %3237 = vmatpush3.bf16.msra.mxu0 %v3352_v51 }
 0x369   : > { %3238 = vmatprep.subr.bf16.mxu0 %v3460_v11  ;;  %v2925_v11 = vld [vmem:[%s4500_s12] ss:$0 sm:$0xff] }
 0x36c   : > { %3239 = vmatpush3.bf16.msra.mxu0 %v3353_v18 }
 0x43a   : > { %v2573_v14 = vpop.f32.mrb[32].mxu0 }
 0x43b   : > { %v2574_v16 = vadd.f32 %v2915_v33, %v2573_v14  ;;  %v3222_v7 = vpop.f32.mrb[33].mxu0 }
 0x43c   : > { %v2576_v58 = vpop.f32.mrb[34].mxu0 }
 0x43d   : > { %v2577_v42 = vadd.f32 %v2915_v33, %v2576_v58  ;;  %v3223_v6 = vpop.f32.mrb[35].mxu0  ;;  %v2580_v34 = vmax.f32 %v2574_v16, 0.0 }
 0x43f   : > { %v2581_v61 = vmax.f32 %v2577_v42, 0.0 }
 0x441   : > { %v2582_v53 = vpack.c.bf16 %v2581_v61, %v2580_v34 }
 0x443   : > { %3233 = vmatmul.mubr.msk.bf16.vlgmr.msra.gmra.mrb[36].mxu1 %vm2615_vm11, %v2582_v53 }
 0x516   : > { %v2653_v28 = vpop.f32.mrb[36].mxu1 }
 0x517   : > { %v2660_v13 = vadd.f32 %v2653_v28, %v2506_v43  ;;  %v3234_v50 = vpop.f32.mrb[37].mxu1 }
 0x518   : > { %v2656_v27 = vpop.f32.mrb[38].mxu1 }
 0x519   : > { %v2661_v45 = vadd.f32 %v2656_v27, %v2509_v30  ;;  %v3235_v29 = vpop.f32.mrb[39].mxu1  ;;  %v2669_v46 = vadd.f32 %v2924_v60, %v2660_v13 }
 0x51b   : > { %v2670_v31 = vadd.f32 %v2924_v60, %v2661_v45 }
 0x51d   : > { %v2671_v39 = vpack.c.bf16 %v2670_v31, %v2669_v46 }
 0x51f   : > { %3241 = vmatmul.mubr.msk.bf16.vlgmr.msra.gmra.mrb[36].mxu0 %vm776_vm0, %v2671_v39 }
 0x5f2   : > { %v2732_v38 = vpop.f32.mrb[36].mxu0 }
 0x5f3   : > { %v2733_v62 = vadd.f32 %v2925_v11, %v2732_v38  ;;  %v3242_v0 = vpop.f32.mrb[37].mxu0 }
 0x5f4   : > { %v2735_v52 = vpop.f32.mrb[38].mxu0 }
 0x5f5   : > { %v2739_v2 = vmax.f32 %v2733_v62, 0.0  ;;  %v2736_v4 = vadd.f32 %v2925_v11, %v2735_v52  ;;  %v3243_v8 = vpop.f32.mrb[39].mxu0 }
 0x5f7   : > { %v2934_v25 = vpack.c.bf16 %v2739_v2, %v2739_v2  ;;  %v2740_v57 = vmax.f32 %v2736_v4, 0.0 }
 0x5f9   : > { %2750 = vst.msk [vmem:[%s489_s23] sm:$0xf] %vm2749_vm12, %v2934_v25  ;;  %v2935_v3 = vpack.c.bf16 %v2740_v57, %v2740_v57 }
 0x5fb   : > { %2751 = vst.msk [vmem:[%s489_s23 + $0x4] sm:$0xf] %vm2749_vm12, %v2935_v3 }
 0x5fc PF: > { %s23_s25 = sadd.s32 1, %s3456_s25  }
 0x5fd   : > { %p20_p5 = scmp.ge.s32.totalorder %s23_s25, 4  }
 0x5ff   :  { %22 = sbr.rel (!%p20_p5) target bundleno = 1 (0x1), region = 108 }

// kernel: dada_res_block_forward.11
= control target key start
LH: loop header
LB: loop body
LE: loop exit
PB: predicated region body
PF: predicated region fallthrough
CT: control target
= control target key end

     0   :  { %s3694_s21 = smov 0   ;;  %s4660_s0 = inlined_call_operand.vmem [shape: bf16[32,32], index: 0, kind: input, shape index: {}]   ;;  %s4661_s1 = inlined_call_operand.vmem [shape: bf16[32,16,64], index: 1, kind: input, shape index: {}]   ;;  %s4662_s2 = inlined_call_operand.vmem [shape: s32[32,16], index: 2, kind: input, shape index: {}]   ;;  %s4663_s3 = inlined_call_operand.vmem [shape: bf16[32,32], index: 3, kind: input, shape index: {}]   ;;  %s4664_s4 = inlined_call_operand.vmem [shape: f32[32,4], index: 4, kind: input, shape index: {}]   ;;  %s4665_s5 = inlined_call_operand.vmem [shape: f32[4,32], index: 5, kind: input, shape index: {}]   ;;  %s4666_s6 = inlined_call_operand.vmem [shape: bf16[32,32], index: 6, kind: input, shape index: {}]   ;;  %s4667_s7 = inlined_call_operand.vmem [shape: f32[1,32], index: 7, kind: input, shape index: {}]   ;;  %s4668_s8 = inlined_call_operand.vmem [shape: f32[1,32], index: 8, kind: input, shape index: {}]   ;;  %s4669_s9 = inlined_call_operand.vmem [shape: f32[1,32], index: 9, kind: input, shape index: {}]   ;;  %s4670_s10 = inlined_call_operand.vmem [shape: bf16[32,64], index: 10, kind: input, shape index: {}]   ;;  %s4671_s11 = inlined_call_operand.vmem [shape: f32[1,64], index: 11, kind: input, shape index: {}]   ;;  %s4672_s12 = inlined_call_operand.vmem [shape: bf16[64,32], index: 12, kind: input, shape index: {}]   ;;  %s4673_s13 = inlined_call_operand.vmem [shape: f32[1,32], index: 13, kind: input, shape index: {}]   ;;  %s4674_s14 = inlined_call_operand.vmem [shape: bf16[32,32], index: 14, kind: input, shape index: {}]   ;;  %s4675_s15 = inlined_call_operand.vmem [shape: f32[1,32], index: 15, kind: input, shape index: {}]   ;;  %s4676_s16 = inlined_call_operand.vmem [shape: bf16[32,32], index: 16, kind: output, shape index: {}]  }
   0x1   :  { %4734 = sst [smem:[#allocation15_spill]] %s4660_s0 }
   0x2 LB: > { %s2971_s22 = sadd.s32 4294967295, %s3603_s21   ;;  %p2975_p0 = scmp.ge.s32.totalorder %s3603_s21, 1  ;;  %s3603_s21 = sphi %s3694_s21, %s26_s21  }
   0x3   : > { %p497_p1 = scmp.lt.s32.totalorder %s3603_s21, 3 }
   0x5   : > { %p498_p2 = pnand %p2975_p0, %p497_p1 }
   0x7   : > { %501 = sbr.rel (%p498_p2) target bundleno = 1542 (0x606), region = 84 }
   0xe   : > { %v875_v0 = vld [vmem:[%s4664_s4] sm:$0xff]  ;;  %v876_v1 = vld [vmem:[%s4664_s4 + $0x8] sm:$0xff]  ;;  %v877_v2 = vld [vmem:[%s4664_s4 + $0x10] sm:$0xff]  ;;  %s2976_s29 = sshll.u32 %s2971_s22, 1  ;;  %s2978_s30 = sshll.u32 %s2971_s22, 4  ;;  %v669_v3 = vlaneseq  ;;  %vm879_vm0 = vcmask 261120  }
   0xf   : > { %v3391_v4 = vpack.c.bf16 %v876_v1, %v875_v0  ;;  %v878_v5 = vld [vmem:[%s4664_s4 + $0x18] sm:$0xff]  ;;  %p564_p3 = scmp.lt.s32.totalorder %s2976_s29, 3  ;;  %p570_p4 = scmp.lt.s32.totalorder %s2978_s30, 31  ;;  %v3605_v7 = vmov 1966171168   ;;  %vm1945_vm1 = vcmask 1043456  }
  0x10   : > { %v3395_v6 = vpack.c.bf16 %v878_v5, %v877_v2  ;;  %v667_v8 = vunpack.c.l.s4 %v3605_v7  ;;  %v3714_v9 = vshrl.u32 %v669_v3, 7  ;;  %s4735_s22 = sld [smem:[#allocation15_spill]]  ;;  %vm1415_vm2 = vcmask 31744   ;;  %s3606_s20 = smov 96  }
  0x11   : > { %3392 = vmatprep.subr.bf16.mxu0 %v3391_v4  ;;  %s4796_s29 = smov (!%p564_p3, %s2976_s29), 3  ;;  %s4798_s30 = smov (!%p570_p4, %s2978_s30), 31  ;;  %vm3608_vm3 = vmmov 0   ;;  %vm2537_vm4 = vcmask 1041409   ;;  %vm2539_vm5 = vcmask 1042434   ;;  %vm2541_vm6 = vcmask 1043459  }
  0x12   : > { %3394 = vmatpush3.bf16.msra.mxu0 %v3391_v4  ;;  %v668_v10 = vunpack.c.0.s8 %v667_v8  ;;  %s3719_s18 = sshll.u32 %s4796_s29, 2  ;;  %s3076_s24 = sshll.u32 %s4798_s30, 3  ;;  %v3738_v16 = vsub.s32 0, %v3714_v9  ;;  %v1220_v8 = vsub.s32 1, %v3714_v9  ;;  %vm2543_vm7 = vcmask 1044484  }
  0x13   : > { %3396 = vmatprep.subr.bf16.mxu0 %v3395_v6  ;;  %s3731_s27 = scalar_lea.vmem %s4661_s1, %s3076_s24  ;;  %s2982_s28 = sshll.u32 %s4796_s29, 3  ;;  %vm2545_vm8 = vcmask 1045509   ;;  %vm2547_vm9 = vcmask 1046534   ;;  %vm2549_vm10 = vcmask 1047559   ;;  %vm2742_vm11 = vcmask 523264  }
  0x14   : > { %v3726_v11 = vsub.s32 %v668_v10, %v3714_v9  ;;  %v3734_v14 = vld [vmem:[%s3731_s27] sm:$0xff]   ;;  %v3741_v18 = vld [vmem:[%s3731_s27 + $0x8] sm:$0xff]   ;;  %v3747_v23 = vld [vmem:[%s3731_s27 + $0x10] sm:$0xff]   ;;  %s3784_s0 = scalar_lea.vmem %s4662_s2, %s2982_s28  ;;  %s592_s19 = scalar_lea.vmem %s4676_s16, %s3719_s18  ;;  %vm2876_vm12 = vcmask 257024  }
  0x15   : > { %v4708_v19 = vunpack.c.l.bf16 %v3734_v14  ;;  %v4707_v20 = vunpack.c.h.bf16 %v3734_v14  ;;  %v4706_v26 = vunpack.c.l.bf16 %v3741_v18  ;;  %v3753_v28 = vld [vmem:[%s3731_s27 + $0x18] sm:$0xff]   ;;  %v4705_v29 = vunpack.c.h.bf16 %v3741_v18  ;;  %v3779_v45 = vld [vmem:[%s3731_s27 + $0x20] sm:$0xff]   ;;  %v3798_v53 = vld [vmem:[%s3731_s27 + $0x28] sm:$0xff]  }
  0x16   : > { %s567_s23 = scalar_lea.vmem %s4735_s22, %s3719_s18  ;;  %3398 = vmatpush3.bf16.msra.mxu0 %v3395_v6  ;;  %4736 = vst [vmem:[#allocation2_spill] sm:$0xff] %v3753_v28  ;;  %v4702_v30 = vunpack.c.l.bf16 %v3747_v23  ;;  %v4701_v39 = vunpack.c.h.bf16 %v3747_v23  ;;  %v4700_v40 = vunpack.c.l.bf16 %v3753_v28  ;;  %4737 = vst [vmem:[#allocation3_spill] sm:$0xff] %v3779_v45  ;;  %v4699_v47 = vunpack.c.h.bf16 %v3753_v28  ;;  %v1201_v52 = vld [vmem:[%s3784_s0] sm:$0xff]  ;;  %v3812_v62 = vld [vmem:[%s3731_s27 + $0x30] sm:$0xff]  }
  0x17   : > { %v3144_v12 = vld [vmem:[%s567_s23] sm:$0xff]   ;;  %v4694_v49 = vunpack.c.l.bf16 %v3779_v45  ;;  %4738 = vst [vmem:[#allocation4_spill] sm:$0xff] %v3798_v53  ;;  %v4693_v56 = vunpack.c.h.bf16 %v3779_v45  ;;  %v1203_v58 = vcvt.s32.f32 %v1201_v52  ;;  %v4690_v60 = vunpack.c.l.bf16 %v3798_v53  ;;  %4739 = vst [vmem:[#allocation5_spill] sm:$0xff] %v3812_v62  ;;  %v3826_v6 = vld [vmem:[%s3731_s27 + $0x38] sm:$0xff]   ;;  %s586_s23 = scalar_lea.vmem %s4663_s3, %s3719_s18 }
  0x18   : > { %v3145_v13 = vunpack.c.l.bf16 %v3144_v12  ;;  %v3800_v54 = vunpack.c.h.bf16 %v3144_v12  ;;  %v4689_v63 = vunpack.c.h.bf16 %v3798_v53  ;;  %v4686_v1 = vunpack.c.l.bf16 %v3812_v62  ;;  %4740 = vst [vmem:[#allocation6_spill] sm:$0xff] %v3826_v6  ;;  %v3879_v52 = vld [vmem:[%s3731_s27 + $0x50] sm:$0xff]  }
  0x19   : > { %v3820_v4 = vmul.f32 -1e+30, %v1203_v58  ;;  %v4679_v10 = vunpack.c.h.bf16 %v3812_v62  ;;  %4742 = vst [vmem:[#allocation8_spill] sm:$0xff] %v3879_v52 }
  0x1a   : > { %v672_v15 = vrot.slane %v3145_v13, %v3726_v11  ;;  %v665_v17 = vcombine.high %v3145_v13, %v3145_v13  ;;  %v721_v7 = vrot.slane %v3800_v54, %v3726_v11 }
  0x1c   : > { %v680_v21 = vcombine.high %v672_v15, %v672_v15  ;;  %v688_v22 = vrot.slane %v672_v15, %v3726_v11  ;;  %v679_v31 = vrot.slane %v665_v17, %v3726_v11  ;;  %v4678_v15 = vunpack.c.l.bf16 %v3826_v6 }
  0x1e   : > { %v710_v24 = vcombine.high %v688_v22, %v688_v22  ;;  %v766_v25 = vrot.slane %v688_v22, %v3738_v16  ;;  %v702_v27 = vrot.slane %v680_v21, %v3726_v11  ;;  %v695_v43 = vrot.slane %v679_v31, %v3726_v11 }
  0x1f   : > { %v681_v44 = vcombine.high %v679_v31, %v679_v31  ;;  %v737_v21 = vrot.slane %v721_v7, %v3726_v11  ;;  %v729_v22 = vcombine.high %v721_v7, %v721_v7  ;;  %v1231_v31 = vsub.s32 2, %v3714_v9 }
  0x20   : > { %v843_v32 = vmul.f32 %v4708_v19, %v766_v25  ;;  %v844_v33 = vmul.f32 %v4707_v20, %v766_v25  ;;  %v770_v34 = vrot.slane %v702_v27, %v3738_v16  ;;  %v774_v35 = vrot.slane %v710_v24, %v3738_v16 }
  0x21   : > { %v712_v36 = vcombine.high %v702_v27, %v702_v27  ;;  %v782_v50 = vrot.slane %v695_v43, %v3738_v16  ;;  %v709_v51 = vrot.slane %v681_v44, %v3726_v11  ;;  %v711_v57 = vcombine.high %v695_v43, %v695_v43  ;;  %v3847_v27 = vld [vmem:[%s3731_s27 + $0x40] sm:$0xff]  }
  0x22   : > { %3257 = vmatprep.mubr.msk.f32.mxu0 %vm879_vm0, %v843_v32  ;;  %v845_v37 = vmul.f32 %v4706_v26, %v770_v34  ;;  %v846_v38 = vmul.f32 %v4705_v29, %v770_v34  ;;  %v847_v41 = vmul.f32 %v4702_v30, %v774_v35  ;;  %v848_v46 = vmul.f32 %v4701_v39, %v774_v35 }
  0x23   : > { %3258 = vmatmul.mubr.msk.f32.vlgmr.msra.gmra.mrb[0].mxu0 %vm879_vm0, %v844_v33  ;;  %v778_v42 = vrot.slane %v712_v36, %v3738_v16  ;;  %v851_v59 = vmul.f32 %v4694_v49, %v782_v50  ;;  %v786_v61 = vrot.slane %v709_v51, %v3738_v16  ;;  %v852_v0 = vmul.f32 %v4693_v56, %v782_v50 }
  0x24   : > { %3260 = vmatprep.mubr.msk.f32.mxu0 %vm879_vm0, %v845_v37  ;;  %v790_v2 = vrot.slane %v711_v57, %v3738_v16  ;;  %v713_v3 = vcombine.high %v709_v51, %v709_v51  ;;  %v1210_v24 = vrot.slane %v3820_v4, %v3738_v16  ;;  %v1221_v25 = vrot.slane %v3820_v4, %v1220_v8 }
  0x25   : > { %v849_v48 = vmul.f32 %v4700_v40, %v778_v42  ;;  %v850_v55 = vmul.f32 %v4699_v47, %v778_v42  ;;  %v853_v5 = vmul.f32 %v4690_v60, %v786_v61  ;;  %v854_v12 = vmul.f32 %v4689_v63, %v786_v61 }
  0x26   : > { %v855_v13 = vmul.f32 %v4686_v1, %v790_v2  ;;  %v794_v17 = vrot.slane %v713_v3, %v3738_v16  ;;  %1212 = vbcast.lane.b32.xlu0 %v1210_v24, 256  ;;  %1223 = vbcast.lane.b32.xlu1 %v1221_v25, 256  ;;  %v856_v32 = vmul.f32 %v4679_v10, %v790_v2  ;;  %v4677_v33 = vunpack.c.h.bf16 %v3826_v6  ;;  %v3895_v3 = vld [vmem:[%s3731_s27 + $0x58] sm:$0xff]  }
  0x27   : > { %3261 = vmatmul.mubr.msk.f32.gmra.mrb[2].mxu0 %vm879_vm0, %v846_v38  ;;  %v4704_v35 = vunpack.c.l.bf16 %v3847_v27  ;;  %v798_v36 = vrot.slane %v737_v21, %v3738_v16  ;;  %v751_v37 = vrot.slane %v729_v22, %v3726_v11  ;;  %v3861_v38 = vld [vmem:[%s3731_s27 + $0x48] sm:$0xff]   ;;  %v1242_v42 = vsub.s32 3, %v3714_v9  ;;  %4743 = vst [vmem:[#allocation9_spill] sm:$0xff] %v3895_v3 }
  0x28   : > { %3263 = vmatprep.mubr.msk.f32.mxu0 %vm879_vm0, %v847_v41  ;;  %v857_v34 = vmul.f32 %v4678_v15, %v794_v17  ;;  %4741 = vst [vmem:[#allocation7_spill] sm:$0xff] %v3861_v38  ;;  %v1232_v41 = vrot.slane %v3820_v4, %v1231_v31  ;;  %v714_v43 = vcombine.high %v3800_v54, %v3800_v54  ;;  %v4698_v50 = vunpack.c.l.bf16 %v3861_v38 }
  0x29   : > { %v858_v44 = vmul.f32 %v4677_v33, %v794_v17  ;;  %v802_v51 = vrot.slane %v751_v37, %v3738_v16  ;;  %v759_v54 = vcombine.high %v737_v21, %v737_v21  ;;  %v1253_v57 = vsub.s32 4, %v3714_v9 }
  0x2a   : > { %1216 = vbcast.lane.b32.xlu0 %v1210_v24, 264  ;;  %1227 = vbcast.lane.b32.xlu1 %v1221_v25, 264  ;;  %v4696_v61 = vunpack.c.l.bf16 %v3879_v52  ;;  %v728_v7 = vrot.slane %v714_v43, %v3726_v11  ;;  %v4695_v21 = vunpack.c.h.bf16 %v3879_v52  ;;  %v4692_v22 = vunpack.c.l.bf16 %v3895_v3  ;;  %v1202_v43 = vld [vmem:[%s3784_s0 + $0x8] sm:$0xff] }
  0x2b   : > { %3264 = vmatmul.mubr.msk.f32.gmra.mrb[4].mxu0 %vm879_vm0, %v848_v46  ;;  %v4703_v46 = vunpack.c.h.bf16 %v3847_v27  ;;  %v806_v2 = vrot.slane %v759_v54, %v3738_v16 }
  0x2c   : > { %3266 = vmatprep.mubr.msk.f32.mxu0 %vm879_vm0, %v849_v48  ;;  %v859_v48 = vmul.f32 %v4704_v35, %v798_v36 }
  0x2d   : > { %v860_v58 = vmul.f32 %v4703_v46, %v798_v36  ;;  %v863_v24 = vmul.f32 %v4696_v61, %v806_v2  ;;  %v3913_v36 = vld [vmem:[%s3731_s27 + $0x60] sm:$0xff]  }
  0x2e   : > { %1238 = vbcast.lane.b32.xlu1 %v1232_v41, 264  ;;  %1234 = vbcast.lane.b32.xlu0 %v1232_v41, 256  ;;  %4744 = vst [vmem:[#allocation10_spill] sm:$0xff] %v3913_v36  ;;  %v1275_v41 = vsub.s32 6, %v3714_v9  ;;  %v4688_v54 = vunpack.c.l.bf16 %v3913_v36 }
  0x2f   : > { %3267 = vmatmul.mubr.msk.f32.gmra.mrb[6].mxu0 %vm879_vm0, %v850_v55  ;;  %v1243_v55 = vrot.slane %v3820_v4, %v1242_v42 }
  0x30   : > { %3269 = vmatprep.mubr.msk.f32.mxu0 %vm879_vm0, %v851_v59  ;;  %v4697_v59 = vunpack.c.h.bf16 %v3861_v38 }
  0x32   : > { %1249 = vbcast.lane.b32.xlu1 %v1243_v55, 264  ;;  %1245 = vbcast.lane.b32.xlu0 %v1243_v55, 256  ;;  %v862_v17 = vmul.f32 %v4697_v59, %v802_v51 }
  0x33   : > { %3270 = vmatmul.mubr.msk.f32.gmra.mrb[8].mxu0 %vm879_vm0, %v852_v0  ;;  %v861_v0 = vmul.f32 %v4698_v50, %v802_v51 }
  0x34   : > { %3272 = vmatprep.mubr.msk.f32.mxu0 %vm879_vm0, %v853_v5  ;;  %v761_v5 = vcombine.high %v751_v37, %v751_v37 }
  0x36   : > { %v810_v25 = vrot.slane %v761_v5, %v3738_v16  ;;  %v1204_v5 = vcvt.s32.f32 %v1202_v43  ;;  %v3947_v43 = vld [vmem:[%s3731_s27 + $0x70] sm:$0xff]  }
  0x37   : > { %3273 = vmatmul.mubr.msk.f32.gmra.mrb[10].mxu0 %vm879_vm0, %v854_v12  ;;  %v1254_v12 = vrot.slane %v3820_v4, %v1253_v57  ;;  %4746 = vst [vmem:[#allocation12_spill] sm:$0xff] %v3947_v43 }
  0x38   : > { %3275 = vmatprep.mubr.msk.f32.mxu0 %vm879_vm0, %v855_v13  ;;  %v1264_v13 = vsub.s32 5, %v3714_v9  ;;  %v865_v51 = vmul.f32 %v4692_v22, %v810_v25  ;;  %v1206_v33 = vmul.f32 -1e+30, %v1204_v5 }
  0x39   : > { %1260 = vbcast.lane.b32.xlu1 %v1254_v12, 264  ;;  %1256 = vbcast.lane.b32.xlu0 %v1254_v12, 256 }
  0x3a   : > { %v1265_v37 = vrot.slane %v3820_v4, %v1264_v13 }
  0x3b   : > { %3276 = vmatmul.mubr.msk.f32.gmra.mrb[12].mxu0 %vm879_vm0, %v856_v32  ;;  %v744_v32 = vrot.slane %v728_v7, %v3726_v11 }
  0x3c   : > { %3278 = vmatprep.mubr.msk.f32.mxu0 %vm879_vm0, %v857_v34  ;;  %v730_v34 = vcombine.high %v728_v7, %v728_v7  ;;  %v1286_v7 = vsub.s32 7, %v3714_v9 }
  0x3d   : > { %v814_v55 = vrot.slane %v744_v32, %v3738_v16  ;;  %1271 = vbcast.lane.b32.xlu1 %v1265_v37, 264  ;;  %1267 = vbcast.lane.b32.xlu0 %v1265_v37, 256  ;;  %v760_v37 = vcombine.high %v744_v32, %v744_v32  ;;  %v4683_v32 = vunpack.c.l.bf16 %v3947_v43 }
  0x3f   : > { %3279 = vmatmul.mubr.msk.f32.gmra.mrb[14].mxu0 %vm879_vm0, %v858_v44  ;;  %v864_v44 = vmul.f32 %v4695_v21, %v806_v2  ;;  %v1276_v2 = vrot.slane %v3820_v4, %v1275_v41  ;;  %v822_v5 = vrot.slane %v760_v37, %v3738_v16 }
  0x40   : > { %3281 = vmatprep.mubr.msk.f32.mxu0 %vm879_vm0, %v859_v48  ;;  %v4691_v48 = vunpack.c.h.bf16 %v3895_v3 }
  0x41   : > { %1282 = vbcast.lane.b32.xlu1 %v1276_v2, 264  ;;  %1278 = vbcast.lane.b32.xlu0 %v1276_v2, 256  ;;  %v3960_v2 = vld [vmem:[%s3731_s27 + $0x78] sm:$0xff]  }
  0x42   : > { %v866_v12 = vmul.f32 %v4691_v48, %v810_v25  ;;  %v1287_v25 = vrot.slane %v3820_v4, %v1286_v7  ;;  %4747 = vst [vmem:[#allocation13_spill] sm:$0xff] %v3960_v2  ;;  %v1298_v4 = vrot.slane %v1206_v33, %v3738_v16 }
  0x43   : > { %3282 = vmatmul.mubr.msk.f32.gmra.mrb[16].mxu0 %vm879_vm0, %v860_v58  ;;  %v758_v58 = vrot.slane %v730_v34, %v3726_v11  ;;  %v867_v11 = vmul.f32 %v4688_v54, %v814_v55 }
  0x44   : > { %3284 = vmatprep.mubr.msk.f32.mxu0 %vm879_vm0, %v861_v0  ;;  %v3931_v0 = vld [vmem:[%s3731_s27 + $0x68] sm:$0xff]  }
  0x45   : > { %4745 = vst [vmem:[#allocation11_spill] sm:$0xff] %v3931_v0  ;;  %v818_v34 = vrot.slane %v758_v58, %v3738_v16  ;;  %v762_v10 = vcombine.high %v758_v58, %v758_v58  ;;  %1293 = vbcast.lane.b32.xlu1 %v1287_v25, 264  ;;  %1289 = vbcast.lane.b32.xlu0 %v1287_v25, 256  ;;  %v4681_v58 = vunpack.c.l.bf16 %v3960_v2 }
  0x46   : > { %v1309_v25 = vrot.slane %v1206_v33, %v1220_v8 }
  0x47   : > { %3285 = vmatmul.mubr.msk.f32.gmra.mrb[18].mxu0 %vm879_vm0, %v862_v17  ;;  %v4687_v17 = vunpack.c.h.bf16 %v3913_v36  ;;  %v826_v37 = vrot.slane %v762_v10, %v3738_v16  ;;  %v1320_v16 = vrot.slane %v1206_v33, %v1231_v31  ;;  %v1331_v10 = vrot.slane %v1206_v33, %v1242_v42 }
  0x48   : > { %3287 = vmatprep.mubr.msk.f32.mxu0 %vm879_vm0, %v863_v24  ;;  %v4685_v24 = vunpack.c.l.bf16 %v3931_v0  ;;  %v1353_v31 = vrot.slane %v1206_v33, %v1264_v13  ;;  %v1375_v42 = vrot.slane %v1206_v33, %v1286_v7 }
  0x49   : > { %1304 = vbcast.lane.b32.xlu1 %v1298_v4, 264  ;;  %1300 = vbcast.lane.b32.xlu0 %v1298_v4, 256  ;;  %v1364_v4 = vrot.slane %v1206_v33, %v1275_v41 }
  0x4a   : > { %v869_v15 = vmul.f32 %v4685_v24, %v818_v34 }
  0x4b   : > { %3288 = vmatmul.mubr.msk.f32.gmra.mrb[20].mxu0 %vm879_vm0, %v864_v44  ;;  %v868_v44 = vmul.f32 %v4687_v17, %v814_v55 }
  0x4c   : > { %3290 = vmatprep.mubr.msk.f32.mxu0 %vm879_vm0, %v865_v51  ;;  %v4684_v51 = vunpack.c.h.bf16 %v3931_v0 }
  0x4d   : > { %1315 = vbcast.lane.b32.xlu1 %v1309_v25, 264  ;;  %1311 = vbcast.lane.b32.xlu0 %v1309_v25, 256 }
  0x4e   : > { %v870_v55 = vmul.f32 %v4684_v51, %v818_v34 }
  0x4f   : > { %3291 = vmatmul.mubr.msk.f32.gmra.mrb[22].mxu0 %vm879_vm0, %v866_v12  ;;  %v4682_v12 = vunpack.c.h.bf16 %v3947_v43 }
  0x50   : > { %3293 = vmatprep.mubr.msk.f32.mxu0 %vm879_vm0, %v867_v11  ;;  %v871_v11 = vmul.f32 %v4683_v32, %v822_v5 }
  0x51   : > { %v872_v34 = vmul.f32 %v4682_v12, %v822_v5  ;;  %1326 = vbcast.lane.b32.xlu1 %v1320_v16, 264  ;;  %1322 = vbcast.lane.b32.xlu0 %v1320_v16, 256  ;;  %v1342_v5 = vrot.slane %v1206_v33, %v1253_v57 }
  0x53   : > { %3294 = vmatmul.mubr.msk.f32.gmra.mrb[24].mxu0 %vm879_vm0, %v868_v44  ;;  %v4680_v44 = vunpack.c.h.bf16 %v3960_v2 }
  0x54   : > { %3296 = vmatprep.mubr.msk.f32.mxu0 %vm879_vm0, %v869_v15  ;;  %v873_v15 = vmul.f32 %v4681_v58, %v826_v37 }
  0x55   : > { %v874_v8 = vmul.f32 %v4680_v44, %v826_v37  ;;  %1337 = vbcast.lane.b32.xlu1 %v1331_v10, 264  ;;  %1333 = vbcast.lane.b32.xlu0 %v1331_v10, 256 }
  0x57   : > { %3297 = vmatmul.mubr.msk.f32.gmra.mrb[26].mxu0 %vm879_vm0, %v870_v55  ;;  %v1848_v55 = vld [vmem:[%s4665_s5] sm:$0xf] }
  0x58   : > { %3299 = vmatprep.mubr.msk.f32.mxu0 %vm879_vm0, %v871_v11  ;;  %3305 = vmatprep.subr.msk.mxu1 %vm1945_vm1, %v1848_v55 }
  0x59   : > { %1348 = vbcast.lane.b32.xlu1 %v1342_v5, 264  ;;  %1344 = vbcast.lane.b32.xlu0 %v1342_v5, 256 }
  0x5a   : > { %3306 = vmatpush3.msk.msra.mxu1 %vm1945_vm1, %v1848_v55 }
  0x5b   : > { %3300 = vmatmul.mubr.msk.f32.gmra.mrb[28].mxu0 %vm879_vm0, %v872_v34 }
  0x5c   : > { %3302 = vmatprep.mubr.msk.f32.mxu0 %vm879_vm0, %v873_v15 }
  0x5d   : > { %1359 = vbcast.lane.b32.xlu1 %v1353_v31, 264  ;;  %1355 = vbcast.lane.b32.xlu0 %v1353_v31, 256 }
  0x5f   : > { %3303 = vmatmul.mubr.msk.f32.gmra.mrb[30].mxu0 %vm879_vm0, %v874_v8 }
  0x61   : > { %1370 = vbcast.lane.b32.xlu1 %v1364_v4, 264  ;;  %1366 = vbcast.lane.b32.xlu0 %v1364_v4, 256 }
  0x65   : > { %1381 = vbcast.lane.b32.xlu1 %v1375_v42, 264  ;;  %1377 = vbcast.lane.b32.xlu0 %v1375_v42, 256 }
  0x98   : > { %v1224_v57 = vpop.permute.xlu1 %1223  ;;  %v1213_v11 = vpop.permute.xlu0 %1212 }
  0x9c   : > { %v1228_v13 = vpop.permute.xlu1 %1227  ;;  %v1217_v37 = vpop.permute.xlu0 %1216 }
  0xa0   : > { %v1239_v25 = vpop.permute.xlu1 %1238  ;;  %v1235_v34 = vpop.permute.xlu0 %1234 }
  0xa4   : > { %v1250_v16 = vpop.permute.xlu1 %1249  ;;  %v1246_v5 = vpop.permute.xlu0 %1245 }
  0xab   : > { %v1261_v51 = vpop.permute.xlu1 %1260 }
  0xaf   : > { %v1272_v54 = vpop.permute.xlu1 %1271 }
  0xf6   : > { %v3259_v9 = vpop.f32.mrb[0].mxu0 }
  0xf7   : > { %v1384_v41 = vadd.f32 %v3259_v9, %v1217_v37  ;;  %v1042_v15 = vpop.f32.mrb[1].mxu0 }
  0xf8   : > { %v1383_v33 = vadd.f32 %v1213_v11, %v1042_v15 }
  0xf9   : > { %v1417_v7 = vsel %vm1415_vm2, %v1384_v41, -inf }
  0xfa   : > { %v1416_v8 = vsel %vm1415_vm2, %v1383_v33, -inf  ;;  %v3262_v10 = vpop.f32.mrb[2].mxu0 }
  0xfb   : > { %v1418_v31 = vmax.f32 %v1416_v8, %v1417_v7  ;;  %v4001_v4 = vadd.f32 %v3262_v10, %v1228_v13  ;;  %v1052_v42 = vpop.f32.mrb[3].mxu0  ;;  %v1257_v13 = vpop.permute.xlu0 %1256 }
  0xfc   : > { %v4003_v55 = vadd.f32 %v1224_v57, %v1052_v42 }
  0xfd   : > { %v1419_v44 = vrot.slane %v1418_v31, 4  ;;  %v1426_v58 = vsel %vm1415_vm2, %v4001_v4, -inf }
  0xfe   : > { %v1425_v11 = vsel %vm1415_vm2, %v4003_v55, -inf  ;;  %v3265_v37 = vpop.f32.mrb[4].mxu0 }
  0xff   : > { %v1420_v9 = vmax.f32 %v1418_v31, %v1419_v44  ;;  %v1427_v15 = vmax.f32 %v1425_v11, %v1426_v58  ;;  %v4009_v12 = vadd.f32 %v3265_v37, %v1239_v25  ;;  %v1062_v32 = vpop.f32.mrb[5].mxu0  ;;  %v1268_v48 = vpop.permute.xlu0 %1267 }
 0x100   : > { %v4011_v7 = vadd.f32 %v1235_v34, %v1062_v32 }
 0x101   : > { %v1421_v8 = vrot.slane %v1420_v9, 2  ;;  %v1428_v57 = vrot.slane %v1427_v15, 4  ;;  %v1435_v10 = vsel %vm1415_vm2, %v4009_v12, -inf }
 0x102   : > { %v1434_v42 = vsel %vm1415_vm2, %v4011_v7, -inf  ;;  %v3268_v24 = vpop.f32.mrb[6].mxu0 }
 0x103   : > { %v1422_v1 = vmax.f32 %v1420_v9, %v1421_v8  ;;  %v1429_v17 = vmax.f32 %v1427_v15, %v1428_v57  ;;  %v1436_v44 = vmax.f32 %v1434_v42, %v1435_v10  ;;  %v4017_v58 = vadd.f32 %v3268_v24, %v1250_v16  ;;  %v1072_v25 = vpop.f32.mrb[7].mxu0 }
 0x104   : > { %v4019_v31 = vadd.f32 %v1246_v5, %v1072_v25 }
 0x105   : > { %v1423_v32 = vrot.slane %v1422_v1, 1  ;;  %v1430_v34 = vrot.slane %v1429_v17, 2  ;;  %v1437_v11 = vrot.slane %v1436_v44, 4  ;;  %v1444_v37 = vsel %vm1415_vm2, %v4017_v58, -inf }
 0x106   : > { %v1443_v63 = vsel %vm1415_vm2, %v4019_v31, -inf  ;;  %v3271_v60 = vpop.f32.mrb[8].mxu0 }
 0x107   : > { %v1424_v9 = vmax.f32 %v1422_v1, %v1423_v32  ;;  %v1431_v15 = vmax.f32 %v1429_v17, %v1430_v34  ;;  %v1438_v8 = vmax.f32 %v1436_v44, %v1437_v11  ;;  %v1445_v24 = vmax.f32 %v1443_v63, %v1444_v37  ;;  %v1082_v16 = vpop.f32.mrb[9].mxu0  ;;  %v1279_v11 = vpop.permute.xlu0 %1278 }
 0x108   : > { %v4025_v57 = vadd.f32 %v3271_v60, %v1261_v51  ;;  %v4027_v5 = vadd.f32 %v1257_v13, %v1082_v16  ;;  %v1283_v51 = vpop.permute.xlu1 %1282 }
 0x109   : > { %v1560_v10 = vsub.f32 %v1383_v33, %v1424_v9  ;;  %v1561_v42 = vsub.f32 %v1384_v41, %v1424_v9  ;;  %v1432_v25 = vrot.slane %v1431_v15, 1  ;;  %v1439_v22 = vrot.slane %v1438_v8, 2 }
 0x10a   : > { %v1446_v56 = vrot.slane %v1445_v24, 4  ;;  %v1453_v49 = vsel %vm1415_vm2, %v4025_v57, -inf  ;;  %v1452_v21 = vsel %vm1415_vm2, %v4027_v5, -inf  ;;  %v3274_v1 = vpop.f32.mrb[10].mxu0 }
 0x10b   : > { %v1592_v17 = vmul.f32 1.442695, %v1560_v10  ;;  %v1594_v44 = vmul.f32 1.442695, %v1561_v42  ;;  %v1433_v63 = vmax.f32 %v1431_v15, %v1432_v25  ;;  %v1440_v32 = vmax.f32 %v1438_v8, %v1439_v22  ;;  %v1092_v60 = vpop.f32.mrb[11].mxu0 }
 0x10c   : > { %v1447_v13 = vmax.f32 %v1445_v24, %v1446_v56  ;;  %v1454_v34 = vmax.f32 %v1452_v21, %v1453_v49  ;;  %v4033_v33 = vadd.f32 %v3274_v1, %v1272_v54  ;;  %v4035_v41 = vadd.f32 %v1268_v48, %v1092_v60 }
 0x10d   : > { %3501 = vpow2.f32 %v1592_v17  ;;  %v1562_v37 = vsub.f32 %v4003_v55, %v1433_v63  ;;  %v1563_v9 = vsub.f32 %v4001_v4, %v1433_v63  ;;  %v1441_v16 = vrot.slane %v1440_v32, 1 }
 0x10e   : > { %3503 = vpow2.f32 %v1594_v44  ;;  %v1448_v10 = vrot.slane %v1447_v13, 2  ;;  %v1455_v42 = vrot.slane %v1454_v34, 4  ;;  %v1462_v22 = vsel %vm1415_vm2, %v4033_v33, -inf  ;;  %v3277_v15 = vpop.f32.mrb[12].mxu0  ;;  %v1294_v44 = vpop.permute.xlu1 %1293 }
 0x10f   : > { %v1596_v56 = vmul.f32 1.442695, %v1562_v37  ;;  %v1598_v49 = vmul.f32 1.442695, %v1563_v9  ;;  %v1442_v21 = vmax.f32 %v1440_v32, %v1441_v16  ;;  %v1461_v48 = vsel %vm1415_vm2, %v4035_v41, -inf  ;;  %v1102_v54 = vpop.f32.mrb[13].mxu0  ;;  %v1290_v9 = vpop.permute.xlu0 %1289 }
 0x110   : > { %v1449_v8 = vmax.f32 %v1447_v13, %v1448_v10  ;;  %v1456_v24 = vmax.f32 %v1454_v34, %v1455_v42  ;;  %v1463_v55 = vmax.f32 %v1461_v48, %v1462_v22  ;;  %v4043_v25 = vadd.f32 %v3277_v15, %v1283_v51 }
 0x111   : > { %3505 = vpow2.f32 %v1596_v56  ;;  %v1564_v4 = vsub.f32 %v4011_v7, %v1442_v21  ;;  %v1565_v1 = vsub.f32 %v4009_v12, %v1442_v21  ;;  %v4047_v17 = vadd.f32 %v1279_v11, %v1102_v54 }
 0x112   : > { %3507 = vpow2.f32 %v1598_v49  ;;  %v1450_v63 = vrot.slane %v1449_v8, 1  ;;  %v1457_v32 = vrot.slane %v1456_v24, 2  ;;  %v1464_v60 = vrot.slane %v1463_v55, 4  ;;  %v3280_v37 = vpop.f32.mrb[14].mxu0 }
 0x113   : > { %v1600_v16 = vmul.f32 1.442695, %v1564_v4  ;;  %v1602_v13 = vmul.f32 1.442695, %v1565_v1  ;;  %v1471_v51 = vsel %vm1415_vm2, %v4043_v25, -inf  ;;  %v1470_v34 = vsel %vm1415_vm2, %v4047_v17, -inf  ;;  %v1305_v1 = vpop.permute.xlu1 %1304 }
 0x114   : > { %v1451_v7 = vmax.f32 %v1449_v8, %v1450_v63  ;;  %v1458_v10 = vmax.f32 %v1456_v24, %v1457_v32  ;;  %v1465_v12 = vmax.f32 %v1463_v55, %v1464_v60  ;;  %v1472_v11 = vmax.f32 %v1470_v34, %v1471_v51  ;;  %v1112_v42 = vpop.f32.mrb[15].mxu0 }
 0x115   : > { %3509 = vpow2.f32 %v1600_v16  ;;  %v4053_v22 = vadd.f32 %v3280_v37, %v1294_v44  ;;  %v4055_v15 = vadd.f32 %v1290_v9, %v1112_v42  ;;  %v1301_v42 = vpop.permute.xlu0 %1300 }
 0x116   : > { %3511 = vpow2.f32 %v1602_v13  ;;  %v1566_v56 = vsub.f32 %v4019_v31, %v1451_v7  ;;  %v1567_v49 = vsub.f32 %v4017_v58, %v1451_v7  ;;  %v1459_v21 = vrot.slane %v1458_v10, 1  ;;  %v3283_v48 = vpop.f32.mrb[16].mxu0 }
 0x117   : > { %v4059_v54 = vpop.eup %3501  ;;  %v1466_v4 = vrot.slane %v1465_v12, 2  ;;  %v1473_v8 = vrot.slane %v1472_v11, 4  ;;  %v1480_v24 = vsel %vm1415_vm2, %v4053_v22, -inf  ;;  %v1479_v55 = vsel %vm1415_vm2, %v4055_v15, -inf  ;;  %v1122_v44 = vpop.f32.mrb[17].mxu0 }
 0x118   : > { %v4065_v63 = vpop.eup %3503  ;;  %v1656_v31 = vsel %vm1415_vm2, %v4059_v54, 0.0  ;;  %v1604_v58 = vmul.f32 1.442695, %v1566_v56  ;;  %v1606_v32 = vmul.f32 1.442695, %v1567_v49  ;;  %v1460_v60 = vmax.f32 %v1458_v10, %v1459_v21 }
 0x119   : > { %v1657_v37 = vsel %vm1415_vm2, %v4065_v63, 0.0  ;;  %v1467_v9 = vmax.f32 %v1465_v12, %v1466_v4  ;;  %v1474_v16 = vmax.f32 %v1472_v11, %v1473_v8  ;;  %v1481_v13 = vmax.f32 %v1479_v55, %v1480_v24 }
 0x11a   : > { %v4071_v51 = vadd.f32 %v1657_v37, %v1656_v31  ;;  %3513 = vpow2.f32 %v1604_v58  ;;  %v1568_v34 = vsub.f32 %v4027_v5, %v1460_v60  ;;  %v1569_v7 = vsub.f32 %v4025_v57, %v1460_v60  ;;  %v4075_v61 = vpop.f32.mrb[18].mxu0  ;;  %v1316_v58 = vpop.permute.xlu1 %1315 }
 0x11b   : > { %v4077_v59 = vpop.eup %3505  ;;  %3515 = vpow2.f32 %v1606_v32  ;;  %v1468_v10 = vrot.slane %v1467_v9, 1  ;;  %v1475_v56 = vrot.slane %v1474_v16, 2  ;;  %v1482_v49 = vrot.slane %v1481_v13, 4  ;;  %v4079_v21 = vpop.f32.mrb[19].mxu0 }
 0x11c   : > { %v4081_v12 = vpop.eup %3507  ;;  %v1665_v5 = vsel %vm1415_vm2, %v4077_v59, 0.0  ;;  %v1608_v4 = vmul.f32 1.442695, %v1568_v34  ;;  %v1610_v57 = vmul.f32 1.442695, %v1569_v7  ;;  %v4088_v60 = vadd.f32 %v3283_v48, %v1305_v1 }
 0x11d   : > { %v1666_v8 = vsel %vm1415_vm2, %v4081_v12, 0.0  ;;  %v1469_v24 = vmax.f32 %v1467_v9, %v1468_v10  ;;  %v1476_v55 = vmax.f32 %v1474_v16, %v1475_v56  ;;  %v1483_v31 = vmax.f32 %v1481_v13, %v1482_v49 }
 0x11e   : > { %v1667_v32 = vadd.f32 %v1666_v8, %v1665_v5  ;;  %3517 = vpow2.f32 %v1608_v4  ;;  %v4090_v37 = vadd.f32 %v1301_v42, %v1122_v44  ;;  %v4092_v50 = vpop.f32.mrb[20].mxu0  ;;  %v1489_v44 = vsel %vm1415_vm2, %v4088_v60, -inf  ;;  %v1312_v42 = vpop.permute.xlu0 %1311 }
 0x11f   : > { %v4094_v47 = vpop.eup %3509  ;;  %3519 = vpow2.f32 %v1610_v57  ;;  %v1570_v34 = vsub.f32 %v4035_v41, %v1469_v24  ;;  %v1571_v7 = vsub.f32 %v4033_v33, %v1469_v24  ;;  %v1477_v40 = vrot.slane %v1476_v55, 1  ;;  %v4098_v9 = vpop.f32.mrb[21].mxu0 }
 0x120   : > { %v4100_v16 = vpop.eup %3511  ;;  %v1668_v13 = vrot.slane %v1667_v32, 4  ;;  %v1674_v48 = vsel %vm1415_vm2, %v4094_v47, 0.0  ;;  %v1484_v1 = vrot.slane %v1483_v31, 2  ;;  %v1488_v57 = vsel %vm1415_vm2, %v4090_v37, -inf  ;;  %v1327_v46 = vpop.permute.xlu1 %1326 }
 0x121   : > { %v1675_v10 = vsel %vm1415_vm2, %v4100_v16, 0.0  ;;  %v1612_v41 = vmul.f32 1.442695, %v1570_v34  ;;  %v1614_v56 = vmul.f32 1.442695, %v1571_v7  ;;  %v1478_v33 = vmax.f32 %v1476_v55, %v1477_v40 }
 0x122   : > { %v1669_v49 = vadd.f32 %v1668_v13, %v1667_v32  ;;  %v1676_v5 = vadd.f32 %v1675_v10, %v1674_v48  ;;  %v1485_v4 = vmax.f32 %v1483_v31, %v1484_v1  ;;  %v3292_v8 = vpop.f32.mrb[22].mxu0  ;;  %v1490_v30 = vmax.f32 %v1488_v57, %v1489_v44  ;;  %v1323_v10 = vpop.permute.xlu0 %1322 }
 0x123   : > { %3521 = vpow2.f32 %v1612_v41  ;;  %v1572_v24 = vsub.f32 %v4047_v17, %v1478_v33  ;;  %v1573_v39 = vsub.f32 %v4043_v25, %v1478_v33  ;;  %v4112_v35 = vpop.f32.mrb[23].mxu0  ;;  %v4127_v57 = vadd.f32 %v4075_v61, %v1316_v58 }
 0x124   : > { %v4114_v29 = vpop.eup %3513  ;;  %v1670_v34 = vrot.slane %v1669_v49, 2  ;;  %v1677_v40 = vrot.slane %v1676_v5, 4  ;;  %3523 = vpow2.f32 %v1614_v56  ;;  %v1486_v55 = vrot.slane %v1485_v4, 1  ;;  %v1338_v58 = vpop.permute.xlu1 %1337 }
 0x125   : > { %v4116_v31 = vpop.eup %3515  ;;  %v1683_v32 = vsel %vm1415_vm2, %v4114_v29, 0.0  ;;  %v1616_v7 = vmul.f32 1.442695, %v1572_v24  ;;  %v1618_v13 = vmul.f32 1.442695, %v1573_v39  ;;  %v1491_v17 = vrot.slane %v1490_v30, 4 }
 0x126   : > { %v4120_v48 = vadd.f32 %v1670_v34, %v1669_v49  ;;  %v1678_v25 = vadd.f32 %v1677_v40, %v1676_v5  ;;  %v1684_v1 = vsel %vm1415_vm2, %v4116_v31, 0.0  ;;  %v1487_v44 = vmax.f32 %v1485_v4, %v1486_v55  ;;  %v4124_v41 = vpop.f32.mrb[24].mxu0 }
 0x127   : > { %v1685_v56 = vadd.f32 %v1684_v1, %v1683_v32  ;;  %3525 = vpow2.f32 %v1616_v7  ;;  %v1492_v33 = vmax.f32 %v1490_v30, %v1491_v17  ;;  %v4129_v26 = vpop.f32.mrb[25].mxu0  ;;  %v1498_v61 = vsel %vm1415_vm2, %v4127_v57, -inf }
 0x128   : > { %v4131_v39 = vpop.eup %3517  ;;  %v1679_v49 = vrot.slane %v1678_v25, 2  ;;  %3527 = vpow2.f32 %v1618_v13  ;;  %v1574_v5 = vsub.f32 %v4055_v15, %v1487_v44  ;;  %v1575_v24 = vsub.f32 %v4053_v22, %v1487_v44 }
 0x129   : > { %v4135_v4 = vpop.eup %3519  ;;  %v1686_v34 = vrot.slane %v1685_v56, 4  ;;  %v1692_v40 = vsel %vm1415_vm2, %v4131_v39, 0.0  ;;  %v1493_v30 = vrot.slane %v1492_v33, 2  ;;  %v4148_v44 = vadd.f32 %v1312_v42, %v4079_v21 }
 0x12a   : > { %v4141_v55 = vadd.f32 %v1679_v49, %v1678_v25  ;;  %v1693_v32 = vsel %vm1415_vm2, %v4135_v4, 0.0  ;;  %v1620_v7 = vmul.f32 1.442695, %v1574_v5  ;;  %v1622_v15 = vmul.f32 1.442695, %v1575_v24  ;;  %v4145_v13 = vpop.f32.mrb[26].mxu0  ;;  %v1334_v5 = vpop.permute.xlu0 %1333 }
 0x12b   : > { %v1687_v22 = vadd.f32 %v1686_v34, %v1685_v56  ;;  %v1694_v17 = vadd.f32 %v1693_v32, %v1692_v40  ;;  %v1494_v1 = vmax.f32 %v1492_v33, %v1493_v30  ;;  %v4150_v20 = vpop.f32.mrb[27].mxu0  ;;  %v4153_v19 = vadd.f32 %v4092_v50, %v1327_v46 }
 0x12c   : > { %3529 = vpow2.f32 %v1620_v7  ;;  %v4156_v25 = vadd.f32 %v1323_v10, %v4098_v9  ;;  %v4158_v49 = vadd.f32 %v3292_v8, %v1338_v58  ;;  %v1497_v46 = vsel %vm1415_vm2, %v4148_v44, -inf }
 0x12d   : > { %v4160_v24 = vpop.eup %3521  ;;  %v1688_v56 = vrot.slane %v1687_v22, 2  ;;  %v1695_v34 = vrot.slane %v1694_v17, 4  ;;  %3531 = vpow2.f32 %v1622_v15  ;;  %v1495_v33 = vrot.slane %v1494_v1, 1 }
 0x12e   : > { %v4162_v21 = vpop.eup %3523  ;;  %v1701_v42 = vsel %vm1415_vm2, %v4160_v24, 0.0  ;;  %v1507_v50 = vsel %vm1415_vm2, %v4153_v19, -inf  ;;  %v1506_v9 = vsel %vm1415_vm2, %v4156_v25, -inf  ;;  %v4172_v8 = vpop.f32.mrb[28].mxu0  ;;  %v1499_v15 = vmax.f32 %v1497_v46, %v1498_v61 }
 0x12f   : > { %v4174_v10 = vadd.f32 %v1688_v56, %v1687_v22  ;;  %v1696_v40 = vadd.f32 %v1695_v34, %v1694_v17  ;;  %v1702_v30 = vsel %vm1415_vm2, %v4162_v21, 0.0  ;;  %v1496_v58 = vmax.f32 %v1494_v1, %v1495_v33  ;;  %v4178_v32 = vpop.f32.mrb[29].mxu0  ;;  %v1349_v56 = vpop.permute.xlu1 %1348 }
 0x130   : > { %v1703_v7 = vadd.f32 %v1702_v30, %v1701_v42  ;;  %v1508_v11 = vmax.f32 %v1506_v9, %v1507_v50  ;;  %v1516_v2 = vsel %vm1415_vm2, %v4158_v49, -inf  ;;  %v4187_v17 = vadd.f32 %v1334_v5, %v4112_v35  ;;  %v1345_v46 = vpop.permute.xlu0 %1344 }
 0x131   : > { %v4182_v43 = vpop.eup %3525  ;;  %v1697_v6 = vrot.slane %v1696_v40, 2  ;;  %v1576_v0 = vsub.f32 %v4090_v37, %v1496_v58  ;;  %v1577_v22 = vsub.f32 %v4088_v60, %v1496_v58  ;;  %v1500_v33 = vrot.slane %v1499_v15, 4 }
 0x132   : > { %v4189_v1 = vpop.eup %3527  ;;  %v1704_v34 = vrot.slane %v1703_v7, 4  ;;  %v1710_v61 = vsel %vm1415_vm2, %v4182_v43, 0.0  ;;  %v1509_v42 = vrot.slane %v1508_v11, 4  ;;  %v4193_v50 = vpop.f32.mrb[30].mxu0  ;;  %v1515_v53 = vsel %vm1415_vm2, %v4187_v17, -inf }
 0x133   : > { %v4195_v9 = vadd.f32 %v1697_v6, %v1696_v40  ;;  %v1711_v60 = vsel %vm1415_vm2, %v4189_v1, 0.0  ;;  %v1624_v37 = vmul.f32 1.442695, %v1576_v0  ;;  %v1626_v35 = vmul.f32 1.442695, %v1577_v22  ;;  %v4199_v5 = vpop.f32.mrb[31].mxu0 }
 0x134   : > { %v1705_v30 = vadd.f32 %v1704_v34, %v1703_v7  ;;  %v1712_v58 = vadd.f32 %v1711_v60, %v1710_v61  ;;  %v1501_v62 = vmax.f32 %v1499_v15, %v1500_v33  ;;  %v1510_v36 = vmax.f32 %v1508_v11, %v1509_v42 }
 0x135   : > { %3533 = vpow2.f32 %v1624_v37  ;;  %v4204_v3 = vadd.f32 %v4124_v41, %v1349_v56  ;;  %v4207_v6 = vadd.f32 %v1345_v46, %v4129_v26  ;;  %v1517_v34 = vmax.f32 %v1515_v53, %v1516_v2  ;;  %v1360_v56 = vpop.permute.xlu1 %1359  ;;  %v1356_v46 = vpop.permute.xlu0 %1355 }
 0x136   : > { %v4209_v40 = vpop.eup %3529  ;;  %v1706_v0 = vrot.slane %v1705_v30, 2  ;;  %v1713_v22 = vrot.slane %v1712_v58, 4  ;;  %3535 = vpow2.f32 %v1626_v35  ;;  %v1502_v45 = vrot.slane %v1501_v62, 2 }
 0x137   : > { %v4211_v7 = vpop.eup %3531  ;;  %v1719_v11 = vsel %vm1415_vm2, %v4209_v40, 0.0  ;;  %v1511_v15 = vrot.slane %v1510_v36, 2  ;;  %v1525_v41 = vsel %vm1415_vm2, %v4204_v3, -inf  ;;  %v1518_v35 = vrot.slane %v1517_v34, 4 }
 0x138   : > { %4748 = vst [vmem:[#allocation14_spill] sm:$0xff] %v4211_v7  ;;  %v4217_v61 = vadd.f32 %v1706_v0, %v1705_v30  ;;  %v1714_v26 = vadd.f32 %v1713_v22, %v1712_v58  ;;  %v1720_v33 = vsel %vm1415_vm2, %v4211_v7, 0.0  ;;  %v1503_v42 = vmax.f32 %v1501_v62, %v1502_v45 }
 0x139   : > { %v1721_v60 = vadd.f32 %v1720_v33, %v1719_v11  ;;  %v1512_v37 = vmax.f32 %v1510_v36, %v1511_v15  ;;  %v1524_v52 = vsel %vm1415_vm2, %v4207_v6, -inf  ;;  %v4224_v28 = vadd.f32 %v4145_v13, %v1360_v56  ;;  %v1371_v56 = vpop.permute.xlu1 %1370 }
 0x13a   : > { %v1715_v38 = vrot.slane %v1714_v26, 2  ;;  %v1504_v53 = vrot.slane %v1503_v42, 1  ;;  %v1526_v2 = vmax.f32 %v1524_v52, %v1525_v41  ;;  %v1519_v58 = vmax.f32 %v1517_v34, %v1518_v35 }
 0x13b   : > { %v1722_v30 = vrot.slane %v1721_v60, 4  ;;  %v1513_v0 = vrot.slane %v1512_v37, 1  ;;  %v4227_v22 = vadd.f32 %v1356_v46, %v4150_v20  ;;  %v1534_v11 = vsel %vm1415_vm2, %v4224_v28, -inf }
 0x13c   : > { %v4229_v45 = vadd.f32 %v1715_v38, %v1714_v26  ;;  %v1505_v62 = vmax.f32 %v1503_v42, %v1504_v53  ;;  %v1527_v36 = vrot.slane %v1526_v2, 4  ;;  %v1520_v7 = vrot.slane %v1519_v58, 2  ;;  %v1367_v38 = vpop.permute.xlu0 %1366 }
 0x13d   : > { %v1723_v15 = vadd.f32 %v1722_v30, %v1721_v60  ;;  %v1514_v33 = vmax.f32 %v1512_v37, %v1513_v0  ;;  %v1533_v52 = vsel %vm1415_vm2, %v4227_v22, -inf }
 0x13e   : > { %v1578_v13 = vsub.f32 %v4148_v44, %v1505_v62  ;;  %v1579_v34 = vsub.f32 %v4127_v57, %v1505_v62  ;;  %v1528_v41 = vmax.f32 %v1526_v2, %v1527_v36  ;;  %v1535_v20 = vmax.f32 %v1533_v52, %v1534_v11 }
 0x13f   : > { %v4237_v26 = vpop.eup %3533  ;;  %v1724_v42 = vrot.slane %v1723_v15, 2  ;;  %v1580_v46 = vsub.f32 %v4156_v25, %v1514_v33  ;;  %v1581_v60 = vsub.f32 %v4153_v19, %v1514_v33  ;;  %v1521_v37 = vmax.f32 %v1519_v58, %v1520_v7 }
 0x140   : > { %v4241_v35 = vpop.eup %3535  ;;  %v1728_v53 = vsel %vm1415_vm2, %v4237_v26, 0.0  ;;  %v1628_v44 = vmul.f32 1.442695, %v1578_v13  ;;  %v1630_v30 = vmul.f32 1.442695, %v1579_v34  ;;  %v1529_v57 = vrot.slane %v1528_v41, 2  ;;  %v1382_v34 = vpop.permute.xlu1 %1381 }
 0x141   : > { %v4245_v2 = vadd.f32 %v1724_v42, %v1723_v15  ;;  %v1729_v0 = vsel %vm1415_vm2, %v4241_v35, 0.0  ;;  %v1632_v62 = vmul.f32 1.442695, %v1580_v46  ;;  %v1634_v36 = vmul.f32 1.442695, %v1581_v60  ;;  %v1378_v42 = vpop.permute.xlu0 %1377 }
 0x142   : > { %v1730_v11 = vadd.f32 %v1729_v0, %v1728_v53  ;;  %3537 = vpow2.f32 %v1628_v44  ;;  %v1522_v25 = vrot.slane %v1521_v37, 1  ;;  %v1530_v19 = vmax.f32 %v1528_v41, %v1529_v57 }
 0x143   : > { %3539 = vpow2.f32 %v1630_v30  ;;  %v1536_v7 = vrot.slane %v1535_v20, 4  ;;  %v4250_v58 = vadd.f32 %v4172_v8, %v1371_v56  ;;  %v4253_v33 = vadd.f32 %v1367_v38, %v4178_v32 }
 0x144   : > { %v1731_v52 = vrot.slane %v1730_v11, 4  ;;  %3541 = vpow2.f32 %v1632_v62  ;;  %v1523_v15 = vmax.f32 %v1521_v37, %v1522_v25  ;;  %v1531_v13 = vrot.slane %v1530_v19, 1 }
 0x145   : > { %3543 = vpow2.f32 %v1634_v36  ;;  %v1537_v46 = vmax.f32 %v1535_v20, %v1536_v7  ;;  %v1543_v60 = vsel %vm1415_vm2, %v4250_v58, -inf  ;;  %v1542_v41 = vsel %vm1415_vm2, %v4253_v33, -inf }
 0x146   : > { %v1732_v53 = vadd.f32 %v1731_v52, %v1730_v11  ;;  %v1582_v8 = vsub.f32 %v4187_v17, %v1523_v15  ;;  %v1583_v32 = vsub.f32 %v4158_v49, %v1523_v15  ;;  %v1532_v56 = vmax.f32 %v1530_v19, %v1531_v13 }
 0x147   : > { %v1538_v38 = vrot.slane %v1537_v46, 2  ;;  %v1544_v44 = vmax.f32 %v1542_v41, %v1543_v60  ;;  %v4262_v37 = vadd.f32 %v4193_v50, %v1382_v34  ;;  %v4265_v30 = vadd.f32 %v1378_v42, %v4199_v5 }
 0x148   : > { %v1733_v20 = vrot.slane %v1732_v53, 2  ;;  %v1636_v57 = vmul.f32 1.442695, %v1582_v8  ;;  %v1638_v0 = vmul.f32 1.442695, %v1583_v32  ;;  %v1584_v62 = vsub.f32 %v4207_v6, %v1532_v56 }
 0x149   : > { %v1585_v36 = vsub.f32 %v4204_v3, %v1532_v56  ;;  %v1539_v11 = vmax.f32 %v1537_v46, %v1538_v38  ;;  %v1545_v17 = vrot.slane %v1544_v44, 4  ;;  %v1552_v49 = vsel %vm1415_vm2, %v4262_v37, -inf }
 0x14a   : > { %v4271_v25 = vadd.f32 %v1733_v20, %v1732_v53  ;;  %3545 = vpow2.f32 %v1636_v57  ;;  %v1640_v50 = vmul.f32 1.442695, %v1584_v62  ;;  %v1551_v5 = vsel %vm1415_vm2, %v4265_v30, -inf }
 0x14b   : > { %3547 = vpow2.f32 %v1638_v0  ;;  %v1642_v19 = vmul.f32 1.442695, %v1585_v36  ;;  %v1540_v7 = vrot.slane %v1539_v11, 1  ;;  %v1546_v52 = vmax.f32 %v1544_v44, %v1545_v17 }
 0x14c   : > { %v4275_v15 = vpop.eup %3537  ;;  %3549 = vpow2.f32 %v1640_v50  ;;  %v1553_v3 = vmax.f32 %v1551_v5, %v1552_v49  ;;  %v4749_v6 = vrot.slane %v4071_v51, 4  ;;  %v1672_v34 = vrot.slane %v4120_v48, 1 }
 0x14d   : > { %v4281_v42 = vpop.eup %3539  ;;  %v1737_v46 = vsel %vm1415_vm2, %v4275_v15, 0.0  ;;  %3551 = vpow2.f32 %v1642_v19  ;;  %v1541_v60 = vmax.f32 %v1539_v11, %v1540_v7  ;;  %v1547_v41 = vrot.slane %v1546_v52, 2 }
 0x14e   : > { %v1660_v13 = vadd.f32 %v4749_v6, %v4071_v51  ;;  %v4285_v53 = vpop.eup %3541  ;;  %v1738_v8 = vsel %vm1415_vm2, %v4281_v42, 0.0  ;;  %v1554_v32 = vrot.slane %v1553_v3, 4  ;;  %v1673_v38 = vadd.f32 %v1672_v34, %v4120_v48 }
 0x14f   : > { %v4290_v51 = vpop.eup %3543  ;;  %v1739_v44 = vadd.f32 %v1738_v8, %v1737_v46  ;;  %v1746_v20 = vsel %vm1415_vm2, %v4285_v53, 0.0  ;;  %v1586_v57 = vsub.f32 %v4227_v22, %v1541_v60  ;;  %v1587_v0 = vsub.f32 %v4224_v28, %v1541_v60 }
 0x150   : > { %v1661_v56 = vrot.slane %v1660_v13, 2  ;;  %v1747_v62 = vsel %vm1415_vm2, %v4290_v51, 0.0  ;;  %v1548_v36 = vmax.f32 %v1546_v52, %v1547_v41  ;;  %v1555_v11 = vmax.f32 %v1553_v3, %v1554_v32 }
 0x151   : > { %v1740_v49 = vrot.slane %v1739_v44, 4  ;;  %v1748_v50 = vadd.f32 %v1747_v62, %v1746_v20  ;;  %v1644_v5 = vmul.f32 1.442695, %v1586_v57  ;;  %v1646_v48 = vmul.f32 1.442695, %v1587_v0 }
 0x152   : > { %v1662_v17 = vadd.f32 %v1661_v56, %v1660_v13  ;;  %v1549_v19 = vrot.slane %v1548_v36, 1  ;;  %v1556_v7 = vrot.slane %v1555_v11, 2  ;;  %3553 = vrcp.f32 %v1673_v38 }
 0x153   : > { %v1741_v34 = vadd.f32 %v1740_v49, %v1739_v44  ;;  %v1749_v46 = vrot.slane %v1748_v50, 4  ;;  %3555 = vpow2.f32 %v1644_v5  ;;  %v1681_v22 = vrot.slane %v4141_v55, 1 }
 0x154   : > { %v1663_v6 = vrot.slane %v1662_v17, 1  ;;  %v4299_v28 = vpop.eup %3545  ;;  %3557 = vpow2.f32 %v1646_v48  ;;  %v1550_v60 = vmax.f32 %v1548_v36, %v1549_v19  ;;  %v1557_v52 = vmax.f32 %v1555_v11, %v1556_v7 }
 0x155   : > { %v4301_v13 = vpop.eup %3547  ;;  %v1742_v41 = vrot.slane %v1741_v34, 2  ;;  %v1750_v8 = vadd.f32 %v1749_v46, %v1748_v50  ;;  %v1755_v32 = vsel %vm1415_vm2, %v4299_v28, 0.0  ;;  %v1682_v56 = vadd.f32 %v1681_v22, %v4141_v55 }
 0x156   : > { %v1664_v3 = vadd.f32 %v1663_v6, %v1662_v17  ;;  %v4306_v38 = vpop.eup %3549  ;;  %v1756_v44 = vsel %vm1415_vm2, %v4301_v13, 0.0  ;;  %v1588_v20 = vsub.f32 %v4253_v33, %v1550_v60  ;;  %v1589_v57 = vsub.f32 %v4250_v58, %v1550_v60 }
 0x157   : > { %v1558_v0 = vrot.slane %v1557_v52, 1  ;;  %v4312_v62 = vpop.eup %3551  ;;  %v4314_v36 = vadd.f32 %v1742_v41, %v1741_v34  ;;  %v1751_v11 = vrot.slane %v1750_v8, 2  ;;  %v1757_v17 = vadd.f32 %v1756_v44, %v1755_v32 }
 0x158   : > { %v1764_v49 = vsel %vm1415_vm2, %v4306_v38, 0.0  ;;  %v1765_v55 = vsel %vm1415_vm2, %v4312_v62, 0.0  ;;  %v1648_v50 = vmul.f32 1.442695, %v1588_v20  ;;  %v1650_v5 = vmul.f32 1.442695, %v1589_v57 }
 0x159   : > { %v1559_v48 = vmax.f32 %v1557_v52, %v1558_v0  ;;  %v1752_v19 = vadd.f32 %v1751_v11, %v1750_v8  ;;  %v1758_v33 = vrot.slane %v1757_v17, 4  ;;  %v1766_v7 = vadd.f32 %v1765_v55, %v1764_v49 }
 0x15a   : > { %3559 = vrcp.f32 %v1664_v3  ;;  %v1690_v34 = vrot.slane %v4174_v10, 1  ;;  %v1699_v60 = vrot.slane %v4195_v9, 1  ;;  %v1717_v55 = vrot.slane %v4229_v45, 1 }
 0x15b   : > { %3561 = vpow2.f32 %v1648_v50  ;;  %v1590_v58 = vsub.f32 %v4265_v30, %v1559_v48  ;;  %v1591_v6 = vsub.f32 %v4262_v37, %v1559_v48  ;;  %v1759_v46 = vadd.f32 %v1758_v33, %v1757_v17 }
 0x15c   : > { %v1767_v22 = vrot.slane %v1766_v7, 4  ;;  %3563 = vpow2.f32 %v1650_v5  ;;  %v3554_v41 = vpop.eup %3553  ;;  %v1691_v52 = vadd.f32 %v1690_v34, %v4174_v10  ;;  %v1700_v11 = vadd.f32 %v1699_v60, %v4195_v9 }
 0x15d   : > { %v1652_v32 = vmul.f32 1.442695, %v1590_v58  ;;  %v1654_v44 = vmul.f32 1.442695, %v1591_v6  ;;  %3565 = vrcp.f32 %v1682_v56  ;;  %v4325_v8 = vpop.eup %3555  ;;  %v1760_v3 = vrot.slane %v1759_v46, 2 }
 0x15e   : > { %v1768_v20 = vadd.f32 %v1767_v22, %v1766_v7  ;;  %v1818_v30 = vmul.f32 %v3554_v41, %v4077_v59  ;;  %v4329_v37 = vmul.f32 %v3554_v41, %v4081_v12  ;;  %v4331_v57 = vpop.eup %3557  ;;  %v1773_v0 = vsel %vm1415_vm2, %v4325_v8, 0.0 }
 0x15f   : > { %3567 = vpow2.f32 %v1652_v32  ;;  %v1708_v56 = vrot.slane %v4217_v61, 1  ;;  %v1761_v10 = vadd.f32 %v1760_v3, %v1759_v46  ;;  %v1774_v49 = vsel %vm1415_vm2, %v4331_v57, 0.0 }
 0x160   : > { %v1769_v17 = vrot.slane %v1768_v20, 2  ;;  %3569 = vpow2.f32 %v1654_v44  ;;  %v1775_v59 = vadd.f32 %v1774_v49, %v1773_v0  ;;  %v1726_v5 = vrot.slane %v4245_v2, 1 }
 0x161   : > { %3571 = vrcp.f32 %v1691_v52  ;;  %v1709_v12 = vadd.f32 %v1708_v56, %v4217_v61  ;;  %v1735_v9 = vrot.slane %v4271_v25, 1  ;;  %v1718_v33 = vadd.f32 %v1717_v55, %v4229_v45 }
 0x162   : > { %v1770_v50 = vadd.f32 %v1769_v17, %v1768_v20  ;;  %3573 = vrcp.f32 %v1700_v11  ;;  %v1776_v48 = vrot.slane %v1775_v59, 4  ;;  %v1744_v7 = vrot.slane %v4314_v36, 1 }
 0x163   : > { %3575 = vrcp.f32 %v1709_v12  ;;  %v1727_v6 = vadd.f32 %v1726_v5, %v4245_v2  ;;  %v1736_v34 = vadd.f32 %v1735_v9, %v4271_v25  ;;  %v1753_v61 = vrot.slane %v1752_v19, 1 }
 0x164   : > { %v3560_v58 = vpop.eup %3559  ;;  %v1762_v46 = vrot.slane %v1761_v10, 1  ;;  %v1777_v60 = vadd.f32 %v1776_v48, %v1775_v59  ;;  %3577 = vrcp.f32 %v1718_v33  ;;  %v1745_v2 = vadd.f32 %v1744_v7, %v4314_v36 }
 0x165   : > { %v4347_v22 = vpop.eup %3561  ;;  %v1816_v41 = vmul.f32 %v3560_v58, %v4059_v54  ;;  %v1817_v32 = vmul.f32 %v3560_v58, %v4065_v63  ;;  %3579 = vrcp.f32 %v1727_v6  ;;  %v1754_v52 = vadd.f32 %v1753_v61, %v1752_v19 }
 0x166   : > { %v4351_v44 = vpop.eup %3563  ;;  %v1782_v45 = vsel %vm1415_vm2, %v4347_v22, 0.0  ;;  %v1778_v3 = vrot.slane %v1777_v60, 2  ;;  %3581 = vrcp.f32 %v1736_v34  ;;  %v1763_v54 = vadd.f32 %v1762_v46, %v1761_v10 }
 0x167   : > { %v3566_v25 = vpop.eup %3565  ;;  %v1783_v20 = vsel %vm1415_vm2, %v4351_v44, 0.0  ;;  %3307 = vmatprep.mubr.msk.f32.mxu1 %vm1415_vm2, %v1816_v41  ;;  %3583 = vrcp.f32 %v1745_v2  ;;  %v1771_v19 = vrot.slane %v1770_v50, 1  ;;  %v4750_v17 = vunpack.c.l.bf16 %v3734_v14 }
 0x168   : > { %v1784_v63 = vadd.f32 %v1783_v20, %v1782_v45  ;;  %3308 = vmatmul.mubr.msk.f32.vlgmr.msra.gmra.mrb[0].mxu1 %vm1415_vm2, %v1817_v32  ;;  %v1820_v0 = vmul.f32 %v3566_v25, %v4094_v47  ;;  %v1821_v11 = vmul.f32 %v3566_v25, %v4100_v16  ;;  %v1779_v36 = vadd.f32 %v1778_v3, %v1777_v60 }
 0x169   : > { %v4362_v56 = vpop.eup %3567  ;;  %3310 = vmatprep.mubr.msk.f32.mxu1 %vm1415_vm2, %v1818_v30  ;;  %3585 = vrcp.f32 %v1754_v52  ;;  %v4751_v49 = vunpack.c.h.bf16 %v3734_v14  ;;  %v4752_v16 = vunpack.c.l.bf16 %v3741_v18  ;;  %v4753_v55 = vunpack.c.h.bf16 %v3741_v18 }
 0x16a   : > { %v4369_v59 = vpop.eup %3569  ;;  %v1785_v12 = vrot.slane %v1784_v63, 4  ;;  %v1791_v47 = vsel %vm1415_vm2, %v4362_v56, 0.0  ;;  %3587 = vrcp.f32 %v1763_v54  ;;  %v1772_v48 = vadd.f32 %v1771_v19, %v1770_v50 }
 0x16b   : > { %v3411_v10 = vpack.i.bf16 %v4751_v49, %v4750_v17  ;;  %v3416_v5 = vpack.i.bf16 %v4753_v55, %v4752_v16  ;;  %v3572_v30 = vpop.eup %3571  ;;  %v1792_v9 = vsel %vm1415_vm2, %v4369_v59, 0.0  ;;  %v1780_v33 = vrot.slane %v1779_v36, 1  ;;  %v4762_v16 = vld [vmem:[#allocation7_spill] sm:$0xff] }
 0x16c   : > { %v4754_v14 = vunpack.c.l.bf16 %v3847_v27  ;;  %v4755_v7 = vunpack.c.h.bf16 %v3847_v27  ;;  %v3574_v6 = vpop.eup %3573  ;;  %v1786_v34 = vadd.f32 %v1785_v12, %v1784_v63  ;;  %v1793_v61 = vadd.f32 %v1792_v9, %v1791_v47  ;;  %3311 = vmatmul.mubr.msk.f32.gmra.mrb[2].mxu1 %vm1415_vm2, %v4329_v37  ;;  %v4758_v63 = vld [vmem:[#allocation14_spill] sm:$0xff] }
 0x16d   : > { %3412 = vrot.lane.b32.xlu0 %v3411_v10, %s3606_s20  ;;  %v1822_v18 = vmul.f32 %v3572_v30, %v4114_v29  ;;  %v1823_v46 = vmul.f32 %v3572_v30, %v4116_v31  ;;  %v3576_v50 = vpop.eup %3575  ;;  %3313 = vmatprep.mubr.msk.f32.mxu1 %vm1415_vm2, %v1820_v0  ;;  %v1824_v60 = vmul.f32 %v3574_v6, %v4131_v39  ;;  %3589 = vrcp.f32 %v1772_v48 }
 0x16e   : > { %v3421_v58 = vpack.i.bf16 %v4755_v7, %v4754_v14  ;;  %v1825_v41 = vmul.f32 %v3574_v6, %v4135_v4  ;;  %v1781_v27 = vadd.f32 %v1780_v33, %v1779_v36  ;;  %3417 = vrot.lane.b32.xlu1 %v3416_v5, %s3606_s20  ;;  %v1787_v32 = vrot.slane %v1786_v34, 2  ;;  %v3578_v29 = vpop.eup %3577  ;;  %v4765_v14 = vld [vmem:[#allocation8_spill] sm:$0xff] }
 0x16f   : > { %v1794_v45 = vrot.slane %v1793_v61, 4  ;;  %v1826_v2 = vmul.f32 %v3576_v50, %v4160_v24  ;;  %v1827_v37 = vmul.f32 %v3576_v50, %v4162_v21  ;;  %v4756_v31 = vunpack.c.l.bf16 %v3747_v23  ;;  %v3580_v4 = vpop.eup %3579 }
 0x170   : > { %3591 = vrcp.f32 %v1781_v27  ;;  %v4757_v39 = vunpack.c.h.bf16 %v3747_v23  ;;  %v1788_v25 = vadd.f32 %v1787_v32, %v1786_v34  ;;  %3314 = vmatmul.mubr.msk.f32.gmra.mrb[4].mxu1 %vm1415_vm2, %v1821_v11  ;;  %v1828_v20 = vmul.f32 %v3578_v29, %v4182_v43  ;;  %v3582_v54 = vpop.eup %3581  ;;  %v4771_v27 = vld [vmem:[#allocation9_spill] sm:$0xff] }
 0x171   : > { %3422 = vrot.lane.b32.xlu0 %v3421_v58, %s3606_s20  ;;  %v1795_v3 = vadd.f32 %v1794_v45, %v1793_v61  ;;  %v1829_v24 = vmul.f32 %v3578_v29, %v4189_v1  ;;  %3316 = vmatprep.mubr.msk.f32.mxu1 %vm1415_vm2, %v1822_v18  ;;  %v1830_v21 = vmul.f32 %v3580_v4, %v4209_v40  ;;  %v3584_v36 = vpop.eup %3583  ;;  %v4759_v1 = vld [vmem:[#allocation2_spill] sm:$0xff]  ;;  %v4763_v55 = vunpack.c.l.bf16 %v4762_v16 }
 0x172   : > { %v3431_v52 = vpack.i.bf16 %v4757_v39, %v4756_v31  ;;  %v1831_v0 = vmul.f32 %v3580_v4, %v4758_v63  ;;  %v1832_v23 = vmul.f32 %v3582_v54, %v4237_v26  ;;  %v1833_v17 = vmul.f32 %v3582_v54, %v4241_v35 }
 0x173   : > { %v1796_v19 = vrot.slane %v1795_v3, 2  ;;  %v1789_v49 = vrot.slane %v1788_v25, 1  ;;  %v3586_v10 = vpop.eup %3585  ;;  %v1834_v11 = vmul.f32 %v3584_v36, %v4275_v15  ;;  %v1835_v43 = vmul.f32 %v3584_v36, %v4281_v42 }
 0x174   : > { %v4760_v12 = vunpack.c.l.bf16 %v4759_v1  ;;  %v4761_v40 = vunpack.c.h.bf16 %v4759_v1  ;;  %v4764_v5 = vunpack.c.h.bf16 %v4762_v16  ;;  %v3588_v30 = vpop.eup %3587  ;;  %3317 = vmatmul.mubr.msk.f32.gmra.mrb[6].mxu1 %vm1415_vm2, %v1823_v46  ;;  %v1836_v15 = vmul.f32 %v3586_v10, %v4285_v53  ;;  %v4768_v53 = vld [vmem:[#allocation3_spill] sm:$0xff] }
 0x175   : > { %3432 = vrot.lane.b32.xlu0 %v3431_v52, %s3606_s20  ;;  %v1797_v35 = vadd.f32 %v1796_v19, %v1795_v3  ;;  %v1837_v42 = vmul.f32 %v3586_v10, %v4290_v51  ;;  %v1790_v9 = vadd.f32 %v1789_v49, %v1788_v25  ;;  %3319 = vmatprep.mubr.msk.f32.mxu1 %vm1415_vm2, %v1824_v60  ;;  %v4766_v7 = vunpack.c.l.bf16 %v4765_v14  ;;  %v4783_v19 = vld [vmem:[#allocation11_spill] sm:$0xff] }
 0x176   : > { %v3441_v47 = vpack.i.bf16 %v4761_v40, %v4760_v12  ;;  %v3426_v26 = vpack.i.bf16 %v4764_v5, %v4763_v55  ;;  %v1838_v48 = vmul.f32 %v3588_v30, %v4299_v28  ;;  %v1839_v33 = vmul.f32 %v3588_v30, %v4301_v13  ;;  %v4786_v12 = vld [vmem:[#allocation6_spill] sm:$0xff] }
 0x177   : > { %v4767_v58 = vunpack.c.h.bf16 %v4765_v14  ;;  %3593 = vrcp.f32 %v1790_v9  ;;  %v1798_v34 = vrot.slane %v1797_v35, 1  ;;  %v3590_v61 = vpop.eup %3589  ;;  %v4769_v51 = vunpack.c.l.bf16 %v4768_v53  ;;  %v3493_v30 = vld [vmem:[%s4670_s10] sm:$0xff]  }
 0x178   : > { %3427 = vrot.lane.b32.xlu1 %v3426_v26, %s3606_s20  ;;  %v4770_v18 = vunpack.c.h.bf16 %v4768_v53  ;;  %3320 = vmatmul.mubr.msk.f32.gmra.mrb[8].mxu1 %vm1415_vm2, %v1825_v41  ;;  %v1840_v28 = vmul.f32 %v3590_v61, %v4306_v38  ;;  %v1841_v13 = vmul.f32 %v3590_v61, %v4312_v62  ;;  %v4772_v32 = vunpack.c.l.bf16 %v4771_v27  ;;  %v4774_v38 = vld [vmem:[#allocation4_spill] sm:$0xff] }
 0x179   : > { %v3436_v6 = vpack.i.bf16 %v4767_v58, %v4766_v7  ;;  %3442 = vrot.lane.b32.xlu0 %v3441_v47, %s3606_s20  ;;  %v1799_v50 = vadd.f32 %v1798_v34, %v1797_v35  ;;  %3322 = vmatprep.mubr.msk.f32.mxu1 %vm1415_vm2, %v1826_v2  ;;  %v4773_v45 = vunpack.c.h.bf16 %v4771_v27  ;;  %v4775_v62 = vunpack.c.l.bf16 %v4774_v38  ;;  %v4777_v2 = vld [vmem:[#allocation10_spill] sm:$0xff]  ;;  %v3494_v35 = vld [vmem:[%s4670_s10 + $0x8] sm:$0xff]  }
 0x17a   : > { %v3451_v46 = vpack.i.bf16 %v4770_v18, %v4769_v51  ;;  %v3592_v60 = vpop.eup %3591  ;;  %v4776_v41 = vunpack.c.h.bf16 %v4774_v38  ;;  %v4778_v4 = vunpack.c.l.bf16 %v4777_v2  ;;  %v4784_v49 = vunpack.c.l.bf16 %v4783_v19 }
 0x17b   : > { %v3446_v29 = vpack.i.bf16 %v4773_v45, %v4772_v32  ;;  %v1842_v31 = vmul.f32 %v3592_v60, %v4325_v8  ;;  %v1843_v39 = vmul.f32 %v3592_v60, %v4331_v57  ;;  %3595 = vrcp.f32 %v1799_v50  ;;  %v4780_v57 = vld [vmem:[#allocation5_spill] sm:$0xff] }
 0x17c   : > { %3437 = vrot.lane.b32.xlu1 %v3436_v6, %s3606_s20  ;;  %v3461_v52 = vpack.i.bf16 %v4776_v41, %v4775_v62  ;;  %3323 = vmatmul.mubr.msk.f32.gmra.mrb[10].mxu1 %vm1415_vm2, %v1827_v37  ;;  %v4779_v8 = vunpack.c.h.bf16 %v4777_v2  ;;  %v4781_v3 = vunpack.c.l.bf16 %v4780_v57  ;;  %v4782_v54 = vunpack.c.h.bf16 %v4780_v57 }
 0x17d   : > { %3452 = vrot.lane.b32.xlu0 %v3451_v46, %s3606_s20  ;;  %3325 = vmatprep.mubr.msk.f32.mxu1 %vm1415_vm2, %v1828_v20  ;;  %v4785_v10 = vunpack.c.h.bf16 %v4783_v19  ;;  %v4787_v40 = vunpack.c.l.bf16 %v4786_v12  ;;  %v4788_v47 = vunpack.c.h.bf16 %v4786_v12 }
 0x17e   : > { %v3456_v25 = vpack.i.bf16 %v4779_v8, %v4778_v4  ;;  %v3471_v63 = vpack.i.bf16 %v4782_v54, %v4781_v3 }
 0x17f   : > { %v3466_v1 = vpack.i.bf16 %v4785_v10, %v4784_v49 }
 0x180   : > { %3447 = vrot.lane.b32.xlu1 %v3446_v29, %s3606_s20  ;;  %3326 = vmatmul.mubr.msk.f32.gmra.mrb[12].mxu1 %vm1415_vm2, %v1829_v24  ;;  %v3481_v24 = vpack.i.bf16 %v4788_v47, %v4787_v40 }
 0x181   : > { %3462 = vrot.lane.b32.xlu0 %v3461_v52, %s3606_s20  ;;  %v3594_v36 = vpop.eup %3593  ;;  %3328 = vmatprep.mubr.msk.f32.mxu1 %vm1415_vm2, %v1830_v21  ;;  %v4789_v21 = vld [vmem:[#allocation12_spill] sm:$0xff] }
 0x182   : > { %v1844_v37 = vmul.f32 %v3594_v36, %v4347_v22  ;;  %v1845_v20 = vmul.f32 %v3594_v36, %v4351_v44  ;;  %v4790_v55 = vunpack.c.l.bf16 %v4789_v21  ;;  %v4791_v5 = vunpack.c.h.bf16 %v4789_v21 }
 0x184   : > { %3457 = vrot.lane.b32.xlu1 %v3456_v25, %s3606_s20  ;;  %3329 = vmatmul.mubr.msk.f32.gmra.mrb[14].mxu1 %vm1415_vm2, %v1831_v0  ;;  %v3476_v26 = vpack.i.bf16 %v4791_v5, %v4790_v55  ;;  %v4792_v0 = vld [vmem:[#allocation13_spill] sm:$0xff] }
 0x185   : > { %3472 = vrot.lane.b32.xlu0 %v3471_v63, %s3606_s20  ;;  %v3596_v16 = vpop.eup %3595  ;;  %3331 = vmatprep.mubr.msk.f32.mxu1 %vm1415_vm2, %v1832_v23  ;;  %v4793_v23 = vunpack.c.l.bf16 %v4792_v0 }
 0x186   : > { %v1846_v22 = vmul.f32 %v3596_v16, %v4362_v56  ;;  %v1847_v44 = vmul.f32 %v3596_v16, %v4369_v59  ;;  %v4794_v56 = vunpack.c.h.bf16 %v4792_v0 }
 0x188   : > { %3467 = vrot.lane.b32.xlu1 %v3466_v1, %s3606_s20  ;;  %3332 = vmatmul.mubr.msk.f32.gmra.mrb[16].mxu1 %vm1415_vm2, %v1833_v17  ;;  %v3486_v59 = vpack.i.bf16 %v4794_v56, %v4793_v23  ;;  %v3491_v17 = vld [vmem:[%s4666_s6] sm:$0xff]  }
 0x189   : > { %3482 = vrot.lane.b32.xlu0 %v3481_v24, %s3606_s20  ;;  %3334 = vmatprep.mubr.msk.f32.mxu1 %vm1415_vm2, %v1834_v11  ;;  %v3607_v11 = vmov 0.0  }
 0x18a   : > { %3355 = vmatprep.subr.bf16.mxu1 %v3607_v11  ;;  %3363 = vmatprep.subr.bf16.mxu0 %v3607_v11 }
 0x18b   : > { %3356 = vmatpush3.bf16.msra.mxu1 %v3491_v17  ;;  %3367 = vmatprep.mubr.msk.bf16.mxu0 %vm3608_vm3, %v3607_v11 }
 0x18c   : > { %3477 = vrot.lane.b32.xlu1 %v3476_v26, %s3606_s20  ;;  %3335 = vmatmul.mubr.msk.f32.gmra.mrb[18].mxu1 %vm1415_vm2, %v1835_v43  ;;  %v3492_v43 = vld [vmem:[%s4666_s6 + $0x8] sm:$0xff]  }
 0x18d   : > { %3337 = vmatprep.mubr.msk.f32.mxu1 %vm1415_vm2, %v1836_v15  ;;  %3357 = vmatprep.subr.bf16.mxu1 %v3607_v11 }
 0x18e   : > { %3364 = vmatpush3.bf16.msra.mxu0 %v3493_v30 }
 0x18f   : > { %3358 = vmatpush3.bf16.msra.mxu1 %v3492_v43  ;;  %3365 = vmatprep.subr.bf16.mxu0 %v3607_v11 }
 0x190   : > { %3487 = vrot.lane.b32.xlu1 %v3486_v59, %s3606_s20  ;;  %3338 = vmatmul.mubr.msk.f32.gmra.mrb[20].mxu1 %vm1415_vm2, %v1837_v42 }
 0x191   : > { %3340 = vmatprep.mubr.msk.f32.mxu1 %vm1415_vm2, %v1838_v48  ;;  %3371 = vmatprep.subr.bf16.mxu1 %v3607_v11 }
 0x192   : > { %3366 = vmatpush3.bf16.msra.mxu0 %v3494_v35 }
 0x193   : > { %3383 = vmatprep.subr.bf16.mxu0 %v3607_v11 }
 0x194   : > { %3341 = vmatmul.mubr.msk.f32.gmra.mrb[22].mxu1 %vm1415_vm2, %v1839_v33 }
 0x195   : > { %3343 = vmatprep.mubr.msk.f32.mxu1 %vm1415_vm2, %v1840_v28 }
 0x198   : > { %3344 = vmatmul.mubr.msk.f32.gmra.mrb[24].mxu1 %vm1415_vm2, %v1841_v13 }
 0x199   : > { %3346 = vmatprep.mubr.msk.f32.mxu1 %vm1415_vm2, %v1842_v31 }
 0x19c   : > { %3347 = vmatmul.mubr.msk.f32.gmra.mrb[26].mxu1 %vm1415_vm2, %v1843_v39 }
 0x19d   : > { %3349 = vmatprep.mubr.msk.f32.mxu1 %vm1415_vm2, %v1844_v37 }
 0x1a0   : > { %3350 = vmatmul.mubr.msk.f32.gmra.mrb[28].mxu1 %vm1415_vm2, %v1845_v20 }
 0x1a1   : > { %3352 = vmatprep.mubr.msk.f32.mxu1 %vm1415_vm2, %v1846_v22 }
 0x1a4   : > { %3353 = vmatmul.mubr.msk.f32.gmra.mrb[30].mxu1 %vm1415_vm2, %v1847_v44 }
 0x1a5   : > { %3359 = vmatprep.mubr.msk.bf16.mxu1 %vm3608_vm3, %v3607_v11 }
 0x1df   : > { %v3413_v15 = vpop.permute.xlu0 %3412 }
 0x1e0   : > { %v3415_v33 = vunpack.i.h.bf16 %v3413_v15  ;;  %v3414_v14 = vunpack.i.l.bf16 %v3413_v15  ;;  %v3418_v7 = vpop.permute.xlu1 %3417 }
 0x1e1   : > { %v3420_v61 = vunpack.i.h.bf16 %v3418_v7  ;;  %v3419_v51 = vunpack.i.l.bf16 %v3418_v7 }
 0x1e3   : > { %v4529_v42 = vpop.permute.xlu0 %3422 }
 0x1e7   : > { %v3433_v9 = vpop.permute.xlu0 %3432 }
 0x1e8   : > { %v3435_v32 = vunpack.i.h.bf16 %v3433_v9  ;;  %v3434_v29 = vunpack.i.l.bf16 %v3433_v9 }
 0x1ea   : > { %v4539_v0 = vpop.permute.xlu1 %3427 }
 0x1eb   : > { %v3443_v48 = vpop.permute.xlu0 %3442 }
 0x1ec   : > { %v3445_v25 = vunpack.i.h.bf16 %v3443_v48  ;;  %v3444_v3 = vunpack.i.l.bf16 %v3443_v48 }
 0x1ef   : > { %v3453_v18 = vpop.permute.xlu0 %3452 }
 0x1f0   : > { %v3455_v47 = vunpack.i.h.bf16 %v3453_v18  ;;  %v3454_v24 = vunpack.i.l.bf16 %v3453_v18 }
 0x1f3   : > { %v3463_v41 = vpop.permute.xlu0 %3462 }
 0x1f4   : > { %v3465_v15 = vunpack.i.h.bf16 %v3463_v41  ;;  %v3464_v9 = vunpack.i.l.bf16 %v3463_v41 }
 0x1f7   : > { %v3473_v16 = vpop.permute.xlu0 %3472 }
 0x23b   : > { %v3309_v58 = vpop.f32.mrb[0].mxu1 }
 0x23c   : > { %v2303_v6 = vmul.f32 %v3415_v33, %v3309_v58  ;;  %v2015_v34 = vpop.f32.mrb[1].mxu1 }
 0x23d   : > { %v2302_v53 = vmul.f32 %v3414_v14, %v2015_v34 }
 0x23e   : > { %v2335_v46 = vsel %vm879_vm0, %v2303_v6, 0.0 }
 0x23f   : > { %v2334_v28 = vsel %vm879_vm0, %v2302_v53, 0.0  ;;  %v3312_v13 = vpop.f32.mrb[2].mxu1 }
 0x240   : > { %v2336_v50 = vadd.f32 %v2335_v46, %v2334_v28  ;;  %v2305_v60 = vmul.f32 %v3420_v61, %v3312_v13  ;;  %v2025_v27 = vpop.f32.mrb[3].mxu1  ;;  %v3483_v61 = vpop.permute.xlu0 %3482  ;;  %v3475_v28 = vunpack.i.h.bf16 %v3473_v16 }
 0x241   : > { %v2304_v45 = vmul.f32 %v3419_v51, %v2025_v27  ;;  %v3474_v27 = vunpack.i.l.bf16 %v3473_v16 }
 0x242   : > { %v2337_v31 = vrot.slane %v2336_v50, 4  ;;  %v2344_v39 = vsel %vm879_vm0, %v2305_v60, 0.0 }
 0x243   : > { %v2343_v38 = vsel %vm879_vm0, %v2304_v45, 0.0  ;;  %v3315_v62 = vpop.f32.mrb[4].mxu1 }
 0x244   : > { %v2338_v52 = vadd.f32 %v2337_v31, %v2336_v50  ;;  %v2345_v2 = vadd.f32 %v2344_v39, %v2343_v38  ;;  %v2307_v4 = vmul.f32 %v3435_v32, %v3315_v62  ;;  %v2035_v8 = vpop.f32.mrb[5].mxu1  ;;  %v4543_v32 = vpop.permute.xlu1 %3437  ;;  %v3485_v39 = vunpack.i.h.bf16 %v3483_v61 }
 0x245   : > { %v2306_v57 = vmul.f32 %v3434_v29, %v2035_v8 }
 0x246   : > { %v2339_v54 = vrot.slane %v2338_v52, 2  ;;  %v2346_v63 = vrot.slane %v2345_v2, 4  ;;  %v2353_v36 = vsel %vm879_vm0, %v2307_v4, 0.0 }
 0x247   : > { %v2352_v37 = vsel %vm879_vm0, %v2306_v57, 0.0  ;;  %v3318_v20 = vpop.f32.mrb[6].mxu1 }
 0x248   : > { %v2340_v19 = vadd.f32 %v2339_v54, %v2338_v52  ;;  %v2347_v49 = vadd.f32 %v2346_v63, %v2345_v2  ;;  %v2354_v10 = vadd.f32 %v2353_v36, %v2352_v37  ;;  %v2309_v1 = vmul.f32 %v3445_v25, %v3318_v20  ;;  %v2045_v12 = vpop.f32.mrb[7].mxu1  ;;  %v4551_v16 = vpop.permute.xlu1 %3447 }
 0x249   : > { %v2308_v40 = vmul.f32 %v3444_v3, %v2045_v12  ;;  %v3484_v37 = vunpack.i.l.bf16 %v3483_v61 }
 0x24a   : > { %v2341_v22 = vrot.slane %v2340_v19, 1  ;;  %v2348_v44 = vrot.slane %v2347_v49, 2  ;;  %v2355_v21 = vrot.slane %v2354_v10, 4  ;;  %v2362_v55 = vsel %vm879_vm0, %v2309_v1, 0.0 }
 0x24b   : > { %v2361_v5 = vsel %vm879_vm0, %v2308_v40, 0.0  ;;  %v3321_v26 = vpop.f32.mrb[8].mxu1  ;;  %v3425_v1 = vunpack.i.h.bf16 %v4529_v42 }
 0x24c   : > { %v2342_v23 = vadd.f32 %v2341_v22, %v2340_v19  ;;  %v2349_v56 = vadd.f32 %v2348_v44, %v2347_v49  ;;  %v2356_v59 = vadd.f32 %v2355_v21, %v2354_v10  ;;  %v2363_v17 = vadd.f32 %v2362_v55, %v2361_v5  ;;  %v2055_v43 = vpop.f32.mrb[9].mxu1 }
 0x24d   : > { %v2311_v30 = vmul.f32 %v3455_v47, %v3321_v26  ;;  %v2310_v35 = vmul.f32 %v3454_v24, %v2055_v43  ;;  %v3424_v26 = vunpack.i.l.bf16 %v4529_v42 }
 0x24e   : > { %v2350_v48 = vrot.slane %v2349_v56, 1  ;;  %v2357_v33 = vrot.slane %v2356_v59, 2  ;;  %v2364_v14 = vrot.slane %v2363_v17, 4  ;;  %v2478_v7 = vpack.c.bf16 %v2342_v23, %v2342_v23 }
 0x24f   : > { %v2371_v58 = vsel %vm879_vm0, %v2311_v30, 0.0  ;;  %v2370_v6 = vsel %vm879_vm0, %v2310_v35, 0.0  ;;  %v3324_v34 = vpop.f32.mrb[10].mxu1 }
 0x250   : > { %v2351_v53 = vadd.f32 %v2350_v48, %v2349_v56  ;;  %v2358_v51 = vadd.f32 %v2357_v33, %v2356_v59  ;;  %v2365_v18 = vadd.f32 %v2364_v14, %v2363_v17  ;;  %v2065_v46 = vpop.f32.mrb[11].mxu1  ;;  %v2372_v13 = vadd.f32 %v2371_v58, %v2370_v6 }
 0x251   : > { %v2313_v50 = vmul.f32 %v3465_v15, %v3324_v34  ;;  %v2312_v60 = vmul.f32 %v3464_v9, %v2065_v46  ;;  %v2521_v38 = vunpack.c.l.b16 %v2478_v7  ;;  %v3430_v14 = vunpack.i.h.bf16 %v4539_v0  ;;  %v4559_v46 = vpop.permute.xlu1 %3457 }
 0x252   : > { %v2479_v45 = vpack.c.bf16 %v2351_v53, %v2351_v53  ;;  %v2359_v29 = vrot.slane %v2358_v51, 1  ;;  %v2366_v31 = vrot.slane %v2365_v18, 2  ;;  %v2373_v62 = vrot.slane %v2372_v13, 4 }
 0x253   : > { %v2380_v41 = vsel %vm879_vm0, %v2313_v50, 0.0  ;;  %v2379_v52 = vsel %vm879_vm0, %v2312_v60, 0.0  ;;  %v3327_v2 = vpop.f32.mrb[12].mxu1 }
 0x254   : > { %v2522_v4 = vunpack.c.l.b16 %v2479_v45  ;;  %v2360_v8 = vadd.f32 %v2359_v29, %v2358_v51  ;;  %v2367_v25 = vadd.f32 %v2366_v31, %v2365_v18  ;;  %v2381_v57 = vadd.f32 %v2380_v41, %v2379_v52  ;;  %v2075_v3 = vpop.f32.mrb[13].mxu1 }
 0x255   : > { %v2374_v54 = vadd.f32 %v2373_v62, %v2372_v13  ;;  %v2315_v63 = vmul.f32 %v3475_v28, %v3327_v2  ;;  %v2314_v36 = vmul.f32 %v3474_v27, %v2075_v3  ;;  %v3429_v18 = vunpack.i.l.bf16 %v4539_v0 }
 0x256   : > { %v2538_v20 = vsel %vm2537_vm4, %v2522_v4, %v2521_v38  ;;  %v2480_v19 = vpack.c.bf16 %v2360_v8, %v2360_v8  ;;  %v2368_v49 = vrot.slane %v2367_v25, 1  ;;  %v2382_v10 = vrot.slane %v2381_v57, 4 }
 0x257   : > { %v2375_v12 = vrot.slane %v2374_v54, 2  ;;  %v2389_v40 = vsel %vm879_vm0, %v2315_v63, 0.0  ;;  %v2388_v47 = vsel %vm879_vm0, %v2314_v36, 0.0  ;;  %v3330_v24 = vpop.f32.mrb[14].mxu1 }
 0x258   : > { %v2523_v22 = vunpack.c.l.b16 %v2480_v19  ;;  %v2369_v44 = vadd.f32 %v2368_v49, %v2367_v25  ;;  %v2383_v21 = vadd.f32 %v2382_v10, %v2381_v57  ;;  %v2390_v55 = vadd.f32 %v2389_v40, %v2388_v47  ;;  %v2085_v5 = vpop.f32.mrb[15].mxu1  ;;  %v4570_v10 = vpop.permute.xlu1 %3467 }
 0x259   : > { %v2376_v23 = vadd.f32 %v2375_v12, %v2374_v54  ;;  %v2317_v56 = vmul.f32 %v3485_v39, %v3330_v24  ;;  %v2316_v59 = vmul.f32 %v3484_v37, %v2085_v5  ;;  %v3440_v39 = vunpack.i.h.bf16 %v4543_v32 }
 0x25a   : > { %v2540_v17 = vsel %vm2539_vm5, %v2523_v22, %v2538_v20  ;;  %v2481_v43 = vpack.c.bf16 %v2369_v44, %v2369_v44  ;;  %v2384_v30 = vrot.slane %v2383_v21, 2  ;;  %v2391_v35 = vrot.slane %v2390_v55, 4 }
 0x25b   : > { %v2377_v15 = vrot.slane %v2376_v23, 1  ;;  %v2398_v9 = vsel %vm879_vm0, %v2317_v56, 0.0  ;;  %v2397_v48 = vsel %vm879_vm0, %v2316_v59, 0.0  ;;  %v3333_v33 = vpop.f32.mrb[16].mxu1  ;;  %v3439_v25 = vunpack.i.l.bf16 %v4543_v32 }
 0x25c   : > { %v2524_v7 = vunpack.c.l.b16 %v2481_v43  ;;  %v2385_v58 = vadd.f32 %v2384_v30, %v2383_v21  ;;  %v2392_v42 = vadd.f32 %v2391_v35, %v2390_v55  ;;  %v2399_v6 = vadd.f32 %v2398_v9, %v2397_v48  ;;  %v2095_v34 = vpop.f32.mrb[17].mxu1 }
 0x25d   : > { %v2378_v61 = vadd.f32 %v2377_v15, %v2376_v23  ;;  %v2319_v53 = vmul.f32 %v3425_v1, %v3333_v33  ;;  %v2318_v51 = vmul.f32 %v3424_v26, %v2095_v34  ;;  %v3450_v49 = vunpack.i.h.bf16 %v4551_v16 }
 0x25e   : > { %v2542_v28 = vsel %vm2541_vm6, %v2524_v7, %v2540_v17  ;;  %v2386_v13 = vrot.slane %v2385_v58, 1  ;;  %v2393_v50 = vrot.slane %v2392_v42, 2  ;;  %v2400_v60 = vrot.slane %v2399_v6, 4 }
 0x25f   : > { %v2482_v27 = vpack.c.bf16 %v2378_v61, %v2378_v61  ;;  %v2407_v45 = vsel %vm879_vm0, %v2319_v53, 0.0  ;;  %v2406_v29 = vsel %vm879_vm0, %v2318_v51, 0.0  ;;  %v3336_v31 = vpop.f32.mrb[18].mxu1  ;;  %v3449_v21 = vunpack.i.l.bf16 %v4551_v16 }
 0x260   : > { %v2387_v38 = vadd.f32 %v2386_v13, %v2385_v58  ;;  %v2394_v62 = vadd.f32 %v2393_v50, %v2392_v42  ;;  %v2401_v41 = vadd.f32 %v2400_v60, %v2399_v6  ;;  %v2408_v0 = vadd.f32 %v2407_v45, %v2406_v29  ;;  %v2105_v52 = vpop.f32.mrb[19].mxu1  ;;  %v3478_v42 = vpop.permute.xlu1 %3477 }
 0x261   : > { %v2525_v2 = vunpack.c.l.b16 %v2482_v27  ;;  %v2321_v4 = vmul.f32 %v3430_v14, %v3336_v31  ;;  %v2320_v8 = vmul.f32 %v3429_v18, %v2105_v52  ;;  %v3460_v30 = vunpack.i.h.bf16 %v4559_v46 }
 0x262   : > { %v2483_v57 = vpack.c.bf16 %v2387_v38, %v2387_v38  ;;  %v2395_v3 = vrot.slane %v2394_v62, 1  ;;  %v2402_v54 = vrot.slane %v2401_v41, 2  ;;  %v2409_v63 = vrot.slane %v2408_v0, 4 }
 0x263   : > { %v2544_v36 = vsel %vm2543_vm7, %v2525_v2, %v2542_v28  ;;  %v2416_v37 = vsel %vm879_vm0, %v2321_v4, 0.0  ;;  %v2415_v20 = vsel %vm879_vm0, %v2320_v8, 0.0  ;;  %v3339_v19 = vpop.f32.mrb[20].mxu1  ;;  %v3459_v58 = vunpack.i.l.bf16 %v4559_v46 }
 0x264   : > { %v2526_v1 = vunpack.c.l.b16 %v2483_v57  ;;  %v2396_v12 = vadd.f32 %v2395_v3, %v2394_v62  ;;  %v2403_v40 = vadd.f32 %v2402_v54, %v2401_v41  ;;  %v2410_v32 = vadd.f32 %v2409_v63, %v2408_v0  ;;  %v2115_v47 = vpop.f32.mrb[21].mxu1  ;;  %v3488_v3 = vpop.permute.xlu1 %3487 }
 0x265   : > { %v2417_v24 = vadd.f32 %v2416_v37, %v2415_v20  ;;  %v2323_v22 = vmul.f32 %v3440_v39, %v3339_v19  ;;  %v2322_v44 = vmul.f32 %v3439_v25, %v2115_v47  ;;  %v3470_v50 = vunpack.i.h.bf16 %v4570_v10 }
 0x266   : > { %v2546_v55 = vsel %vm2545_vm8, %v2526_v1, %v2544_v36  ;;  %v2484_v5 = vpack.c.bf16 %v2396_v12, %v2396_v12  ;;  %v2404_v26 = vrot.slane %v2403_v40, 1  ;;  %v2411_v23 = vrot.slane %v2410_v32, 2 }
 0x267   : > { %v2418_v56 = vrot.slane %v2417_v24, 4  ;;  %v2425_v59 = vsel %vm879_vm0, %v2323_v22, 0.0  ;;  %v2424_v17 = vsel %vm879_vm0, %v2322_v44, 0.0  ;;  %v3342_v43 = vpop.f32.mrb[22].mxu1  ;;  %v3469_v46 = vunpack.i.l.bf16 %v4570_v10 }
 0x268   : > { %v2527_v35 = vunpack.c.l.b16 %v2484_v5  ;;  %v2405_v15 = vadd.f32 %v2404_v26, %v2403_v40  ;;  %v2412_v9 = vadd.f32 %v2411_v23, %v2410_v32  ;;  %v2426_v48 = vadd.f32 %v2425_v59, %v2424_v17  ;;  %v2125_v33 = vpop.f32.mrb[23].mxu1 }
 0x269   : > { %v2419_v14 = vadd.f32 %v2418_v56, %v2417_v24  ;;  %v2325_v16 = vmul.f32 %v3450_v49, %v3342_v43  ;;  %v2324_v7 = vmul.f32 %v3449_v21, %v2125_v33  ;;  %v3480_v57 = vunpack.i.h.bf16 %v3478_v42 }
 0x26a   : > { %v2548_v6 = vsel %vm2547_vm9, %v2527_v35, %v2546_v55  ;;  %v2485_v34 = vpack.c.bf16 %v2405_v15, %v2405_v15  ;;  %v2413_v61 = vrot.slane %v2412_v9, 1  ;;  %v2427_v53 = vrot.slane %v2426_v48, 4 }
 0x26b   : > { %v2420_v51 = vrot.slane %v2419_v14, 2  ;;  %v2434_v18 = vsel %vm879_vm0, %v2325_v16, 0.0  ;;  %v2433_v28 = vsel %vm879_vm0, %v2324_v7, 0.0  ;;  %v3345_v13 = vpop.f32.mrb[24].mxu1  ;;  %v3479_v20 = vunpack.i.l.bf16 %v3478_v42 }
 0x26c   : > { %v2528_v60 = vunpack.c.l.b16 %v2485_v34  ;;  %v2428_v27 = vadd.f32 %v2427_v53, %v2426_v48  ;;  %v2435_v45 = vadd.f32 %v2434_v18, %v2433_v28  ;;  %v2135_v29 = vpop.f32.mrb[25].mxu1  ;;  %v2414_v31 = vadd.f32 %v2413_v61, %v2412_v9 }
 0x26d   : > { %v2421_v39 = vadd.f32 %v2420_v51, %v2419_v14  ;;  %v2327_v38 = vmul.f32 %v3460_v30, %v3345_v13  ;;  %v2326_v62 = vmul.f32 %v3459_v58, %v2135_v29  ;;  %v3490_v47 = vunpack.i.h.bf16 %v3488_v3 }
 0x26e   : > { %v4584_v41 = vsel %vm2549_vm10, %v2528_v60, %v2548_v6  ;;  %v2429_v0 = vrot.slane %v2428_v27, 2  ;;  %v2436_v52 = vrot.slane %v2435_v45, 4  ;;  %v2486_v19 = vpack.c.bf16 %v2414_v31, %v2414_v31 }
 0x26f   : > { %v2422_v2 = vrot.slane %v2421_v39, 1  ;;  %v2443_v4 = vsel %vm879_vm0, %v2327_v38, 0.0  ;;  %v2442_v8 = vsel %vm879_vm0, %v2326_v62, 0.0  ;;  %v3348_v25 = vpop.f32.mrb[26].mxu1  ;;  %v3489_v55 = vunpack.i.l.bf16 %v3488_v3 }
 0x270   : > { %v2430_v54 = vadd.f32 %v2429_v0, %v2428_v27  ;;  %v2437_v63 = vadd.f32 %v2436_v52, %v2435_v45  ;;  %v2444_v36 = vadd.f32 %v2443_v4, %v2442_v8  ;;  %v2145_v37 = vpop.f32.mrb[27].mxu1  ;;  %v2329_v10 = vmul.f32 %v3470_v50, %v3348_v25 }
 0x271   : > { %v2423_v49 = vadd.f32 %v2422_v2, %v2421_v39  ;;  %v2328_v1 = vmul.f32 %v3469_v46, %v2145_v37  ;;  %v2529_v17 = vunpack.c.l.b16 %v2486_v19 }
 0x272   : > { %v2431_v12 = vrot.slane %v2430_v54, 1  ;;  %v2438_v40 = vrot.slane %v2437_v63, 2  ;;  %v2445_v32 = vrot.slane %v2444_v36, 4  ;;  %v2452_v22 = vsel %vm879_vm0, %v2329_v10, 0.0 }
 0x273   : > { %v2487_v24 = vpack.c.bf16 %v2423_v49, %v2423_v49  ;;  %v2451_v44 = vsel %vm879_vm0, %v2328_v1, 0.0  ;;  %v3351_v21 = vpop.f32.mrb[28].mxu1 }
 0x274   : > { %v2432_v5 = vadd.f32 %v2431_v12, %v2430_v54  ;;  %v2439_v26 = vadd.f32 %v2438_v40, %v2437_v63  ;;  %v2446_v23 = vadd.f32 %v2445_v32, %v2444_v36  ;;  %v2453_v56 = vadd.f32 %v2452_v22, %v2451_v44  ;;  %v2155_v59 = vpop.f32.mrb[29].mxu1 }
 0x275   : > { %v2530_v43 = vunpack.c.l.b16 %v2487_v24  ;;  %v2331_v30 = vmul.f32 %v3480_v57, %v3351_v21  ;;  %v2330_v35 = vmul.f32 %v3479_v20, %v2155_v59 }
 0x276   : > { %v2488_v15 = vpack.c.bf16 %v2432_v5, %v2432_v5  ;;  %v2440_v9 = vrot.slane %v2439_v26, 1  ;;  %v2447_v48 = vrot.slane %v2446_v23, 2  ;;  %v2454_v33 = vrot.slane %v2453_v56, 4 }
 0x277   : > { %v2551_v14 = vsel %vm2537_vm4, %v2530_v43, %v2529_v17  ;;  %v2461_v16 = vsel %vm879_vm0, %v2331_v30, 0.0  ;;  %v2460_v7 = vsel %vm879_vm0, %v2330_v35, 0.0  ;;  %v3354_v58 = vpop.f32.mrb[30].mxu1 }
 0x278   : > { %v2531_v42 = vunpack.c.l.b16 %v2488_v15  ;;  %v2441_v6 = vadd.f32 %v2440_v9, %v2439_v26  ;;  %v2448_v34 = vadd.f32 %v2447_v48, %v2446_v23  ;;  %v2455_v61 = vadd.f32 %v2454_v33, %v2453_v56  ;;  %v2165_v53 = vpop.f32.mrb[31].mxu1  ;;  %v3495_v26 = vld [vmem:[%s4672_s12] sm:$0xff]   ;;  %v3496_v23 = vld [vmem:[%s4672_s12 + $0x8] sm:$0xff]  }
 0x279   : > { %v2462_v51 = vadd.f32 %v2461_v16, %v2460_v7  ;;  %v2333_v18 = vmul.f32 %v3490_v47, %v3354_v58  ;;  %v2332_v28 = vmul.f32 %v3489_v55, %v2165_v53  ;;  %v3052_v56 = vld [vmem:[%s4667_s7] ss:$0 sm:$0xff]  ;;  %v3497_v53 = vld [vmem:[%s4672_s12 + $0x10] sm:$0xff]  }
 0x27a   : > { %v2552_v13 = vsel %vm2539_vm5, %v2531_v42, %v2551_v14  ;;  %v2489_v50 = vpack.c.bf16 %v2441_v6, %v2441_v6  ;;  %v2449_v60 = vrot.slane %v2448_v34, 1  ;;  %v2456_v27 = vrot.slane %v2455_v61, 2  ;;  %v3056_v15 = vld [vmem:[%s4668_s8] ss:$0 sm:$0xff] }
 0x27b   : > { %v2463_v45 = vrot.slane %v2462_v51, 4  ;;  %v2470_v29 = vsel %vm879_vm0, %v2333_v18, 0.0  ;;  %v2469_v46 = vsel %vm879_vm0, %v2332_v28, 0.0  ;;  %v3057_v58 = vld [vmem:[%s4669_s9] ss:$0 sm:$0xff] }
 0x27c   : > { %v2532_v31 = vunpack.c.l.b16 %v2489_v50  ;;  %v2450_v39 = vadd.f32 %v2449_v60, %v2448_v34  ;;  %v2457_v38 = vadd.f32 %v2456_v27, %v2455_v61  ;;  %v2471_v62 = vadd.f32 %v2470_v29, %v2469_v46  ;;  %v3058_v18 = vld [vmem:[%s4671_s11] ss:$0 sm:$0xff] }
 0x27d   : > { %v2464_v0 = vadd.f32 %v2463_v45, %v2462_v51  ;;  %v3498_v51 = vld [vmem:[%s4672_s12 + $0x18] sm:$0xff]  }
 0x27e   : > { %v2553_v52 = vsel %vm2541_vm6, %v2532_v31, %v2552_v13  ;;  %v2490_v2 = vpack.c.bf16 %v2450_v39, %v2450_v39  ;;  %v2458_v4 = vrot.slane %v2457_v38, 1  ;;  %v2472_v8 = vrot.slane %v2471_v62, 4  ;;  %v3499_v39 = vld [vmem:[%s4674_s14] sm:$0xff]  }
 0x27f   : > { %v2465_v25 = vrot.slane %v2464_v0, 2 }
 0x280   : > { %v2533_v57 = vunpack.c.l.b16 %v2490_v2  ;;  %v2459_v3 = vadd.f32 %v2458_v4, %v2457_v38  ;;  %v2473_v54 = vadd.f32 %v2472_v8, %v2471_v62  ;;  %v3500_v38 = vld [vmem:[%s4674_s14 + $0x8] sm:$0xff]   ;;  %v3067_v2 = vld [vmem:[%s4673_s13] ss:$0 sm:$0xff] }
 0x281   : > { %v2466_v63 = vadd.f32 %v2465_v25, %v2464_v0 }
 0x282   : > { %v2554_v36 = vsel %vm2543_vm7, %v2533_v57, %v2553_v52  ;;  %v2491_v37 = vpack.c.bf16 %v2459_v3, %v2459_v3  ;;  %v2474_v20 = vrot.slane %v2473_v54, 2 }
 0x283   : > { %v2467_v19 = vrot.slane %v2466_v63, 1 }
 0x284   : > { %v2534_v49 = vunpack.c.l.b16 %v2491_v37  ;;  %v2475_v10 = vadd.f32 %v2474_v20, %v2473_v54 }
 0x285   : > { %v2468_v1 = vadd.f32 %v2467_v19, %v2466_v63 }
 0x286   : > { %v2555_v12 = vsel %vm2545_vm8, %v2534_v49, %v2554_v36  ;;  %v2476_v40 = vrot.slane %v2475_v10, 1 }
 0x287   : > { %v2492_v32 = vpack.c.bf16 %v2468_v1, %v2468_v1 }
 0x288   : > { %v2477_v47 = vadd.f32 %v2476_v40, %v2475_v10 }
 0x289   : > { %v2535_v24 = vunpack.c.l.b16 %v2492_v32 }
 0x28a   : > { %v2493_v22 = vpack.c.bf16 %v2477_v47, %v2477_v47 }
 0x28b   : > { %v2556_v44 = vsel %vm2547_vm9, %v2535_v24, %v2555_v12 }
 0x28c   : > { %v2536_v21 = vunpack.c.l.b16 %v2493_v22 }
 0x28e   : > { %v2557_v55 = vsel %vm2549_vm10, %v2536_v21, %v2556_v44 }
 0x28f   : > { %v2558_v5 = vpack.c.b16 %v2557_v55, %v4584_v41  ;;  %v3148_v41 = vld [vmem:[%s586_s23] sm:$0xff]  }
 0x290   : > { %v3149_v59 = vunpack.c.l.bf16 %v3148_v41  ;;  %v3150_v35 = vunpack.c.h.bf16 %v3148_v41 }
 0x291   : > { %3360 = vmatmul.mubr.msk.bf16.vlgmr.msra.gmra.mrb[32].mxu1 %vm879_vm0, %v2558_v5 }
 0x292   : > { %3379 = vmatprep.mubr.msk.bf16.mxu1 %vm3608_vm3, %v3607_v11  ;;  %3372 = vmatpush3.bf16.msra.mxu1 %v3495_v26 }
 0x293   : > { %3373 = vmatprep.subr.bf16.mxu1 %v3607_v11 }
 0x296   : > { %3374 = vmatpush3.bf16.msra.mxu1 %v3496_v23 }
 0x297   : > { %3375 = vmatprep.subr.bf16.mxu1 %v3607_v11 }
 0x29a   : > { %3376 = vmatpush3.bf16.msra.mxu1 %v3497_v53 }
 0x29b   : > { %3377 = vmatprep.subr.bf16.mxu1 %v3607_v11 }
 0x29e   : > { %3378 = vmatpush3.bf16.msra.mxu1 %v3498_v51 }
 0x364   : > { %v2608_v17 = vpop.f32.mrb[32].mxu1 }
 0x365   : > { %v2609_v43 = vadd.f32 %v3052_v56, %v2608_v17  ;;  %v3361_v30 = vpop.f32.mrb[33].mxu1 }
 0x366   : > { %v2611_v9 = vpop.f32.mrb[34].mxu1 }
 0x367   : > { %v2619_v48 = vadd.f32 %v3149_v59, %v2609_v43  ;;  %v2612_v33 = vadd.f32 %v3052_v56, %v2611_v9  ;;  %v3362_v14 = vpop.f32.mrb[35].mxu1 }
 0x369   : > { %v2628_v16 = vmul.f32 %v3056_v15, %v2619_v48  ;;  %v2620_v7 = vadd.f32 %v3150_v35, %v2612_v33 }
 0x36b   : > { %v2629_v42 = vmul.f32 %v3056_v15, %v2620_v7  ;;  %v2637_v6 = vadd.f32 %v3057_v58, %v2628_v16 }
 0x36d   : > { %v2638_v34 = vadd.f32 %v3057_v58, %v2629_v42 }
 0x36f   : > { %v2639_v61 = vpack.c.bf16 %v2638_v34, %v2637_v6 }
 0x371   : > { %3368 = vmatmul.mubr.msk.bf16.vlgmr.msra.gmra.mrb[32].mxu0 %vm879_vm0, %v2639_v61 }
 0x372   : > { %3387 = vmatprep.mubr.msk.bf16.mxu0 %vm3608_vm3, %v3607_v11  ;;  %3384 = vmatpush3.bf16.msra.mxu0 %v3499_v39 }
 0x373   : > { %3385 = vmatprep.subr.bf16.mxu0 %v3607_v11  ;;  %v3068_v11 = vld [vmem:[%s4675_s15] ss:$0 sm:$0xff] }
 0x376   : > { %3386 = vmatpush3.bf16.msra.mxu0 %v3500_v38 }
 0x444   : > { %v2700_v28 = vpop.f32.mrb[32].mxu0 }
 0x445   : > { %v2701_v13 = vadd.f32 %v3058_v18, %v2700_v28  ;;  %v3369_v50 = vpop.f32.mrb[33].mxu0 }
 0x446   : > { %v2703_v60 = vpop.f32.mrb[34].mxu0 }
 0x447   : > { %v2704_v27 = vadd.f32 %v3058_v18, %v2703_v60  ;;  %v3370_v45 = vpop.f32.mrb[35].mxu0  ;;  %v2707_v29 = vmax.f32 %v2701_v13, 0.0 }
 0x449   : > { %v2708_v46 = vmax.f32 %v2704_v27, 0.0 }
 0x44b   : > { %v2709_v31 = vpack.c.bf16 %v2708_v46, %v2707_v29 }
 0x44d   : > { %3380 = vmatmul.mubr.msk.bf16.vlgmr.msra.gmra.mrb[36].mxu1 %vm2742_vm11, %v2709_v31 }
 0x520   : > { %v2780_v62 = vpop.f32.mrb[36].mxu1 }
 0x521   : > { %v2787_v0 = vadd.f32 %v2780_v62, %v2637_v6  ;;  %v3381_v52 = vpop.f32.mrb[37].mxu1 }
 0x522   : > { %v2783_v4 = vpop.f32.mrb[38].mxu1 }
 0x523   : > { %v2788_v8 = vadd.f32 %v2783_v4, %v2638_v34  ;;  %v3382_v25 = vpop.f32.mrb[39].mxu1  ;;  %v2796_v57 = vadd.f32 %v3067_v2, %v2787_v0 }
 0x525   : > { %v2797_v3 = vadd.f32 %v3067_v2, %v2788_v8 }
 0x527   : > { %v2798_v54 = vpack.c.bf16 %v2797_v3, %v2796_v57 }
 0x529   : > { %3388 = vmatmul.mubr.msk.bf16.vlgmr.msra.gmra.mrb[36].mxu0 %vm879_vm0, %v2798_v54 }
 0x5fc   : > { %v2859_v63 = vpop.f32.mrb[36].mxu0 }
 0x5fd   : > { %v2860_v36 = vadd.f32 %v3068_v11, %v2859_v63  ;;  %v3389_v37 = vpop.f32.mrb[37].mxu0 }
 0x5fe   : > { %v2862_v20 = vpop.f32.mrb[38].mxu0 }
 0x5ff   : > { %v2866_v19 = vmax.f32 %v2860_v36, 0.0  ;;  %v2863_v49 = vadd.f32 %v3068_v11, %v2862_v20  ;;  %v3390_v10 = vpop.f32.mrb[39].mxu0 }
 0x601   : > { %v3077_v1 = vpack.c.bf16 %v2866_v19, %v2866_v19  ;;  %v2867_v12 = vmax.f32 %v2863_v49, 0.0 }
 0x603   : > { %2877 = vst.msk [vmem:[%s592_s19] sm:$0xf] %vm2876_vm12, %v3077_v1  ;;  %v3078_v40 = vpack.c.bf16 %v2867_v12, %v2867_v12 }
 0x605   : > { %2878 = vst.msk [vmem:[%s592_s19 + $0x4] sm:$0xf] %vm2876_vm12, %v3078_v40 }
 0x606 PF: > { %s26_s21 = sadd.s32 1, %s3603_s21  }
 0x607   : > { %p23_p5 = scmp.ge.s32.totalorder %s26_s21, 4  }
 0x609   :  { %25 = sbr.rel (!%p23_p5) target bundleno = 2 (0x2), region = 123 }

// kernel: dada_res_block_forward.13
= control target key start
LH: loop header
LB: loop body
LE: loop exit
PB: predicated region body
PF: predicated region fallthrough
CT: control target
= control target key end

     0   :  { %s4928_s0 = inlined_call_operand.vmem [shape: bf16[32,32], index: 0, kind: input, shape index: {}]   ;;  %s4929_s1 = inlined_call_operand.vmem [shape: bf16[32,16,64], index: 1, kind: input, shape index: {}]   ;;  %s4930_s2 = inlined_call_operand.vmem [shape: s32[32,16], index: 2, kind: input, shape index: {}]   ;;  %s4931_s3 = inlined_call_operand.vmem [shape: bf16[32,32], index: 3, kind: input, shape index: {}]   ;;  %s4932_s4 = inlined_call_operand.vmem [shape: bf16[32,32], index: 4, kind: input, shape index: {}]   ;;  %s4933_s5 = inlined_call_operand.vmem [shape: f32[32,4], index: 5, kind: input, shape index: {}]   ;;  %s4934_s6 = inlined_call_operand.vmem [shape: f32[4,32], index: 6, kind: input, shape index: {}]   ;;  %s4935_s7 = inlined_call_operand.vmem [shape: bf16[32,32], index: 7, kind: input, shape index: {}]   ;;  %s4936_s8 = inlined_call_operand.vmem [shape: f32[1,32], index: 8, kind: input, shape index: {}]   ;;  %s4937_s9 = inlined_call_operand.vmem [shape: f32[1,32], index: 9, kind: input, shape index: {}]   ;;  %s4938_s10 = inlined_call_operand.vmem [shape: f32[1,32], index: 10, kind: input, shape index: {}]   ;;  %s4939_s11 = inlined_call_operand.vmem [shape: bf16[32,64], index: 11, kind: input, shape index: {}]   ;;  %s4940_s12 = inlined_call_operand.vmem [shape: f32[1,64], index: 12, kind: input, shape index: {}]   ;;  %s4941_s13 = inlined_call_operand.vmem [shape: bf16[64,32], index: 13, kind: input, shape index: {}]   ;;  %s4942_s14 = inlined_call_operand.vmem [shape: f32[1,32], index: 14, kind: input, shape index: {}]   ;;  %s4943_s15 = inlined_call_operand.vmem [shape: bf16[32,32], index: 15, kind: input, shape index: {}]   ;;  %s4944_s16 = inlined_call_operand.vmem [shape: f32[1,32], index: 16, kind: input, shape index: {}]   ;;  %s4945_s17 = inlined_call_operand.hbm [shape: f32[32,32], index: 17, kind: output, shape index: {}]  }
   0x1   :  { %5008 = sst [smem:[#allocation23_spill]] %s4928_s0 }
   0x2   :  { %5009 = sst [smem:[#allocation24_spill]] %s4929_s1 }
   0x3   :  { %5010 = sst [smem:[#allocation25_spill]] %s4933_s5 }
   0x4   :  { %22 = vsyncpa [#allocation3], 0 }
   0x5   :  { %24 = vsyncpa [#allocation3 + $0x1], 0  ;;  %s3871_s24 = smov 0   ;;  %s3873_s25 = smov 0  }
   0x6   :  { %s3875_s26 = smov 0   ;;  %s3877_s27 = smov 0  }
   0x7 LB: > { %5011 = sst [smem:[#allocation5_spill]] %s3760_s24  ;;  %s3892_s28 = sadd.s32 4294967295, %s3772_s27   ;;  %s3772_s27 = sphi %s3877_s27, %s5082_s27   ;;  %s3768_s26 = sphi %s3875_s26, %s5084_s26   ;;  %s3764_s25 = sphi %s3873_s25, %s5086_s25   ;;  %s3760_s24 = sphi %s3871_s24, %s5085_s24  }
   0x8   : > { %5012 = sst [smem:[#allocation6_spill]] %s3768_s26  ;;  %s3047_s29 = sadd.s32 4294967294, %s3772_s27  }
   0x9   : > { %s3896_s0 = sadd.s32 1, %s3772_s27   ;;  %s419_s30 = sadd.s32 1, %s3768_s26 }
   0xa   : > { %5013 = sst [smem:[#allocation7_spill]] %s3896_s0  ;;  %s416_s18 = ssub.s32 %s3772_s27, %s3896_s0 }
   0xb   : > { %p429_p0 = scmp.ne.s32.totalorder %s3768_s26, %s3764_s25  ;;  %p417_p1 = scmp.eq.s32.totalorder %s416_s18, 0 }
   0xc   : > { %p430_p2 = scmp.eq.s32.totalorder %s3892_s28, 1  ;;  %p435_p3 = scmp.ne.s32.totalorder %s3764_s25, %s3760_s24 }
   0xd   : > { %p436_p4 = scmp.eq.s32.totalorder %s3047_s29, 1  ;;  %p3050_p7 = scmp.ge.s32.totalorder %s3772_s27, 1 }
   0xe   : > { %s3907_s19 = scalar_select %p417_p1, %s3768_s26, %s419_s30  }
   0xf   : > { %p3909_p5 = por %p430_p2, %p429_p0  ;;  %p3913_p6 = por %p436_p4, %p435_p3 }
  0x10   : > { %5014 = sst [smem:[#allocation8_spill]] %s3907_s19  ;;  %p536_p8 = scmp.lt.s32.totalorder %s3772_s27, 3 }
  0x11   : > { %s5016_s20 = scalar_select %p3913_p6, 1, 0 }
  0x12   : > { %p537_p9 = pnand %p3050_p7, %p536_p8 }
  0x13   : > { %5017 = sst [smem:[#allocation9_spill]] %s5016_s20 }
  0x14   : > { %540 = sbr.rel (%p537_p9) target bundleno = 1569 (0x621), region = 88 }
  0x1b   : > { %s5018_s5 = sld [smem:[#allocation25_spill]]  ;;  %s3052_s19 = sshll.u32 %s3892_s28, 1  ;;  %v716_v3 = vlaneseq  ;;  %v3774_v7 = vmov 1966171168   ;;  %vm926_vm0 = vcmask 261120   ;;  %vm1992_vm1 = vcmask 1043456  }
  0x1c   : > { %s3054_s26 = sshll.u32 %s3892_s28, 4  ;;  %p610_p10 = scmp.lt.s32.totalorder %s3052_s19, 3  ;;  %v714_v8 = vunpack.c.l.s4 %v3774_v7  ;;  %vm1462_vm2 = vcmask 31744   ;;  %vm3777_vm3 = vmmov 0   ;;  %vm2584_vm4 = vcmask 1041409  }
  0x1d   : > { %p616_p11 = scmp.lt.s32.totalorder %s3054_s26, 31  ;;  %v3933_v9 = vshrl.u32 %v716_v3, 7  ;;  %s5019_s22 = sld [smem:[#allocation23_spill]]  ;;  %vm2586_vm5 = vcmask 1042434   ;;  %vm2588_vm6 = vcmask 1043459   ;;  %vm2590_vm7 = vcmask 1044484  }
  0x1e   : > { %s5088_s19 = smov (!%p610_p10, %s3052_s19), 3  ;;  %v715_v10 = vunpack.c.0.s8 %v714_v8  ;;  %vm2592_vm8 = vcmask 1045509   ;;  %vm2594_vm9 = vcmask 1046534   ;;  %vm2596_vm10 = vcmask 1047559  }
  0x1f   : > { %s5090_s26 = smov (!%p616_p11, %s3054_s26), 31  ;;  %s3938_s21 = sshll.u32 %s5088_s19, 2  ;;  %v3957_v16 = vsub.s32 0, %v3933_v9  ;;  %v1267_v8 = vsub.s32 1, %v3933_v9  ;;  %vm2789_vm11 = vcmask 523264  }
  0x20   : > { %s3153_s29 = sshll.u32 %s5090_s26, 3  ;;  %v3945_v11 = vsub.s32 %v715_v10, %v3933_v9  ;;  %s632_s18 = scalar_lea.vmem %s4931_s3, %s3938_s21 }
  0x21   : > { %v922_v0 = vld [vmem:[%s5018_s5] sm:$0xff]  ;;  %v923_v1 = vld [vmem:[%s5018_s5 + $0x8] sm:$0xff]  ;;  %v924_v2 = vld [vmem:[%s5018_s5 + $0x10] sm:$0xff] }
  0x22   : > { %v3471_v4 = vpack.c.bf16 %v923_v1, %v922_v0  ;;  %v925_v5 = vld [vmem:[%s5018_s5 + $0x18] sm:$0xff]  ;;  %s5020_s5 = sld [smem:[#allocation24_spill]] }
  0x23   : > { %v3475_v6 = vpack.c.bf16 %v925_v5, %v924_v2  ;;  %s613_s23 = scalar_lea.vmem %s5019_s22, %s3938_s21  ;;  %s3775_s22 = smov 96  }
  0x24   : > { %3472 = vmatprep.subr.bf16.mxu0 %v3471_v4  ;;  %v3220_v12 = vld [vmem:[%s613_s23] sm:$0xff]   ;;  %s606_s23 = sand.u32 1, %s3764_s25  }
  0x25   : > { %3474 = vmatpush3.bf16.msra.mxu0 %v3471_v4  ;;  %v3221_v13 = vunpack.c.l.bf16 %v3220_v12  ;;  %v4019_v54 = vunpack.c.h.bf16 %v3220_v12 }
  0x26   : > { %3476 = vmatprep.subr.bf16.mxu0 %v3475_v6 }
  0x27   : > { %v719_v15 = vrot.slane %v3221_v13, %v3945_v11  ;;  %v712_v17 = vcombine.high %v3221_v13, %v3221_v13  ;;  %v768_v7 = vrot.slane %v4019_v54, %v3945_v11 }
  0x28   : > { %s3950_s24 = scalar_lea.vmem %s5020_s5, %s3153_s29  ;;  %s3058_s5 = sshll.u32 %s5088_s19, 3 }
  0x29   : > { %3478 = vmatpush3.bf16.msra.mxu0 %v3475_v6  ;;  %v3953_v14 = vld [vmem:[%s3950_s24] sm:$0xff]   ;;  %v3960_v18 = vld [vmem:[%s3950_s24 + $0x8] sm:$0xff]   ;;  %v727_v21 = vcombine.high %v719_v15, %v719_v15  ;;  %v735_v22 = vrot.slane %v719_v15, %v3945_v11  ;;  %v3966_v23 = vld [vmem:[%s3950_s24 + $0x10] sm:$0xff]   ;;  %v726_v31 = vrot.slane %v712_v17, %v3945_v11  ;;  %s4003_s0 = scalar_lea.vmem %s4930_s2, %s3058_s5  ;;  %s3051_s5 = sshll.u32 %s606_s23, 4 }
  0x2a   : > { %v4982_v19 = vunpack.c.l.bf16 %v3953_v14  ;;  %v4981_v20 = vunpack.c.h.bf16 %v3953_v14  ;;  %v4980_v26 = vunpack.c.l.bf16 %v3960_v18  ;;  %v3972_v28 = vld [vmem:[%s3950_s24 + $0x18] sm:$0xff]   ;;  %v4979_v29 = vunpack.c.h.bf16 %v3960_v18  ;;  %v3998_v45 = vld [vmem:[%s3950_s24 + $0x20] sm:$0xff]   ;;  %v4017_v53 = vld [vmem:[%s3950_s24 + $0x28] sm:$0xff]  }
  0x2b   : > { %v757_v24 = vcombine.high %v735_v22, %v735_v22  ;;  %v813_v25 = vrot.slane %v735_v22, %v3957_v16  ;;  %v749_v27 = vrot.slane %v727_v21, %v3945_v11  ;;  %5021 = vst [vmem:[#allocation10_spill] sm:$0xff] %v3972_v28  ;;  %v4976_v30 = vunpack.c.l.bf16 %v3966_v23  ;;  %5022 = vst [vmem:[#allocation11_spill] sm:$0xff] %v3998_v45  ;;  %v1248_v52 = vld [vmem:[%s4003_s0] sm:$0xff]  ;;  %v4031_v62 = vld [vmem:[%s3950_s24 + $0x30] sm:$0xff]  }
  0x2c   : > { %v4975_v39 = vunpack.c.h.bf16 %v3966_v23  ;;  %v4974_v40 = vunpack.c.l.bf16 %v3972_v28  ;;  %v742_v43 = vrot.slane %v726_v31, %v3945_v11  ;;  %v728_v44 = vcombine.high %v726_v31, %v726_v31  ;;  %5023 = vst [vmem:[#allocation12_spill] sm:$0xff] %v4017_v53  ;;  %5024 = vst [vmem:[#allocation13_spill] sm:$0xff] %v4031_v62  ;;  %v4045_v6 = vld [vmem:[%s3950_s24 + $0x38] sm:$0xff]  }
  0x2d   : > { %v890_v32 = vmul.f32 %v4982_v19, %v813_v25  ;;  %v891_v33 = vmul.f32 %v4981_v20, %v813_v25  ;;  %v817_v34 = vrot.slane %v749_v27, %v3957_v16  ;;  %v821_v35 = vrot.slane %v757_v24, %v3957_v16  ;;  %5025 = vst [vmem:[#allocation14_spill] sm:$0xff] %v4045_v6 }
  0x2e   : > { %v759_v36 = vcombine.high %v749_v27, %v749_v27  ;;  %v4973_v47 = vunpack.c.h.bf16 %v3972_v28  ;;  %v4968_v49 = vunpack.c.l.bf16 %v3998_v45  ;;  %v829_v50 = vrot.slane %v742_v43, %v3957_v16  ;;  %v4066_v27 = vld [vmem:[%s3950_s24 + $0x40] sm:$0xff]  }
  0x2f   : > { %3337 = vmatprep.mubr.msk.f32.mxu0 %vm926_vm0, %v890_v32  ;;  %v892_v37 = vmul.f32 %v4980_v26, %v817_v34  ;;  %v893_v38 = vmul.f32 %v4979_v29, %v817_v34  ;;  %v894_v41 = vmul.f32 %v4976_v30, %v821_v35  ;;  %v895_v46 = vmul.f32 %v4975_v39, %v821_v35 }
  0x30   : > { %3338 = vmatmul.mubr.msk.f32.vlgmr.msra.gmra.mrb[0].mxu0 %vm926_vm0, %v891_v33  ;;  %v825_v42 = vrot.slane %v759_v36, %v3957_v16  ;;  %v756_v51 = vrot.slane %v728_v44, %v3945_v11  ;;  %v4967_v56 = vunpack.c.h.bf16 %v3998_v45  ;;  %v758_v57 = vcombine.high %v742_v43, %v742_v43 }
  0x31   : > { %3340 = vmatprep.mubr.msk.f32.mxu0 %vm926_vm0, %v892_v37  ;;  %v1250_v58 = vcvt.s32.f32 %v1248_v52  ;;  %v898_v59 = vmul.f32 %v4968_v49, %v829_v50  ;;  %v4964_v60 = vunpack.c.l.bf16 %v4017_v53  ;;  %v4963_v63 = vunpack.c.h.bf16 %v4017_v53  ;;  %v4098_v52 = vld [vmem:[%s3950_s24 + $0x50] sm:$0xff]  }
  0x32   : > { %v896_v48 = vmul.f32 %v4974_v40, %v825_v42  ;;  %v897_v55 = vmul.f32 %v4973_v47, %v825_v42  ;;  %v833_v61 = vrot.slane %v756_v51, %v3957_v16  ;;  %v899_v0 = vmul.f32 %v4967_v56, %v829_v50  ;;  %5027 = vst [vmem:[#allocation16_spill] sm:$0xff] %v4098_v52 }
  0x33   : > { %v4960_v1 = vunpack.c.l.bf16 %v4031_v62  ;;  %v837_v2 = vrot.slane %v758_v57, %v3957_v16  ;;  %v760_v3 = vcombine.high %v756_v51, %v756_v51  ;;  %v4039_v4 = vmul.f32 -1e+30, %v1250_v58 }
  0x34   : > { %3341 = vmatmul.mubr.msk.f32.gmra.mrb[2].mxu0 %vm926_vm0, %v893_v38  ;;  %v900_v5 = vmul.f32 %v4964_v60, %v833_v61  ;;  %v4953_v10 = vunpack.c.h.bf16 %v4031_v62  ;;  %v901_v12 = vmul.f32 %v4963_v63, %v833_v61  ;;  %v4952_v15 = vunpack.c.l.bf16 %v4045_v6  ;;  %v4080_v38 = vld [vmem:[%s3950_s24 + $0x48] sm:$0xff]  }
  0x35   : > { %3343 = vmatprep.mubr.msk.f32.mxu0 %vm926_vm0, %v894_v41  ;;  %v902_v13 = vmul.f32 %v4960_v1, %v837_v2  ;;  %v841_v17 = vrot.slane %v760_v3, %v3957_v16  ;;  %v784_v21 = vrot.slane %v768_v7, %v3945_v11  ;;  %v776_v22 = vcombine.high %v768_v7, %v768_v7  ;;  %v4114_v3 = vld [vmem:[%s3950_s24 + $0x58] sm:$0xff]  }
  0x36   : > { %v1257_v24 = vrot.slane %v4039_v4, %v3957_v16  ;;  %v1268_v25 = vrot.slane %v4039_v4, %v1267_v8  ;;  %v1278_v31 = vsub.s32 2, %v3933_v9  ;;  %v903_v32 = vmul.f32 %v4953_v10, %v837_v2  ;;  %5026 = vst [vmem:[#allocation15_spill] sm:$0xff] %v4080_v38  ;;  %5028 = vst [vmem:[#allocation17_spill] sm:$0xff] %v4114_v3 }
  0x37   : > { %v4951_v33 = vunpack.c.h.bf16 %v4045_v6  ;;  %v904_v34 = vmul.f32 %v4952_v15, %v841_v17  ;;  %v4978_v35 = vunpack.c.l.bf16 %v4066_v27  ;;  %v845_v36 = vrot.slane %v784_v21, %v3957_v16 }
  0x38   : > { %3344 = vmatmul.mubr.msk.f32.gmra.mrb[4].mxu0 %vm926_vm0, %v895_v46  ;;  %1259 = vbcast.lane.b32.xlu0 %v1257_v24, 256  ;;  %v798_v37 = vrot.slane %v776_v22, %v3945_v11  ;;  %v1279_v41 = vrot.slane %v4039_v4, %v1278_v31  ;;  %v1289_v42 = vsub.s32 3, %v3933_v9  ;;  %v761_v43 = vcombine.high %v4019_v54, %v4019_v54 }
  0x39   : > { %3346 = vmatprep.mubr.msk.f32.mxu0 %vm926_vm0, %v896_v48  ;;  %1270 = vbcast.lane.b32.xlu1 %v1268_v25, 256  ;;  %v905_v44 = vmul.f32 %v4951_v33, %v841_v17  ;;  %v4977_v46 = vunpack.c.h.bf16 %v4066_v27  ;;  %v906_v48 = vmul.f32 %v4978_v35, %v845_v36  ;;  %v4972_v50 = vunpack.c.l.bf16 %v4080_v38 }
  0x3a   : > { %v849_v51 = vrot.slane %v798_v37, %v3957_v16  ;;  %v806_v54 = vcombine.high %v784_v21, %v784_v21  ;;  %v1300_v57 = vsub.s32 4, %v3933_v9  ;;  %v4970_v61 = vunpack.c.l.bf16 %v4098_v52 }
  0x3b   : > { %v907_v58 = vmul.f32 %v4977_v46, %v845_v36  ;;  %v775_v7 = vrot.slane %v761_v43, %v3945_v11  ;;  %v4969_v21 = vunpack.c.h.bf16 %v4098_v52  ;;  %v4966_v22 = vunpack.c.l.bf16 %v4114_v3  ;;  %v4132_v36 = vld [vmem:[%s3950_s24 + $0x60] sm:$0xff]   ;;  %v1249_v43 = vld [vmem:[%s4003_s0 + $0x8] sm:$0xff]  ;;  %s3154_s0 = sshll.u32 %s3892_s28, 8  ;;  %s4887_s28 = scalar_lea.sflag [#allocation3], %s606_s23 }
  0x3c   : > { %3347 = vmatmul.mubr.msk.f32.gmra.mrb[6].mxu0 %vm926_vm0, %v897_v55  ;;  %1263 = vbcast.lane.b32.xlu0 %v1257_v24, 264  ;;  %v1290_v55 = vrot.slane %v4039_v4, %v1289_v42  ;;  %v853_v2 = vrot.slane %v806_v54, %v3957_v16  ;;  %5029 = vst [vmem:[#allocation18_spill] sm:$0xff] %v4132_v36  ;;  %v4962_v54 = vunpack.c.l.bf16 %v4132_v36  ;;  %s4881_s29 = scalar_lea.hbm %s4945_s17, %s3154_s0 }
  0x3d   : > { %3349 = vmatprep.mubr.msk.f32.mxu0 %vm926_vm0, %v898_v59  ;;  %1274 = vbcast.lane.b32.xlu1 %v1268_v25, 264  ;;  %v4971_v59 = vunpack.c.h.bf16 %v4080_v38 }
  0x3e   : > { %v910_v24 = vmul.f32 %v4970_v61, %v853_v2 }
  0x3f   : > { %v909_v17 = vmul.f32 %v4971_v59, %v849_v51 }
  0x40   : > { %3350 = vmatmul.mubr.msk.f32.gmra.mrb[8].mxu0 %vm926_vm0, %v899_v0  ;;  %1281 = vbcast.lane.b32.xlu0 %v1279_v41, 256  ;;  %v908_v0 = vmul.f32 %v4972_v50, %v849_v51 }
  0x41   : > { %3352 = vmatprep.mubr.msk.f32.mxu0 %vm926_vm0, %v900_v5  ;;  %1285 = vbcast.lane.b32.xlu1 %v1279_v41, 264  ;;  %v808_v5 = vcombine.high %v798_v37, %v798_v37  ;;  %v1322_v41 = vsub.s32 6, %v3933_v9 }
  0x43   : > { %v857_v25 = vrot.slane %v808_v5, %v3957_v16  ;;  %v1251_v5 = vcvt.s32.f32 %v1249_v43  ;;  %v4166_v43 = vld [vmem:[%s3950_s24 + $0x70] sm:$0xff]  }
  0x44   : > { %3353 = vmatmul.mubr.msk.f32.gmra.mrb[10].mxu0 %vm926_vm0, %v901_v12  ;;  %1292 = vbcast.lane.b32.xlu0 %v1290_v55, 256  ;;  %v1301_v12 = vrot.slane %v4039_v4, %v1300_v57  ;;  %5031 = vst [vmem:[#allocation20_spill] sm:$0xff] %v4166_v43 }
  0x45   : > { %3355 = vmatprep.mubr.msk.f32.mxu0 %vm926_vm0, %v902_v13  ;;  %1296 = vbcast.lane.b32.xlu1 %v1290_v55, 264  ;;  %v1311_v13 = vsub.s32 5, %v3933_v9  ;;  %v912_v51 = vmul.f32 %v4966_v22, %v857_v25  ;;  %v1253_v33 = vmul.f32 -1e+30, %v1251_v5 }
  0x47   : > { %v1312_v37 = vrot.slane %v4039_v4, %v1311_v13 }
  0x48   : > { %3356 = vmatmul.mubr.msk.f32.gmra.mrb[12].mxu0 %vm926_vm0, %v903_v32  ;;  %v791_v32 = vrot.slane %v775_v7, %v3945_v11  ;;  %1303 = vbcast.lane.b32.xlu0 %v1301_v12, 256 }
  0x49   : > { %3358 = vmatprep.mubr.msk.f32.mxu0 %vm926_vm0, %v904_v34  ;;  %v777_v34 = vcombine.high %v775_v7, %v775_v7  ;;  %1307 = vbcast.lane.b32.xlu1 %v1301_v12, 264  ;;  %v1333_v7 = vsub.s32 7, %v3933_v9 }
  0x4a   : > { %v861_v55 = vrot.slane %v791_v32, %v3957_v16 }
  0x4c   : > { %3359 = vmatmul.mubr.msk.f32.gmra.mrb[14].mxu0 %vm926_vm0, %v905_v44  ;;  %v911_v44 = vmul.f32 %v4969_v21, %v853_v2  ;;  %1314 = vbcast.lane.b32.xlu0 %v1312_v37, 256  ;;  %v1323_v2 = vrot.slane %v4039_v4, %v1322_v41 }
  0x4d   : > { %3361 = vmatprep.mubr.msk.f32.mxu0 %vm926_vm0, %v906_v48  ;;  %v4965_v48 = vunpack.c.h.bf16 %v4114_v3  ;;  %1318 = vbcast.lane.b32.xlu1 %v1312_v37, 264  ;;  %v807_v37 = vcombine.high %v791_v32, %v791_v32  ;;  %v4957_v32 = vunpack.c.l.bf16 %v4166_v43 }
  0x4f   : > { %v913_v12 = vmul.f32 %v4965_v48, %v857_v25  ;;  %v1334_v25 = vrot.slane %v4039_v4, %v1333_v7  ;;  %v869_v5 = vrot.slane %v807_v37, %v3957_v16  ;;  %v1345_v4 = vrot.slane %v1253_v33, %v3957_v16 }
  0x50   : > { %3362 = vmatmul.mubr.msk.f32.gmra.mrb[16].mxu0 %vm926_vm0, %v907_v58  ;;  %v805_v58 = vrot.slane %v777_v34, %v3945_v11  ;;  %v914_v11 = vmul.f32 %v4962_v54, %v861_v55  ;;  %1325 = vbcast.lane.b32.xlu0 %v1323_v2, 256 }
  0x51   : > { %3364 = vmatprep.mubr.msk.f32.mxu0 %vm926_vm0, %v908_v0  ;;  %v4150_v0 = vld [vmem:[%s3950_s24 + $0x68] sm:$0xff]   ;;  %1329 = vbcast.lane.b32.xlu1 %v1323_v2, 264  ;;  %v4179_v2 = vld [vmem:[%s3950_s24 + $0x78] sm:$0xff]   ;;  %s608_s24 = scalar_lea.vmem [#allocation2], %s3051_s5 }
  0x52   : > { %5030 = vst [vmem:[#allocation19_spill] sm:$0xff] %v4150_v0  ;;  %v865_v34 = vrot.slane %v805_v58, %v3957_v16  ;;  %v809_v10 = vcombine.high %v805_v58, %v805_v58  ;;  %5032 = vst [vmem:[#allocation21_spill] sm:$0xff] %v4179_v2  ;;  %v4955_v58 = vunpack.c.l.bf16 %v4179_v2  ;;  %s2937_s20 = sshll.u32 %s608_s24, 4  ;;  %s4883_s20 = int_to_ptr.vmem [resolvable:$true] %s2937_s20 }
  0x53   : > { %s3710_s30 = scalar_lea.vmem %s4883_s20, 256 }
  0x54   : > { %3365 = vmatmul.mubr.msk.f32.gmra.mrb[18].mxu0 %vm926_vm0, %v909_v17  ;;  %v4961_v17 = vunpack.c.h.bf16 %v4132_v36  ;;  %1336 = vbcast.lane.b32.xlu0 %v1334_v25, 256  ;;  %v873_v37 = vrot.slane %v809_v10, %v3957_v16  ;;  %v1367_v16 = vrot.slane %v1253_v33, %v1278_v31  ;;  %v1378_v10 = vrot.slane %v1253_v33, %v1289_v42  ;;  %p3711_p12 = scmp.ne.s32.totalorder %s4883_s20, %s3710_s30 }
  0x55   : > { %3367 = vmatprep.mubr.msk.f32.mxu0 %vm926_vm0, %v910_v24  ;;  %v4959_v24 = vunpack.c.l.bf16 %v4150_v0  ;;  %1340 = vbcast.lane.b32.xlu1 %v1334_v25, 264  ;;  %v1356_v25 = vrot.slane %v1253_v33, %v1267_v8  ;;  %v1400_v31 = vrot.slane %v1253_v33, %v1311_v13  ;;  %v1422_v42 = vrot.slane %v1253_v33, %v1333_v7 }
  0x56   : > { %p3712_p13 = pnand %p3711_p12, %p3909_p5 }
  0x57   : > { %v916_v15 = vmul.f32 %v4959_v24, %v865_v34 }
  0x58   : > { %3368 = vmatmul.mubr.msk.f32.gmra.mrb[20].mxu0 %vm926_vm0, %v911_v44  ;;  %v915_v44 = vmul.f32 %v4961_v17, %v861_v55  ;;  %1347 = vbcast.lane.b32.xlu0 %v1345_v4, 256  ;;  %p3713_p0 = pneg %p3712_p13 }
  0x59   : > { %3370 = vmatprep.mubr.msk.f32.mxu0 %vm926_vm0, %v912_v51  ;;  %v4958_v51 = vunpack.c.h.bf16 %v4150_v0  ;;  %1351 = vbcast.lane.b32.xlu1 %v1345_v4, 264  ;;  %v1411_v4 = vrot.slane %v1253_v33, %v1322_v41 }
  0x5b   : > { %v917_v55 = vmul.f32 %v4958_v51, %v865_v34 }
  0x5c   : > { %3371 = vmatmul.mubr.msk.f32.gmra.mrb[22].mxu0 %vm926_vm0, %v913_v12  ;;  %v4956_v12 = vunpack.c.h.bf16 %v4166_v43  ;;  %1358 = vbcast.lane.b32.xlu0 %v1356_v25, 256 }
  0x5d   : > { %3373 = vmatprep.mubr.msk.f32.mxu0 %vm926_vm0, %v914_v11  ;;  %v918_v11 = vmul.f32 %v4957_v32, %v869_v5  ;;  %1362 = vbcast.lane.b32.xlu1 %v1356_v25, 264 }
  0x5e   : > { %v919_v34 = vmul.f32 %v4956_v12, %v869_v5  ;;  %v1389_v5 = vrot.slane %v1253_v33, %v1300_v57 }
  0x60   : > { %3374 = vmatmul.mubr.msk.f32.gmra.mrb[24].mxu0 %vm926_vm0, %v915_v44  ;;  %v4954_v44 = vunpack.c.h.bf16 %v4179_v2  ;;  %1369 = vbcast.lane.b32.xlu0 %v1367_v16, 256 }
  0x61   : > { %3376 = vmatprep.mubr.msk.f32.mxu0 %vm926_vm0, %v916_v15  ;;  %v920_v15 = vmul.f32 %v4955_v58, %v873_v37  ;;  %1373 = vbcast.lane.b32.xlu1 %v1367_v16, 264 }
  0x62   : > { %v921_v8 = vmul.f32 %v4954_v44, %v873_v37 }
  0x64   : > { %3377 = vmatmul.mubr.msk.f32.gmra.mrb[26].mxu0 %vm926_vm0, %v917_v55  ;;  %1380 = vbcast.lane.b32.xlu0 %v1378_v10, 256  ;;  %v1895_v55 = vld [vmem:[%s4934_s6] sm:$0xf] }
  0x65   : > { %3379 = vmatprep.mubr.msk.f32.mxu0 %vm926_vm0, %v918_v11  ;;  %1384 = vbcast.lane.b32.xlu1 %v1378_v10, 264 }
  0x66   : > { %3385 = vmatprep.subr.msk.mxu1 %vm1992_vm1, %v1895_v55 }
  0x67   : > { %3386 = vmatpush3.msk.msra.mxu1 %vm1992_vm1, %v1895_v55 }
  0x68   : > { %3380 = vmatmul.mubr.msk.f32.gmra.mrb[28].mxu0 %vm926_vm0, %v919_v34  ;;  %1391 = vbcast.lane.b32.xlu0 %v1389_v5, 256 }
  0x69   : > { %3382 = vmatprep.mubr.msk.f32.mxu0 %vm926_vm0, %v920_v15  ;;  %1395 = vbcast.lane.b32.xlu1 %v1389_v5, 264 }
  0x6c   : > { %3383 = vmatmul.mubr.msk.f32.gmra.mrb[30].mxu0 %vm926_vm0, %v921_v8  ;;  %1402 = vbcast.lane.b32.xlu0 %v1400_v31, 256 }
  0x6d   : > { %1406 = vbcast.lane.b32.xlu1 %v1400_v31, 264 }
  0x70   : > { %1413 = vbcast.lane.b32.xlu0 %v1411_v4, 256 }
  0x71   : > { %1417 = vbcast.lane.b32.xlu1 %v1411_v4, 264 }
  0x74   : > { %1424 = vbcast.lane.b32.xlu0 %v1422_v42, 256 }
  0x75   : > { %1428 = vbcast.lane.b32.xlu1 %v1422_v42, 264 }
  0xaa   : > { %v1260_v11 = vpop.permute.xlu0 %1259 }
  0xab   : > { %v1271_v57 = vpop.permute.xlu1 %1270 }
  0xae   : > { %v1264_v37 = vpop.permute.xlu0 %1263 }
  0xaf   : > { %v1275_v13 = vpop.permute.xlu1 %1274 }
  0xb2   : > { %v1282_v34 = vpop.permute.xlu0 %1281 }
  0xb3   : > { %v1286_v25 = vpop.permute.xlu1 %1285 }
  0xb6   : > { %v1293_v5 = vpop.permute.xlu0 %1292 }
  0xb7   : > { %v1297_v16 = vpop.permute.xlu1 %1296 }
  0xbb   : > { %v1308_v51 = vpop.permute.xlu1 %1307 }
  0xbf   : > { %v1319_v54 = vpop.permute.xlu1 %1318 }
 0x103   : > { %v3339_v9 = vpop.f32.mrb[0].mxu0 }
 0x104   : > { %v1431_v41 = vadd.f32 %v3339_v9, %v1264_v37  ;;  %v1089_v15 = vpop.f32.mrb[1].mxu0 }
 0x105   : > { %v1430_v33 = vadd.f32 %v1260_v11, %v1089_v15 }
 0x106   : > { %v1464_v7 = vsel %vm1462_vm2, %v1431_v41, -inf }
 0x107   : > { %v1463_v8 = vsel %vm1462_vm2, %v1430_v33, -inf  ;;  %v3342_v10 = vpop.f32.mrb[2].mxu0 }
 0x108   : > { %v1465_v31 = vmax.f32 %v1463_v8, %v1464_v7  ;;  %v4220_v4 = vadd.f32 %v3342_v10, %v1275_v13  ;;  %v1099_v42 = vpop.f32.mrb[3].mxu0  ;;  %v1304_v13 = vpop.permute.xlu0 %1303 }
 0x109   : > { %v4222_v55 = vadd.f32 %v1271_v57, %v1099_v42 }
 0x10a   : > { %v1466_v44 = vrot.slane %v1465_v31, 4  ;;  %v1473_v58 = vsel %vm1462_vm2, %v4220_v4, -inf }
 0x10b   : > { %v1472_v11 = vsel %vm1462_vm2, %v4222_v55, -inf  ;;  %v3345_v37 = vpop.f32.mrb[4].mxu0 }
 0x10c   : > { %v1467_v9 = vmax.f32 %v1465_v31, %v1466_v44  ;;  %v1474_v15 = vmax.f32 %v1472_v11, %v1473_v58  ;;  %v4228_v12 = vadd.f32 %v3345_v37, %v1286_v25  ;;  %v1109_v32 = vpop.f32.mrb[5].mxu0  ;;  %v1315_v48 = vpop.permute.xlu0 %1314 }
 0x10d   : > { %v4230_v7 = vadd.f32 %v1282_v34, %v1109_v32 }
 0x10e   : > { %v1468_v8 = vrot.slane %v1467_v9, 2  ;;  %v1475_v57 = vrot.slane %v1474_v15, 4  ;;  %v1482_v10 = vsel %vm1462_vm2, %v4228_v12, -inf }
 0x10f   : > { %v1481_v42 = vsel %vm1462_vm2, %v4230_v7, -inf  ;;  %v3348_v24 = vpop.f32.mrb[6].mxu0 }
 0x110   : > { %v1469_v1 = vmax.f32 %v1467_v9, %v1468_v8  ;;  %v1476_v17 = vmax.f32 %v1474_v15, %v1475_v57  ;;  %v1483_v44 = vmax.f32 %v1481_v42, %v1482_v10  ;;  %v4236_v58 = vadd.f32 %v3348_v24, %v1297_v16  ;;  %v1119_v25 = vpop.f32.mrb[7].mxu0 }
 0x111   : > { %v4238_v31 = vadd.f32 %v1293_v5, %v1119_v25 }
 0x112   : > { %v1470_v32 = vrot.slane %v1469_v1, 1  ;;  %v1477_v34 = vrot.slane %v1476_v17, 2  ;;  %v1484_v11 = vrot.slane %v1483_v44, 4  ;;  %v1491_v37 = vsel %vm1462_vm2, %v4236_v58, -inf }
 0x113   : > { %v1490_v63 = vsel %vm1462_vm2, %v4238_v31, -inf  ;;  %v3351_v60 = vpop.f32.mrb[8].mxu0 }
 0x114   : > { %v1471_v9 = vmax.f32 %v1469_v1, %v1470_v32  ;;  %v1478_v15 = vmax.f32 %v1476_v17, %v1477_v34  ;;  %v1485_v8 = vmax.f32 %v1483_v44, %v1484_v11  ;;  %v1492_v24 = vmax.f32 %v1490_v63, %v1491_v37  ;;  %v1129_v16 = vpop.f32.mrb[9].mxu0  ;;  %v1326_v11 = vpop.permute.xlu0 %1325 }
 0x115   : > { %v4244_v57 = vadd.f32 %v3351_v60, %v1308_v51  ;;  %v4246_v5 = vadd.f32 %v1304_v13, %v1129_v16  ;;  %v1330_v51 = vpop.permute.xlu1 %1329 }
 0x116   : > { %v1607_v10 = vsub.f32 %v1430_v33, %v1471_v9  ;;  %v1608_v42 = vsub.f32 %v1431_v41, %v1471_v9  ;;  %v1479_v25 = vrot.slane %v1478_v15, 1  ;;  %v1486_v22 = vrot.slane %v1485_v8, 2 }
 0x117   : > { %v1493_v56 = vrot.slane %v1492_v24, 4  ;;  %v1500_v49 = vsel %vm1462_vm2, %v4244_v57, -inf  ;;  %v1499_v21 = vsel %vm1462_vm2, %v4246_v5, -inf  ;;  %v3354_v1 = vpop.f32.mrb[10].mxu0 }
 0x118   : > { %v1639_v17 = vmul.f32 1.442695, %v1607_v10  ;;  %v1641_v44 = vmul.f32 1.442695, %v1608_v42  ;;  %v1480_v63 = vmax.f32 %v1478_v15, %v1479_v25  ;;  %v1487_v32 = vmax.f32 %v1485_v8, %v1486_v22  ;;  %v1139_v60 = vpop.f32.mrb[11].mxu0 }
 0x119   : > { %v1494_v13 = vmax.f32 %v1492_v24, %v1493_v56  ;;  %v1501_v34 = vmax.f32 %v1499_v21, %v1500_v49  ;;  %v4252_v33 = vadd.f32 %v3354_v1, %v1319_v54  ;;  %v4254_v41 = vadd.f32 %v1315_v48, %v1139_v60 }
 0x11a   : > { %3614 = vpow2.f32 %v1639_v17  ;;  %v1609_v37 = vsub.f32 %v4222_v55, %v1480_v63  ;;  %v1610_v9 = vsub.f32 %v4220_v4, %v1480_v63  ;;  %v1488_v16 = vrot.slane %v1487_v32, 1 }
 0x11b   : > { %3616 = vpow2.f32 %v1641_v44  ;;  %v1495_v10 = vrot.slane %v1494_v13, 2  ;;  %v1502_v42 = vrot.slane %v1501_v34, 4  ;;  %v1509_v22 = vsel %vm1462_vm2, %v4252_v33, -inf  ;;  %v3357_v15 = vpop.f32.mrb[12].mxu0  ;;  %v1341_v44 = vpop.permute.xlu1 %1340 }
 0x11c   : > { %v1643_v56 = vmul.f32 1.442695, %v1609_v37  ;;  %v1645_v49 = vmul.f32 1.442695, %v1610_v9  ;;  %v1489_v21 = vmax.f32 %v1487_v32, %v1488_v16  ;;  %v1508_v48 = vsel %vm1462_vm2, %v4254_v41, -inf  ;;  %v1149_v54 = vpop.f32.mrb[13].mxu0  ;;  %v1337_v9 = vpop.permute.xlu0 %1336 }
 0x11d   : > { %v1496_v8 = vmax.f32 %v1494_v13, %v1495_v10  ;;  %v1503_v24 = vmax.f32 %v1501_v34, %v1502_v42  ;;  %v1510_v55 = vmax.f32 %v1508_v48, %v1509_v22  ;;  %v4262_v25 = vadd.f32 %v3357_v15, %v1330_v51 }
 0x11e   : > { %3618 = vpow2.f32 %v1643_v56  ;;  %v1611_v4 = vsub.f32 %v4230_v7, %v1489_v21  ;;  %v1612_v1 = vsub.f32 %v4228_v12, %v1489_v21  ;;  %v4266_v17 = vadd.f32 %v1326_v11, %v1149_v54 }
 0x11f   : > { %3620 = vpow2.f32 %v1645_v49  ;;  %v1497_v63 = vrot.slane %v1496_v8, 1  ;;  %v1504_v32 = vrot.slane %v1503_v24, 2  ;;  %v1511_v60 = vrot.slane %v1510_v55, 4  ;;  %v3360_v37 = vpop.f32.mrb[14].mxu0 }
 0x120   : > { %v1647_v16 = vmul.f32 1.442695, %v1611_v4  ;;  %v1649_v13 = vmul.f32 1.442695, %v1612_v1  ;;  %v1518_v51 = vsel %vm1462_vm2, %v4262_v25, -inf  ;;  %v1517_v34 = vsel %vm1462_vm2, %v4266_v17, -inf  ;;  %v1352_v1 = vpop.permute.xlu1 %1351 }
 0x121   : > { %v1498_v7 = vmax.f32 %v1496_v8, %v1497_v63  ;;  %v1505_v10 = vmax.f32 %v1503_v24, %v1504_v32  ;;  %v1512_v12 = vmax.f32 %v1510_v55, %v1511_v60  ;;  %v1519_v11 = vmax.f32 %v1517_v34, %v1518_v51  ;;  %v1159_v42 = vpop.f32.mrb[15].mxu0 }
 0x122   : > { %3622 = vpow2.f32 %v1647_v16  ;;  %v4272_v22 = vadd.f32 %v3360_v37, %v1341_v44  ;;  %v4274_v15 = vadd.f32 %v1337_v9, %v1159_v42  ;;  %v1348_v42 = vpop.permute.xlu0 %1347 }
 0x123   : > { %3624 = vpow2.f32 %v1649_v13  ;;  %v1613_v56 = vsub.f32 %v4238_v31, %v1498_v7  ;;  %v1614_v49 = vsub.f32 %v4236_v58, %v1498_v7  ;;  %v1506_v21 = vrot.slane %v1505_v10, 1  ;;  %v3363_v48 = vpop.f32.mrb[16].mxu0 }
 0x124   : > { %v4278_v54 = vpop.eup %3614  ;;  %v1513_v4 = vrot.slane %v1512_v12, 2  ;;  %v1520_v8 = vrot.slane %v1519_v11, 4  ;;  %v1527_v24 = vsel %vm1462_vm2, %v4272_v22, -inf  ;;  %v1526_v55 = vsel %vm1462_vm2, %v4274_v15, -inf  ;;  %v1169_v44 = vpop.f32.mrb[17].mxu0 }
 0x125   : > { %v4284_v63 = vpop.eup %3616  ;;  %v1703_v31 = vsel %vm1462_vm2, %v4278_v54, 0.0  ;;  %v1651_v58 = vmul.f32 1.442695, %v1613_v56  ;;  %v1653_v32 = vmul.f32 1.442695, %v1614_v49  ;;  %v1507_v60 = vmax.f32 %v1505_v10, %v1506_v21 }
 0x126   : > { %v1704_v37 = vsel %vm1462_vm2, %v4284_v63, 0.0  ;;  %v1514_v9 = vmax.f32 %v1512_v12, %v1513_v4  ;;  %v1521_v16 = vmax.f32 %v1519_v11, %v1520_v8  ;;  %v1528_v13 = vmax.f32 %v1526_v55, %v1527_v24 }
 0x127   : > { %v4290_v51 = vadd.f32 %v1704_v37, %v1703_v31  ;;  %3626 = vpow2.f32 %v1651_v58  ;;  %v1615_v34 = vsub.f32 %v4246_v5, %v1507_v60  ;;  %v1616_v7 = vsub.f32 %v4244_v57, %v1507_v60  ;;  %v4294_v61 = vpop.f32.mrb[18].mxu0  ;;  %v1363_v58 = vpop.permute.xlu1 %1362 }
 0x128   : > { %v4296_v59 = vpop.eup %3618  ;;  %3628 = vpow2.f32 %v1653_v32  ;;  %v1515_v10 = vrot.slane %v1514_v9, 1  ;;  %v1522_v56 = vrot.slane %v1521_v16, 2  ;;  %v1529_v49 = vrot.slane %v1528_v13, 4  ;;  %v4298_v21 = vpop.f32.mrb[19].mxu0 }
 0x129   : > { %v4300_v12 = vpop.eup %3620  ;;  %v1712_v5 = vsel %vm1462_vm2, %v4296_v59, 0.0  ;;  %v1655_v4 = vmul.f32 1.442695, %v1615_v34  ;;  %v1657_v57 = vmul.f32 1.442695, %v1616_v7  ;;  %v4307_v60 = vadd.f32 %v3363_v48, %v1352_v1 }
 0x12a   : > { %v1713_v8 = vsel %vm1462_vm2, %v4300_v12, 0.0  ;;  %v1516_v24 = vmax.f32 %v1514_v9, %v1515_v10  ;;  %v1523_v55 = vmax.f32 %v1521_v16, %v1522_v56  ;;  %v1530_v31 = vmax.f32 %v1528_v13, %v1529_v49 }
 0x12b   : > { %v1714_v32 = vadd.f32 %v1713_v8, %v1712_v5  ;;  %3630 = vpow2.f32 %v1655_v4  ;;  %v4309_v37 = vadd.f32 %v1348_v42, %v1169_v44  ;;  %v4311_v50 = vpop.f32.mrb[20].mxu0  ;;  %v1536_v44 = vsel %vm1462_vm2, %v4307_v60, -inf  ;;  %v1359_v42 = vpop.permute.xlu0 %1358 }
 0x12c   : > { %v4313_v47 = vpop.eup %3622  ;;  %3632 = vpow2.f32 %v1657_v57  ;;  %v1617_v34 = vsub.f32 %v4254_v41, %v1516_v24  ;;  %v1618_v7 = vsub.f32 %v4252_v33, %v1516_v24  ;;  %v1524_v40 = vrot.slane %v1523_v55, 1  ;;  %v4317_v9 = vpop.f32.mrb[21].mxu0 }
 0x12d   : > { %v4319_v16 = vpop.eup %3624  ;;  %v1715_v13 = vrot.slane %v1714_v32, 4  ;;  %v1721_v48 = vsel %vm1462_vm2, %v4313_v47, 0.0  ;;  %v1531_v1 = vrot.slane %v1530_v31, 2  ;;  %v1535_v57 = vsel %vm1462_vm2, %v4309_v37, -inf  ;;  %v1374_v46 = vpop.permute.xlu1 %1373 }
 0x12e   : > { %v1722_v10 = vsel %vm1462_vm2, %v4319_v16, 0.0  ;;  %v1659_v41 = vmul.f32 1.442695, %v1617_v34  ;;  %v1661_v56 = vmul.f32 1.442695, %v1618_v7  ;;  %v1525_v33 = vmax.f32 %v1523_v55, %v1524_v40 }
 0x12f   : > { %v1716_v49 = vadd.f32 %v1715_v13, %v1714_v32  ;;  %v1723_v5 = vadd.f32 %v1722_v10, %v1721_v48  ;;  %v1532_v4 = vmax.f32 %v1530_v31, %v1531_v1  ;;  %v3372_v8 = vpop.f32.mrb[22].mxu0  ;;  %v1537_v30 = vmax.f32 %v1535_v57, %v1536_v44  ;;  %v1370_v10 = vpop.permute.xlu0 %1369 }
 0x130   : > { %3634 = vpow2.f32 %v1659_v41  ;;  %v1619_v24 = vsub.f32 %v4266_v17, %v1525_v33  ;;  %v1620_v39 = vsub.f32 %v4262_v25, %v1525_v33  ;;  %v4331_v35 = vpop.f32.mrb[23].mxu0  ;;  %v4346_v57 = vadd.f32 %v4294_v61, %v1363_v58 }
 0x131   : > { %v4333_v29 = vpop.eup %3626  ;;  %v1717_v34 = vrot.slane %v1716_v49, 2  ;;  %v1724_v40 = vrot.slane %v1723_v5, 4  ;;  %3636 = vpow2.f32 %v1661_v56  ;;  %v1533_v55 = vrot.slane %v1532_v4, 1  ;;  %v1385_v58 = vpop.permute.xlu1 %1384 }
 0x132   : > { %v4335_v31 = vpop.eup %3628  ;;  %v1730_v32 = vsel %vm1462_vm2, %v4333_v29, 0.0  ;;  %v1663_v7 = vmul.f32 1.442695, %v1619_v24  ;;  %v1665_v13 = vmul.f32 1.442695, %v1620_v39  ;;  %v1538_v17 = vrot.slane %v1537_v30, 4 }
 0x133   : > { %v4339_v48 = vadd.f32 %v1717_v34, %v1716_v49  ;;  %v1725_v25 = vadd.f32 %v1724_v40, %v1723_v5  ;;  %v1731_v1 = vsel %vm1462_vm2, %v4335_v31, 0.0  ;;  %v1534_v44 = vmax.f32 %v1532_v4, %v1533_v55  ;;  %v4343_v41 = vpop.f32.mrb[24].mxu0 }
 0x134   : > { %v1732_v56 = vadd.f32 %v1731_v1, %v1730_v32  ;;  %3638 = vpow2.f32 %v1663_v7  ;;  %v1539_v33 = vmax.f32 %v1537_v30, %v1538_v17  ;;  %v4348_v26 = vpop.f32.mrb[25].mxu0  ;;  %v1545_v61 = vsel %vm1462_vm2, %v4346_v57, -inf }
 0x135   : > { %v4350_v39 = vpop.eup %3630  ;;  %v1726_v49 = vrot.slane %v1725_v25, 2  ;;  %3640 = vpow2.f32 %v1665_v13  ;;  %v1621_v5 = vsub.f32 %v4274_v15, %v1534_v44  ;;  %v1622_v24 = vsub.f32 %v4272_v22, %v1534_v44 }
 0x136   : > { %v4354_v4 = vpop.eup %3632  ;;  %v1733_v34 = vrot.slane %v1732_v56, 4  ;;  %v1739_v40 = vsel %vm1462_vm2, %v4350_v39, 0.0  ;;  %v1540_v30 = vrot.slane %v1539_v33, 2  ;;  %v4367_v44 = vadd.f32 %v1359_v42, %v4298_v21 }
 0x137   : > { %v4360_v55 = vadd.f32 %v1726_v49, %v1725_v25  ;;  %v1740_v32 = vsel %vm1462_vm2, %v4354_v4, 0.0  ;;  %v1667_v7 = vmul.f32 1.442695, %v1621_v5  ;;  %v1669_v15 = vmul.f32 1.442695, %v1622_v24  ;;  %v4364_v13 = vpop.f32.mrb[26].mxu0  ;;  %v1381_v5 = vpop.permute.xlu0 %1380 }
 0x138   : > { %v1734_v22 = vadd.f32 %v1733_v34, %v1732_v56  ;;  %v1741_v17 = vadd.f32 %v1740_v32, %v1739_v40  ;;  %v1541_v1 = vmax.f32 %v1539_v33, %v1540_v30  ;;  %v4369_v20 = vpop.f32.mrb[27].mxu0  ;;  %v4372_v19 = vadd.f32 %v4311_v50, %v1374_v46 }
 0x139   : > { %3642 = vpow2.f32 %v1667_v7  ;;  %v4375_v25 = vadd.f32 %v1370_v10, %v4317_v9  ;;  %v4377_v49 = vadd.f32 %v3372_v8, %v1385_v58  ;;  %v1544_v46 = vsel %vm1462_vm2, %v4367_v44, -inf }
 0x13a   : > { %v4379_v24 = vpop.eup %3634  ;;  %v1735_v56 = vrot.slane %v1734_v22, 2  ;;  %v1742_v34 = vrot.slane %v1741_v17, 4  ;;  %3644 = vpow2.f32 %v1669_v15  ;;  %v1542_v33 = vrot.slane %v1541_v1, 1 }
 0x13b   : > { %v4381_v21 = vpop.eup %3636  ;;  %v1748_v42 = vsel %vm1462_vm2, %v4379_v24, 0.0  ;;  %v1554_v50 = vsel %vm1462_vm2, %v4372_v19, -inf  ;;  %v1553_v9 = vsel %vm1462_vm2, %v4375_v25, -inf  ;;  %v4391_v8 = vpop.f32.mrb[28].mxu0  ;;  %v1546_v15 = vmax.f32 %v1544_v46, %v1545_v61 }
 0x13c   : > { %v4393_v10 = vadd.f32 %v1735_v56, %v1734_v22  ;;  %v1743_v40 = vadd.f32 %v1742_v34, %v1741_v17  ;;  %v1749_v30 = vsel %vm1462_vm2, %v4381_v21, 0.0  ;;  %v1543_v58 = vmax.f32 %v1541_v1, %v1542_v33  ;;  %v4397_v32 = vpop.f32.mrb[29].mxu0  ;;  %v1396_v56 = vpop.permute.xlu1 %1395 }
 0x13d   : > { %v1750_v7 = vadd.f32 %v1749_v30, %v1748_v42  ;;  %v1555_v11 = vmax.f32 %v1553_v9, %v1554_v50  ;;  %v1563_v2 = vsel %vm1462_vm2, %v4377_v49, -inf  ;;  %v4406_v17 = vadd.f32 %v1381_v5, %v4331_v35  ;;  %v1392_v46 = vpop.permute.xlu0 %1391 }
 0x13e   : > { %v4401_v43 = vpop.eup %3638  ;;  %v1744_v6 = vrot.slane %v1743_v40, 2  ;;  %v1623_v0 = vsub.f32 %v4309_v37, %v1543_v58  ;;  %v1624_v22 = vsub.f32 %v4307_v60, %v1543_v58  ;;  %v1547_v33 = vrot.slane %v1546_v15, 4 }
 0x13f   : > { %v4408_v1 = vpop.eup %3640  ;;  %v1751_v34 = vrot.slane %v1750_v7, 4  ;;  %v1757_v61 = vsel %vm1462_vm2, %v4401_v43, 0.0  ;;  %v1556_v42 = vrot.slane %v1555_v11, 4  ;;  %v4412_v50 = vpop.f32.mrb[30].mxu0  ;;  %v1562_v53 = vsel %vm1462_vm2, %v4406_v17, -inf }
 0x140   : > { %v4414_v9 = vadd.f32 %v1744_v6, %v1743_v40  ;;  %v1758_v60 = vsel %vm1462_vm2, %v4408_v1, 0.0  ;;  %v1671_v37 = vmul.f32 1.442695, %v1623_v0  ;;  %v1673_v35 = vmul.f32 1.442695, %v1624_v22  ;;  %v4418_v5 = vpop.f32.mrb[31].mxu0 }
 0x141   : > { %v1752_v30 = vadd.f32 %v1751_v34, %v1750_v7  ;;  %v1759_v58 = vadd.f32 %v1758_v60, %v1757_v61  ;;  %v1548_v62 = vmax.f32 %v1546_v15, %v1547_v33  ;;  %v1557_v36 = vmax.f32 %v1555_v11, %v1556_v42 }
 0x142   : > { %3646 = vpow2.f32 %v1671_v37  ;;  %v4423_v3 = vadd.f32 %v4343_v41, %v1396_v56  ;;  %v4426_v6 = vadd.f32 %v1392_v46, %v4348_v26  ;;  %v1564_v34 = vmax.f32 %v1562_v53, %v1563_v2  ;;  %v1407_v56 = vpop.permute.xlu1 %1406  ;;  %v1403_v46 = vpop.permute.xlu0 %1402 }
 0x143   : > { %v4428_v40 = vpop.eup %3642  ;;  %v1753_v0 = vrot.slane %v1752_v30, 2  ;;  %v1760_v22 = vrot.slane %v1759_v58, 4  ;;  %3648 = vpow2.f32 %v1673_v35  ;;  %v1549_v45 = vrot.slane %v1548_v62, 2 }
 0x144   : > { %v4430_v7 = vpop.eup %3644  ;;  %v1766_v11 = vsel %vm1462_vm2, %v4428_v40, 0.0  ;;  %v1558_v15 = vrot.slane %v1557_v36, 2  ;;  %v1572_v41 = vsel %vm1462_vm2, %v4423_v3, -inf  ;;  %v1565_v35 = vrot.slane %v1564_v34, 4 }
 0x145   : > { %5033 = vst [vmem:[#allocation22_spill] sm:$0xff] %v4430_v7  ;;  %v4436_v61 = vadd.f32 %v1753_v0, %v1752_v30  ;;  %v1761_v26 = vadd.f32 %v1760_v22, %v1759_v58  ;;  %v1767_v33 = vsel %vm1462_vm2, %v4430_v7, 0.0  ;;  %v1550_v42 = vmax.f32 %v1548_v62, %v1549_v45 }
 0x146   : > { %v1768_v60 = vadd.f32 %v1767_v33, %v1766_v11  ;;  %v1559_v37 = vmax.f32 %v1557_v36, %v1558_v15  ;;  %v1571_v52 = vsel %vm1462_vm2, %v4426_v6, -inf  ;;  %v4443_v28 = vadd.f32 %v4364_v13, %v1407_v56  ;;  %v1418_v56 = vpop.permute.xlu1 %1417 }
 0x147   : > { %v1762_v38 = vrot.slane %v1761_v26, 2  ;;  %v1551_v53 = vrot.slane %v1550_v42, 1  ;;  %v1573_v2 = vmax.f32 %v1571_v52, %v1572_v41  ;;  %v1566_v58 = vmax.f32 %v1564_v34, %v1565_v35 }
 0x148   : > { %v1769_v30 = vrot.slane %v1768_v60, 4  ;;  %v1560_v0 = vrot.slane %v1559_v37, 1  ;;  %v4446_v22 = vadd.f32 %v1403_v46, %v4369_v20  ;;  %v1581_v11 = vsel %vm1462_vm2, %v4443_v28, -inf }
 0x149   : > { %v4448_v45 = vadd.f32 %v1762_v38, %v1761_v26  ;;  %v1552_v62 = vmax.f32 %v1550_v42, %v1551_v53  ;;  %v1574_v36 = vrot.slane %v1573_v2, 4  ;;  %v1567_v7 = vrot.slane %v1566_v58, 2  ;;  %v1414_v38 = vpop.permute.xlu0 %1413 }
 0x14a   : > { %v1770_v15 = vadd.f32 %v1769_v30, %v1768_v60  ;;  %v1561_v33 = vmax.f32 %v1559_v37, %v1560_v0  ;;  %v1580_v52 = vsel %vm1462_vm2, %v4446_v22, -inf }
 0x14b   : > { %v1625_v13 = vsub.f32 %v4367_v44, %v1552_v62  ;;  %v1626_v34 = vsub.f32 %v4346_v57, %v1552_v62  ;;  %v1575_v41 = vmax.f32 %v1573_v2, %v1574_v36  ;;  %v1582_v20 = vmax.f32 %v1580_v52, %v1581_v11 }
 0x14c   : > { %v4456_v26 = vpop.eup %3646  ;;  %v1771_v42 = vrot.slane %v1770_v15, 2  ;;  %v1627_v46 = vsub.f32 %v4375_v25, %v1561_v33  ;;  %v1628_v60 = vsub.f32 %v4372_v19, %v1561_v33  ;;  %v1568_v37 = vmax.f32 %v1566_v58, %v1567_v7 }
 0x14d   : > { %v4460_v35 = vpop.eup %3648  ;;  %v1775_v53 = vsel %vm1462_vm2, %v4456_v26, 0.0  ;;  %v1675_v44 = vmul.f32 1.442695, %v1625_v13  ;;  %v1677_v30 = vmul.f32 1.442695, %v1626_v34  ;;  %v1576_v57 = vrot.slane %v1575_v41, 2  ;;  %v1429_v34 = vpop.permute.xlu1 %1428 }
 0x14e   : > { %v4464_v2 = vadd.f32 %v1771_v42, %v1770_v15  ;;  %v1776_v0 = vsel %vm1462_vm2, %v4460_v35, 0.0  ;;  %v1679_v62 = vmul.f32 1.442695, %v1627_v46  ;;  %v1681_v36 = vmul.f32 1.442695, %v1628_v60  ;;  %v1425_v42 = vpop.permute.xlu0 %1424 }
 0x14f   : > { %v1777_v11 = vadd.f32 %v1776_v0, %v1775_v53  ;;  %3650 = vpow2.f32 %v1675_v44  ;;  %v1569_v25 = vrot.slane %v1568_v37, 1  ;;  %v1577_v19 = vmax.f32 %v1575_v41, %v1576_v57 }
 0x150   : > { %3652 = vpow2.f32 %v1677_v30  ;;  %v1583_v7 = vrot.slane %v1582_v20, 4  ;;  %v4469_v58 = vadd.f32 %v4391_v8, %v1418_v56  ;;  %v4472_v33 = vadd.f32 %v1414_v38, %v4397_v32 }
 0x151   : > { %v1778_v52 = vrot.slane %v1777_v11, 4  ;;  %3654 = vpow2.f32 %v1679_v62  ;;  %v1570_v15 = vmax.f32 %v1568_v37, %v1569_v25  ;;  %v1578_v13 = vrot.slane %v1577_v19, 1 }
 0x152   : > { %3656 = vpow2.f32 %v1681_v36  ;;  %v1584_v46 = vmax.f32 %v1582_v20, %v1583_v7  ;;  %v1590_v60 = vsel %vm1462_vm2, %v4469_v58, -inf  ;;  %v1589_v41 = vsel %vm1462_vm2, %v4472_v33, -inf }
 0x153   : > { %v1779_v53 = vadd.f32 %v1778_v52, %v1777_v11  ;;  %v1629_v8 = vsub.f32 %v4406_v17, %v1570_v15  ;;  %v1630_v32 = vsub.f32 %v4377_v49, %v1570_v15  ;;  %v1579_v56 = vmax.f32 %v1577_v19, %v1578_v13 }
 0x154   : > { %v1585_v38 = vrot.slane %v1584_v46, 2  ;;  %v1591_v44 = vmax.f32 %v1589_v41, %v1590_v60  ;;  %v4481_v37 = vadd.f32 %v4412_v50, %v1429_v34  ;;  %v4484_v30 = vadd.f32 %v1425_v42, %v4418_v5 }
 0x155   : > { %v1780_v20 = vrot.slane %v1779_v53, 2  ;;  %v1683_v57 = vmul.f32 1.442695, %v1629_v8  ;;  %v1685_v0 = vmul.f32 1.442695, %v1630_v32  ;;  %v1631_v62 = vsub.f32 %v4426_v6, %v1579_v56 }
 0x156   : > { %v1632_v36 = vsub.f32 %v4423_v3, %v1579_v56  ;;  %v1586_v11 = vmax.f32 %v1584_v46, %v1585_v38  ;;  %v1592_v17 = vrot.slane %v1591_v44, 4  ;;  %v1599_v49 = vsel %vm1462_vm2, %v4481_v37, -inf }
 0x157   : > { %v4490_v25 = vadd.f32 %v1780_v20, %v1779_v53  ;;  %3658 = vpow2.f32 %v1683_v57  ;;  %v1687_v50 = vmul.f32 1.442695, %v1631_v62  ;;  %v1598_v5 = vsel %vm1462_vm2, %v4484_v30, -inf }
 0x158   : > { %3660 = vpow2.f32 %v1685_v0  ;;  %v1689_v19 = vmul.f32 1.442695, %v1632_v36  ;;  %v1587_v7 = vrot.slane %v1586_v11, 1  ;;  %v1593_v52 = vmax.f32 %v1591_v44, %v1592_v17 }
 0x159   : > { %v4494_v15 = vpop.eup %3650  ;;  %3662 = vpow2.f32 %v1687_v50  ;;  %v1600_v3 = vmax.f32 %v1598_v5, %v1599_v49  ;;  %v5034_v6 = vrot.slane %v4290_v51, 4  ;;  %v1719_v34 = vrot.slane %v4339_v48, 1 }
 0x15a   : > { %v4500_v42 = vpop.eup %3652  ;;  %v1784_v46 = vsel %vm1462_vm2, %v4494_v15, 0.0  ;;  %3664 = vpow2.f32 %v1689_v19  ;;  %v1588_v60 = vmax.f32 %v1586_v11, %v1587_v7  ;;  %v1594_v41 = vrot.slane %v1593_v52, 2 }
 0x15b   : > { %v1707_v13 = vadd.f32 %v5034_v6, %v4290_v51  ;;  %v4504_v53 = vpop.eup %3654  ;;  %v1785_v8 = vsel %vm1462_vm2, %v4500_v42, 0.0  ;;  %v1601_v32 = vrot.slane %v1600_v3, 4  ;;  %v1720_v38 = vadd.f32 %v1719_v34, %v4339_v48 }
 0x15c   : > { %v4509_v51 = vpop.eup %3656  ;;  %v1786_v44 = vadd.f32 %v1785_v8, %v1784_v46  ;;  %v1793_v20 = vsel %vm1462_vm2, %v4504_v53, 0.0  ;;  %v1633_v57 = vsub.f32 %v4446_v22, %v1588_v60  ;;  %v1634_v0 = vsub.f32 %v4443_v28, %v1588_v60 }
 0x15d   : > { %v1708_v56 = vrot.slane %v1707_v13, 2  ;;  %v1794_v62 = vsel %vm1462_vm2, %v4509_v51, 0.0  ;;  %v1595_v36 = vmax.f32 %v1593_v52, %v1594_v41  ;;  %v1602_v11 = vmax.f32 %v1600_v3, %v1601_v32 }
 0x15e   : > { %v1787_v49 = vrot.slane %v1786_v44, 4  ;;  %v1795_v50 = vadd.f32 %v1794_v62, %v1793_v20  ;;  %v1691_v5 = vmul.f32 1.442695, %v1633_v57  ;;  %v1693_v48 = vmul.f32 1.442695, %v1634_v0 }
 0x15f   : > { %v1709_v17 = vadd.f32 %v1708_v56, %v1707_v13  ;;  %v1596_v19 = vrot.slane %v1595_v36, 1  ;;  %v1603_v7 = vrot.slane %v1602_v11, 2  ;;  %3666 = vrcp.f32 %v1720_v38 }
 0x160   : > { %v1788_v34 = vadd.f32 %v1787_v49, %v1786_v44  ;;  %v1796_v46 = vrot.slane %v1795_v50, 4  ;;  %3668 = vpow2.f32 %v1691_v5  ;;  %v1728_v22 = vrot.slane %v4360_v55, 1 }
 0x161   : > { %v1710_v6 = vrot.slane %v1709_v17, 1  ;;  %v4518_v28 = vpop.eup %3658  ;;  %3670 = vpow2.f32 %v1693_v48  ;;  %v1597_v60 = vmax.f32 %v1595_v36, %v1596_v19  ;;  %v1604_v52 = vmax.f32 %v1602_v11, %v1603_v7 }
 0x162   : > { %v4520_v13 = vpop.eup %3660  ;;  %v1789_v41 = vrot.slane %v1788_v34, 2  ;;  %v1797_v8 = vadd.f32 %v1796_v46, %v1795_v50  ;;  %v1802_v32 = vsel %vm1462_vm2, %v4518_v28, 0.0  ;;  %v1729_v56 = vadd.f32 %v1728_v22, %v4360_v55 }
 0x163   : > { %v1711_v3 = vadd.f32 %v1710_v6, %v1709_v17  ;;  %v4525_v38 = vpop.eup %3662  ;;  %v1803_v44 = vsel %vm1462_vm2, %v4520_v13, 0.0  ;;  %v1635_v20 = vsub.f32 %v4472_v33, %v1597_v60  ;;  %v1636_v57 = vsub.f32 %v4469_v58, %v1597_v60 }
 0x164   : > { %v1605_v0 = vrot.slane %v1604_v52, 1  ;;  %v4531_v62 = vpop.eup %3664  ;;  %v4533_v36 = vadd.f32 %v1789_v41, %v1788_v34  ;;  %v1798_v11 = vrot.slane %v1797_v8, 2  ;;  %v1804_v17 = vadd.f32 %v1803_v44, %v1802_v32 }
 0x165   : > { %v1811_v49 = vsel %vm1462_vm2, %v4525_v38, 0.0  ;;  %v1812_v55 = vsel %vm1462_vm2, %v4531_v62, 0.0  ;;  %v1695_v50 = vmul.f32 1.442695, %v1635_v20  ;;  %v1697_v5 = vmul.f32 1.442695, %v1636_v57 }
 0x166   : > { %v1606_v48 = vmax.f32 %v1604_v52, %v1605_v0  ;;  %v1799_v19 = vadd.f32 %v1798_v11, %v1797_v8  ;;  %v1805_v33 = vrot.slane %v1804_v17, 4  ;;  %v1813_v7 = vadd.f32 %v1812_v55, %v1811_v49 }
 0x167   : > { %3672 = vrcp.f32 %v1711_v3  ;;  %v1737_v34 = vrot.slane %v4393_v10, 1  ;;  %v1746_v60 = vrot.slane %v4414_v9, 1  ;;  %v1764_v55 = vrot.slane %v4448_v45, 1 }
 0x168   : > { %3674 = vpow2.f32 %v1695_v50  ;;  %v1637_v58 = vsub.f32 %v4484_v30, %v1606_v48  ;;  %v1638_v6 = vsub.f32 %v4481_v37, %v1606_v48  ;;  %v1806_v46 = vadd.f32 %v1805_v33, %v1804_v17 }
 0x169   : > { %v1814_v22 = vrot.slane %v1813_v7, 4  ;;  %3676 = vpow2.f32 %v1697_v5  ;;  %v3667_v41 = vpop.eup %3666  ;;  %v1738_v52 = vadd.f32 %v1737_v34, %v4393_v10  ;;  %v1747_v11 = vadd.f32 %v1746_v60, %v4414_v9 }
 0x16a   : > { %v1699_v32 = vmul.f32 1.442695, %v1637_v58  ;;  %v1701_v44 = vmul.f32 1.442695, %v1638_v6  ;;  %3678 = vrcp.f32 %v1729_v56  ;;  %v4544_v8 = vpop.eup %3668  ;;  %v1807_v3 = vrot.slane %v1806_v46, 2 }
 0x16b   : > { %v1815_v20 = vadd.f32 %v1814_v22, %v1813_v7  ;;  %v1865_v30 = vmul.f32 %v3667_v41, %v4296_v59  ;;  %v4548_v37 = vmul.f32 %v3667_v41, %v4300_v12  ;;  %v4550_v57 = vpop.eup %3670  ;;  %v1820_v0 = vsel %vm1462_vm2, %v4544_v8, 0.0 }
 0x16c   : > { %3680 = vpow2.f32 %v1699_v32  ;;  %v1755_v56 = vrot.slane %v4436_v61, 1  ;;  %v1808_v10 = vadd.f32 %v1807_v3, %v1806_v46  ;;  %v1821_v49 = vsel %vm1462_vm2, %v4550_v57, 0.0 }
 0x16d   : > { %v1816_v17 = vrot.slane %v1815_v20, 2  ;;  %3682 = vpow2.f32 %v1701_v44  ;;  %v1822_v59 = vadd.f32 %v1821_v49, %v1820_v0  ;;  %v1773_v5 = vrot.slane %v4464_v2, 1 }
 0x16e   : > { %3684 = vrcp.f32 %v1738_v52  ;;  %v1756_v12 = vadd.f32 %v1755_v56, %v4436_v61  ;;  %v1782_v9 = vrot.slane %v4490_v25, 1  ;;  %v1765_v33 = vadd.f32 %v1764_v55, %v4448_v45 }
 0x16f   : > { %v1817_v50 = vadd.f32 %v1816_v17, %v1815_v20  ;;  %3686 = vrcp.f32 %v1747_v11  ;;  %v1823_v48 = vrot.slane %v1822_v59, 4  ;;  %v1791_v7 = vrot.slane %v4533_v36, 1 }
 0x170   : > { %3688 = vrcp.f32 %v1756_v12  ;;  %v1774_v6 = vadd.f32 %v1773_v5, %v4464_v2  ;;  %v1783_v34 = vadd.f32 %v1782_v9, %v4490_v25  ;;  %v1800_v61 = vrot.slane %v1799_v19, 1 }
 0x171   : > { %v3673_v58 = vpop.eup %3672  ;;  %v1809_v46 = vrot.slane %v1808_v10, 1  ;;  %v1824_v60 = vadd.f32 %v1823_v48, %v1822_v59  ;;  %3690 = vrcp.f32 %v1765_v33  ;;  %v1792_v2 = vadd.f32 %v1791_v7, %v4533_v36 }
 0x172   : > { %v4566_v22 = vpop.eup %3674  ;;  %v1863_v41 = vmul.f32 %v3673_v58, %v4278_v54  ;;  %v1864_v32 = vmul.f32 %v3673_v58, %v4284_v63  ;;  %3692 = vrcp.f32 %v1774_v6  ;;  %v1801_v52 = vadd.f32 %v1800_v61, %v1799_v19 }
 0x173   : > { %v4570_v44 = vpop.eup %3676  ;;  %v1829_v45 = vsel %vm1462_vm2, %v4566_v22, 0.0  ;;  %v1825_v3 = vrot.slane %v1824_v60, 2  ;;  %3694 = vrcp.f32 %v1783_v34  ;;  %v1810_v54 = vadd.f32 %v1809_v46, %v1808_v10 }
 0x174   : > { %v3679_v25 = vpop.eup %3678  ;;  %v1830_v20 = vsel %vm1462_vm2, %v4570_v44, 0.0  ;;  %3387 = vmatprep.mubr.msk.f32.mxu1 %vm1462_vm2, %v1863_v41  ;;  %3696 = vrcp.f32 %v1792_v2  ;;  %v1818_v19 = vrot.slane %v1817_v50, 1  ;;  %v5035_v17 = vunpack.c.l.bf16 %v3953_v14 }
 0x175   : > { %v1831_v63 = vadd.f32 %v1830_v20, %v1829_v45  ;;  %3388 = vmatmul.mubr.msk.f32.vlgmr.msra.gmra.mrb[0].mxu1 %vm1462_vm2, %v1864_v32  ;;  %v1867_v0 = vmul.f32 %v3679_v25, %v4313_v47  ;;  %v1868_v11 = vmul.f32 %v3679_v25, %v4319_v16  ;;  %v1826_v36 = vadd.f32 %v1825_v3, %v1824_v60 }
 0x176   : > { %v4581_v56 = vpop.eup %3680  ;;  %3390 = vmatprep.mubr.msk.f32.mxu1 %vm1462_vm2, %v1865_v30  ;;  %3698 = vrcp.f32 %v1801_v52  ;;  %v5036_v49 = vunpack.c.h.bf16 %v3953_v14  ;;  %v5037_v16 = vunpack.c.l.bf16 %v3960_v18  ;;  %v5038_v55 = vunpack.c.h.bf16 %v3960_v18 }
 0x177   : > { %v4588_v59 = vpop.eup %3682  ;;  %v1832_v12 = vrot.slane %v1831_v63, 4  ;;  %v1838_v47 = vsel %vm1462_vm2, %v4581_v56, 0.0  ;;  %3700 = vrcp.f32 %v1810_v54  ;;  %v1819_v48 = vadd.f32 %v1818_v19, %v1817_v50 }
 0x178   : > { %v3524_v10 = vpack.i.bf16 %v5036_v49, %v5035_v17  ;;  %v3529_v5 = vpack.i.bf16 %v5038_v55, %v5037_v16  ;;  %v3685_v30 = vpop.eup %3684  ;;  %v1839_v9 = vsel %vm1462_vm2, %v4588_v59, 0.0  ;;  %v1827_v33 = vrot.slane %v1826_v36, 1  ;;  %v5047_v16 = vld [vmem:[#allocation15_spill] sm:$0xff] }
 0x179   : > { %v5039_v14 = vunpack.c.l.bf16 %v4066_v27  ;;  %v5040_v7 = vunpack.c.h.bf16 %v4066_v27  ;;  %v3687_v6 = vpop.eup %3686  ;;  %v1833_v34 = vadd.f32 %v1832_v12, %v1831_v63  ;;  %v1840_v61 = vadd.f32 %v1839_v9, %v1838_v47  ;;  %3391 = vmatmul.mubr.msk.f32.gmra.mrb[2].mxu1 %vm1462_vm2, %v4548_v37  ;;  %v5043_v63 = vld [vmem:[#allocation22_spill] sm:$0xff] }
 0x17a   : > { %3525 = vrot.lane.b32.xlu0 %v3524_v10, %s3775_s22  ;;  %v1869_v18 = vmul.f32 %v3685_v30, %v4333_v29  ;;  %v1870_v46 = vmul.f32 %v3685_v30, %v4335_v31  ;;  %v3689_v50 = vpop.eup %3688  ;;  %3393 = vmatprep.mubr.msk.f32.mxu1 %vm1462_vm2, %v1867_v0  ;;  %v1871_v60 = vmul.f32 %v3687_v6, %v4350_v39  ;;  %3702 = vrcp.f32 %v1819_v48 }
 0x17b   : > { %v3534_v58 = vpack.i.bf16 %v5040_v7, %v5039_v14  ;;  %v1872_v41 = vmul.f32 %v3687_v6, %v4354_v4  ;;  %v1828_v27 = vadd.f32 %v1827_v33, %v1826_v36  ;;  %3530 = vrot.lane.b32.xlu1 %v3529_v5, %s3775_s22  ;;  %v1834_v32 = vrot.slane %v1833_v34, 2  ;;  %v3691_v29 = vpop.eup %3690  ;;  %v5050_v14 = vld [vmem:[#allocation16_spill] sm:$0xff] }
 0x17c   : > { %v1841_v45 = vrot.slane %v1840_v61, 4  ;;  %v1873_v2 = vmul.f32 %v3689_v50, %v4379_v24  ;;  %v1874_v37 = vmul.f32 %v3689_v50, %v4381_v21  ;;  %v5041_v31 = vunpack.c.l.bf16 %v3966_v23  ;;  %v3693_v4 = vpop.eup %3692 }
 0x17d   : > { %3704 = vrcp.f32 %v1828_v27  ;;  %v5042_v39 = vunpack.c.h.bf16 %v3966_v23  ;;  %v1835_v25 = vadd.f32 %v1834_v32, %v1833_v34  ;;  %3394 = vmatmul.mubr.msk.f32.gmra.mrb[4].mxu1 %vm1462_vm2, %v1868_v11  ;;  %v1875_v20 = vmul.f32 %v3691_v29, %v4401_v43  ;;  %v3695_v54 = vpop.eup %3694  ;;  %v5056_v27 = vld [vmem:[#allocation17_spill] sm:$0xff] }
 0x17e   : > { %3535 = vrot.lane.b32.xlu0 %v3534_v58, %s3775_s22  ;;  %v1842_v3 = vadd.f32 %v1841_v45, %v1840_v61  ;;  %v1876_v24 = vmul.f32 %v3691_v29, %v4408_v1  ;;  %3396 = vmatprep.mubr.msk.f32.mxu1 %vm1462_vm2, %v1869_v18  ;;  %v1877_v21 = vmul.f32 %v3693_v4, %v4428_v40  ;;  %v3697_v36 = vpop.eup %3696  ;;  %v5044_v1 = vld [vmem:[#allocation10_spill] sm:$0xff]  ;;  %v5048_v55 = vunpack.c.l.bf16 %v5047_v16 }
 0x17f   : > { %v3544_v52 = vpack.i.bf16 %v5042_v39, %v5041_v31  ;;  %v1878_v0 = vmul.f32 %v3693_v4, %v5043_v63  ;;  %v1879_v23 = vmul.f32 %v3695_v54, %v4456_v26  ;;  %v1880_v17 = vmul.f32 %v3695_v54, %v4460_v35 }
 0x180   : > { %v1843_v19 = vrot.slane %v1842_v3, 2  ;;  %v1836_v49 = vrot.slane %v1835_v25, 1  ;;  %v3699_v10 = vpop.eup %3698  ;;  %v1881_v11 = vmul.f32 %v3697_v36, %v4494_v15  ;;  %v1882_v43 = vmul.f32 %v3697_v36, %v4500_v42 }
 0x181   : > { %v5045_v12 = vunpack.c.l.bf16 %v5044_v1  ;;  %v5046_v40 = vunpack.c.h.bf16 %v5044_v1  ;;  %v5049_v5 = vunpack.c.h.bf16 %v5047_v16  ;;  %v3701_v30 = vpop.eup %3700  ;;  %3397 = vmatmul.mubr.msk.f32.gmra.mrb[6].mxu1 %vm1462_vm2, %v1870_v46  ;;  %v1883_v15 = vmul.f32 %v3699_v10, %v4504_v53  ;;  %v5053_v53 = vld [vmem:[#allocation11_spill] sm:$0xff] }
 0x182   : > { %3545 = vrot.lane.b32.xlu0 %v3544_v52, %s3775_s22  ;;  %v1844_v35 = vadd.f32 %v1843_v19, %v1842_v3  ;;  %v1884_v42 = vmul.f32 %v3699_v10, %v4509_v51  ;;  %v1837_v9 = vadd.f32 %v1836_v49, %v1835_v25  ;;  %3399 = vmatprep.mubr.msk.f32.mxu1 %vm1462_vm2, %v1871_v60  ;;  %v5051_v7 = vunpack.c.l.bf16 %v5050_v14  ;;  %v5068_v19 = vld [vmem:[#allocation19_spill] sm:$0xff] }
 0x183   : > { %v3554_v47 = vpack.i.bf16 %v5046_v40, %v5045_v12  ;;  %v3539_v26 = vpack.i.bf16 %v5049_v5, %v5048_v55  ;;  %v1885_v48 = vmul.f32 %v3701_v30, %v4518_v28  ;;  %v1886_v33 = vmul.f32 %v3701_v30, %v4520_v13  ;;  %v5071_v12 = vld [vmem:[#allocation14_spill] sm:$0xff] }
 0x184   : > { %v5052_v58 = vunpack.c.h.bf16 %v5050_v14  ;;  %3706 = vrcp.f32 %v1837_v9  ;;  %v1845_v34 = vrot.slane %v1844_v35, 1  ;;  %v3703_v61 = vpop.eup %3702  ;;  %v5054_v51 = vunpack.c.l.bf16 %v5053_v53  ;;  %v3606_v30 = vld [vmem:[%s4939_s11] sm:$0xff]  }
 0x185   : > { %3540 = vrot.lane.b32.xlu1 %v3539_v26, %s3775_s22  ;;  %v5055_v18 = vunpack.c.h.bf16 %v5053_v53  ;;  %3400 = vmatmul.mubr.msk.f32.gmra.mrb[8].mxu1 %vm1462_vm2, %v1872_v41  ;;  %v1887_v28 = vmul.f32 %v3703_v61, %v4525_v38  ;;  %v1888_v13 = vmul.f32 %v3703_v61, %v4531_v62  ;;  %v5057_v32 = vunpack.c.l.bf16 %v5056_v27  ;;  %v5059_v38 = vld [vmem:[#allocation12_spill] sm:$0xff] }
 0x186   : > { %v3549_v6 = vpack.i.bf16 %v5052_v58, %v5051_v7  ;;  %3555 = vrot.lane.b32.xlu0 %v3554_v47, %s3775_s22  ;;  %v1846_v50 = vadd.f32 %v1845_v34, %v1844_v35  ;;  %3402 = vmatprep.mubr.msk.f32.mxu1 %vm1462_vm2, %v1873_v2  ;;  %v5058_v45 = vunpack.c.h.bf16 %v5056_v27  ;;  %v5060_v62 = vunpack.c.l.bf16 %v5059_v38  ;;  %v5062_v2 = vld [vmem:[#allocation18_spill] sm:$0xff]  ;;  %v3607_v35 = vld [vmem:[%s4939_s11 + $0x8] sm:$0xff]  }
 0x187   : > { %v3564_v46 = vpack.i.bf16 %v5055_v18, %v5054_v51  ;;  %v3705_v60 = vpop.eup %3704  ;;  %v5061_v41 = vunpack.c.h.bf16 %v5059_v38  ;;  %v5063_v4 = vunpack.c.l.bf16 %v5062_v2  ;;  %v5069_v49 = vunpack.c.l.bf16 %v5068_v19 }
 0x188   : > { %v3559_v29 = vpack.i.bf16 %v5058_v45, %v5057_v32  ;;  %v1889_v31 = vmul.f32 %v3705_v60, %v4544_v8  ;;  %v1890_v39 = vmul.f32 %v3705_v60, %v4550_v57  ;;  %3708 = vrcp.f32 %v1846_v50  ;;  %v5065_v57 = vld [vmem:[#allocation13_spill] sm:$0xff] }
 0x189   : > { %3550 = vrot.lane.b32.xlu1 %v3549_v6, %s3775_s22  ;;  %v3574_v52 = vpack.i.bf16 %v5061_v41, %v5060_v62  ;;  %3403 = vmatmul.mubr.msk.f32.gmra.mrb[10].mxu1 %vm1462_vm2, %v1874_v37  ;;  %v5064_v8 = vunpack.c.h.bf16 %v5062_v2  ;;  %v5066_v3 = vunpack.c.l.bf16 %v5065_v57  ;;  %v5067_v54 = vunpack.c.h.bf16 %v5065_v57 }
 0x18a   : > { %3565 = vrot.lane.b32.xlu0 %v3564_v46, %s3775_s22  ;;  %3405 = vmatprep.mubr.msk.f32.mxu1 %vm1462_vm2, %v1875_v20  ;;  %v5070_v10 = vunpack.c.h.bf16 %v5068_v19  ;;  %v5072_v40 = vunpack.c.l.bf16 %v5071_v12  ;;  %v5073_v47 = vunpack.c.h.bf16 %v5071_v12 }
 0x18b   : > { %v3569_v25 = vpack.i.bf16 %v5064_v8, %v5063_v4  ;;  %v3584_v63 = vpack.i.bf16 %v5067_v54, %v5066_v3 }
 0x18c   : > { %v3579_v1 = vpack.i.bf16 %v5070_v10, %v5069_v49 }
 0x18d   : > { %3560 = vrot.lane.b32.xlu1 %v3559_v29, %s3775_s22  ;;  %3406 = vmatmul.mubr.msk.f32.gmra.mrb[12].mxu1 %vm1462_vm2, %v1876_v24  ;;  %v3594_v24 = vpack.i.bf16 %v5073_v47, %v5072_v40 }
 0x18e   : > { %3575 = vrot.lane.b32.xlu0 %v3574_v52, %s3775_s22  ;;  %v3707_v36 = vpop.eup %3706  ;;  %3408 = vmatprep.mubr.msk.f32.mxu1 %vm1462_vm2, %v1877_v21  ;;  %v5074_v21 = vld [vmem:[#allocation20_spill] sm:$0xff] }
 0x18f   : > { %v1891_v37 = vmul.f32 %v3707_v36, %v4566_v22  ;;  %v1892_v20 = vmul.f32 %v3707_v36, %v4570_v44  ;;  %v5075_v55 = vunpack.c.l.bf16 %v5074_v21  ;;  %v5076_v5 = vunpack.c.h.bf16 %v5074_v21 }
 0x191   : > { %3570 = vrot.lane.b32.xlu1 %v3569_v25, %s3775_s22  ;;  %3409 = vmatmul.mubr.msk.f32.gmra.mrb[14].mxu1 %vm1462_vm2, %v1878_v0  ;;  %v3589_v26 = vpack.i.bf16 %v5076_v5, %v5075_v55  ;;  %v5077_v0 = vld [vmem:[#allocation21_spill] sm:$0xff] }
 0x192   : > { %3585 = vrot.lane.b32.xlu0 %v3584_v63, %s3775_s22  ;;  %v3709_v16 = vpop.eup %3708  ;;  %3411 = vmatprep.mubr.msk.f32.mxu1 %vm1462_vm2, %v1879_v23  ;;  %v5078_v23 = vunpack.c.l.bf16 %v5077_v0 }
 0x193   : > { %v1893_v22 = vmul.f32 %v3709_v16, %v4581_v56  ;;  %v1894_v44 = vmul.f32 %v3709_v16, %v4588_v59  ;;  %v5079_v56 = vunpack.c.h.bf16 %v5077_v0 }
 0x195   : > { %3580 = vrot.lane.b32.xlu1 %v3579_v1, %s3775_s22  ;;  %3412 = vmatmul.mubr.msk.f32.gmra.mrb[16].mxu1 %vm1462_vm2, %v1880_v17  ;;  %v3599_v59 = vpack.i.bf16 %v5079_v56, %v5078_v23  ;;  %v3604_v17 = vld [vmem:[%s4935_s7] sm:$0xff]  }
 0x196   : > { %3595 = vrot.lane.b32.xlu0 %v3594_v24, %s3775_s22  ;;  %3414 = vmatprep.mubr.msk.f32.mxu1 %vm1462_vm2, %v1881_v11  ;;  %v3776_v11 = vmov 0.0  }
 0x197   : > { %3435 = vmatprep.subr.bf16.mxu1 %v3776_v11  ;;  %3443 = vmatprep.subr.bf16.mxu0 %v3776_v11 }
 0x198   : > { %3436 = vmatpush3.bf16.msra.mxu1 %v3604_v17  ;;  %3447 = vmatprep.mubr.msk.bf16.mxu0 %vm3777_vm3, %v3776_v11 }
 0x199   : > { %3590 = vrot.lane.b32.xlu1 %v3589_v26, %s3775_s22  ;;  %3415 = vmatmul.mubr.msk.f32.gmra.mrb[18].mxu1 %vm1462_vm2, %v1882_v43  ;;  %v3605_v43 = vld [vmem:[%s4935_s7 + $0x8] sm:$0xff]  }
 0x19a   : > { %3417 = vmatprep.mubr.msk.f32.mxu1 %vm1462_vm2, %v1883_v15  ;;  %3437 = vmatprep.subr.bf16.mxu1 %v3776_v11 }
 0x19b   : > { %3444 = vmatpush3.bf16.msra.mxu0 %v3606_v30 }
 0x19c   : > { %3438 = vmatpush3.bf16.msra.mxu1 %v3605_v43  ;;  %3445 = vmatprep.subr.bf16.mxu0 %v3776_v11 }
 0x19d   : > { %3600 = vrot.lane.b32.xlu1 %v3599_v59, %s3775_s22  ;;  %3418 = vmatmul.mubr.msk.f32.gmra.mrb[20].mxu1 %vm1462_vm2, %v1884_v42 }
 0x19e   : > { %3420 = vmatprep.mubr.msk.f32.mxu1 %vm1462_vm2, %v1885_v48  ;;  %3451 = vmatprep.subr.bf16.mxu1 %v3776_v11 }
 0x19f   : > { %3446 = vmatpush3.bf16.msra.mxu0 %v3607_v35 }
 0x1a0   : > { %3463 = vmatprep.subr.bf16.mxu0 %v3776_v11 }
 0x1a1   : > { %3421 = vmatmul.mubr.msk.f32.gmra.mrb[22].mxu1 %vm1462_vm2, %v1886_v33 }
 0x1a2   : > { %3423 = vmatprep.mubr.msk.f32.mxu1 %vm1462_vm2, %v1887_v28 }
 0x1a5   : > { %3424 = vmatmul.mubr.msk.f32.gmra.mrb[24].mxu1 %vm1462_vm2, %v1888_v13 }
 0x1a6   : > { %3426 = vmatprep.mubr.msk.f32.mxu1 %vm1462_vm2, %v1889_v31 }
 0x1a9   : > { %3427 = vmatmul.mubr.msk.f32.gmra.mrb[26].mxu1 %vm1462_vm2, %v1890_v39 }
 0x1aa   : > { %3429 = vmatprep.mubr.msk.f32.mxu1 %vm1462_vm2, %v1891_v37 }
 0x1ad   : > { %3430 = vmatmul.mubr.msk.f32.gmra.mrb[28].mxu1 %vm1462_vm2, %v1892_v20 }
 0x1ae   : > { %3432 = vmatprep.mubr.msk.f32.mxu1 %vm1462_vm2, %v1893_v22 }
 0x1b1   : > { %3433 = vmatmul.mubr.msk.f32.gmra.mrb[30].mxu1 %vm1462_vm2, %v1894_v44 }
 0x1b2   : > { %3439 = vmatprep.mubr.msk.bf16.mxu1 %vm3777_vm3, %v3776_v11 }
 0x1ec   : > { %v3526_v15 = vpop.permute.xlu0 %3525 }
 0x1ed   : > { %v3528_v33 = vunpack.i.h.bf16 %v3526_v15  ;;  %v3527_v14 = vunpack.i.l.bf16 %v3526_v15  ;;  %v3531_v7 = vpop.permute.xlu1 %3530 }
 0x1ee   : > { %v3533_v61 = vunpack.i.h.bf16 %v3531_v7  ;;  %v3532_v51 = vunpack.i.l.bf16 %v3531_v7 }
 0x1f0   : > { %v4748_v42 = vpop.permute.xlu0 %3535 }
 0x1f4   : > { %v3546_v9 = vpop.permute.xlu0 %3545 }
 0x1f5   : > { %v3548_v32 = vunpack.i.h.bf16 %v3546_v9  ;;  %v3547_v29 = vunpack.i.l.bf16 %v3546_v9 }
 0x1f7   : > { %v4758_v0 = vpop.permute.xlu1 %3540 }
 0x1f8   : > { %v3556_v48 = vpop.permute.xlu0 %3555 }
 0x1f9   : > { %v3558_v25 = vunpack.i.h.bf16 %v3556_v48  ;;  %v3557_v3 = vunpack.i.l.bf16 %v3556_v48 }
 0x1fc   : > { %v3566_v18 = vpop.permute.xlu0 %3565 }
 0x1fd   : > { %v3568_v47 = vunpack.i.h.bf16 %v3566_v18  ;;  %v3567_v24 = vunpack.i.l.bf16 %v3566_v18 }
 0x200   : > { %v3576_v41 = vpop.permute.xlu0 %3575 }
 0x201   : > { %v3578_v15 = vunpack.i.h.bf16 %v3576_v41  ;;  %v3577_v9 = vunpack.i.l.bf16 %v3576_v41 }
 0x204   : > { %v3586_v16 = vpop.permute.xlu0 %3585 }
 0x248   : > { %v3389_v58 = vpop.f32.mrb[0].mxu1 }
 0x249   : > { %v2350_v6 = vmul.f32 %v3528_v33, %v3389_v58  ;;  %v2062_v34 = vpop.f32.mrb[1].mxu1 }
 0x24a   : > { %v2349_v53 = vmul.f32 %v3527_v14, %v2062_v34 }
 0x24b   : > { %v2382_v46 = vsel %vm926_vm0, %v2350_v6, 0.0 }
 0x24c   : > { %v2381_v28 = vsel %vm926_vm0, %v2349_v53, 0.0  ;;  %v3392_v13 = vpop.f32.mrb[2].mxu1 }
 0x24d   : > { %v2383_v50 = vadd.f32 %v2382_v46, %v2381_v28  ;;  %v2352_v60 = vmul.f32 %v3533_v61, %v3392_v13  ;;  %v2072_v27 = vpop.f32.mrb[3].mxu1  ;;  %v3596_v61 = vpop.permute.xlu0 %3595  ;;  %v3588_v28 = vunpack.i.h.bf16 %v3586_v16 }
 0x24e   : > { %v2351_v45 = vmul.f32 %v3532_v51, %v2072_v27  ;;  %v3587_v27 = vunpack.i.l.bf16 %v3586_v16 }
 0x24f   : > { %v2384_v31 = vrot.slane %v2383_v50, 4  ;;  %v2391_v39 = vsel %vm926_vm0, %v2352_v60, 0.0 }
 0x250   : > { %v2390_v38 = vsel %vm926_vm0, %v2351_v45, 0.0  ;;  %v3395_v62 = vpop.f32.mrb[4].mxu1 }
 0x251   : > { %v2385_v52 = vadd.f32 %v2384_v31, %v2383_v50  ;;  %v2392_v2 = vadd.f32 %v2391_v39, %v2390_v38  ;;  %v2354_v4 = vmul.f32 %v3548_v32, %v3395_v62  ;;  %v2082_v8 = vpop.f32.mrb[5].mxu1  ;;  %v4762_v32 = vpop.permute.xlu1 %3550  ;;  %v3598_v39 = vunpack.i.h.bf16 %v3596_v61 }
 0x252   : > { %v2353_v57 = vmul.f32 %v3547_v29, %v2082_v8 }
 0x253   : > { %v2386_v54 = vrot.slane %v2385_v52, 2  ;;  %v2393_v63 = vrot.slane %v2392_v2, 4  ;;  %v2400_v36 = vsel %vm926_vm0, %v2354_v4, 0.0 }
 0x254   : > { %v2399_v37 = vsel %vm926_vm0, %v2353_v57, 0.0  ;;  %v3398_v20 = vpop.f32.mrb[6].mxu1 }
 0x255   : > { %v2387_v19 = vadd.f32 %v2386_v54, %v2385_v52  ;;  %v2394_v49 = vadd.f32 %v2393_v63, %v2392_v2  ;;  %v2401_v10 = vadd.f32 %v2400_v36, %v2399_v37  ;;  %v2356_v1 = vmul.f32 %v3558_v25, %v3398_v20  ;;  %v2092_v12 = vpop.f32.mrb[7].mxu1  ;;  %v4770_v16 = vpop.permute.xlu1 %3560 }
 0x256   : > { %v2355_v40 = vmul.f32 %v3557_v3, %v2092_v12  ;;  %v3597_v37 = vunpack.i.l.bf16 %v3596_v61 }
 0x257   : > { %v2388_v22 = vrot.slane %v2387_v19, 1  ;;  %v2395_v44 = vrot.slane %v2394_v49, 2  ;;  %v2402_v21 = vrot.slane %v2401_v10, 4  ;;  %v2409_v55 = vsel %vm926_vm0, %v2356_v1, 0.0 }
 0x258   : > { %v2408_v5 = vsel %vm926_vm0, %v2355_v40, 0.0  ;;  %v3401_v26 = vpop.f32.mrb[8].mxu1  ;;  %v3538_v1 = vunpack.i.h.bf16 %v4748_v42 }
 0x259   : > { %v2389_v23 = vadd.f32 %v2388_v22, %v2387_v19  ;;  %v2396_v56 = vadd.f32 %v2395_v44, %v2394_v49  ;;  %v2403_v59 = vadd.f32 %v2402_v21, %v2401_v10  ;;  %v2410_v17 = vadd.f32 %v2409_v55, %v2408_v5  ;;  %v2102_v43 = vpop.f32.mrb[9].mxu1 }
 0x25a   : > { %v2358_v30 = vmul.f32 %v3568_v47, %v3401_v26  ;;  %v2357_v35 = vmul.f32 %v3567_v24, %v2102_v43  ;;  %v3537_v26 = vunpack.i.l.bf16 %v4748_v42 }
 0x25b   : > { %v2397_v48 = vrot.slane %v2396_v56, 1  ;;  %v2404_v33 = vrot.slane %v2403_v59, 2  ;;  %v2411_v14 = vrot.slane %v2410_v17, 4  ;;  %v2525_v7 = vpack.c.bf16 %v2389_v23, %v2389_v23 }
 0x25c   : > { %v2418_v58 = vsel %vm926_vm0, %v2358_v30, 0.0  ;;  %v2417_v6 = vsel %vm926_vm0, %v2357_v35, 0.0  ;;  %v3404_v34 = vpop.f32.mrb[10].mxu1 }
 0x25d   : > { %v2398_v53 = vadd.f32 %v2397_v48, %v2396_v56  ;;  %v2405_v51 = vadd.f32 %v2404_v33, %v2403_v59  ;;  %v2412_v18 = vadd.f32 %v2411_v14, %v2410_v17  ;;  %v2112_v46 = vpop.f32.mrb[11].mxu1  ;;  %v2419_v13 = vadd.f32 %v2418_v58, %v2417_v6 }
 0x25e   : > { %v2360_v50 = vmul.f32 %v3578_v15, %v3404_v34  ;;  %v2359_v60 = vmul.f32 %v3577_v9, %v2112_v46  ;;  %v2568_v38 = vunpack.c.l.b16 %v2525_v7  ;;  %v3543_v14 = vunpack.i.h.bf16 %v4758_v0  ;;  %v4778_v46 = vpop.permute.xlu1 %3570 }
 0x25f   : > { %v2526_v45 = vpack.c.bf16 %v2398_v53, %v2398_v53  ;;  %v2406_v29 = vrot.slane %v2405_v51, 1  ;;  %v2413_v31 = vrot.slane %v2412_v18, 2  ;;  %v2420_v62 = vrot.slane %v2419_v13, 4 }
 0x260   : > { %v2427_v41 = vsel %vm926_vm0, %v2360_v50, 0.0  ;;  %v2426_v52 = vsel %vm926_vm0, %v2359_v60, 0.0  ;;  %v3407_v2 = vpop.f32.mrb[12].mxu1 }
 0x261   : > { %v2569_v4 = vunpack.c.l.b16 %v2526_v45  ;;  %v2407_v8 = vadd.f32 %v2406_v29, %v2405_v51  ;;  %v2414_v25 = vadd.f32 %v2413_v31, %v2412_v18  ;;  %v2428_v57 = vadd.f32 %v2427_v41, %v2426_v52  ;;  %v2122_v3 = vpop.f32.mrb[13].mxu1 }
 0x262   : > { %v2421_v54 = vadd.f32 %v2420_v62, %v2419_v13  ;;  %v2362_v63 = vmul.f32 %v3588_v28, %v3407_v2  ;;  %v2361_v36 = vmul.f32 %v3587_v27, %v2122_v3  ;;  %v3542_v18 = vunpack.i.l.bf16 %v4758_v0 }
 0x263   : > { %v2585_v20 = vsel %vm2584_vm4, %v2569_v4, %v2568_v38  ;;  %v2527_v19 = vpack.c.bf16 %v2407_v8, %v2407_v8  ;;  %v2415_v49 = vrot.slane %v2414_v25, 1  ;;  %v2429_v10 = vrot.slane %v2428_v57, 4 }
 0x264   : > { %v2422_v12 = vrot.slane %v2421_v54, 2  ;;  %v2436_v40 = vsel %vm926_vm0, %v2362_v63, 0.0  ;;  %v2435_v47 = vsel %vm926_vm0, %v2361_v36, 0.0  ;;  %v3410_v24 = vpop.f32.mrb[14].mxu1 }
 0x265   : > { %v2570_v22 = vunpack.c.l.b16 %v2527_v19  ;;  %v2416_v44 = vadd.f32 %v2415_v49, %v2414_v25  ;;  %v2430_v21 = vadd.f32 %v2429_v10, %v2428_v57  ;;  %v2437_v55 = vadd.f32 %v2436_v40, %v2435_v47  ;;  %v2132_v5 = vpop.f32.mrb[15].mxu1  ;;  %v4789_v10 = vpop.permute.xlu1 %3580 }
 0x266   : > { %v2423_v23 = vadd.f32 %v2422_v12, %v2421_v54  ;;  %v2364_v56 = vmul.f32 %v3598_v39, %v3410_v24  ;;  %v2363_v59 = vmul.f32 %v3597_v37, %v2132_v5  ;;  %v3553_v39 = vunpack.i.h.bf16 %v4762_v32 }
 0x267   : > { %v2587_v17 = vsel %vm2586_vm5, %v2570_v22, %v2585_v20  ;;  %v2528_v43 = vpack.c.bf16 %v2416_v44, %v2416_v44  ;;  %v2431_v30 = vrot.slane %v2430_v21, 2  ;;  %v2438_v35 = vrot.slane %v2437_v55, 4 }
 0x268   : > { %v2424_v15 = vrot.slane %v2423_v23, 1  ;;  %v2445_v9 = vsel %vm926_vm0, %v2364_v56, 0.0  ;;  %v2444_v48 = vsel %vm926_vm0, %v2363_v59, 0.0  ;;  %v3413_v33 = vpop.f32.mrb[16].mxu1  ;;  %v3552_v25 = vunpack.i.l.bf16 %v4762_v32 }
 0x269   : > { %v2571_v7 = vunpack.c.l.b16 %v2528_v43  ;;  %v2432_v58 = vadd.f32 %v2431_v30, %v2430_v21  ;;  %v2439_v42 = vadd.f32 %v2438_v35, %v2437_v55  ;;  %v2446_v6 = vadd.f32 %v2445_v9, %v2444_v48  ;;  %v2142_v34 = vpop.f32.mrb[17].mxu1 }
 0x26a   : > { %v2425_v61 = vadd.f32 %v2424_v15, %v2423_v23  ;;  %v2366_v53 = vmul.f32 %v3538_v1, %v3413_v33  ;;  %v2365_v51 = vmul.f32 %v3537_v26, %v2142_v34  ;;  %v3563_v49 = vunpack.i.h.bf16 %v4770_v16 }
 0x26b   : > { %v2589_v28 = vsel %vm2588_vm6, %v2571_v7, %v2587_v17  ;;  %v2433_v13 = vrot.slane %v2432_v58, 1  ;;  %v2440_v50 = vrot.slane %v2439_v42, 2  ;;  %v2447_v60 = vrot.slane %v2446_v6, 4 }
 0x26c   : > { %v2529_v27 = vpack.c.bf16 %v2425_v61, %v2425_v61  ;;  %v2454_v45 = vsel %vm926_vm0, %v2366_v53, 0.0  ;;  %v2453_v29 = vsel %vm926_vm0, %v2365_v51, 0.0  ;;  %v3416_v31 = vpop.f32.mrb[18].mxu1  ;;  %v3562_v21 = vunpack.i.l.bf16 %v4770_v16 }
 0x26d   : > { %v2434_v38 = vadd.f32 %v2433_v13, %v2432_v58  ;;  %v2441_v62 = vadd.f32 %v2440_v50, %v2439_v42  ;;  %v2448_v41 = vadd.f32 %v2447_v60, %v2446_v6  ;;  %v2455_v0 = vadd.f32 %v2454_v45, %v2453_v29  ;;  %v2152_v52 = vpop.f32.mrb[19].mxu1  ;;  %v3591_v42 = vpop.permute.xlu1 %3590 }
 0x26e   : > { %v2572_v2 = vunpack.c.l.b16 %v2529_v27  ;;  %v2368_v4 = vmul.f32 %v3543_v14, %v3416_v31  ;;  %v2367_v8 = vmul.f32 %v3542_v18, %v2152_v52  ;;  %v3573_v30 = vunpack.i.h.bf16 %v4778_v46 }
 0x26f   : > { %v2530_v57 = vpack.c.bf16 %v2434_v38, %v2434_v38  ;;  %v2442_v3 = vrot.slane %v2441_v62, 1  ;;  %v2449_v54 = vrot.slane %v2448_v41, 2  ;;  %v2456_v63 = vrot.slane %v2455_v0, 4 }
 0x270   : > { %v2591_v36 = vsel %vm2590_vm7, %v2572_v2, %v2589_v28  ;;  %v2463_v37 = vsel %vm926_vm0, %v2368_v4, 0.0  ;;  %v2462_v20 = vsel %vm926_vm0, %v2367_v8, 0.0  ;;  %v3419_v19 = vpop.f32.mrb[20].mxu1  ;;  %v3572_v58 = vunpack.i.l.bf16 %v4778_v46 }
 0x271   : > { %v2573_v1 = vunpack.c.l.b16 %v2530_v57  ;;  %v2443_v12 = vadd.f32 %v2442_v3, %v2441_v62  ;;  %v2450_v40 = vadd.f32 %v2449_v54, %v2448_v41  ;;  %v2457_v32 = vadd.f32 %v2456_v63, %v2455_v0  ;;  %v2162_v47 = vpop.f32.mrb[21].mxu1  ;;  %v3601_v3 = vpop.permute.xlu1 %3600 }
 0x272   : > { %v2464_v24 = vadd.f32 %v2463_v37, %v2462_v20  ;;  %v2370_v22 = vmul.f32 %v3553_v39, %v3419_v19  ;;  %v2369_v44 = vmul.f32 %v3552_v25, %v2162_v47  ;;  %v3583_v50 = vunpack.i.h.bf16 %v4789_v10 }
 0x273   : > { %v2593_v55 = vsel %vm2592_vm8, %v2573_v1, %v2591_v36  ;;  %v2531_v5 = vpack.c.bf16 %v2443_v12, %v2443_v12  ;;  %v2451_v26 = vrot.slane %v2450_v40, 1  ;;  %v2458_v23 = vrot.slane %v2457_v32, 2 }
 0x274   : > { %v2465_v56 = vrot.slane %v2464_v24, 4  ;;  %v2472_v59 = vsel %vm926_vm0, %v2370_v22, 0.0  ;;  %v2471_v17 = vsel %vm926_vm0, %v2369_v44, 0.0  ;;  %v3422_v43 = vpop.f32.mrb[22].mxu1  ;;  %v3582_v46 = vunpack.i.l.bf16 %v4789_v10 }
 0x275   : > { %v2574_v35 = vunpack.c.l.b16 %v2531_v5  ;;  %v2452_v15 = vadd.f32 %v2451_v26, %v2450_v40  ;;  %v2459_v9 = vadd.f32 %v2458_v23, %v2457_v32  ;;  %v2473_v48 = vadd.f32 %v2472_v59, %v2471_v17  ;;  %v2172_v33 = vpop.f32.mrb[23].mxu1 }
 0x276   : > { %v2466_v14 = vadd.f32 %v2465_v56, %v2464_v24  ;;  %v2372_v16 = vmul.f32 %v3563_v49, %v3422_v43  ;;  %v2371_v7 = vmul.f32 %v3562_v21, %v2172_v33  ;;  %v3593_v57 = vunpack.i.h.bf16 %v3591_v42 }
 0x277   : > { %v2595_v6 = vsel %vm2594_vm9, %v2574_v35, %v2593_v55  ;;  %v2532_v34 = vpack.c.bf16 %v2452_v15, %v2452_v15  ;;  %v2460_v61 = vrot.slane %v2459_v9, 1  ;;  %v2474_v53 = vrot.slane %v2473_v48, 4 }
 0x278   : > { %v2467_v51 = vrot.slane %v2466_v14, 2  ;;  %v2481_v18 = vsel %vm926_vm0, %v2372_v16, 0.0  ;;  %v2480_v28 = vsel %vm926_vm0, %v2371_v7, 0.0  ;;  %v3425_v13 = vpop.f32.mrb[24].mxu1  ;;  %v3592_v20 = vunpack.i.l.bf16 %v3591_v42 }
 0x279   : > { %v2575_v60 = vunpack.c.l.b16 %v2532_v34  ;;  %v2475_v27 = vadd.f32 %v2474_v53, %v2473_v48  ;;  %v2482_v45 = vadd.f32 %v2481_v18, %v2480_v28  ;;  %v2182_v29 = vpop.f32.mrb[25].mxu1  ;;  %v2461_v31 = vadd.f32 %v2460_v61, %v2459_v9 }
 0x27a   : > { %v2468_v39 = vadd.f32 %v2467_v51, %v2466_v14  ;;  %v2374_v38 = vmul.f32 %v3573_v30, %v3425_v13  ;;  %v2373_v62 = vmul.f32 %v3572_v58, %v2182_v29  ;;  %v3603_v47 = vunpack.i.h.bf16 %v3601_v3 }
 0x27b   : > { %v4803_v41 = vsel %vm2596_vm10, %v2575_v60, %v2595_v6  ;;  %v2476_v0 = vrot.slane %v2475_v27, 2  ;;  %v2483_v52 = vrot.slane %v2482_v45, 4  ;;  %v2533_v19 = vpack.c.bf16 %v2461_v31, %v2461_v31 }
 0x27c   : > { %v2469_v2 = vrot.slane %v2468_v39, 1  ;;  %v2490_v4 = vsel %vm926_vm0, %v2374_v38, 0.0  ;;  %v2489_v8 = vsel %vm926_vm0, %v2373_v62, 0.0  ;;  %v3428_v25 = vpop.f32.mrb[26].mxu1  ;;  %v3602_v55 = vunpack.i.l.bf16 %v3601_v3 }
 0x27d   : > { %v2477_v54 = vadd.f32 %v2476_v0, %v2475_v27  ;;  %v2484_v63 = vadd.f32 %v2483_v52, %v2482_v45  ;;  %v2491_v36 = vadd.f32 %v2490_v4, %v2489_v8  ;;  %v2192_v37 = vpop.f32.mrb[27].mxu1  ;;  %v2376_v10 = vmul.f32 %v3583_v50, %v3428_v25 }
 0x27e   : > { %v2470_v49 = vadd.f32 %v2469_v2, %v2468_v39  ;;  %v2375_v1 = vmul.f32 %v3582_v46, %v2192_v37  ;;  %v2576_v17 = vunpack.c.l.b16 %v2533_v19 }
 0x27f   : > { %v2478_v12 = vrot.slane %v2477_v54, 1  ;;  %v2485_v40 = vrot.slane %v2484_v63, 2  ;;  %v2492_v32 = vrot.slane %v2491_v36, 4  ;;  %v2499_v22 = vsel %vm926_vm0, %v2376_v10, 0.0 }
 0x280   : > { %v2534_v24 = vpack.c.bf16 %v2470_v49, %v2470_v49  ;;  %v2498_v44 = vsel %vm926_vm0, %v2375_v1, 0.0  ;;  %v3431_v21 = vpop.f32.mrb[28].mxu1 }
 0x281   : > { %v2479_v5 = vadd.f32 %v2478_v12, %v2477_v54  ;;  %v2486_v26 = vadd.f32 %v2485_v40, %v2484_v63  ;;  %v2493_v23 = vadd.f32 %v2492_v32, %v2491_v36  ;;  %v2500_v56 = vadd.f32 %v2499_v22, %v2498_v44  ;;  %v2202_v59 = vpop.f32.mrb[29].mxu1 }
 0x282   : > { %v2577_v43 = vunpack.c.l.b16 %v2534_v24  ;;  %v2378_v30 = vmul.f32 %v3593_v57, %v3431_v21  ;;  %v2377_v35 = vmul.f32 %v3592_v20, %v2202_v59 }
 0x283   : > { %v2535_v15 = vpack.c.bf16 %v2479_v5, %v2479_v5  ;;  %v2487_v9 = vrot.slane %v2486_v26, 1  ;;  %v2494_v48 = vrot.slane %v2493_v23, 2  ;;  %v2501_v33 = vrot.slane %v2500_v56, 4 }
 0x284   : > { %v2598_v14 = vsel %vm2584_vm4, %v2577_v43, %v2576_v17  ;;  %v2508_v16 = vsel %vm926_vm0, %v2378_v30, 0.0  ;;  %v2507_v7 = vsel %vm926_vm0, %v2377_v35, 0.0  ;;  %v3434_v58 = vpop.f32.mrb[30].mxu1 }
 0x285   : > { %v2578_v42 = vunpack.c.l.b16 %v2535_v15  ;;  %v2488_v6 = vadd.f32 %v2487_v9, %v2486_v26  ;;  %v2495_v34 = vadd.f32 %v2494_v48, %v2493_v23  ;;  %v2502_v61 = vadd.f32 %v2501_v33, %v2500_v56  ;;  %v2212_v53 = vpop.f32.mrb[31].mxu1  ;;  %v3608_v26 = vld [vmem:[%s4941_s13] sm:$0xff]   ;;  %v3609_v23 = vld [vmem:[%s4941_s13 + $0x8] sm:$0xff]  }
 0x286   : > { %v2509_v51 = vadd.f32 %v2508_v16, %v2507_v7  ;;  %v2380_v18 = vmul.f32 %v3603_v47, %v3434_v58  ;;  %v2379_v28 = vmul.f32 %v3602_v55, %v2212_v53  ;;  %v3128_v56 = vld [vmem:[%s4936_s8] ss:$0 sm:$0xff]  ;;  %v3610_v53 = vld [vmem:[%s4941_s13 + $0x10] sm:$0xff]  }
 0x287   : > { %v2599_v13 = vsel %vm2586_vm5, %v2578_v42, %v2598_v14  ;;  %v2536_v50 = vpack.c.bf16 %v2488_v6, %v2488_v6  ;;  %v2496_v60 = vrot.slane %v2495_v34, 1  ;;  %v2503_v27 = vrot.slane %v2502_v61, 2  ;;  %v3132_v15 = vld [vmem:[%s4937_s9] ss:$0 sm:$0xff] }
 0x288   : > { %v2510_v45 = vrot.slane %v2509_v51, 4  ;;  %v2517_v29 = vsel %vm926_vm0, %v2380_v18, 0.0  ;;  %v2516_v46 = vsel %vm926_vm0, %v2379_v28, 0.0  ;;  %v3133_v58 = vld [vmem:[%s4938_s10] ss:$0 sm:$0xff] }
 0x289   : > { %v2579_v31 = vunpack.c.l.b16 %v2536_v50  ;;  %v2497_v39 = vadd.f32 %v2496_v60, %v2495_v34  ;;  %v2504_v38 = vadd.f32 %v2503_v27, %v2502_v61  ;;  %v2518_v62 = vadd.f32 %v2517_v29, %v2516_v46  ;;  %v3134_v18 = vld [vmem:[%s4940_s12] ss:$0 sm:$0xff] }
 0x28a   : > { %v2511_v0 = vadd.f32 %v2510_v45, %v2509_v51  ;;  %v3611_v51 = vld [vmem:[%s4941_s13 + $0x18] sm:$0xff]  }
 0x28b   : > { %v2600_v52 = vsel %vm2588_vm6, %v2579_v31, %v2599_v13  ;;  %v2537_v2 = vpack.c.bf16 %v2497_v39, %v2497_v39  ;;  %v2505_v4 = vrot.slane %v2504_v38, 1  ;;  %v2519_v8 = vrot.slane %v2518_v62, 4  ;;  %v3612_v39 = vld [vmem:[%s4943_s15] sm:$0xff]  }
 0x28c   : > { %v2512_v25 = vrot.slane %v2511_v0, 2 }
 0x28d   : > { %v2580_v57 = vunpack.c.l.b16 %v2537_v2  ;;  %v2506_v3 = vadd.f32 %v2505_v4, %v2504_v38  ;;  %v2520_v54 = vadd.f32 %v2519_v8, %v2518_v62  ;;  %v3613_v38 = vld [vmem:[%s4943_s15 + $0x8] sm:$0xff]   ;;  %v3143_v2 = vld [vmem:[%s4942_s14] ss:$0 sm:$0xff] }
 0x28e   : > { %v2513_v63 = vadd.f32 %v2512_v25, %v2511_v0 }
 0x28f   : > { %v2601_v36 = vsel %vm2590_vm7, %v2580_v57, %v2600_v52  ;;  %v2538_v37 = vpack.c.bf16 %v2506_v3, %v2506_v3  ;;  %v2521_v20 = vrot.slane %v2520_v54, 2 }
 0x290   : > { %v2514_v19 = vrot.slane %v2513_v63, 1 }
 0x291   : > { %v2581_v49 = vunpack.c.l.b16 %v2538_v37  ;;  %v2522_v10 = vadd.f32 %v2521_v20, %v2520_v54 }
 0x292   : > { %v2515_v1 = vadd.f32 %v2514_v19, %v2513_v63 }
 0x293   : > { %v2602_v12 = vsel %vm2592_vm8, %v2581_v49, %v2601_v36  ;;  %v2523_v40 = vrot.slane %v2522_v10, 1 }
 0x294   : > { %v2539_v32 = vpack.c.bf16 %v2515_v1, %v2515_v1 }
 0x295   : > { %v2524_v47 = vadd.f32 %v2523_v40, %v2522_v10 }
 0x296   : > { %v2582_v24 = vunpack.c.l.b16 %v2539_v32 }
 0x297   : > { %v2540_v22 = vpack.c.bf16 %v2524_v47, %v2524_v47 }
 0x298   : > { %v2603_v44 = vsel %vm2594_vm9, %v2582_v24, %v2602_v12 }
 0x299   : > { %v2583_v21 = vunpack.c.l.b16 %v2540_v22 }
 0x29b   : > { %v2604_v55 = vsel %vm2596_vm10, %v2583_v21, %v2603_v44 }
 0x29c   : > { %v2605_v5 = vpack.c.b16 %v2604_v55, %v4803_v41  ;;  %v3224_v41 = vld [vmem:[%s632_s18] sm:$0xff]   ;;  %s638_s18 = scalar_lea.vmem %s4932_s4, %s3938_s21 }
 0x29d   : > { %v3225_v59 = vunpack.c.l.bf16 %v3224_v41  ;;  %v3226_v35 = vunpack.c.h.bf16 %v3224_v41  ;;  %v3228_v63 = vld [vmem:[%s638_s18] sm:$0xff]   ;;  %s3778_s18 = smov [#allocation2]  }
 0x29e   : > { %3440 = vmatmul.mubr.msk.bf16.vlgmr.msra.gmra.mrb[32].mxu1 %vm926_vm0, %v2605_v5  ;;  %v3229_v20 = vunpack.c.l.bf16 %v3228_v63  ;;  %v3230_v12 = vunpack.c.h.bf16 %v3228_v63  ;;  %s3714_s5 = sshll.u32 %s3778_s18, 4  ;;  %s3715_s5 = int_to_ptr.vmem [resolvable:$false] %s3714_s5 }
 0x29f   : > { %3459 = vmatprep.mubr.msk.bf16.mxu1 %vm3777_vm3, %v3776_v11  ;;  %3452 = vmatpush3.bf16.msra.mxu1 %v3608_v26  ;;  %s3716_s26 = scalar_lea.vmem %s3715_s5, 512  ;;  %p3717_p1 = scmp.lt.s32.totalorder %s4883_s20, %s3715_s5 }
 0x2a0   : > { %3453 = vmatprep.subr.bf16.mxu1 %v3776_v11  ;;  %p3718_p2 = scmp.lt.s32.totalorder %s3716_s26, %s3710_s30 }
 0x2a2   : > { %p3719_p3 = por %p3718_p2, %p3717_p1 }
 0x2a3   : > { %3454 = vmatpush3.bf16.msra.mxu1 %v3609_v23 }
 0x2a4   : > { %3455 = vmatprep.subr.bf16.mxu1 %v3776_v11  ;;  %p3720_p4 = pnand %p3719_p3, %p3713_p0 }
 0x2a7   : > { %3456 = vmatpush3.bf16.msra.mxu1 %v3610_v53 }
 0x2a8   : > { %3457 = vmatprep.subr.bf16.mxu1 %v3776_v11 }
 0x2ab   : > { %3458 = vmatpush3.bf16.msra.mxu1 %v3611_v51 }
 0x371   : > { %v2655_v17 = vpop.f32.mrb[32].mxu1 }
 0x372   : > { %v2656_v43 = vadd.f32 %v3128_v56, %v2655_v17  ;;  %v3441_v30 = vpop.f32.mrb[33].mxu1 }
 0x373   : > { %v2658_v9 = vpop.f32.mrb[34].mxu1 }
 0x374   : > { %v2666_v48 = vadd.f32 %v3225_v59, %v2656_v43  ;;  %v2659_v33 = vadd.f32 %v3128_v56, %v2658_v9  ;;  %v3442_v14 = vpop.f32.mrb[35].mxu1 }
 0x376   : > { %v2675_v16 = vmul.f32 %v3132_v15, %v2666_v48  ;;  %v2667_v7 = vadd.f32 %v3226_v35, %v2659_v33 }
 0x378   : > { %v2676_v42 = vmul.f32 %v3132_v15, %v2667_v7  ;;  %v2684_v6 = vadd.f32 %v3133_v58, %v2675_v16 }
 0x37a   : > { %v2685_v34 = vadd.f32 %v3133_v58, %v2676_v42 }
 0x37c   : > { %v2686_v61 = vpack.c.bf16 %v2685_v34, %v2684_v6 }
 0x37e   : > { %3448 = vmatmul.mubr.msk.bf16.vlgmr.msra.gmra.mrb[32].mxu0 %vm926_vm0, %v2686_v61 }
 0x37f   : > { %3467 = vmatprep.mubr.msk.bf16.mxu0 %vm3777_vm3, %v3776_v11  ;;  %3464 = vmatpush3.bf16.msra.mxu0 %v3612_v39 }
 0x380   : > { %3465 = vmatprep.subr.bf16.mxu0 %v3776_v11  ;;  %v3144_v11 = vld [vmem:[%s4944_s16] ss:$0 sm:$0xff] }
 0x383   : > { %3466 = vmatpush3.bf16.msra.mxu0 %v3613_v38 }
 0x451   : > { %v2747_v28 = vpop.f32.mrb[32].mxu0 }
 0x452   : > { %v2748_v13 = vadd.f32 %v3134_v18, %v2747_v28  ;;  %v3449_v50 = vpop.f32.mrb[33].mxu0 }
 0x453   : > { %v2750_v60 = vpop.f32.mrb[34].mxu0 }
 0x454   : > { %v2751_v27 = vadd.f32 %v3134_v18, %v2750_v60  ;;  %v3450_v45 = vpop.f32.mrb[35].mxu0  ;;  %v2754_v29 = vmax.f32 %v2748_v13, 0.0 }
 0x456   : > { %v2755_v46 = vmax.f32 %v2751_v27, 0.0 }
 0x458   : > { %v2756_v31 = vpack.c.bf16 %v2755_v46, %v2754_v29 }
 0x45a   : > { %3460 = vmatmul.mubr.msk.bf16.vlgmr.msra.gmra.mrb[36].mxu1 %vm2789_vm11, %v2756_v31 }
 0x52d   : > { %v2827_v62 = vpop.f32.mrb[36].mxu1 }
 0x52e   : > { %v2834_v0 = vadd.f32 %v2827_v62, %v2684_v6  ;;  %v3461_v52 = vpop.f32.mrb[37].mxu1 }
 0x52f   : > { %v2830_v4 = vpop.f32.mrb[38].mxu1 }
 0x530   : > { %v2835_v8 = vadd.f32 %v2830_v4, %v2685_v34  ;;  %v3462_v25 = vpop.f32.mrb[39].mxu1  ;;  %v2843_v57 = vadd.f32 %v3143_v2, %v2834_v0 }
 0x532   : > { %v2844_v3 = vadd.f32 %v3143_v2, %v2835_v8 }
 0x534   : > { %v2845_v54 = vpack.c.bf16 %v2844_v3, %v2843_v57 }
 0x536   : > { %3468 = vmatmul.mubr.msk.bf16.vlgmr.msra.gmra.mrb[36].mxu0 %vm926_vm0, %v2845_v54 }
 0x609   : > { %v2906_v36 = vpop.f32.mrb[36].mxu0 }
 0x60a   : > { %v2907_v37 = vadd.f32 %v3144_v11, %v2906_v36  ;;  %v3469_v19 = vpop.f32.mrb[37].mxu0 }
 0x60b   : > { %v2909_v49 = vpop.f32.mrb[38].mxu0 }
 0x60c   : > { %v2913_v10 = vmax.f32 %v2907_v37, 0.0  ;;  %v2910_v1 = vadd.f32 %v3144_v11, %v2909_v49  ;;  %v3470_v40 = vpop.f32.mrb[39].mxu0 }
 0x60e   : > { %v2919_v32 = vadd.f32 %v3229_v20, %v2913_v10  ;;  %v2914_v47 = vmax.f32 %v2910_v1, 0.0 }
 0x610   : > { %2921 = vst.msk [vmem:[%s608_s24] sm:$0xff] %vm926_vm0, %v2919_v32  ;;  %v2920_v24 = vadd.f32 %v3230_v12, %v2914_v47 }
 0x612   : > { %2922 = vst.msk [vmem:[%s608_s24 + $0x8] sm:$0xff] %vm926_vm0, %v2920_v24 }
 0x613   : > { %3723 = shalt.err (!%p3720_p4)
}
 0x614   : > { %s3724_s23 = scalar_lea.hbm %s4881_s29, 256  ;;  %s3728_s24 = scalar_lea.hbm %s4945_s17, 512 }
 0x615   : > { %p3725_p7 = scmp.ne.s32.totalorder %s4881_s29, %s3724_s23  ;;  %p3729_p10 = scmp.lt.u32.totalorder %s4881_s29, %s4945_s17 }
 0x616   : > { %p3730_p11 = scmp.lt.u32.totalorder %s3728_s24, %s3724_s23  ;;  %p3732_p13 = scmp.lt.u32.totalorder %s3724_s23, %s4881_s29 }
 0x617   : > { %p3726_p8 = pnand %p3725_p7, %p3909_p5 }
 0x618   : > { %p3731_p12 = por %p3730_p11, %p3729_p10 }
 0x619   : > { %p3727_p9 = pneg %p3726_p8 }
 0x61a   : > { %p3733_p0 = por %p3732_p13, %p3731_p12 }
 0x61c   : > { %p3734_p1 = pnand %p3733_p0, %p3727_p9 }
 0x61e   : > { %3737 = shalt.err (!%p3734_p1)
}
 0x61f   : > { %s3779_s30 = smov 128   ;;  %s3780_s18 = smov 8  }
 0x620   : > { %3479 = dma.vmem_to_hbm [thread:$0]  (%p3909_p5), %s4883_s20, 256, %s4881_s29, %s4887_s28, %s3779_s30, %s3779_s30, %s3780_s18  }
 0x621 PF: > { %s5080_s5 = sld [smem:[#allocation5_spill]]  ;;  %p3485_p2 = scmp.ge.s32.totalorder %s3772_s27, 2 }
 0x623   : > { %p3482_p3 = pnand %p3485_p2, %p3913_p6 }
 0x627   : > { %s2952_s19 = sand.u32 1, %s5080_s5  }
 0x628   : > { %s2953_s23 = scalar_lea.sflag [#allocation3], %s2952_s19 }
 0x629   : > { %3755 = dma.done.wait (!%p3482_p3), %s2953_s23, 256  }
 0x62a   : > { %3757 = vsyncadd (!%p3482_p3), %s2953_s23, 4294967040  ;;  %s5082_s27 = sld [smem:[#allocation7_spill]]  ;;  %s5083_s0 = sld [smem:[#allocation6_spill]] }
 0x62b   : > { %s5084_s26 = sld [smem:[#allocation8_spill]]  ;;  %s5085_s24 = smov %s3764_s25 }
 0x630   : > { %p27_p4 = scmp.ge.s32.totalorder %s5082_s27, 4   ;;  %s5086_s25 = smov %s5083_s0 }
 0x632   :  { %29 = sbr.rel (!%p27_p4) target bundleno = 7 (0x7), region = 135 }
 0x639   :  { %2958 = vsyncpa [#allocation3], 1 }
 0x63a   :  { %2960 = vsyncpa [#allocation3 + $0x1], 1 }

</bundles_post_ra>
